<compile_context>
chip_gen: v7x
topology: tpu7x:2x2x1
jax: 0.10.0
libtpu: 0.0.40
codegen_flags: <defaults>
</compile_context>

<pallas_src>
import jax
import jax.numpy as jnp
from jax.experimental import pallas as pl
from jax.experimental.pallas import tpu as pltpu

BN_EPS = 1e-5
VMEM_LIMIT_BYTES = 32 * 1024 * 1024   # safe scoped-VMEM request on v5e/v6e/v7x
MAX_TILE_M = 1024                     # rows per grid step (multiple of 8)


def _round_up(x, m):
    return (x + m - 1) // m * m


def _tiles(m):
    """Tile size / padded extent for the M (= N*Ho*Wo) axis."""
    tm = MAX_TILE_M if m > MAX_TILE_M else _round_up(m, 8)
    return tm, _round_up(m, tm)


def _pad_rows(a, m_pad):
    m = a.shape[0]
    if m == m_pad:
        return a
    pads = ((0, m_pad - m),) + ((0, 0),) * (a.ndim - 1)
    return jnp.pad(a, pads)


# ----------------------------- Pallas kernels -------------------------------

def _matmul_stats_kernel(x_ref, w_ref, y_ref, sum_ref, sq_ref):
    """Pass 1: conv-as-matmul (bf16 in, f32 MXU acc) + per-channel sum/sumsq."""
    y = jnp.dot(x_ref[...], w_ref[...], preferred_element_type=jnp.float32)
    y_ref[...] = y.astype(y_ref.dtype)

    @pl.when(pl.program_id(0) == 0)
    def _():
        sum_ref[...] = jnp.zeros_like(sum_ref)
        sq_ref[...] = jnp.zeros_like(sq_ref)

    sum_ref[...] = sum_ref[...] + jnp.sum(y, axis=0, keepdims=True)
    sq_ref[...] = sq_ref[...] + jnp.sum(y * y, axis=0, keepdims=True)


def _bn_relu_kernel(y_ref, scale_ref, shift_ref, out_ref):
    """Pass 2: y*scale + shift, ReLU (lane-packed layout)."""
    y = y_ref[...].astype(jnp.float32) * scale_ref[...] + shift_ref[...]
    out_ref[...] = jnp.maximum(y, 0.0).astype(out_ref.dtype)


def _bn_add_relu_kernel(y_ref, scale_ref, shift_ref,
                        ry_ref, rscale_ref, rshift_ref, out_ref):
    """Pass 2 (BasicBlock tail): BN(main) + BN-or-identity(shortcut), ReLU."""
    y = y_ref[...].astype(jnp.float32) * scale_ref[...] + shift_ref[...]
    r = ry_ref[...].astype(jnp.float32) * rscale_ref[...] + rshift_ref[...]
    out_ref[...] = jnp.maximum(y + r, 0.0).astype(out_ref.dtype)


def _pool_fc_kernel(x_ref, w_ref, b_ref, out_ref):
    """AdaptiveAvgPool2d((1,1)) + Linear(64 -> num_classes)."""
    pooled = jnp.mean(x_ref[...].astype(jnp.float32), axis=1)       # [tn, C]
    out_ref[...] = (jnp.dot(pooled, w_ref[...],
                            preferred_element_type=jnp.float32) + b_ref[...])


# ------------------------------ kernel drivers -------------------------------

def matmul_stats(patches, w):
    """patches [M, K] @ w [K, Cout] -> (y [M_pad, Cout] bf16, mean, var)."""
    m, k = patches.shape
    cout = w.shape[1]
    tm, m_pad = _tiles(m)
    patches = _pad_rows(patches.astype(jnp.bfloat16), m_pad)  # zero rows -> no stat effect
    wb = w.astype(jnp.bfloat16)

    y, s1, s2 = pl.pallas_call(
        _matmul_stats_kernel,
        grid=(m_pad // tm,),
        out_shape=(jax.ShapeDtypeStruct((m_pad, cout), jnp.bfloat16),
                   jax.ShapeDtypeStruct((1, cout), jnp.float32),
                   jax.ShapeDtypeStruct((1, cout), jnp.float32)),
        in_specs=[pl.BlockSpec((tm, k), lambda i: (i, 0)),
                  pl.BlockSpec((k, cout), lambda i: (0, 0))],
        out_specs=(pl.BlockSpec((tm, cout), lambda i: (i, 0)),
                   pl.BlockSpec((1, cout), lambda i: (0, 0)),
                   pl.BlockSpec((1, cout), lambda i: (0, 0))),
        compiler_params=pltpu.CompilerParams(
            dimension_semantics=("arbitrary",),        # stats accumulator resident
            vmem_limit_bytes=VMEM_LIMIT_BYTES),
    )(patches, wb)

    mean = s1[0] / m
    var = s2[0] / m - mean * mean          # biased variance (PyTorch BN forward)
    return y, mean, var


def _bn_affine(gamma, beta, mean, var):
    inv = jax.lax.rsqrt(var + BN_EPS)
    scale = gamma.astype(jnp.float32) * inv
    shift = beta.astype(jnp.float32) - mean * scale
    cout = scale.shape[0]
    return scale.reshape(1, cout), shift.reshape(1, cout)


def bn_apply(y_pad, m_real, scale, shift, residual=None,
             res_scale=None, res_shift=None, out_dtype=jnp.bfloat16):
    """Pass 2 driver.  Operates on a lane-packed (M/8, 8*Cout) view so the last
    dim is a multiple of 128 (unmasked vector loads/stores)."""
    m_pad, cout = y_pad.shape
    tm, m_pad_chk = _tiles(m_real)
    assert m_pad_chk == m_pad, "pass-1 / pass-2 tiling mismatch"

    mp, wide, tmp = m_pad // 8, 8 * cout, tm // 8
    y_w = y_pad.reshape(mp, wide)                       # contiguous view: free
    scale_w = jnp.tile(scale, (1, 8))
    shift_w = jnp.tile(shift, (1, 8))

    row_spec = pl.BlockSpec((tmp, wide), lambda i: (i, 0))
    vec_spec = pl.BlockSpec((1, wide), lambda i: (0, 0))

    if residual is None:
        kernel = _bn_relu_kernel
        args = (y_w, scale_w, shift_w)
        in_specs = [row_spec, vec_spec, vec_spec]
    else:
        res_w = _pad_rows(residual, m_pad).reshape(mp, wide)
        kernel = _bn_add_relu_kernel
        args = (y_w, scale_w, shift_w, res_w,
                jnp.tile(res_scale, (1, 8)), jnp.tile(res_shift, (1, 8)))
        in_specs = [row_spec, vec_spec, vec_spec,
                    row_spec, vec_spec, vec_spec]

    out = pl.pallas_call(
        kernel,
        grid=(mp // tmp,),
        out_shape=jax.ShapeDtypeStruct((mp, wide), out_dtype),
        in_specs=in_specs,
        out_specs=row_spec,
        compiler_params=pltpu.CompilerParams(
            dimension_semantics=("parallel",),
            vmem_limit_bytes=VMEM_LIMIT_BYTES),
    )(*args)
    return out.reshape(m_pad, cout)[:m_real]


# ------------------------------ network glue ---------------------------------

def im2col_3x3(x, stride):
    """x: [N, H, W, C] NHWC, padding=1, 3x3 kernel -> [N*Ho*Wo, 9*C]."""
    # TODO(synk): 3x3 tap extraction still materialized in XLA (9x patch
    # duplication in HBM); folding the taps into the matmul kernel (direct
    # conv with halo blocks) is a further optimization not done here.
    n, h, w, c = x.shape
    ho = (h + 2 - 3) // stride + 1
    wo = (w + 2 - 3) // stride + 1
    xp = jnp.pad(x, ((0, 0), (1, 1), (1, 1), (0, 0)))
    cols = []
    for dy in range(3):
        for dx in range(3):
            cols.append(xp[:, dy:dy + (ho - 1) * stride + 1:stride,
                           dx:dx + (wo - 1) * stride + 1:stride, :])
    patches = jnp.concatenate(cols, axis=-1)                     # [N,Ho,Wo,9C]
    return patches.reshape(n * ho * wo, 9 * c), (n, ho, wo)


def conv3x3_bn_relu(x, w, gamma, beta, stride):
    n, _, _, cin = x.shape
    cout = w.shape[-1]
    patches, (_, ho, wo) = im2col_3x3(x, stride)
    y, mean, var = matmul_stats(patches, w.reshape(9 * cin, cout))
    scale, shift = _bn_affine(gamma, beta, mean, var)
    out = bn_apply(y, patches.shape[0], scale, shift)
    return out.reshape(n, ho, wo, cout)


def basic_block(x, p, stride, has_proj):
    """x: [N, H, W, Cin] bf16 -> [N, Ho, Wo, Cout] bf16. stride/has_proj static."""
    n, h, w, cin = x.shape
    cout = p["conv1_w"].shape[-1]

    # main path: conv1 + bn1 + relu
    out1 = conv3x3_bn_relu(x, p["conv1_w"], p["bn1_gamma"], p["bn1_beta"], stride)
    _, ho, wo, _ = out1.shape

    # main path: conv2 matmul + global BN stats (bn2 fused with residual below)
    p2, _ = im2col_3x3(out1, 1)
    m2 = p2.shape[0]
    y2, mean2, var2 = matmul_stats(p2, p["conv2_w"].reshape(9 * cout, cout))
    scale2, shift2 = _bn_affine(p["bn2_gamma"], p["bn2_beta"], mean2, var2)

    # shortcut
    if has_proj:
        xs = x[:, ::stride, ::stride, :].reshape(m2, cin)
        ysc, mean_sc, var_sc = matmul_stats(xs, p["sc_w"].reshape(cin, cout))
        rscale, rshift = _bn_affine(p["sc_gamma"], p["sc_beta"], mean_sc, var_sc)
        res = ysc                                       # already M-padded, pre-BN
    else:
        res = x.reshape(m2, cin)
        rscale = jnp.ones((1, cout), jnp.float32)
        rshift = jnp.zeros((1, cout), jnp.float32)

    out = bn_apply(y2, m2, scale2, shift2,
                   residual=res, res_scale=rscale, res_shift=rshift)
    return out.reshape(n, ho, wo, cout)


def pool_fc(x_nhwc, fc_w, fc_b):
    n, h, w, c = x_nhwc.shape
    nc = fc_w.shape[1]
    feat = x_nhwc.reshape(n, h * w, c)
    tn = min(256, _round_up(n, 8))
    n_pad = _round_up(n, tn)
    feat = _pad_rows(feat, n_pad)

    logits = pl.pallas_call(
        _pool_fc_kernel,
        grid=(n_pad // tn,),
        out_shape=jax.ShapeDtypeStruct((n_pad, nc), jnp.float32),
        in_specs=[pl.BlockSpec((tn, h * w, c), lambda i: (i, 0, 0)),
                  pl.BlockSpec((c, nc), lambda i: (0, 0)),
                  pl.BlockSpec((1, nc), lambda i: (0, 0))],
        out_specs=pl.BlockSpec((tn, nc), lambda i: (i, 0)),
        compiler_params=pltpu.CompilerParams(
            dimension_semantics=("parallel",),
            vmem_limit_bytes=VMEM_LIMIT_BYTES),
    )(feat, fc_w.astype(jnp.float32), fc_b.reshape(1, nc).astype(jnp.float32))
    return logits[:n]


def make_arch(num_blocks):
    """Static (non-traced) architecture description."""
    arch = []
    in_c = 16
    for name, out_c, stride0, nblk in (("layer1", 16, 1, num_blocks[0]),
                                       ("layer2", 32, 2, num_blocks[1]),
                                       ("layer3", 64, 2, num_blocks[2])):
        blocks = []
        for s in [stride0] + [1] * (nblk - 1):
            blocks.append((s, s != 1 or in_c != out_c))
            in_c = out_c
        arch.append((name, tuple(blocks)))
    return tuple(arch)


def make_resnet_forward(num_blocks=(1, 1, 1)):
    arch = make_arch(num_blocks)     # strides / proj flags are static Python

    def forward(x_nchw, params):
        x = jnp.transpose(x_nchw, (0, 2, 3, 1)).astype(jnp.bfloat16)  # NCHW->NHWC
        # stem: conv1 + bn1 + relu
        x = conv3x3_bn_relu(x, params["conv1_w"], params["bn1_gamma"],
                            params["bn1_beta"], stride=1)
        for name, blocks in arch:
            for bi, (stride, has_proj) in enumerate(blocks):
                x = basic_block(x, params[name][bi], stride, has_proj)
        return pool_fc(x, params["fc_w"], params["fc_b"])

    return forward


# -------------------------- deterministic params -----------------------------

def init_params(key, num_blocks=(1, 1, 1), conv1_channels=16, num_classes=10):
    keys = iter(jax.random.split(key, 128))

    def conv_w(cin, cout, k=3):
        fan_in = cin * k * k
        return (jax.random.normal(next(keys), (k, k, cin, cout), jnp.float32)
                * (2.0 / fan_in) ** 0.5)

    def bn(c):
        g = 1.0 + 0.1 * jax.random.normal(next(keys), (c,), jnp.float32)
        b = 0.1 * jax.random.normal(next(keys), (c,), jnp.float32)
        return g, b

    params = {"conv1_w": conv_w(3, conv1_channels)}
    params["bn1_gamma"], params["bn1_beta"] = bn(conv1_channels)

    in_c = 16
    for name, out_c, stride0, nblk in (("layer1", 16, 1, num_blocks[0]),
                                       ("layer2", 32, 2, num_blocks[1]),
                                       ("layer3", 64, 2, num_blocks[2])):
        blocks = []
        for s in [stride0] + [1] * (nblk - 1):
            bp = {"conv1_w": conv_w(in_c, out_c),
                  "conv2_w": conv_w(out_c, out_c)}
            bp["bn1_gamma"], bp["bn1_beta"] = bn(out_c)
            bp["bn2_gamma"], bp["bn2_beta"] = bn(out_c)
            if s != 1 or in_c != out_c:
                bp["sc_w"] = conv_w(in_c, out_c, k=1)
                bp["sc_gamma"], bp["sc_beta"] = bn(out_c)
            blocks.append(bp)                    # arrays only (jit-safe pytree)
            in_c = out_c
        params[name] = blocks
    params["fc_w"] = jax.random.normal(next(keys), (64, num_classes),
                                       jnp.float32) / 64.0 ** 0.5
    params["fc_b"] = 0.01 * jax.random.normal(next(keys), (num_classes,),
                                              jnp.float32)
    return params


# --------------------------------- main --------------------------------------

if __name__ == "__main__":
    key = jax.random.PRNGKey(0)
    k_param, k_x = jax.random.split(key)
    params = init_params(k_param, num_blocks=(1, 1, 1),
                         conv1_channels=16, num_classes=10)
    # small CIFAR-like input: batch=2, channels=3, spatial=16
    x = jax.random.normal(k_x, (2, 3, 16, 16), jnp.float32)

    forward = jax.jit(make_resnet_forward(num_blocks=(1, 1, 1)))
    logits = forward(x, params)
    jax.block_until_ready(logits)
    assert logits.shape == (2, 10)
    # TODO(synk): BatchNorm running-stat buffer updates (training-mode side
    # effect) are not reproduced; they do not affect the forward output.
    print("KERNEL_OK")
</pallas_src>

<mosaic_0001>
module attributes {stable_mosaic.version = 11 : i64} {
  func.func @_matmul_stats_kernel(%arg0: i32, %arg1: memref<512x27xbf16, #tpu.memory_space<vmem>>, %arg2: memref<27x16xbf16, #tpu.memory_space<vmem>>, %arg3: memref<512x16xbf16, #tpu.memory_space<vmem>>, %arg4: memref<1x16xf32, #tpu.memory_space<vmem>>, %arg5: memref<1x16xf32, #tpu.memory_space<vmem>>) attributes {dimension_semantics = [#tpu.dimension_semantics<arbitrary>], iteration_bounds = array<i64: 1>, scalar_prefetch = 0 : i64, scratch_operands = 0 : i64, tpu.core_type = #tpu.core_type<tc>, window_params = [{transform_indices = @transform_0, window_bounds = array<i64: 512, 27>}, {pipeline_mode = #tpu.pipeline_mode<synchronous>, transform_indices = @transform_1, window_bounds = array<i64: 27, 16>}, {transform_indices = @transform_2, window_bounds = array<i64: 512, 16>}, {pipeline_mode = #tpu.pipeline_mode<synchronous>, transform_indices = @transform_3, window_bounds = array<i64: 1, 16>}, {pipeline_mode = #tpu.pipeline_mode<synchronous>, transform_indices = @transform_4, window_bounds = array<i64: 1, 16>}]} {
    %c0 = arith.constant 0 : index
    %c0_0 = arith.constant 0 : index
    %0 = vector.load %arg1[%c0, %c0_0] : memref<512x27xbf16, #tpu.memory_space<vmem>>, vector<512x27xbf16>
    %c0_1 = arith.constant 0 : index
    %c0_2 = arith.constant 0 : index
    %1 = vector.load %arg2[%c0_1, %c0_2] : memref<27x16xbf16, #tpu.memory_space<vmem>>, vector<27x16xbf16>
    %cst = arith.constant dense<0.000000e+00> : vector<512x16xf32>
    %2 = tpu.matmul %0, %1, %cst {dimension_numbers = #tpu.dot_dimension_numbers<[1], [0], [0], [1], [0, 0, 1, 1], [], []>} : vector<512x27xbf16>, vector<27x16xbf16>, vector<512x16xf32> -> vector<512x16xf32>
    %3 = arith.truncf %2 : vector<512x16xf32> to vector<512x16xbf16>
    %c0_3 = arith.constant 0 : index
    %c0_4 = arith.constant 0 : index
    %4 = vector.load %arg3[%c0_3, %c0_4] : memref<512x16xbf16, #tpu.memory_space<vmem>>, vector<512x16xbf16>
    tpu.vector_store %arg3[%c0_3, %c0_4], %3 {strides = array<i32>} : memref<512x16xbf16, #tpu.memory_space<vmem>>, vector<512x16xbf16>,
    %c0_i32 = arith.constant 0 : i32
    %5 = arith.cmpi eq, %arg0, %c0_i32 : i32
    %6 = arith.extui %5 : i1 to i32
    %c0_i32_5 = arith.constant 0 : i32
    %7 = arith.cmpi ne, %6, %c0_i32_5 : i32
    scf.if %7 {
      %cst_16 = arith.constant 0.000000e+00 : f32
      %19 = vector.broadcast %cst_16 : f32 to vector<1x16xf32>
      %c0_17 = arith.constant 0 : index
      %c0_18 = arith.constant 0 : index
      %20 = vector.load %arg4[%c0_17, %c0_18] : memref<1x16xf32, #tpu.memory_space<vmem>>, vector<1x16xf32>
      tpu.vector_store %arg4[%c0_17, %c0_18], %19 {strides = array<i32>} : memref<1x16xf32, #tpu.memory_space<vmem>>, vector<1x16xf32>,
      %cst_19 = arith.constant 0.000000e+00 : f32
      %21 = vector.broadcast %cst_19 : f32 to vector<1x16xf32>
      %c0_20 = arith.constant 0 : index
      %c0_21 = arith.constant 0 : index
      %22 = vector.load %arg5[%c0_20, %c0_21] : memref<1x16xf32, #tpu.memory_space<vmem>>, vector<1x16xf32>
      tpu.vector_store %arg5[%c0_20, %c0_21], %21 {strides = array<i32>} : memref<1x16xf32, #tpu.memory_space<vmem>>, vector<1x16xf32>,
    } else {
    }
    %c0_6 = arith.constant 0 : index
    %c0_7 = arith.constant 0 : index
    %8 = vector.load %arg4[%c0_6, %c0_7] : memref<1x16xf32, #tpu.memory_space<vmem>>, vector<1x16xf32>
    %cst_8 = arith.constant dense<0.000000e+00> : vector<16xf32>
    %9 = vector.multi_reduction <add>, %2, %cst_8 [0] : vector<512x16xf32> to vector<16xf32>
    %10 = vector.shape_cast %9 : vector<16xf32> to vector<1x16xf32>
    %11 = arith.addf %8, %10 : vector<1x16xf32>
    %c0_9 = arith.constant 0 : index
    %c0_10 = arith.constant 0 : index
    %12 = vector.load %arg4[%c0_9, %c0_10] : memref<1x16xf32, #tpu.memory_space<vmem>>, vector<1x16xf32>
    tpu.vector_store %arg4[%c0_9, %c0_10], %11 {strides = array<i32>} : memref<1x16xf32, #tpu.memory_space<vmem>>, vector<1x16xf32>,
    %c0_11 = arith.constant 0 : index
    %c0_12 = arith.constant 0 : index
    %13 = vector.load %arg5[%c0_11, %c0_12] : memref<1x16xf32, #tpu.memory_space<vmem>>, vector<1x16xf32>
    %14 = arith.mulf %2, %2 : vector<512x16xf32>
    %cst_13 = arith.constant dense<0.000000e+00> : vector<16xf32>
    %15 = vector.multi_reduction <add>, %14, %cst_13 [0] : vector<512x16xf32> to vector<16xf32>
    %16 = vector.shape_cast %15 : vector<16xf32> to vector<1x16xf32>
    %17 = arith.addf %13, %16 : vector<1x16xf32>
    %c0_14 = arith.constant 0 : index
    %c0_15 = arith.constant 0 : index
    %18 = vector.load %arg5[%c0_14, %c0_15] : memref<1x16xf32, #tpu.memory_space<vmem>>, vector<1x16xf32>
    tpu.vector_store %arg5[%c0_14, %c0_15], %17 {strides = array<i32>} : memref<1x16xf32, #tpu.memory_space<vmem>>, vector<1x16xf32>,
    return
  }
  func.func @transform_0(%arg0: i32) -> (i32, i32) {
    %c0_i32 = arith.constant 0 : i32
    %c0_i32_0 = arith.constant 0 : i32
    return %arg0, %c0_i32 : i32, i32
  }
  func.func @transform_1(%arg0: i32) -> (i32, i32) {
    %c0_i32 = arith.constant 0 : i32
    %c0_i32_0 = arith.constant 0 : i32
    %c0_i32_1 = arith.constant 0 : i32
    return %c0_i32, %c0_i32_0 : i32, i32
  }
  func.func @transform_2(%arg0: i32) -> (i32, i32) {
    %c0_i32 = arith.constant 0 : i32
    %c0_i32_0 = arith.constant 0 : i32
    return %arg0, %c0_i32 : i32, i32
  }
  func.func @transform_3(%arg0: i32) -> (i32, i32) {
    %c0_i32 = arith.constant 0 : i32
    %c0_i32_0 = arith.constant 0 : i32
    %c0_i32_1 = arith.constant 0 : i32
    return %c0_i32, %c0_i32_0 : i32, i32
  }
  func.func @transform_4(%arg0: i32) -> (i32, i32) {
    %c0_i32 = arith.constant 0 : i32
    %c0_i32_0 = arith.constant 0 : i32
    %c0_i32_1 = arith.constant 0 : i32
    return %c0_i32, %c0_i32_0 : i32, i32
  }
}

module attributes {stable_mosaic.version = 11 : i64} {
  func.func @_bn_relu_kernel(%arg0: i32, %arg1: memref<64x128xbf16, #tpu.memory_space<vmem>>, %arg2: memref<1x128xf32, #tpu.memory_space<vmem>>, %arg3: memref<1x128xf32, #tpu.memory_space<vmem>>, %arg4: memref<64x128xbf16, #tpu.memory_space<vmem>>) attributes {dimension_semantics = [#tpu.dimension_semantics<parallel>], iteration_bounds = array<i64: 1>, scalar_prefetch = 0 : i64, scratch_operands = 0 : i64, tpu.core_type = #tpu.core_type<tc>, window_params = [{transform_indices = @transform_0, window_bounds = array<i64: 64, 128>}, {pipeline_mode = #tpu.pipeline_mode<synchronous>, transform_indices = @transform_1, window_bounds = array<i64: 1, 128>}, {pipeline_mode = #tpu.pipeline_mode<synchronous>, transform_indices = @transform_2, window_bounds = array<i64: 1, 128>}, {transform_indices = @transform_3, window_bounds = array<i64: 64, 128>}]} {
    %c0 = arith.constant 0 : index
    %c0_0 = arith.constant 0 : index
    %0 = vector.load %arg1[%c0, %c0_0] : memref<64x128xbf16, #tpu.memory_space<vmem>>, vector<64x128xbf16>
    %1 = arith.extf %0 : vector<64x128xbf16> to vector<64x128xf32>
    %c0_1 = arith.constant 0 : index
    %c0_2 = arith.constant 0 : index
    %2 = vector.load %arg2[%c0_1, %c0_2] : memref<1x128xf32, #tpu.memory_space<vmem>>, vector<1x128xf32>
    %3 = vector.broadcast %2 : vector<1x128xf32> to vector<64x128xf32>
    %4 = arith.mulf %1, %3 : vector<64x128xf32>
    %c0_3 = arith.constant 0 : index
    %c0_4 = arith.constant 0 : index
    %5 = vector.load %arg3[%c0_3, %c0_4] : memref<1x128xf32, #tpu.memory_space<vmem>>, vector<1x128xf32>
    %6 = vector.broadcast %5 : vector<1x128xf32> to vector<64x128xf32>
    %7 = arith.addf %4, %6 : vector<64x128xf32>
    %cst = arith.constant 0.000000e+00 : f32
    %8 = vector.broadcast %cst : f32 to vector<64x128xf32>
    %9 = arith.maximumf %7, %8 : vector<64x128xf32>
    %10 = arith.truncf %9 : vector<64x128xf32> to vector<64x128xbf16>
    %c0_5 = arith.constant 0 : index
    %c0_6 = arith.constant 0 : index
    %11 = vector.load %arg4[%c0_5, %c0_6] : memref<64x128xbf16, #tpu.memory_space<vmem>>, vector<64x128xbf16>
    tpu.vector_store %arg4[%c0_5, %c0_6], %10 {strides = array<i32>} : memref<64x128xbf16, #tpu.memory_space<vmem>>, vector<64x128xbf16>,
    return
  }
  func.func @transform_0(%arg0: i32) -> (i32, i32) {
    %c0_i32 = arith.constant 0 : i32
    %c0_i32_0 = arith.constant 0 : i32
    return %arg0, %c0_i32 : i32, i32
  }
  func.func @transform_1(%arg0: i32) -> (i32, i32) {
    %c0_i32 = arith.constant 0 : i32
    %c0_i32_0 = arith.constant 0 : i32
    %c0_i32_1 = arith.constant 0 : i32
    return %c0_i32, %c0_i32_0 : i32, i32
  }
  func.func @transform_2(%arg0: i32) -> (i32, i32) {
    %c0_i32 = arith.constant 0 : i32
    %c0_i32_0 = arith.constant 0 : i32
    %c0_i32_1 = arith.constant 0 : i32
    return %c0_i32, %c0_i32_0 : i32, i32
  }
  func.func @transform_3(%arg0: i32) -> (i32, i32) {
    %c0_i32 = arith.constant 0 : i32
    %c0_i32_0 = arith.constant 0 : i32
    return %arg0, %c0_i32 : i32, i32
  }
}

module attributes {stable_mosaic.version = 11 : i64} {
  func.func @_matmul_stats_kernel(%arg0: i32, %arg1: memref<512x144xbf16, #tpu.memory_space<vmem>>, %arg2: memref<144x16xbf16, #tpu.memory_space<vmem>>, %arg3: memref<512x16xbf16, #tpu.memory_space<vmem>>, %arg4: memref<1x16xf32, #tpu.memory_space<vmem>>, %arg5: memref<1x16xf32, #tpu.memory_space<vmem>>) attributes {dimension_semantics = [#tpu.dimension_semantics<arbitrary>], iteration_bounds = array<i64: 1>, scalar_prefetch = 0 : i64, scratch_operands = 0 : i64, tpu.core_type = #tpu.core_type<tc>, window_params = [{transform_indices = @transform_0, window_bounds = array<i64: 512, 144>}, {pipeline_mode = #tpu.pipeline_mode<synchronous>, transform_indices = @transform_1, window_bounds = array<i64: 144, 16>}, {transform_indices = @transform_2, window_bounds = array<i64: 512, 16>}, {pipeline_mode = #tpu.pipeline_mode<synchronous>, transform_indices = @transform_3, window_bounds = array<i64: 1, 16>}, {pipeline_mode = #tpu.pipeline_mode<synchronous>, transform_indices = @transform_4, window_bounds = array<i64: 1, 16>}]} {
    %c0 = arith.constant 0 : index
    %c0_0 = arith.constant 0 : index
    %0 = vector.load %arg1[%c0, %c0_0] : memref<512x144xbf16, #tpu.memory_space<vmem>>, vector<512x144xbf16>
    %c0_1 = arith.constant 0 : index
    %c0_2 = arith.constant 0 : index
    %1 = vector.load %arg2[%c0_1, %c0_2] : memref<144x16xbf16, #tpu.memory_space<vmem>>, vector<144x16xbf16>
    %cst = arith.constant dense<0.000000e+00> : vector<512x16xf32>
    %2 = tpu.matmul %0, %1, %cst {dimension_numbers = #tpu.dot_dimension_numbers<[1], [0], [0], [1], [0, 0, 1, 1], [], []>} : vector<512x144xbf16>, vector<144x16xbf16>, vector<512x16xf32> -> vector<512x16xf32>
    %3 = arith.truncf %2 : vector<512x16xf32> to vector<512x16xbf16>
    %c0_3 = arith.constant 0 : index
    %c0_4 = arith.constant 0 : index
    %4 = vector.load %arg3[%c0_3, %c0_4] : memref<512x16xbf16, #tpu.memory_space<vmem>>, vector<512x16xbf16>
    tpu.vector_store %arg3[%c0_3, %c0_4], %3 {strides = array<i32>} : memref<512x16xbf16, #tpu.memory_space<vmem>>, vector<512x16xbf16>,
    %c0_i32 = arith.constant 0 : i32
    %5 = arith.cmpi eq, %arg0, %c0_i32 : i32
    %6 = arith.extui %5 : i1 to i32
    %c0_i32_5 = arith.constant 0 : i32
    %7 = arith.cmpi ne, %6, %c0_i32_5 : i32
    scf.if %7 {
      %cst_16 = arith.constant 0.000000e+00 : f32
      %19 = vector.broadcast %cst_16 : f32 to vector<1x16xf32>
      %c0_17 = arith.constant 0 : index
      %c0_18 = arith.constant 0 : index
      %20 = vector.load %arg4[%c0_17, %c0_18] : memref<1x16xf32, #tpu.memory_space<vmem>>, vector<1x16xf32>
      tpu.vector_store %arg4[%c0_17, %c0_18], %19 {strides = array<i32>} : memref<1x16xf32, #tpu.memory_space<vmem>>, vector<1x16xf32>,
      %cst_19 = arith.constant 0.000000e+00 : f32
      %21 = vector.broadcast %cst_19 : f32 to vector<1x16xf32>
      %c0_20 = arith.constant 0 : index
      %c0_21 = arith.constant 0 : index
      %22 = vector.load %arg5[%c0_20, %c0_21] : memref<1x16xf32, #tpu.memory_space<vmem>>, vector<1x16xf32>
      tpu.vector_store %arg5[%c0_20, %c0_21], %21 {strides = array<i32>} : memref<1x16xf32, #tpu.memory_space<vmem>>, vector<1x16xf32>,
    } else {
    }
    %c0_6 = arith.constant 0 : index
    %c0_7 = arith.constant 0 : index
    %8 = vector.load %arg4[%c0_6, %c0_7] : memref<1x16xf32, #tpu.memory_space<vmem>>, vector<1x16xf32>
    %cst_8 = arith.constant dense<0.000000e+00> : vector<16xf32>
    %9 = vector.multi_reduction <add>, %2, %cst_8 [0] : vector<512x16xf32> to vector<16xf32>
    %10 = vector.shape_cast %9 : vector<16xf32> to vector<1x16xf32>
    %11 = arith.addf %8, %10 : vector<1x16xf32>
    %c0_9 = arith.constant 0 : index
    %c0_10 = arith.constant 0 : index
    %12 = vector.load %arg4[%c0_9, %c0_10] : memref<1x16xf32, #tpu.memory_space<vmem>>, vector<1x16xf32>
    tpu.vector_store %arg4[%c0_9, %c0_10], %11 {strides = array<i32>} : memref<1x16xf32, #tpu.memory_space<vmem>>, vector<1x16xf32>,
    %c0_11 = arith.constant 0 : index
    %c0_12 = arith.constant 0 : index
    %13 = vector.load %arg5[%c0_11, %c0_12] : memref<1x16xf32, #tpu.memory_space<vmem>>, vector<1x16xf32>
    %14 = arith.mulf %2, %2 : vector<512x16xf32>
    %cst_13 = arith.constant dense<0.000000e+00> : vector<16xf32>
    %15 = vector.multi_reduction <add>, %14, %cst_13 [0] : vector<512x16xf32> to vector<16xf32>
    %16 = vector.shape_cast %15 : vector<16xf32> to vector<1x16xf32>
    %17 = arith.addf %13, %16 : vector<1x16xf32>
    %c0_14 = arith.constant 0 : index
    %c0_15 = arith.constant 0 : index
    %18 = vector.load %arg5[%c0_14, %c0_15] : memref<1x16xf32, #tpu.memory_space<vmem>>, vector<1x16xf32>
    tpu.vector_store %arg5[%c0_14, %c0_15], %17 {strides = array<i32>} : memref<1x16xf32, #tpu.memory_space<vmem>>, vector<1x16xf32>,
    return
  }
  func.func @transform_0(%arg0: i32) -> (i32, i32) {
    %c0_i32 = arith.constant 0 : i32
    %c0_i32_0 = arith.constant 0 : i32
    return %arg0, %c0_i32 : i32, i32
  }
  func.func @transform_1(%arg0: i32) -> (i32, i32) {
    %c0_i32 = arith.constant 0 : i32
    %c0_i32_0 = arith.constant 0 : i32
    %c0_i32_1 = arith.constant 0 : i32
    return %c0_i32, %c0_i32_0 : i32, i32
  }
  func.func @transform_2(%arg0: i32) -> (i32, i32) {
    %c0_i32 = arith.constant 0 : i32
    %c0_i32_0 = arith.constant 0 : i32
    return %arg0, %c0_i32 : i32, i32
  }
  func.func @transform_3(%arg0: i32) -> (i32, i32) {
    %c0_i32 = arith.constant 0 : i32
    %c0_i32_0 = arith.constant 0 : i32
    %c0_i32_1 = arith.constant 0 : i32
    return %c0_i32, %c0_i32_0 : i32, i32
  }
  func.func @transform_4(%arg0: i32) -> (i32, i32) {
    %c0_i32 = arith.constant 0 : i32
    %c0_i32_0 = arith.constant 0 : i32
    %c0_i32_1 = arith.constant 0 : i32
    return %c0_i32, %c0_i32_0 : i32, i32
  }
}

module attributes {stable_mosaic.version = 11 : i64} {
  func.func @_bn_add_relu_kernel(%arg0: i32, %arg1: memref<64x128xbf16, #tpu.memory_space<vmem>>, %arg2: memref<1x128xf32, #tpu.memory_space<vmem>>, %arg3: memref<1x128xf32, #tpu.memory_space<vmem>>, %arg4: memref<64x128xbf16, #tpu.memory_space<vmem>>, %arg5: memref<1x128xf32, #tpu.memory_space<vmem>>, %arg6: memref<1x128xf32, #tpu.memory_space<vmem>>, %arg7: memref<64x128xbf16, #tpu.memory_space<vmem>>) attributes {dimension_semantics = [#tpu.dimension_semantics<parallel>], iteration_bounds = array<i64: 1>, scalar_prefetch = 0 : i64, scratch_operands = 0 : i64, tpu.core_type = #tpu.core_type<tc>, window_params = [{transform_indices = @transform_0, window_bounds = array<i64: 64, 128>}, {pipeline_mode = #tpu.pipeline_mode<synchronous>, transform_indices = @transform_1, window_bounds = array<i64: 1, 128>}, {pipeline_mode = #tpu.pipeline_mode<synchronous>, transform_indices = @transform_2, window_bounds = array<i64: 1, 128>}, {transform_indices = @transform_3, window_bounds = array<i64: 64, 128>}, {pipeline_mode = #tpu.pipeline_mode<synchronous>, transform_indices = @transform_4, window_bounds = array<i64: 1, 128>}, {pipeline_mode = #tpu.pipeline_mode<synchronous>, transform_indices = @transform_5, window_bounds = array<i64: 1, 128>}, {transform_indices = @transform_6, window_bounds = array<i64: 64, 128>}]} {
    %c0 = arith.constant 0 : index
    %c0_0 = arith.constant 0 : index
    %0 = vector.load %arg1[%c0, %c0_0] : memref<64x128xbf16, #tpu.memory_space<vmem>>, vector<64x128xbf16>
    %1 = arith.extf %0 : vector<64x128xbf16> to vector<64x128xf32>
    %c0_1 = arith.constant 0 : index
    %c0_2 = arith.constant 0 : index
    %2 = vector.load %arg2[%c0_1, %c0_2] : memref<1x128xf32, #tpu.memory_space<vmem>>, vector<1x128xf32>
    %3 = vector.broadcast %2 : vector<1x128xf32> to vector<64x128xf32>
    %4 = arith.mulf %1, %3 : vector<64x128xf32>
    %c0_3 = arith.constant 0 : index
    %c0_4 = arith.constant 0 : index
    %5 = vector.load %arg3[%c0_3, %c0_4] : memref<1x128xf32, #tpu.memory_space<vmem>>, vector<1x128xf32>
    %6 = vector.broadcast %5 : vector<1x128xf32> to vector<64x128xf32>
    %7 = arith.addf %4, %6 : vector<64x128xf32>
    %c0_5 = arith.constant 0 : index
    %c0_6 = arith.constant 0 : index
    %8 = vector.load %arg4[%c0_5, %c0_6] : memref<64x128xbf16, #tpu.memory_space<vmem>>, vector<64x128xbf16>
    %9 = arith.extf %8 : vector<64x128xbf16> to vector<64x128xf32>
    %c0_7 = arith.constant 0 : index
    %c0_8 = arith.constant 0 : index
    %10 = vector.load %arg5[%c0_7, %c0_8] : memref<1x128xf32, #tpu.memory_space<vmem>>, vector<1x128xf32>
    %11 = vector.broadcast %10 : vector<1x128xf32> to vector<64x128xf32>
    %12 = arith.mulf %9, %11 : vector<64x128xf32>
    %c0_9 = arith.constant 0 : index
    %c0_10 = arith.constant 0 : index
    %13 = vector.load %arg6[%c0_9, %c0_10] : memref<1x128xf32, #tpu.memory_space<vmem>>, vector<1x128xf32>
    %14 = vector.broadcast %13 : vector<1x128xf32> to vector<64x128xf32>
    %15 = arith.addf %12, %14 : vector<64x128xf32>
    %16 = arith.addf %7, %15 : vector<64x128xf32>
    %cst = arith.constant 0.000000e+00 : f32
    %17 = vector.broadcast %cst : f32 to vector<64x128xf32>
    %18 = arith.maximumf %16, %17 : vector<64x128xf32>
    %19 = arith.truncf %18 : vector<64x128xf32> to vector<64x128xbf16>
    %c0_11 = arith.constant 0 : index
    %c0_12 = arith.constant 0 : index
    %20 = vector.load %arg7[%c0_11, %c0_12] : memref<64x128xbf16, #tpu.memory_space<vmem>>, vector<64x128xbf16>
    tpu.vector_store %arg7[%c0_11, %c0_12], %19 {strides = array<i32>} : memref<64x128xbf16, #tpu.memory_space<vmem>>, vector<64x128xbf16>,
    return
  }
  func.func @transform_0(%arg0: i32) -> (i32, i32) {
    %c0_i32 = arith.constant 0 : i32
    %c0_i32_0 = arith.constant 0 : i32
    return %arg0, %c0_i32 : i32, i32
  }
  func.func @transform_1(%arg0: i32) -> (i32, i32) {
    %c0_i32 = arith.constant 0 : i32
    %c0_i32_0 = arith.constant 0 : i32
    %c0_i32_1 = arith.constant 0 : i32
    return %c0_i32, %c0_i32_0 : i32, i32
  }
  func.func @transform_2(%arg0: i32) -> (i32, i32) {
    %c0_i32 = arith.constant 0 : i32
    %c0_i32_0 = arith.constant 0 : i32
    %c0_i32_1 = arith.constant 0 : i32
    return %c0_i32, %c0_i32_0 : i32, i32
  }
  func.func @transform_3(%arg0: i32) -> (i32, i32) {
    %c0_i32 = arith.constant 0 : i32
    %c0_i32_0 = arith.constant 0 : i32
    return %arg0, %c0_i32 : i32, i32
  }
  func.func @transform_4(%arg0: i32) -> (i32, i32) {
    %c0_i32 = arith.constant 0 : i32
    %c0_i32_0 = arith.constant 0 : i32
    %c0_i32_1 = arith.constant 0 : i32
    return %c0_i32, %c0_i32_0 : i32, i32
  }
  func.func @transform_5(%arg0: i32) -> (i32, i32) {
    %c0_i32 = arith.constant 0 : i32
    %c0_i32_0 = arith.constant 0 : i32
    %c0_i32_1 = arith.constant 0 : i32
    return %c0_i32, %c0_i32_0 : i32, i32
  }
  func.func @transform_6(%arg0: i32) -> (i32, i32) {
    %c0_i32 = arith.constant 0 : i32
    %c0_i32_0 = arith.constant 0 : i32
    return %arg0, %c0_i32 : i32, i32
  }
}

module attributes {stable_mosaic.version = 11 : i64} {
  func.func @_matmul_stats_kernel(%arg0: i32, %arg1: memref<128x16xbf16, #tpu.memory_space<vmem>>, %arg2: memref<16x32xbf16, #tpu.memory_space<vmem>>, %arg3: memref<128x32xbf16, #tpu.memory_space<vmem>>, %arg4: memref<1x32xf32, #tpu.memory_space<vmem>>, %arg5: memref<1x32xf32, #tpu.memory_space<vmem>>) attributes {dimension_semantics = [#tpu.dimension_semantics<arbitrary>], iteration_bounds = array<i64: 1>, scalar_prefetch = 0 : i64, scratch_operands = 0 : i64, tpu.core_type = #tpu.core_type<tc>, window_params = [{transform_indices = @transform_0, window_bounds = array<i64: 128, 16>}, {pipeline_mode = #tpu.pipeline_mode<synchronous>, transform_indices = @transform_1, window_bounds = array<i64: 16, 32>}, {transform_indices = @transform_2, window_bounds = array<i64: 128, 32>}, {pipeline_mode = #tpu.pipeline_mode<synchronous>, transform_indices = @transform_3, window_bounds = array<i64: 1, 32>}, {pipeline_mode = #tpu.pipeline_mode<synchronous>, transform_indices = @transform_4, window_bounds = array<i64: 1, 32>}]} {
    %c0 = arith.constant 0 : index
    %c0_0 = arith.constant 0 : index
    %0 = vector.load %arg1[%c0, %c0_0] : memref<128x16xbf16, #tpu.memory_space<vmem>>, vector<128x16xbf16>
    %c0_1 = arith.constant 0 : index
    %c0_2 = arith.constant 0 : index
    %1 = vector.load %arg2[%c0_1, %c0_2] : memref<16x32xbf16, #tpu.memory_space<vmem>>, vector<16x32xbf16>
    %cst = arith.constant dense<0.000000e+00> : vector<128x32xf32>
    %2 = tpu.matmul %0, %1, %cst {dimension_numbers = #tpu.dot_dimension_numbers<[1], [0], [0], [1], [0, 0, 1, 1], [], []>} : vector<128x16xbf16>, vector<16x32xbf16>, vector<128x32xf32> -> vector<128x32xf32>
    %3 = arith.truncf %2 : vector<128x32xf32> to vector<128x32xbf16>
    %c0_3 = arith.constant 0 : index
    %c0_4 = arith.constant 0 : index
    %4 = vector.load %arg3[%c0_3, %c0_4] : memref<128x32xbf16, #tpu.memory_space<vmem>>, vector<128x32xbf16>
    tpu.vector_store %arg3[%c0_3, %c0_4], %3 {strides = array<i32>} : memref<128x32xbf16, #tpu.memory_space<vmem>>, vector<128x32xbf16>,
    %c0_i32 = arith.constant 0 : i32
    %5 = arith.cmpi eq, %arg0, %c0_i32 : i32
    %6 = arith.extui %5 : i1 to i32
    %c0_i32_5 = arith.constant 0 : i32
    %7 = arith.cmpi ne, %6, %c0_i32_5 : i32
    scf.if %7 {
      %cst_16 = arith.constant 0.000000e+00 : f32
      %19 = vector.broadcast %cst_16 : f32 to vector<1x32xf32>
      %c0_17 = arith.constant 0 : index
      %c0_18 = arith.constant 0 : index
      %20 = vector.load %arg4[%c0_17, %c0_18] : memref<1x32xf32, #tpu.memory_space<vmem>>, vector<1x32xf32>
      tpu.vector_store %arg4[%c0_17, %c0_18], %19 {strides = array<i32>} : memref<1x32xf32, #tpu.memory_space<vmem>>, vector<1x32xf32>,
      %cst_19 = arith.constant 0.000000e+00 : f32
      %21 = vector.broadcast %cst_19 : f32 to vector<1x32xf32>
      %c0_20 = arith.constant 0 : index
      %c0_21 = arith.constant 0 : index
      %22 = vector.load %arg5[%c0_20, %c0_21] : memref<1x32xf32, #tpu.memory_space<vmem>>, vector<1x32xf32>
      tpu.vector_store %arg5[%c0_20, %c0_21], %21 {strides = array<i32>} : memref<1x32xf32, #tpu.memory_space<vmem>>, vector<1x32xf32>,
    } else {
    }
    %c0_6 = arith.constant 0 : index
    %c0_7 = arith.constant 0 : index
    %8 = vector.load %arg4[%c0_6, %c0_7] : memref<1x32xf32, #tpu.memory_space<vmem>>, vector<1x32xf32>
    %cst_8 = arith.constant dense<0.000000e+00> : vector<32xf32>
    %9 = vector.multi_reduction <add>, %2, %cst_8 [0] : vector<128x32xf32> to vector<32xf32>
    %10 = vector.shape_cast %9 : vector<32xf32> to vector<1x32xf32>
    %11 = arith.addf %8, %10 : vector<1x32xf32>
    %c0_9 = arith.constant 0 : index
    %c0_10 = arith.constant 0 : index
    %12 = vector.load %arg4[%c0_9, %c0_10] : memref<1x32xf32, #tpu.memory_space<vmem>>, vector<1x32xf32>
    tpu.vector_store %arg4[%c0_9, %c0_10], %11 {strides = array<i32>} : memref<1x32xf32, #tpu.memory_space<vmem>>, vector<1x32xf32>,
    %c0_11 = arith.constant 0 : index
    %c0_12 = arith.constant 0 : index
    %13 = vector.load %arg5[%c0_11, %c0_12] : memref<1x32xf32, #tpu.memory_space<vmem>>, vector<1x32xf32>
    %14 = arith.mulf %2, %2 : vector<128x32xf32>
    %cst_13 = arith.constant dense<0.000000e+00> : vector<32xf32>
    %15 = vector.multi_reduction <add>, %14, %cst_13 [0] : vector<128x32xf32> to vector<32xf32>
    %16 = vector.shape_cast %15 : vector<32xf32> to vector<1x32xf32>
    %17 = arith.addf %13, %16 : vector<1x32xf32>
    %c0_14 = arith.constant 0 : index
    %c0_15 = arith.constant 0 : index
    %18 = vector.load %arg5[%c0_14, %c0_15] : memref<1x32xf32, #tpu.memory_space<vmem>>, vector<1x32xf32>
    tpu.vector_store %arg5[%c0_14, %c0_15], %17 {strides = array<i32>} : memref<1x32xf32, #tpu.memory_space<vmem>>, vector<1x32xf32>,
    return
  }
  func.func @transform_0(%arg0: i32) -> (i32, i32) {
    %c0_i32 = arith.constant 0 : i32
    %c0_i32_0 = arith.constant 0 : i32
    return %arg0, %c0_i32 : i32, i32
  }
  func.func @transform_1(%arg0: i32) -> (i32, i32) {
    %c0_i32 = arith.constant 0 : i32
    %c0_i32_0 = arith.constant 0 : i32
    %c0_i32_1 = arith.constant 0 : i32
    return %c0_i32, %c0_i32_0 : i32, i32
  }
  func.func @transform_2(%arg0: i32) -> (i32, i32) {
    %c0_i32 = arith.constant 0 : i32
    %c0_i32_0 = arith.constant 0 : i32
    return %arg0, %c0_i32 : i32, i32
  }
  func.func @transform_3(%arg0: i32) -> (i32, i32) {
    %c0_i32 = arith.constant 0 : i32
    %c0_i32_0 = arith.constant 0 : i32
    %c0_i32_1 = arith.constant 0 : i32
    return %c0_i32, %c0_i32_0 : i32, i32
  }
  func.func @transform_4(%arg0: i32) -> (i32, i32) {
    %c0_i32 = arith.constant 0 : i32
    %c0_i32_0 = arith.constant 0 : i32
    %c0_i32_1 = arith.constant 0 : i32
    return %c0_i32, %c0_i32_0 : i32, i32
  }
}

module attributes {stable_mosaic.version = 11 : i64} {
  func.func @_bn_relu_kernel(%arg0: i32, %arg1: memref<16x256xbf16, #tpu.memory_space<vmem>>, %arg2: memref<1x256xf32, #tpu.memory_space<vmem>>, %arg3: memref<1x256xf32, #tpu.memory_space<vmem>>, %arg4: memref<16x256xbf16, #tpu.memory_space<vmem>>) attributes {dimension_semantics = [#tpu.dimension_semantics<parallel>], iteration_bounds = array<i64: 1>, scalar_prefetch = 0 : i64, scratch_operands = 0 : i64, tpu.core_type = #tpu.core_type<tc>, window_params = [{transform_indices = @transform_0, window_bounds = array<i64: 16, 256>}, {pipeline_mode = #tpu.pipeline_mode<synchronous>, transform_indices = @transform_1, window_bounds = array<i64: 1, 256>}, {pipeline_mode = #tpu.pipeline_mode<synchronous>, transform_indices = @transform_2, window_bounds = array<i64: 1, 256>}, {transform_indices = @transform_3, window_bounds = array<i64: 16, 256>}]} {
    %c0 = arith.constant 0 : index
    %c0_0 = arith.constant 0 : index
    %0 = vector.load %arg1[%c0, %c0_0] : memref<16x256xbf16, #tpu.memory_space<vmem>>, vector<16x256xbf16>
    %1 = arith.extf %0 : vector<16x256xbf16> to vector<16x256xf32>
    %c0_1 = arith.constant 0 : index
    %c0_2 = arith.constant 0 : index
    %2 = vector.load %arg2[%c0_1, %c0_2] : memref<1x256xf32, #tpu.memory_space<vmem>>, vector<1x256xf32>
    %3 = vector.broadcast %2 : vector<1x256xf32> to vector<16x256xf32>
    %4 = arith.mulf %1, %3 : vector<16x256xf32>
    %c0_3 = arith.constant 0 : index
    %c0_4 = arith.constant 0 : index
    %5 = vector.load %arg3[%c0_3, %c0_4] : memref<1x256xf32, #tpu.memory_space<vmem>>, vector<1x256xf32>
    %6 = vector.broadcast %5 : vector<1x256xf32> to vector<16x256xf32>
    %7 = arith.addf %4, %6 : vector<16x256xf32>
    %cst = arith.constant 0.000000e+00 : f32
    %8 = vector.broadcast %cst : f32 to vector<16x256xf32>
    %9 = arith.maximumf %7, %8 : vector<16x256xf32>
    %10 = arith.truncf %9 : vector<16x256xf32> to vector<16x256xbf16>
    %c0_5 = arith.constant 0 : index
    %c0_6 = arith.constant 0 : index
    %11 = vector.load %arg4[%c0_5, %c0_6] : memref<16x256xbf16, #tpu.memory_space<vmem>>, vector<16x256xbf16>
    tpu.vector_store %arg4[%c0_5, %c0_6], %10 {strides = array<i32>} : memref<16x256xbf16, #tpu.memory_space<vmem>>, vector<16x256xbf16>,
    return
  }
  func.func @transform_0(%arg0: i32) -> (i32, i32) {
    %c0_i32 = arith.constant 0 : i32
    %c0_i32_0 = arith.constant 0 : i32
    return %arg0, %c0_i32 : i32, i32
  }
  func.func @transform_1(%arg0: i32) -> (i32, i32) {
    %c0_i32 = arith.constant 0 : i32
    %c0_i32_0 = arith.constant 0 : i32
    %c0_i32_1 = arith.constant 0 : i32
    return %c0_i32, %c0_i32_0 : i32, i32
  }
  func.func @transform_2(%arg0: i32) -> (i32, i32) {
    %c0_i32 = arith.constant 0 : i32
    %c0_i32_0 = arith.constant 0 : i32
    %c0_i32_1 = arith.constant 0 : i32
    return %c0_i32, %c0_i32_0 : i32, i32
  }
  func.func @transform_3(%arg0: i32) -> (i32, i32) {
    %c0_i32 = arith.constant 0 : i32
    %c0_i32_0 = arith.constant 0 : i32
    return %arg0, %c0_i32 : i32, i32
  }
}

module attributes {stable_mosaic.version = 11 : i64} {
  func.func @_matmul_stats_kernel(%arg0: i32, %arg1: memref<128x144xbf16, #tpu.memory_space<vmem>>, %arg2: memref<144x32xbf16, #tpu.memory_space<vmem>>, %arg3: memref<128x32xbf16, #tpu.memory_space<vmem>>, %arg4: memref<1x32xf32, #tpu.memory_space<vmem>>, %arg5: memref<1x32xf32, #tpu.memory_space<vmem>>) attributes {dimension_semantics = [#tpu.dimension_semantics<arbitrary>], iteration_bounds = array<i64: 1>, scalar_prefetch = 0 : i64, scratch_operands = 0 : i64, tpu.core_type = #tpu.core_type<tc>, window_params = [{transform_indices = @transform_0, window_bounds = array<i64: 128, 144>}, {pipeline_mode = #tpu.pipeline_mode<synchronous>, transform_indices = @transform_1, window_bounds = array<i64: 144, 32>}, {transform_indices = @transform_2, window_bounds = array<i64: 128, 32>}, {pipeline_mode = #tpu.pipeline_mode<synchronous>, transform_indices = @transform_3, window_bounds = array<i64: 1, 32>}, {pipeline_mode = #tpu.pipeline_mode<synchronous>, transform_indices = @transform_4, window_bounds = array<i64: 1, 32>}]} {
    %c0 = arith.constant 0 : index
    %c0_0 = arith.constant 0 : index
    %0 = vector.load %arg1[%c0, %c0_0] : memref<128x144xbf16, #tpu.memory_space<vmem>>, vector<128x144xbf16>
    %c0_1 = arith.constant 0 : index
    %c0_2 = arith.constant 0 : index
    %1 = vector.load %arg2[%c0_1, %c0_2] : memref<144x32xbf16, #tpu.memory_space<vmem>>, vector<144x32xbf16>
    %cst = arith.constant dense<0.000000e+00> : vector<128x32xf32>
    %2 = tpu.matmul %0, %1, %cst {dimension_numbers = #tpu.dot_dimension_numbers<[1], [0], [0], [1], [0, 0, 1, 1], [], []>} : vector<128x144xbf16>, vector<144x32xbf16>, vector<128x32xf32> -> vector<128x32xf32>
    %3 = arith.truncf %2 : vector<128x32xf32> to vector<128x32xbf16>
    %c0_3 = arith.constant 0 : index
    %c0_4 = arith.constant 0 : index
    %4 = vector.load %arg3[%c0_3, %c0_4] : memref<128x32xbf16, #tpu.memory_space<vmem>>, vector<128x32xbf16>
    tpu.vector_store %arg3[%c0_3, %c0_4], %3 {strides = array<i32>} : memref<128x32xbf16, #tpu.memory_space<vmem>>, vector<128x32xbf16>,
    %c0_i32 = arith.constant 0 : i32
    %5 = arith.cmpi eq, %arg0, %c0_i32 : i32
    %6 = arith.extui %5 : i1 to i32
    %c0_i32_5 = arith.constant 0 : i32
    %7 = arith.cmpi ne, %6, %c0_i32_5 : i32
    scf.if %7 {
      %cst_16 = arith.constant 0.000000e+00 : f32
      %19 = vector.broadcast %cst_16 : f32 to vector<1x32xf32>
      %c0_17 = arith.constant 0 : index
      %c0_18 = arith.constant 0 : index
      %20 = vector.load %arg4[%c0_17, %c0_18] : memref<1x32xf32, #tpu.memory_space<vmem>>, vector<1x32xf32>
      tpu.vector_store %arg4[%c0_17, %c0_18], %19 {strides = array<i32>} : memref<1x32xf32, #tpu.memory_space<vmem>>, vector<1x32xf32>,
      %cst_19 = arith.constant 0.000000e+00 : f32
      %21 = vector.broadcast %cst_19 : f32 to vector<1x32xf32>
      %c0_20 = arith.constant 0 : index
      %c0_21 = arith.constant 0 : index
      %22 = vector.load %arg5[%c0_20, %c0_21] : memref<1x32xf32, #tpu.memory_space<vmem>>, vector<1x32xf32>
      tpu.vector_store %arg5[%c0_20, %c0_21], %21 {strides = array<i32>} : memref<1x32xf32, #tpu.memory_space<vmem>>, vector<1x32xf32>,
    } else {
    }
    %c0_6 = arith.constant 0 : index
    %c0_7 = arith.constant 0 : index
    %8 = vector.load %arg4[%c0_6, %c0_7] : memref<1x32xf32, #tpu.memory_space<vmem>>, vector<1x32xf32>
    %cst_8 = arith.constant dense<0.000000e+00> : vector<32xf32>
    %9 = vector.multi_reduction <add>, %2, %cst_8 [0] : vector<128x32xf32> to vector<32xf32>
    %10 = vector.shape_cast %9 : vector<32xf32> to vector<1x32xf32>
    %11 = arith.addf %8, %10 : vector<1x32xf32>
    %c0_9 = arith.constant 0 : index
    %c0_10 = arith.constant 0 : index
    %12 = vector.load %arg4[%c0_9, %c0_10] : memref<1x32xf32, #tpu.memory_space<vmem>>, vector<1x32xf32>
    tpu.vector_store %arg4[%c0_9, %c0_10], %11 {strides = array<i32>} : memref<1x32xf32, #tpu.memory_space<vmem>>, vector<1x32xf32>,
    %c0_11 = arith.constant 0 : index
    %c0_12 = arith.constant 0 : index
    %13 = vector.load %arg5[%c0_11, %c0_12] : memref<1x32xf32, #tpu.memory_space<vmem>>, vector<1x32xf32>
    %14 = arith.mulf %2, %2 : vector<128x32xf32>
    %cst_13 = arith.constant dense<0.000000e+00> : vector<32xf32>
    %15 = vector.multi_reduction <add>, %14, %cst_13 [0] : vector<128x32xf32> to vector<32xf32>
    %16 = vector.shape_cast %15 : vector<32xf32> to vector<1x32xf32>
    %17 = arith.addf %13, %16 : vector<1x32xf32>
    %c0_14 = arith.constant 0 : index
    %c0_15 = arith.constant 0 : index
    %18 = vector.load %arg5[%c0_14, %c0_15] : memref<1x32xf32, #tpu.memory_space<vmem>>, vector<1x32xf32>
    tpu.vector_store %arg5[%c0_14, %c0_15], %17 {strides = array<i32>} : memref<1x32xf32, #tpu.memory_space<vmem>>, vector<1x32xf32>,
    return
  }
  func.func @transform_0(%arg0: i32) -> (i32, i32) {
    %c0_i32 = arith.constant 0 : i32
    %c0_i32_0 = arith.constant 0 : i32
    return %arg0, %c0_i32 : i32, i32
  }
  func.func @transform_1(%arg0: i32) -> (i32, i32) {
    %c0_i32 = arith.constant 0 : i32
    %c0_i32_0 = arith.constant 0 : i32
    %c0_i32_1 = arith.constant 0 : i32
    return %c0_i32, %c0_i32_0 : i32, i32
  }
  func.func @transform_2(%arg0: i32) -> (i32, i32) {
    %c0_i32 = arith.constant 0 : i32
    %c0_i32_0 = arith.constant 0 : i32
    return %arg0, %c0_i32 : i32, i32
  }
  func.func @transform_3(%arg0: i32) -> (i32, i32) {
    %c0_i32 = arith.constant 0 : i32
    %c0_i32_0 = arith.constant 0 : i32
    %c0_i32_1 = arith.constant 0 : i32
    return %c0_i32, %c0_i32_0 : i32, i32
  }
  func.func @transform_4(%arg0: i32) -> (i32, i32) {
    %c0_i32 = arith.constant 0 : i32
    %c0_i32_0 = arith.constant 0 : i32
    %c0_i32_1 = arith.constant 0 : i32
    return %c0_i32, %c0_i32_0 : i32, i32
  }
}

module attributes {stable_mosaic.version = 11 : i64} {
  func.func @_matmul_stats_kernel(%arg0: i32, %arg1: memref<128x288xbf16, #tpu.memory_space<vmem>>, %arg2: memref<288x32xbf16, #tpu.memory_space<vmem>>, %arg3: memref<128x32xbf16, #tpu.memory_space<vmem>>, %arg4: memref<1x32xf32, #tpu.memory_space<vmem>>, %arg5: memref<1x32xf32, #tpu.memory_space<vmem>>) attributes {dimension_semantics = [#tpu.dimension_semantics<arbitrary>], iteration_bounds = array<i64: 1>, scalar_prefetch = 0 : i64, scratch_operands = 0 : i64, tpu.core_type = #tpu.core_type<tc>, window_params = [{transform_indices = @transform_0, window_bounds = array<i64: 128, 288>}, {pipeline_mode = #tpu.pipeline_mode<synchronous>, transform_indices = @transform_1, window_bounds = array<i64: 288, 32>}, {transform_indices = @transform_2, window_bounds = array<i64: 128, 32>}, {pipeline_mode = #tpu.pipeline_mode<synchronous>, transform_indices = @transform_3, window_bounds = array<i64: 1, 32>}, {pipeline_mode = #tpu.pipeline_mode<synchronous>, transform_indices = @transform_4, window_bounds = array<i64: 1, 32>}]} {
    %c0 = arith.constant 0 : index
    %c0_0 = arith.constant 0 : index
    %0 = vector.load %arg1[%c0, %c0_0] : memref<128x288xbf16, #tpu.memory_space<vmem>>, vector<128x288xbf16>
    %c0_1 = arith.constant 0 : index
    %c0_2 = arith.constant 0 : index
    %1 = vector.load %arg2[%c0_1, %c0_2] : memref<288x32xbf16, #tpu.memory_space<vmem>>, vector<288x32xbf16>
    %cst = arith.constant dense<0.000000e+00> : vector<128x32xf32>
    %2 = tpu.matmul %0, %1, %cst {dimension_numbers = #tpu.dot_dimension_numbers<[1], [0], [0], [1], [0, 0, 1, 1], [], []>} : vector<128x288xbf16>, vector<288x32xbf16>, vector<128x32xf32> -> vector<128x32xf32>
    %3 = arith.truncf %2 : vector<128x32xf32> to vector<128x32xbf16>
    %c0_3 = arith.constant 0 : index
    %c0_4 = arith.constant 0 : index
    %4 = vector.load %arg3[%c0_3, %c0_4] : memref<128x32xbf16, #tpu.memory_space<vmem>>, vector<128x32xbf16>
    tpu.vector_store %arg3[%c0_3, %c0_4], %3 {strides = array<i32>} : memref<128x32xbf16, #tpu.memory_space<vmem>>, vector<128x32xbf16>,
    %c0_i32 = arith.constant 0 : i32
    %5 = arith.cmpi eq, %arg0, %c0_i32 : i32
    %6 = arith.extui %5 : i1 to i32
    %c0_i32_5 = arith.constant 0 : i32
    %7 = arith.cmpi ne, %6, %c0_i32_5 : i32
    scf.if %7 {
      %cst_16 = arith.constant 0.000000e+00 : f32
      %19 = vector.broadcast %cst_16 : f32 to vector<1x32xf32>
      %c0_17 = arith.constant 0 : index
      %c0_18 = arith.constant 0 : index
      %20 = vector.load %arg4[%c0_17, %c0_18] : memref<1x32xf32, #tpu.memory_space<vmem>>, vector<1x32xf32>
      tpu.vector_store %arg4[%c0_17, %c0_18], %19 {strides = array<i32>} : memref<1x32xf32, #tpu.memory_space<vmem>>, vector<1x32xf32>,
      %cst_19 = arith.constant 0.000000e+00 : f32
      %21 = vector.broadcast %cst_19 : f32 to vector<1x32xf32>
      %c0_20 = arith.constant 0 : index
      %c0_21 = arith.constant 0 : index
      %22 = vector.load %arg5[%c0_20, %c0_21] : memref<1x32xf32, #tpu.memory_space<vmem>>, vector<1x32xf32>
      tpu.vector_store %arg5[%c0_20, %c0_21], %21 {strides = array<i32>} : memref<1x32xf32, #tpu.memory_space<vmem>>, vector<1x32xf32>,
    } else {
    }
    %c0_6 = arith.constant 0 : index
    %c0_7 = arith.constant 0 : index
    %8 = vector.load %arg4[%c0_6, %c0_7] : memref<1x32xf32, #tpu.memory_space<vmem>>, vector<1x32xf32>
    %cst_8 = arith.constant dense<0.000000e+00> : vector<32xf32>
    %9 = vector.multi_reduction <add>, %2, %cst_8 [0] : vector<128x32xf32> to vector<32xf32>
    %10 = vector.shape_cast %9 : vector<32xf32> to vector<1x32xf32>
    %11 = arith.addf %8, %10 : vector<1x32xf32>
    %c0_9 = arith.constant 0 : index
    %c0_10 = arith.constant 0 : index
    %12 = vector.load %arg4[%c0_9, %c0_10] : memref<1x32xf32, #tpu.memory_space<vmem>>, vector<1x32xf32>
    tpu.vector_store %arg4[%c0_9, %c0_10], %11 {strides = array<i32>} : memref<1x32xf32, #tpu.memory_space<vmem>>, vector<1x32xf32>,
    %c0_11 = arith.constant 0 : index
    %c0_12 = arith.constant 0 : index
    %13 = vector.load %arg5[%c0_11, %c0_12] : memref<1x32xf32, #tpu.memory_space<vmem>>, vector<1x32xf32>
    %14 = arith.mulf %2, %2 : vector<128x32xf32>
    %cst_13 = arith.constant dense<0.000000e+00> : vector<32xf32>
    %15 = vector.multi_reduction <add>, %14, %cst_13 [0] : vector<128x32xf32> to vector<32xf32>
    %16 = vector.shape_cast %15 : vector<32xf32> to vector<1x32xf32>
    %17 = arith.addf %13, %16 : vector<1x32xf32>
    %c0_14 = arith.constant 0 : index
    %c0_15 = arith.constant 0 : index
    %18 = vector.load %arg5[%c0_14, %c0_15] : memref<1x32xf32, #tpu.memory_space<vmem>>, vector<1x32xf32>
    tpu.vector_store %arg5[%c0_14, %c0_15], %17 {strides = array<i32>} : memref<1x32xf32, #tpu.memory_space<vmem>>, vector<1x32xf32>,
    return
  }
  func.func @transform_0(%arg0: i32) -> (i32, i32) {
    %c0_i32 = arith.constant 0 : i32
    %c0_i32_0 = arith.constant 0 : i32
    return %arg0, %c0_i32 : i32, i32
  }
  func.func @transform_1(%arg0: i32) -> (i32, i32) {
    %c0_i32 = arith.constant 0 : i32
    %c0_i32_0 = arith.constant 0 : i32
    %c0_i32_1 = arith.constant 0 : i32
    return %c0_i32, %c0_i32_0 : i32, i32
  }
  func.func @transform_2(%arg0: i32) -> (i32, i32) {
    %c0_i32 = arith.constant 0 : i32
    %c0_i32_0 = arith.constant 0 : i32
    return %arg0, %c0_i32 : i32, i32
  }
  func.func @transform_3(%arg0: i32) -> (i32, i32) {
    %c0_i32 = arith.constant 0 : i32
    %c0_i32_0 = arith.constant 0 : i32
    %c0_i32_1 = arith.constant 0 : i32
    return %c0_i32, %c0_i32_0 : i32, i32
  }
  func.func @transform_4(%arg0: i32) -> (i32, i32) {
    %c0_i32 = arith.constant 0 : i32
    %c0_i32_0 = arith.constant 0 : i32
    %c0_i32_1 = arith.constant 0 : i32
    return %c0_i32, %c0_i32_0 : i32, i32
  }
}

module attributes {stable_mosaic.version = 11 : i64} {
  func.func @_bn_add_relu_kernel(%arg0: i32, %arg1: memref<16x256xbf16, #tpu.memory_space<vmem>>, %arg2: memref<1x256xf32, #tpu.memory_space<vmem>>, %arg3: memref<1x256xf32, #tpu.memory_space<vmem>>, %arg4: memref<16x256xbf16, #tpu.memory_space<vmem>>, %arg5: memref<1x256xf32, #tpu.memory_space<vmem>>, %arg6: memref<1x256xf32, #tpu.memory_space<vmem>>, %arg7: memref<16x256xbf16, #tpu.memory_space<vmem>>) attributes {dimension_semantics = [#tpu.dimension_semantics<parallel>], iteration_bounds = array<i64: 1>, scalar_prefetch = 0 : i64, scratch_operands = 0 : i64, tpu.core_type = #tpu.core_type<tc>, window_params = [{transform_indices = @transform_0, window_bounds = array<i64: 16, 256>}, {pipeline_mode = #tpu.pipeline_mode<synchronous>, transform_indices = @transform_1, window_bounds = array<i64: 1, 256>}, {pipeline_mode = #tpu.pipeline_mode<synchronous>, transform_indices = @transform_2, window_bounds = array<i64: 1, 256>}, {transform_indices = @transform_3, window_bounds = array<i64: 16, 256>}, {pipeline_mode = #tpu.pipeline_mode<synchronous>, transform_indices = @transform_4, window_bounds = array<i64: 1, 256>}, {pipeline_mode = #tpu.pipeline_mode<synchronous>, transform_indices = @transform_5, window_bounds = array<i64: 1, 256>}, {transform_indices = @transform_6, window_bounds = array<i64: 16, 256>}]} {
    %c0 = arith.constant 0 : index
    %c0_0 = arith.constant 0 : index
    %0 = vector.load %arg1[%c0, %c0_0] : memref<16x256xbf16, #tpu.memory_space<vmem>>, vector<16x256xbf16>
    %1 = arith.extf %0 : vector<16x256xbf16> to vector<16x256xf32>
    %c0_1 = arith.constant 0 : index
    %c0_2 = arith.constant 0 : index
    %2 = vector.load %arg2[%c0_1, %c0_2] : memref<1x256xf32, #tpu.memory_space<vmem>>, vector<1x256xf32>
    %3 = vector.broadcast %2 : vector<1x256xf32> to vector<16x256xf32>
    %4 = arith.mulf %1, %3 : vector<16x256xf32>
    %c0_3 = arith.constant 0 : index
    %c0_4 = arith.constant 0 : index
    %5 = vector.load %arg3[%c0_3, %c0_4] : memref<1x256xf32, #tpu.memory_space<vmem>>, vector<1x256xf32>
    %6 = vector.broadcast %5 : vector<1x256xf32> to vector<16x256xf32>
    %7 = arith.addf %4, %6 : vector<16x256xf32>
    %c0_5 = arith.constant 0 : index
    %c0_6 = arith.constant 0 : index
    %8 = vector.load %arg4[%c0_5, %c0_6] : memref<16x256xbf16, #tpu.memory_space<vmem>>, vector<16x256xbf16>
    %9 = arith.extf %8 : vector<16x256xbf16> to vector<16x256xf32>
    %c0_7 = arith.constant 0 : index
    %c0_8 = arith.constant 0 : index
    %10 = vector.load %arg5[%c0_7, %c0_8] : memref<1x256xf32, #tpu.memory_space<vmem>>, vector<1x256xf32>
    %11 = vector.broadcast %10 : vector<1x256xf32> to vector<16x256xf32>
    %12 = arith.mulf %9, %11 : vector<16x256xf32>
    %c0_9 = arith.constant 0 : index
    %c0_10 = arith.constant 0 : index
    %13 = vector.load %arg6[%c0_9, %c0_10] : memref<1x256xf32, #tpu.memory_space<vmem>>, vector<1x256xf32>
    %14 = vector.broadcast %13 : vector<1x256xf32> to vector<16x256xf32>
    %15 = arith.addf %12, %14 : vector<16x256xf32>
    %16 = arith.addf %7, %15 : vector<16x256xf32>
    %cst = arith.constant 0.000000e+00 : f32
    %17 = vector.broadcast %cst : f32 to vector<16x256xf32>
    %18 = arith.maximumf %16, %17 : vector<16x256xf32>
    %19 = arith.truncf %18 : vector<16x256xf32> to vector<16x256xbf16>
    %c0_11 = arith.constant 0 : index
    %c0_12 = arith.constant 0 : index
    %20 = vector.load %arg7[%c0_11, %c0_12] : memref<16x256xbf16, #tpu.memory_space<vmem>>, vector<16x256xbf16>
    tpu.vector_store %arg7[%c0_11, %c0_12], %19 {strides = array<i32>} : memref<16x256xbf16, #tpu.memory_space<vmem>>, vector<16x256xbf16>,
    return
  }
  func.func @transform_0(%arg0: i32) -> (i32, i32) {
    %c0_i32 = arith.constant 0 : i32
    %c0_i32_0 = arith.constant 0 : i32
    return %arg0, %c0_i32 : i32, i32
  }
  func.func @transform_1(%arg0: i32) -> (i32, i32) {
    %c0_i32 = arith.constant 0 : i32
    %c0_i32_0 = arith.constant 0 : i32
    %c0_i32_1 = arith.constant 0 : i32
    return %c0_i32, %c0_i32_0 : i32, i32
  }
  func.func @transform_2(%arg0: i32) -> (i32, i32) {
    %c0_i32 = arith.constant 0 : i32
    %c0_i32_0 = arith.constant 0 : i32
    %c0_i32_1 = arith.constant 0 : i32
    return %c0_i32, %c0_i32_0 : i32, i32
  }
  func.func @transform_3(%arg0: i32) -> (i32, i32) {
    %c0_i32 = arith.constant 0 : i32
    %c0_i32_0 = arith.constant 0 : i32
    return %arg0, %c0_i32 : i32, i32
  }
  func.func @transform_4(%arg0: i32) -> (i32, i32) {
    %c0_i32 = arith.constant 0 : i32
    %c0_i32_0 = arith.constant 0 : i32
    %c0_i32_1 = arith.constant 0 : i32
    return %c0_i32, %c0_i32_0 : i32, i32
  }
  func.func @transform_5(%arg0: i32) -> (i32, i32) {
    %c0_i32 = arith.constant 0 : i32
    %c0_i32_0 = arith.constant 0 : i32
    %c0_i32_1 = arith.constant 0 : i32
    return %c0_i32, %c0_i32_0 : i32, i32
  }
  func.func @transform_6(%arg0: i32) -> (i32, i32) {
    %c0_i32 = arith.constant 0 : i32
    %c0_i32_0 = arith.constant 0 : i32
    return %arg0, %c0_i32 : i32, i32
  }
}

module attributes {stable_mosaic.version = 11 : i64} {
  func.func @_matmul_stats_kernel(%arg0: i32, %arg1: memref<32x32xbf16, #tpu.memory_space<vmem>>, %arg2: memref<32x64xbf16, #tpu.memory_space<vmem>>, %arg3: memref<32x64xbf16, #tpu.memory_space<vmem>>, %arg4: memref<1x64xf32, #tpu.memory_space<vmem>>, %arg5: memref<1x64xf32, #tpu.memory_space<vmem>>) attributes {dimension_semantics = [#tpu.dimension_semantics<arbitrary>], iteration_bounds = array<i64: 1>, scalar_prefetch = 0 : i64, scratch_operands = 0 : i64, tpu.core_type = #tpu.core_type<tc>, window_params = [{transform_indices = @transform_0, window_bounds = array<i64: 32, 32>}, {pipeline_mode = #tpu.pipeline_mode<synchronous>, transform_indices = @transform_1, window_bounds = array<i64: 32, 64>}, {transform_indices = @transform_2, window_bounds = array<i64: 32, 64>}, {pipeline_mode = #tpu.pipeline_mode<synchronous>, transform_indices = @transform_3, window_bounds = array<i64: 1, 64>}, {pipeline_mode = #tpu.pipeline_mode<synchronous>, transform_indices = @transform_4, window_bounds = array<i64: 1, 64>}]} {
    %c0 = arith.constant 0 : index
    %c0_0 = arith.constant 0 : index
    %0 = vector.load %arg1[%c0, %c0_0] : memref<32x32xbf16, #tpu.memory_space<vmem>>, vector<32x32xbf16>
    %c0_1 = arith.constant 0 : index
    %c0_2 = arith.constant 0 : index
    %1 = vector.load %arg2[%c0_1, %c0_2] : memref<32x64xbf16, #tpu.memory_space<vmem>>, vector<32x64xbf16>
    %cst = arith.constant dense<0.000000e+00> : vector<32x64xf32>
    %2 = tpu.matmul %0, %1, %cst {dimension_numbers = #tpu.dot_dimension_numbers<[1], [0], [0], [1], [0, 0, 1, 1], [], []>} : vector<32x32xbf16>, vector<32x64xbf16>, vector<32x64xf32> -> vector<32x64xf32>
    %3 = arith.truncf %2 : vector<32x64xf32> to vector<32x64xbf16>
    %c0_3 = arith.constant 0 : index
    %c0_4 = arith.constant 0 : index
    %4 = vector.load %arg3[%c0_3, %c0_4] : memref<32x64xbf16, #tpu.memory_space<vmem>>, vector<32x64xbf16>
    tpu.vector_store %arg3[%c0_3, %c0_4], %3 {strides = array<i32>} : memref<32x64xbf16, #tpu.memory_space<vmem>>, vector<32x64xbf16>,
    %c0_i32 = arith.constant 0 : i32
    %5 = arith.cmpi eq, %arg0, %c0_i32 : i32
    %6 = arith.extui %5 : i1 to i32
    %c0_i32_5 = arith.constant 0 : i32
    %7 = arith.cmpi ne, %6, %c0_i32_5 : i32
    scf.if %7 {
      %cst_16 = arith.constant 0.000000e+00 : f32
      %19 = vector.broadcast %cst_16 : f32 to vector<1x64xf32>
      %c0_17 = arith.constant 0 : index
      %c0_18 = arith.constant 0 : index
      %20 = vector.load %arg4[%c0_17, %c0_18] : memref<1x64xf32, #tpu.memory_space<vmem>>, vector<1x64xf32>
      tpu.vector_store %arg4[%c0_17, %c0_18], %19 {strides = array<i32>} : memref<1x64xf32, #tpu.memory_space<vmem>>, vector<1x64xf32>,
      %cst_19 = arith.constant 0.000000e+00 : f32
      %21 = vector.broadcast %cst_19 : f32 to vector<1x64xf32>
      %c0_20 = arith.constant 0 : index
      %c0_21 = arith.constant 0 : index
      %22 = vector.load %arg5[%c0_20, %c0_21] : memref<1x64xf32, #tpu.memory_space<vmem>>, vector<1x64xf32>
      tpu.vector_store %arg5[%c0_20, %c0_21], %21 {strides = array<i32>} : memref<1x64xf32, #tpu.memory_space<vmem>>, vector<1x64xf32>,
    } else {
    }
    %c0_6 = arith.constant 0 : index
    %c0_7 = arith.constant 0 : index
    %8 = vector.load %arg4[%c0_6, %c0_7] : memref<1x64xf32, #tpu.memory_space<vmem>>, vector<1x64xf32>
    %cst_8 = arith.constant dense<0.000000e+00> : vector<64xf32>
    %9 = vector.multi_reduction <add>, %2, %cst_8 [0] : vector<32x64xf32> to vector<64xf32>
    %10 = vector.shape_cast %9 : vector<64xf32> to vector<1x64xf32>
    %11 = arith.addf %8, %10 : vector<1x64xf32>
    %c0_9 = arith.constant 0 : index
    %c0_10 = arith.constant 0 : index
    %12 = vector.load %arg4[%c0_9, %c0_10] : memref<1x64xf32, #tpu.memory_space<vmem>>, vector<1x64xf32>
    tpu.vector_store %arg4[%c0_9, %c0_10], %11 {strides = array<i32>} : memref<1x64xf32, #tpu.memory_space<vmem>>, vector<1x64xf32>,
    %c0_11 = arith.constant 0 : index
    %c0_12 = arith.constant 0 : index
    %13 = vector.load %arg5[%c0_11, %c0_12] : memref<1x64xf32, #tpu.memory_space<vmem>>, vector<1x64xf32>
    %14 = arith.mulf %2, %2 : vector<32x64xf32>
    %cst_13 = arith.constant dense<0.000000e+00> : vector<64xf32>
    %15 = vector.multi_reduction <add>, %14, %cst_13 [0] : vector<32x64xf32> to vector<64xf32>
    %16 = vector.shape_cast %15 : vector<64xf32> to vector<1x64xf32>
    %17 = arith.addf %13, %16 : vector<1x64xf32>
    %c0_14 = arith.constant 0 : index
    %c0_15 = arith.constant 0 : index
    %18 = vector.load %arg5[%c0_14, %c0_15] : memref<1x64xf32, #tpu.memory_space<vmem>>, vector<1x64xf32>
    tpu.vector_store %arg5[%c0_14, %c0_15], %17 {strides = array<i32>} : memref<1x64xf32, #tpu.memory_space<vmem>>, vector<1x64xf32>,
    return
  }
  func.func @transform_0(%arg0: i32) -> (i32, i32) {
    %c0_i32 = arith.constant 0 : i32
    %c0_i32_0 = arith.constant 0 : i32
    return %arg0, %c0_i32 : i32, i32
  }
  func.func @transform_1(%arg0: i32) -> (i32, i32) {
    %c0_i32 = arith.constant 0 : i32
    %c0_i32_0 = arith.constant 0 : i32
    %c0_i32_1 = arith.constant 0 : i32
    return %c0_i32, %c0_i32_0 : i32, i32
  }
  func.func @transform_2(%arg0: i32) -> (i32, i32) {
    %c0_i32 = arith.constant 0 : i32
    %c0_i32_0 = arith.constant 0 : i32
    return %arg0, %c0_i32 : i32, i32
  }
  func.func @transform_3(%arg0: i32) -> (i32, i32) {
    %c0_i32 = arith.constant 0 : i32
    %c0_i32_0 = arith.constant 0 : i32
    %c0_i32_1 = arith.constant 0 : i32
    return %c0_i32, %c0_i32_0 : i32, i32
  }
  func.func @transform_4(%arg0: i32) -> (i32, i32) {
    %c0_i32 = arith.constant 0 : i32
    %c0_i32_0 = arith.constant 0 : i32
    %c0_i32_1 = arith.constant 0 : i32
    return %c0_i32, %c0_i32_0 : i32, i32
  }
}

module attributes {stable_mosaic.version = 11 : i64} {
  func.func @_bn_relu_kernel(%arg0: i32, %arg1: memref<4x512xbf16, #tpu.memory_space<vmem>>, %arg2: memref<1x512xf32, #tpu.memory_space<vmem>>, %arg3: memref<1x512xf32, #tpu.memory_space<vmem>>, %arg4: memref<4x512xbf16, #tpu.memory_space<vmem>>) attributes {dimension_semantics = [#tpu.dimension_semantics<parallel>], iteration_bounds = array<i64: 1>, scalar_prefetch = 0 : i64, scratch_operands = 0 : i64, tpu.core_type = #tpu.core_type<tc>, window_params = [{transform_indices = @transform_0, window_bounds = array<i64: 4, 512>}, {pipeline_mode = #tpu.pipeline_mode<synchronous>, transform_indices = @transform_1, window_bounds = array<i64: 1, 512>}, {pipeline_mode = #tpu.pipeline_mode<synchronous>, transform_indices = @transform_2, window_bounds = array<i64: 1, 512>}, {transform_indices = @transform_3, window_bounds = array<i64: 4, 512>}]} {
    %c0 = arith.constant 0 : index
    %c0_0 = arith.constant 0 : index
    %0 = vector.load %arg1[%c0, %c0_0] : memref<4x512xbf16, #tpu.memory_space<vmem>>, vector<4x512xbf16>
    %1 = arith.extf %0 : vector<4x512xbf16> to vector<4x512xf32>
    %c0_1 = arith.constant 0 : index
    %c0_2 = arith.constant 0 : index
    %2 = vector.load %arg2[%c0_1, %c0_2] : memref<1x512xf32, #tpu.memory_space<vmem>>, vector<1x512xf32>
    %3 = vector.broadcast %2 : vector<1x512xf32> to vector<4x512xf32>
    %4 = arith.mulf %1, %3 : vector<4x512xf32>
    %c0_3 = arith.constant 0 : index
    %c0_4 = arith.constant 0 : index
    %5 = vector.load %arg3[%c0_3, %c0_4] : memref<1x512xf32, #tpu.memory_space<vmem>>, vector<1x512xf32>
    %6 = vector.broadcast %5 : vector<1x512xf32> to vector<4x512xf32>
    %7 = arith.addf %4, %6 : vector<4x512xf32>
    %cst = arith.constant 0.000000e+00 : f32
    %8 = vector.broadcast %cst : f32 to vector<4x512xf32>
    %9 = arith.maximumf %7, %8 : vector<4x512xf32>
    %10 = arith.truncf %9 : vector<4x512xf32> to vector<4x512xbf16>
    %c0_5 = arith.constant 0 : index
    %c0_6 = arith.constant 0 : index
    %11 = vector.load %arg4[%c0_5, %c0_6] : memref<4x512xbf16, #tpu.memory_space<vmem>>, vector<4x512xbf16>
    tpu.vector_store %arg4[%c0_5, %c0_6], %10 {strides = array<i32>} : memref<4x512xbf16, #tpu.memory_space<vmem>>, vector<4x512xbf16>,
    return
  }
  func.func @transform_0(%arg0: i32) -> (i32, i32) {
    %c0_i32 = arith.constant 0 : i32
    %c0_i32_0 = arith.constant 0 : i32
    return %arg0, %c0_i32 : i32, i32
  }
  func.func @transform_1(%arg0: i32) -> (i32, i32) {
    %c0_i32 = arith.constant 0 : i32
    %c0_i32_0 = arith.constant 0 : i32
    %c0_i32_1 = arith.constant 0 : i32
    return %c0_i32, %c0_i32_0 : i32, i32
  }
  func.func @transform_2(%arg0: i32) -> (i32, i32) {
    %c0_i32 = arith.constant 0 : i32
    %c0_i32_0 = arith.constant 0 : i32
    %c0_i32_1 = arith.constant 0 : i32
    return %c0_i32, %c0_i32_0 : i32, i32
  }
  func.func @transform_3(%arg0: i32) -> (i32, i32) {
    %c0_i32 = arith.constant 0 : i32
    %c0_i32_0 = arith.constant 0 : i32
    return %arg0, %c0_i32 : i32, i32
  }
}

module attributes {stable_mosaic.version = 11 : i64} {
  func.func @_matmul_stats_kernel(%arg0: i32, %arg1: memref<32x288xbf16, #tpu.memory_space<vmem>>, %arg2: memref<288x64xbf16, #tpu.memory_space<vmem>>, %arg3: memref<32x64xbf16, #tpu.memory_space<vmem>>, %arg4: memref<1x64xf32, #tpu.memory_space<vmem>>, %arg5: memref<1x64xf32, #tpu.memory_space<vmem>>) attributes {dimension_semantics = [#tpu.dimension_semantics<arbitrary>], iteration_bounds = array<i64: 1>, scalar_prefetch = 0 : i64, scratch_operands = 0 : i64, tpu.core_type = #tpu.core_type<tc>, window_params = [{transform_indices = @transform_0, window_bounds = array<i64: 32, 288>}, {pipeline_mode = #tpu.pipeline_mode<synchronous>, transform_indices = @transform_1, window_bounds = array<i64: 288, 64>}, {transform_indices = @transform_2, window_bounds = array<i64: 32, 64>}, {pipeline_mode = #tpu.pipeline_mode<synchronous>, transform_indices = @transform_3, window_bounds = array<i64: 1, 64>}, {pipeline_mode = #tpu.pipeline_mode<synchronous>, transform_indices = @transform_4, window_bounds = array<i64: 1, 64>}]} {
    %c0 = arith.constant 0 : index
    %c0_0 = arith.constant 0 : index
    %0 = vector.load %arg1[%c0, %c0_0] : memref<32x288xbf16, #tpu.memory_space<vmem>>, vector<32x288xbf16>
    %c0_1 = arith.constant 0 : index
    %c0_2 = arith.constant 0 : index
    %1 = vector.load %arg2[%c0_1, %c0_2] : memref<288x64xbf16, #tpu.memory_space<vmem>>, vector<288x64xbf16>
    %cst = arith.constant dense<0.000000e+00> : vector<32x64xf32>
    %2 = tpu.matmul %0, %1, %cst {dimension_numbers = #tpu.dot_dimension_numbers<[1], [0], [0], [1], [0, 0, 1, 1], [], []>} : vector<32x288xbf16>, vector<288x64xbf16>, vector<32x64xf32> -> vector<32x64xf32>
    %3 = arith.truncf %2 : vector<32x64xf32> to vector<32x64xbf16>
    %c0_3 = arith.constant 0 : index
    %c0_4 = arith.constant 0 : index
    %4 = vector.load %arg3[%c0_3, %c0_4] : memref<32x64xbf16, #tpu.memory_space<vmem>>, vector<32x64xbf16>
    tpu.vector_store %arg3[%c0_3, %c0_4], %3 {strides = array<i32>} : memref<32x64xbf16, #tpu.memory_space<vmem>>, vector<32x64xbf16>,
    %c0_i32 = arith.constant 0 : i32
    %5 = arith.cmpi eq, %arg0, %c0_i32 : i32
    %6 = arith.extui %5 : i1 to i32
    %c0_i32_5 = arith.constant 0 : i32
    %7 = arith.cmpi ne, %6, %c0_i32_5 : i32
    scf.if %7 {
      %cst_16 = arith.constant 0.000000e+00 : f32
      %19 = vector.broadcast %cst_16 : f32 to vector<1x64xf32>
      %c0_17 = arith.constant 0 : index
      %c0_18 = arith.constant 0 : index
      %20 = vector.load %arg4[%c0_17, %c0_18] : memref<1x64xf32, #tpu.memory_space<vmem>>, vector<1x64xf32>
      tpu.vector_store %arg4[%c0_17, %c0_18], %19 {strides = array<i32>} : memref<1x64xf32, #tpu.memory_space<vmem>>, vector<1x64xf32>,
      %cst_19 = arith.constant 0.000000e+00 : f32
      %21 = vector.broadcast %cst_19 : f32 to vector<1x64xf32>
      %c0_20 = arith.constant 0 : index
      %c0_21 = arith.constant 0 : index
      %22 = vector.load %arg5[%c0_20, %c0_21] : memref<1x64xf32, #tpu.memory_space<vmem>>, vector<1x64xf32>
      tpu.vector_store %arg5[%c0_20, %c0_21], %21 {strides = array<i32>} : memref<1x64xf32, #tpu.memory_space<vmem>>, vector<1x64xf32>,
    } else {
    }
    %c0_6 = arith.constant 0 : index
    %c0_7 = arith.constant 0 : index
    %8 = vector.load %arg4[%c0_6, %c0_7] : memref<1x64xf32, #tpu.memory_space<vmem>>, vector<1x64xf32>
    %cst_8 = arith.constant dense<0.000000e+00> : vector<64xf32>
    %9 = vector.multi_reduction <add>, %2, %cst_8 [0] : vector<32x64xf32> to vector<64xf32>
    %10 = vector.shape_cast %9 : vector<64xf32> to vector<1x64xf32>
    %11 = arith.addf %8, %10 : vector<1x64xf32>
    %c0_9 = arith.constant 0 : index
    %c0_10 = arith.constant 0 : index
    %12 = vector.load %arg4[%c0_9, %c0_10] : memref<1x64xf32, #tpu.memory_space<vmem>>, vector<1x64xf32>
    tpu.vector_store %arg4[%c0_9, %c0_10], %11 {strides = array<i32>} : memref<1x64xf32, #tpu.memory_space<vmem>>, vector<1x64xf32>,
    %c0_11 = arith.constant 0 : index
    %c0_12 = arith.constant 0 : index
    %13 = vector.load %arg5[%c0_11, %c0_12] : memref<1x64xf32, #tpu.memory_space<vmem>>, vector<1x64xf32>
    %14 = arith.mulf %2, %2 : vector<32x64xf32>
    %cst_13 = arith.constant dense<0.000000e+00> : vector<64xf32>
    %15 = vector.multi_reduction <add>, %14, %cst_13 [0] : vector<32x64xf32> to vector<64xf32>
    %16 = vector.shape_cast %15 : vector<64xf32> to vector<1x64xf32>
    %17 = arith.addf %13, %16 : vector<1x64xf32>
    %c0_14 = arith.constant 0 : index
    %c0_15 = arith.constant 0 : index
    %18 = vector.load %arg5[%c0_14, %c0_15] : memref<1x64xf32, #tpu.memory_space<vmem>>, vector<1x64xf32>
    tpu.vector_store %arg5[%c0_14, %c0_15], %17 {strides = array<i32>} : memref<1x64xf32, #tpu.memory_space<vmem>>, vector<1x64xf32>,
    return
  }
  func.func @transform_0(%arg0: i32) -> (i32, i32) {
    %c0_i32 = arith.constant 0 : i32
    %c0_i32_0 = arith.constant 0 : i32
    return %arg0, %c0_i32 : i32, i32
  }
  func.func @transform_1(%arg0: i32) -> (i32, i32) {
    %c0_i32 = arith.constant 0 : i32
    %c0_i32_0 = arith.constant 0 : i32
    %c0_i32_1 = arith.constant 0 : i32
    return %c0_i32, %c0_i32_0 : i32, i32
  }
  func.func @transform_2(%arg0: i32) -> (i32, i32) {
    %c0_i32 = arith.constant 0 : i32
    %c0_i32_0 = arith.constant 0 : i32
    return %arg0, %c0_i32 : i32, i32
  }
  func.func @transform_3(%arg0: i32) -> (i32, i32) {
    %c0_i32 = arith.constant 0 : i32
    %c0_i32_0 = arith.constant 0 : i32
    %c0_i32_1 = arith.constant 0 : i32
    return %c0_i32, %c0_i32_0 : i32, i32
  }
  func.func @transform_4(%arg0: i32) -> (i32, i32) {
    %c0_i32 = arith.constant 0 : i32
    %c0_i32_0 = arith.constant 0 : i32
    %c0_i32_1 = arith.constant 0 : i32
    return %c0_i32, %c0_i32_0 : i32, i32
  }
}

module attributes {stable_mosaic.version = 11 : i64} {
  func.func @_matmul_stats_kernel(%arg0: i32, %arg1: memref<32x576xbf16, #tpu.memory_space<vmem>>, %arg2: memref<576x64xbf16, #tpu.memory_space<vmem>>, %arg3: memref<32x64xbf16, #tpu.memory_space<vmem>>, %arg4: memref<1x64xf32, #tpu.memory_space<vmem>>, %arg5: memref<1x64xf32, #tpu.memory_space<vmem>>) attributes {dimension_semantics = [#tpu.dimension_semantics<arbitrary>], iteration_bounds = array<i64: 1>, scalar_prefetch = 0 : i64, scratch_operands = 0 : i64, tpu.core_type = #tpu.core_type<tc>, window_params = [{transform_indices = @transform_0, window_bounds = array<i64: 32, 576>}, {pipeline_mode = #tpu.pipeline_mode<synchronous>, transform_indices = @transform_1, window_bounds = array<i64: 576, 64>}, {transform_indices = @transform_2, window_bounds = array<i64: 32, 64>}, {pipeline_mode = #tpu.pipeline_mode<synchronous>, transform_indices = @transform_3, window_bounds = array<i64: 1, 64>}, {pipeline_mode = #tpu.pipeline_mode<synchronous>, transform_indices = @transform_4, window_bounds = array<i64: 1, 64>}]} {
    %c0 = arith.constant 0 : index
    %c0_0 = arith.constant 0 : index
    %0 = vector.load %arg1[%c0, %c0_0] : memref<32x576xbf16, #tpu.memory_space<vmem>>, vector<32x576xbf16>
    %c0_1 = arith.constant 0 : index
    %c0_2 = arith.constant 0 : index
    %1 = vector.load %arg2[%c0_1, %c0_2] : memref<576x64xbf16, #tpu.memory_space<vmem>>, vector<576x64xbf16>
    %cst = arith.constant dense<0.000000e+00> : vector<32x64xf32>
    %2 = tpu.matmul %0, %1, %cst {dimension_numbers = #tpu.dot_dimension_numbers<[1], [0], [0], [1], [0, 0, 1, 1], [], []>} : vector<32x576xbf16>, vector<576x64xbf16>, vector<32x64xf32> -> vector<32x64xf32>
    %3 = arith.truncf %2 : vector<32x64xf32> to vector<32x64xbf16>
    %c0_3 = arith.constant 0 : index
    %c0_4 = arith.constant 0 : index
    %4 = vector.load %arg3[%c0_3, %c0_4] : memref<32x64xbf16, #tpu.memory_space<vmem>>, vector<32x64xbf16>
    tpu.vector_store %arg3[%c0_3, %c0_4], %3 {strides = array<i32>} : memref<32x64xbf16, #tpu.memory_space<vmem>>, vector<32x64xbf16>,
    %c0_i32 = arith.constant 0 : i32
    %5 = arith.cmpi eq, %arg0, %c0_i32 : i32
    %6 = arith.extui %5 : i1 to i32
    %c0_i32_5 = arith.constant 0 : i32
    %7 = arith.cmpi ne, %6, %c0_i32_5 : i32
    scf.if %7 {
      %cst_16 = arith.constant 0.000000e+00 : f32
      %19 = vector.broadcast %cst_16 : f32 to vector<1x64xf32>
      %c0_17 = arith.constant 0 : index
      %c0_18 = arith.constant 0 : index
      %20 = vector.load %arg4[%c0_17, %c0_18] : memref<1x64xf32, #tpu.memory_space<vmem>>, vector<1x64xf32>
      tpu.vector_store %arg4[%c0_17, %c0_18], %19 {strides = array<i32>} : memref<1x64xf32, #tpu.memory_space<vmem>>, vector<1x64xf32>,
      %cst_19 = arith.constant 0.000000e+00 : f32
      %21 = vector.broadcast %cst_19 : f32 to vector<1x64xf32>
      %c0_20 = arith.constant 0 : index
      %c0_21 = arith.constant 0 : index
      %22 = vector.load %arg5[%c0_20, %c0_21] : memref<1x64xf32, #tpu.memory_space<vmem>>, vector<1x64xf32>
      tpu.vector_store %arg5[%c0_20, %c0_21], %21 {strides = array<i32>} : memref<1x64xf32, #tpu.memory_space<vmem>>, vector<1x64xf32>,
    } else {
    }
    %c0_6 = arith.constant 0 : index
    %c0_7 = arith.constant 0 : index
    %8 = vector.load %arg4[%c0_6, %c0_7] : memref<1x64xf32, #tpu.memory_space<vmem>>, vector<1x64xf32>
    %cst_8 = arith.constant dense<0.000000e+00> : vector<64xf32>
    %9 = vector.multi_reduction <add>, %2, %cst_8 [0] : vector<32x64xf32> to vector<64xf32>
    %10 = vector.shape_cast %9 : vector<64xf32> to vector<1x64xf32>
    %11 = arith.addf %8, %10 : vector<1x64xf32>
    %c0_9 = arith.constant 0 : index
    %c0_10 = arith.constant 0 : index
    %12 = vector.load %arg4[%c0_9, %c0_10] : memref<1x64xf32, #tpu.memory_space<vmem>>, vector<1x64xf32>
    tpu.vector_store %arg4[%c0_9, %c0_10], %11 {strides = array<i32>} : memref<1x64xf32, #tpu.memory_space<vmem>>, vector<1x64xf32>,
    %c0_11 = arith.constant 0 : index
    %c0_12 = arith.constant 0 : index
    %13 = vector.load %arg5[%c0_11, %c0_12] : memref<1x64xf32, #tpu.memory_space<vmem>>, vector<1x64xf32>
    %14 = arith.mulf %2, %2 : vector<32x64xf32>
    %cst_13 = arith.constant dense<0.000000e+00> : vector<64xf32>
    %15 = vector.multi_reduction <add>, %14, %cst_13 [0] : vector<32x64xf32> to vector<64xf32>
    %16 = vector.shape_cast %15 : vector<64xf32> to vector<1x64xf32>
    %17 = arith.addf %13, %16 : vector<1x64xf32>
    %c0_14 = arith.constant 0 : index
    %c0_15 = arith.constant 0 : index
    %18 = vector.load %arg5[%c0_14, %c0_15] : memref<1x64xf32, #tpu.memory_space<vmem>>, vector<1x64xf32>
    tpu.vector_store %arg5[%c0_14, %c0_15], %17 {strides = array<i32>} : memref<1x64xf32, #tpu.memory_space<vmem>>, vector<1x64xf32>,
    return
  }
  func.func @transform_0(%arg0: i32) -> (i32, i32) {
    %c0_i32 = arith.constant 0 : i32
    %c0_i32_0 = arith.constant 0 : i32
    return %arg0, %c0_i32 : i32, i32
  }
  func.func @transform_1(%arg0: i32) -> (i32, i32) {
    %c0_i32 = arith.constant 0 : i32
    %c0_i32_0 = arith.constant 0 : i32
    %c0_i32_1 = arith.constant 0 : i32
    return %c0_i32, %c0_i32_0 : i32, i32
  }
  func.func @transform_2(%arg0: i32) -> (i32, i32) {
    %c0_i32 = arith.constant 0 : i32
    %c0_i32_0 = arith.constant 0 : i32
    return %arg0, %c0_i32 : i32, i32
  }
  func.func @transform_3(%arg0: i32) -> (i32, i32) {
    %c0_i32 = arith.constant 0 : i32
    %c0_i32_0 = arith.constant 0 : i32
    %c0_i32_1 = arith.constant 0 : i32
    return %c0_i32, %c0_i32_0 : i32, i32
  }
  func.func @transform_4(%arg0: i32) -> (i32, i32) {
    %c0_i32 = arith.constant 0 : i32
    %c0_i32_0 = arith.constant 0 : i32
    %c0_i32_1 = arith.constant 0 : i32
    return %c0_i32, %c0_i32_0 : i32, i32
  }
}

module attributes {stable_mosaic.version = 11 : i64} {
  func.func @_bn_add_relu_kernel(%arg0: i32, %arg1: memref<4x512xbf16, #tpu.memory_space<vmem>>, %arg2: memref<1x512xf32, #tpu.memory_space<vmem>>, %arg3: memref<1x512xf32, #tpu.memory_space<vmem>>, %arg4: memref<4x512xbf16, #tpu.memory_space<vmem>>, %arg5: memref<1x512xf32, #tpu.memory_space<vmem>>, %arg6: memref<1x512xf32, #tpu.memory_space<vmem>>, %arg7: memref<4x512xbf16, #tpu.memory_space<vmem>>) attributes {dimension_semantics = [#tpu.dimension_semantics<parallel>], iteration_bounds = array<i64: 1>, scalar_prefetch = 0 : i64, scratch_operands = 0 : i64, tpu.core_type = #tpu.core_type<tc>, window_params = [{transform_indices = @transform_0, window_bounds = array<i64: 4, 512>}, {pipeline_mode = #tpu.pipeline_mode<synchronous>, transform_indices = @transform_1, window_bounds = array<i64: 1, 512>}, {pipeline_mode = #tpu.pipeline_mode<synchronous>, transform_indices = @transform_2, window_bounds = array<i64: 1, 512>}, {transform_indices = @transform_3, window_bounds = array<i64: 4, 512>}, {pipeline_mode = #tpu.pipeline_mode<synchronous>, transform_indices = @transform_4, window_bounds = array<i64: 1, 512>}, {pipeline_mode = #tpu.pipeline_mode<synchronous>, transform_indices = @transform_5, window_bounds = array<i64: 1, 512>}, {transform_indices = @transform_6, window_bounds = array<i64: 4, 512>}]} {
    %c0 = arith.constant 0 : index
    %c0_0 = arith.constant 0 : index
    %0 = vector.load %arg1[%c0, %c0_0] : memref<4x512xbf16, #tpu.memory_space<vmem>>, vector<4x512xbf16>
    %1 = arith.extf %0 : vector<4x512xbf16> to vector<4x512xf32>
    %c0_1 = arith.constant 0 : index
    %c0_2 = arith.constant 0 : index
    %2 = vector.load %arg2[%c0_1, %c0_2] : memref<1x512xf32, #tpu.memory_space<vmem>>, vector<1x512xf32>
    %3 = vector.broadcast %2 : vector<1x512xf32> to vector<4x512xf32>
    %4 = arith.mulf %1, %3 : vector<4x512xf32>
    %c0_3 = arith.constant 0 : index
    %c0_4 = arith.constant 0 : index
    %5 = vector.load %arg3[%c0_3, %c0_4] : memref<1x512xf32, #tpu.memory_space<vmem>>, vector<1x512xf32>
    %6 = vector.broadcast %5 : vector<1x512xf32> to vector<4x512xf32>
    %7 = arith.addf %4, %6 : vector<4x512xf32>
    %c0_5 = arith.constant 0 : index
    %c0_6 = arith.constant 0 : index
    %8 = vector.load %arg4[%c0_5, %c0_6] : memref<4x512xbf16, #tpu.memory_space<vmem>>, vector<4x512xbf16>
    %9 = arith.extf %8 : vector<4x512xbf16> to vector<4x512xf32>
    %c0_7 = arith.constant 0 : index
    %c0_8 = arith.constant 0 : index
    %10 = vector.load %arg5[%c0_7, %c0_8] : memref<1x512xf32, #tpu.memory_space<vmem>>, vector<1x512xf32>
    %11 = vector.broadcast %10 : vector<1x512xf32> to vector<4x512xf32>
    %12 = arith.mulf %9, %11 : vector<4x512xf32>
    %c0_9 = arith.constant 0 : index
    %c0_10 = arith.constant 0 : index
    %13 = vector.load %arg6[%c0_9, %c0_10] : memref<1x512xf32, #tpu.memory_space<vmem>>, vector<1x512xf32>
    %14 = vector.broadcast %13 : vector<1x512xf32> to vector<4x512xf32>
    %15 = arith.addf %12, %14 : vector<4x512xf32>
    %16 = arith.addf %7, %15 : vector<4x512xf32>
    %cst = arith.constant 0.000000e+00 : f32
    %17 = vector.broadcast %cst : f32 to vector<4x512xf32>
    %18 = arith.maximumf %16, %17 : vector<4x512xf32>
    %19 = arith.truncf %18 : vector<4x512xf32> to vector<4x512xbf16>
    %c0_11 = arith.constant 0 : index
    %c0_12 = arith.constant 0 : index
    %20 = vector.load %arg7[%c0_11, %c0_12] : memref<4x512xbf16, #tpu.memory_space<vmem>>, vector<4x512xbf16>
    tpu.vector_store %arg7[%c0_11, %c0_12], %19 {strides = array<i32>} : memref<4x512xbf16, #tpu.memory_space<vmem>>, vector<4x512xbf16>,
    return
  }
  func.func @transform_0(%arg0: i32) -> (i32, i32) {
    %c0_i32 = arith.constant 0 : i32
    %c0_i32_0 = arith.constant 0 : i32
    return %arg0, %c0_i32 : i32, i32
  }
  func.func @transform_1(%arg0: i32) -> (i32, i32) {
    %c0_i32 = arith.constant 0 : i32
    %c0_i32_0 = arith.constant 0 : i32
    %c0_i32_1 = arith.constant 0 : i32
    return %c0_i32, %c0_i32_0 : i32, i32
  }
  func.func @transform_2(%arg0: i32) -> (i32, i32) {
    %c0_i32 = arith.constant 0 : i32
    %c0_i32_0 = arith.constant 0 : i32
    %c0_i32_1 = arith.constant 0 : i32
    return %c0_i32, %c0_i32_0 : i32, i32
  }
  func.func @transform_3(%arg0: i32) -> (i32, i32) {
    %c0_i32 = arith.constant 0 : i32
    %c0_i32_0 = arith.constant 0 : i32
    return %arg0, %c0_i32 : i32, i32
  }
  func.func @transform_4(%arg0: i32) -> (i32, i32) {
    %c0_i32 = arith.constant 0 : i32
    %c0_i32_0 = arith.constant 0 : i32
    %c0_i32_1 = arith.constant 0 : i32
    return %c0_i32, %c0_i32_0 : i32, i32
  }
  func.func @transform_5(%arg0: i32) -> (i32, i32) {
    %c0_i32 = arith.constant 0 : i32
    %c0_i32_0 = arith.constant 0 : i32
    %c0_i32_1 = arith.constant 0 : i32
    return %c0_i32, %c0_i32_0 : i32, i32
  }
  func.func @transform_6(%arg0: i32) -> (i32, i32) {
    %c0_i32 = arith.constant 0 : i32
    %c0_i32_0 = arith.constant 0 : i32
    return %arg0, %c0_i32 : i32, i32
  }
}

module attributes {stable_mosaic.version = 11 : i64} {
  func.func @_pool_fc_kernel(%arg0: i32, %arg1: memref<8x16x64xbf16, #tpu.memory_space<vmem>>, %arg2: memref<64x10xf32, #tpu.memory_space<vmem>>, %arg3: memref<1x10xf32, #tpu.memory_space<vmem>>, %arg4: memref<8x10xf32, #tpu.memory_space<vmem>>) attributes {dimension_semantics = [#tpu.dimension_semantics<parallel>], iteration_bounds = array<i64: 1>, scalar_prefetch = 0 : i64, scratch_operands = 0 : i64, tpu.core_type = #tpu.core_type<tc>, window_params = [{transform_indices = @transform_0, window_bounds = array<i64: 8, 16, 64>}, {pipeline_mode = #tpu.pipeline_mode<synchronous>, transform_indices = @transform_1, window_bounds = array<i64: 64, 10>}, {pipeline_mode = #tpu.pipeline_mode<synchronous>, transform_indices = @transform_2, window_bounds = array<i64: 1, 10>}, {transform_indices = @transform_3, window_bounds = array<i64: 8, 10>}]} {
    %c0 = arith.constant 0 : index
    %c0_0 = arith.constant 0 : index
    %c0_1 = arith.constant 0 : index
    %0 = vector.load %arg1[%c0, %c0_0, %c0_1] : memref<8x16x64xbf16, #tpu.memory_space<vmem>>, vector<8x16x64xbf16>
    %1 = arith.extf %0 : vector<8x16x64xbf16> to vector<8x16x64xf32>
    %cst = arith.constant dense<0.000000e+00> : vector<8x64xf32>
    %2 = vector.multi_reduction <add>, %1, %cst [1] : vector<8x16x64xf32> to vector<8x64xf32>
    %cst_2 = arith.constant 1.600000e+01 : f32
    %3 = vector.broadcast %cst_2 : f32 to vector<8x64xf32>
    %4 = arith.divf %2, %3 : vector<8x64xf32>
    %c0_3 = arith.constant 0 : index
    %c0_4 = arith.constant 0 : index
    %5 = vector.load %arg2[%c0_3, %c0_4] : memref<64x10xf32, #tpu.memory_space<vmem>>, vector<64x10xf32>
    %cst_5 = arith.constant dense<0.000000e+00> : vector<8x10xf32>
    %6 = tpu.matmul %4, %5, %cst_5 {dimension_numbers = #tpu.dot_dimension_numbers<[1], [0], [0], [1], [0, 0, 1, 1], [], []>} : vector<8x64xf32>, vector<64x10xf32>, vector<8x10xf32> -> vector<8x10xf32>
    %c0_6 = arith.constant 0 : index
    %c0_7 = arith.constant 0 : index
    %7 = vector.load %arg3[%c0_6, %c0_7] : memref<1x10xf32, #tpu.memory_space<vmem>>, vector<1x10xf32>
    %8 = vector.broadcast %7 : vector<1x10xf32> to vector<8x10xf32>
    %9 = arith.addf %6, %8 : vector<8x10xf32>
    %c0_8 = arith.constant 0 : index
    %c0_9 = arith.constant 0 : index
    %10 = vector.load %arg4[%c0_8, %c0_9] : memref<8x10xf32, #tpu.memory_space<vmem>>, vector<8x10xf32>
    tpu.vector_store %arg4[%c0_8, %c0_9], %9 {strides = array<i32>} : memref<8x10xf32, #tpu.memory_space<vmem>>, vector<8x10xf32>,
    return
  }
  func.func @transform_0(%arg0: i32) -> (i32, i32, i32) {
    %c0_i32 = arith.constant 0 : i32
    %c0_i32_0 = arith.constant 0 : i32
    %c0_i32_1 = arith.constant 0 : i32
    return %arg0, %c0_i32, %c0_i32_0 : i32, i32, i32
  }
  func.func @transform_1(%arg0: i32) -> (i32, i32) {
    %c0_i32 = arith.constant 0 : i32
    %c0_i32_0 = arith.constant 0 : i32
    %c0_i32_1 = arith.constant 0 : i32
    return %c0_i32, %c0_i32_0 : i32, i32
  }
  func.func @transform_2(%arg0: i32) -> (i32, i32) {
    %c0_i32 = arith.constant 0 : i32
    %c0_i32_0 = arith.constant 0 : i32
    %c0_i32_1 = arith.constant 0 : i32
    return %c0_i32, %c0_i32_0 : i32, i32
  }
  func.func @transform_3(%arg0: i32) -> (i32, i32) {
    %c0_i32 = arith.constant 0 : i32
    %c0_i32_0 = arith.constant 0 : i32
    return %arg0, %c0_i32 : i32, i32
  }
}

</mosaic_0001>

<bundles_post_ra>
// kernel: forward.18
= control target key start
LH: loop header
LB: loop body
LE: loop exit
PB: predicated region body
PF: predicated region fallthrough
CT: control target
= control target key end

     0   :  { %s222_s0 = inlined_call_operand.vmem [shape: bf16[64,128], index: 0, kind: input, shape index: {}]   ;;  %s223_s1 = inlined_call_operand.vmem [shape: f32[1,128], index: 1, kind: input, shape index: {}]   ;;  %s224_s2 = inlined_call_operand.vmem [shape: f32[1,128], index: 2, kind: input, shape index: {}]   ;;  %s225_s3 = inlined_call_operand.vmem [shape: bf16[64,128], index: 3, kind: output, shape index: {}]  }
   0x1   :  { %v131_v0 = vld [vmem:[%s222_s0] sm:$0xff]   ;;  %v166_v4 = vld [vmem:[%s222_s0 + $0x8] sm:$0xff]   ;;  %v167_v5 = vld [vmem:[%s222_s0 + $0x10] sm:$0xff]  }
   0x2   :  { %v112_v1 = vld [vmem:[%s223_s1] ss:$0 sm:$0xff]  ;;  %v132_v2 = vunpack.c.l.bf16 %v131_v0  ;;  %v133_v3 = vunpack.c.h.bf16 %v131_v0  ;;  %v168_v6 = vld [vmem:[%s222_s0 + $0x18] sm:$0xff]   ;;  %v136_v8 = vunpack.c.l.bf16 %v166_v4  ;;  %v137_v9 = vunpack.c.h.bf16 %v166_v4 }
   0x3   :  { %v113_v7 = vld [vmem:[%s224_s2] ss:$0 sm:$0xff]  ;;  %v140_v10 = vunpack.c.l.bf16 %v167_v5  ;;  %v141_v11 = vunpack.c.h.bf16 %v167_v5  ;;  %v144_v14 = vunpack.c.l.bf16 %v168_v6  ;;  %v145_v15 = vunpack.c.h.bf16 %v168_v6 }
   0x4   :  { %v37_v12 = vmul.f32 %v132_v2, %v112_v1  ;;  %v38_v13 = vmul.f32 %v133_v3, %v112_v1  ;;  %v39_v16 = vmul.f32 %v136_v8, %v112_v1  ;;  %v40_v17 = vmul.f32 %v137_v9, %v112_v1 }
   0x5   :  { %v41_v18 = vmul.f32 %v140_v10, %v112_v1  ;;  %v42_v19 = vmul.f32 %v141_v11, %v112_v1  ;;  %v43_v22 = vmul.f32 %v144_v14, %v112_v1  ;;  %v44_v23 = vmul.f32 %v145_v15, %v112_v1 }
   0x6   :  { %v52_v20 = vadd.f32 %v113_v7, %v37_v12  ;;  %v53_v21 = vadd.f32 %v113_v7, %v38_v13  ;;  %v54_v24 = vadd.f32 %v113_v7, %v39_v16  ;;  %v55_v25 = vadd.f32 %v113_v7, %v40_v17 }
   0x7   :  { %v56_v26 = vadd.f32 %v113_v7, %v41_v18  ;;  %v57_v27 = vadd.f32 %v113_v7, %v42_v19  ;;  %v58_v30 = vadd.f32 %v113_v7, %v43_v22  ;;  %v59_v31 = vadd.f32 %v113_v7, %v44_v23 }
   0x8   :  { %v60_v28 = vmax.f32 %v52_v20, 0.0  ;;  %v61_v29 = vmax.f32 %v53_v21, 0.0  ;;  %v62_v32 = vmax.f32 %v54_v24, 0.0  ;;  %v63_v33 = vmax.f32 %v55_v25, 0.0 }
   0x9   :  { %v64_v34 = vmax.f32 %v56_v26, 0.0  ;;  %v65_v35 = vmax.f32 %v57_v27, 0.0  ;;  %v66_v37 = vmax.f32 %v58_v30, 0.0  ;;  %v67_v38 = vmax.f32 %v59_v31, 0.0 }
   0xa   :  { %v149_v36 = vpack.c.bf16 %v61_v29, %v60_v28  ;;  %v154_v39 = vpack.c.bf16 %v63_v33, %v62_v32 }
   0xb   :  { %v159_v40 = vpack.c.bf16 %v65_v35, %v64_v34  ;;  %v164_v41 = vpack.c.bf16 %v67_v38, %v66_v37 }
   0xc   :  { %150 = vst [vmem:[%s225_s3] sm:$0xff] %v149_v36   ;;  %169 = vst [vmem:[%s225_s3 + $0x8] sm:$0xff] %v154_v39  }
   0xd   :  { %170 = vst [vmem:[%s225_s3 + $0x10] sm:$0xff] %v159_v40   ;;  %171 = vst [vmem:[%s225_s3 + $0x18] sm:$0xff] %v164_v41  }

// kernel: forward.17
= control target key start
LH: loop header
LB: loop body
LE: loop exit
PB: predicated region body
PF: predicated region fallthrough
CT: control target
= control target key end

     0   :  { %vm351_vm0 = vcmask 1044480   ;;  %vm352_vm1 = vcmask 1045504   ;;  %vm254_vm2 = vcmask 220160   ;;  %v1661_v1 = vmov 65535   ;;  %s2452_s1 = inlined_call_operand.vmem [shape: bf16[27,16], index: 1, kind: input, shape index: {}]   ;;  %s2453_s0 = inlined_call_operand.vmem [shape: bf16[512,27], index: 0, kind: input, shape index: {}]   ;;  %s2454_s3 = inlined_call_operand.vmem [shape: f32[1,16], index: 3, kind: output, shape index: {1}]   ;;  %s2455_s4 = inlined_call_operand.vmem [shape: f32[1,16], index: 4, kind: output, shape index: {2}]   ;;  %s2456_s2 = inlined_call_operand.vmem [shape: bf16[512,16], index: 2, kind: output, shape index: {0}]  }
   0x1   :  { %v1627_v0 = vld [vmem:[%s2452_s1] sm:$0xff]   ;;  %v353_v2 = vsel %vm351_vm0, 4294967295, %v1661_v1  ;;  %v1628_v3 = vld [vmem:[%s2452_s1 + $0x8] sm:$0x3f]   ;;  %v1631_v8 = vld [vmem:[%s2453_s0 + $0x10] sm:$0xff]   ;;  %vm972_vm3 = vcmask 122880  }
   0x2   :  { %1553 = vmatprep.subr.bf16.mxu0 %v1627_v0  ;;  %v354_v4 = vsel %vm352_vm1, %v353_v2, 0  ;;  %v1629_v5 = vld [vmem:[%s2453_s0] sm:$0xff]   ;;  %1621 = vmatprep.subr.bf16.mxu1 %v1627_v0  ;;  %v1630_v7 = vld [vmem:[%s2453_s0 + $0x8] sm:$0xff]   ;;  %v1632_v9 = vld [vmem:[%s2453_s0 + $0x18] sm:$0xff]   ;;  %v1662_v38 = vmov 0.0   ;;  %vm903_vm4 = vcmask 125952  }
   0x3   :  { %1554 = vmatpush3.bf16.msra.mxu0 %v1627_v0  ;;  %v356_v6 = vand.u32 %v1628_v3, %v354_v4  ;;  %1623 = vmatpush3.bf16.msra.mxu1 %v1627_v0  ;;  %v1633_v10 = vld [vmem:[%s2453_s0 + $0x20] sm:$0xff]   ;;  %v1646_v12 = vld [vmem:[%s2453_s0 + $0x88] sm:$0xff]   ;;  %v1647_v13 = vld [vmem:[%s2453_s0 + $0x90] sm:$0xff]   ;;  %973 = vst.msk [vmem:[%s2454_s3] sm:$0x1] %vm972_vm3, %v1662_v38  ;;  %vm976_vm5 = vcmask 130048  }
   0x4   :  { %1557 = vmatprep.mubr.msk.bf16.mxu0 %vm254_vm2, %v1629_v5  ;;  %v1645_v11 = vld [vmem:[%s2453_s0 + $0x80] sm:$0xff]   ;;  %v1634_v14 = vld [vmem:[%s2453_s0 + $0x28] sm:$0xff]   ;;  %v1635_v15 = vld [vmem:[%s2453_s0 + $0x30] sm:$0xff]   ;;  %974 = vst.msk [vmem:[%s2455_s4] sm:$0x1] %vm972_vm3, %v1662_v38 }
   0x5   :  { %1555 = vmatprep.subr.bf16.mxu0 %v356_v6  ;;  %1622 = vmatprep.subr.bf16.mxu1 %v356_v6  ;;  %v1648_v16 = vld [vmem:[%s2453_s0 + $0x98] sm:$0xff]   ;;  %v1649_v17 = vld [vmem:[%s2453_s0 + $0xa0] sm:$0xff]   ;;  %v1650_v20 = vld [vmem:[%s2453_s0 + $0xa8] sm:$0xff]  }
   0x6   :  { %1589 = vmatprep.mubr.msk.bf16.mxu1 %vm254_vm2, %v1645_v11  ;;  %v1636_v18 = vld [vmem:[%s2453_s0 + $0x38] sm:$0xff]   ;;  %v1637_v19 = vld [vmem:[%s2453_s0 + $0x40] sm:$0xff]   ;;  %v1651_v21 = vld [vmem:[%s2453_s0 + $0xb0] sm:$0xff]  }
   0x7   :  { %1556 = vmatpush3.bf16.msra.mxu0 %v356_v6  ;;  %1624 = vmatpush3.bf16.msra.mxu1 %v356_v6  ;;  %v1638_v22 = vld [vmem:[%s2453_s0 + $0x48] sm:$0xff]   ;;  %v1639_v23 = vld [vmem:[%s2453_s0 + $0x50] sm:$0xff]   ;;  %v1652_v24 = vld [vmem:[%s2453_s0 + $0xb8] sm:$0xff]  }
   0x8   :  { %v1653_v25 = vld [vmem:[%s2453_s0 + $0xc0] sm:$0xff]   ;;  %v1640_v26 = vld [vmem:[%s2453_s0 + $0x58] sm:$0xff]   ;;  %v1654_v28 = vld [vmem:[%s2453_s0 + $0xc8] sm:$0xff]  }
   0x9   :  { %v1641_v27 = vld [vmem:[%s2453_s0 + $0x60] sm:$0xff]   ;;  %v1655_v29 = vld [vmem:[%s2453_s0 + $0xd0] sm:$0xff]   ;;  %v1642_v30 = vld [vmem:[%s2453_s0 + $0x68] sm:$0xff]  }
   0xa   :  { %1558 = vmatmul.mubr.msk.bf16.vlgmr.msra.gmra.mrb[0].mxu0 %vm254_vm2, %v1630_v7  ;;  %1590 = vmatmul.mubr.msk.bf16.vlgmr.msra.gmra.mrb[0].mxu1 %vm254_vm2, %v1646_v12  ;;  %v1643_v31 = vld [vmem:[%s2453_s0 + $0x70] sm:$0xff]   ;;  %v1656_v32 = vld [vmem:[%s2453_s0 + $0xd8] sm:$0xff]   ;;  %v1657_v33 = vld [vmem:[%s2453_s0 + $0xe0] sm:$0xff]  }
   0xb   :  { %1561 = vmatprep.mubr.msk.bf16.mxu0 %vm254_vm2, %v1631_v8  ;;  %1593 = vmatprep.mubr.msk.bf16.mxu1 %vm254_vm2, %v1647_v13  ;;  %v1644_v34 = vld [vmem:[%s2453_s0 + $0x78] sm:$0xff]   ;;  %v1658_v35 = vld [vmem:[%s2453_s0 + $0xe8] sm:$0xff]   ;;  %v1659_v36 = vld [vmem:[%s2453_s0 + $0xf0] sm:$0xff]  }
   0xc   :  { %v1660_v37 = vld [vmem:[%s2453_s0 + $0xf8] sm:$0xff]  }
  0x12   :  { %1562 = vmatmul.mubr.msk.bf16.gmra.mrb[4].mxu0 %vm254_vm2, %v1632_v9  ;;  %1594 = vmatmul.mubr.msk.bf16.gmra.mrb[4].mxu1 %vm254_vm2, %v1648_v16 }
  0x13   :  { %1565 = vmatprep.mubr.msk.bf16.mxu0 %vm254_vm2, %v1633_v10  ;;  %1597 = vmatprep.mubr.msk.bf16.mxu1 %vm254_vm2, %v1649_v17 }
  0x1a   :  { %1566 = vmatmul.mubr.msk.bf16.gmra.mrb[8].mxu0 %vm254_vm2, %v1634_v14  ;;  %1598 = vmatmul.mubr.msk.bf16.gmra.mrb[8].mxu1 %vm254_vm2, %v1650_v20 }
  0x1b   :  { %1569 = vmatprep.mubr.msk.bf16.mxu0 %vm254_vm2, %v1635_v15  ;;  %1601 = vmatprep.mubr.msk.bf16.mxu1 %vm254_vm2, %v1651_v21 }
  0x22   :  { %1570 = vmatmul.mubr.msk.bf16.gmra.mrb[12].mxu0 %vm254_vm2, %v1636_v18  ;;  %1602 = vmatmul.mubr.msk.bf16.gmra.mrb[12].mxu1 %vm254_vm2, %v1652_v24 }
  0x23   :  { %1573 = vmatprep.mubr.msk.bf16.mxu0 %vm254_vm2, %v1637_v19  ;;  %1605 = vmatprep.mubr.msk.bf16.mxu1 %vm254_vm2, %v1653_v25 }
  0x2a   :  { %1574 = vmatmul.mubr.msk.bf16.gmra.mrb[16].mxu0 %vm254_vm2, %v1638_v22  ;;  %1606 = vmatmul.mubr.msk.bf16.gmra.mrb[16].mxu1 %vm254_vm2, %v1654_v28 }
  0x2b   :  { %1577 = vmatprep.mubr.msk.bf16.mxu0 %vm254_vm2, %v1639_v23  ;;  %1609 = vmatprep.mubr.msk.bf16.mxu1 %vm254_vm2, %v1655_v29 }
  0x32   :  { %1578 = vmatmul.mubr.msk.bf16.gmra.mrb[20].mxu0 %vm254_vm2, %v1640_v26  ;;  %1610 = vmatmul.mubr.msk.bf16.gmra.mrb[20].mxu1 %vm254_vm2, %v1656_v32 }
  0x33   :  { %1581 = vmatprep.mubr.msk.bf16.mxu0 %vm254_vm2, %v1641_v27  ;;  %1613 = vmatprep.mubr.msk.bf16.mxu1 %vm254_vm2, %v1657_v33 }
  0x3a   :  { %1582 = vmatmul.mubr.msk.bf16.gmra.mrb[24].mxu0 %vm254_vm2, %v1642_v30  ;;  %1614 = vmatmul.mubr.msk.bf16.gmra.mrb[24].mxu1 %vm254_vm2, %v1658_v35 }
  0x3b   :  { %1585 = vmatprep.mubr.msk.bf16.mxu0 %vm254_vm2, %v1643_v31  ;;  %1617 = vmatprep.mubr.msk.bf16.mxu1 %vm254_vm2, %v1659_v36 }
  0x42   :  { %1586 = vmatmul.mubr.msk.bf16.gmra.mrb[28].mxu0 %vm254_vm2, %v1644_v34  ;;  %1618 = vmatmul.mubr.msk.bf16.gmra.mrb[28].mxu1 %vm254_vm2, %v1660_v37 }
  0xdd   :  { %v1559_v39 = vpop.f32.mrb[0].mxu0  ;;  %v1859_v10 = vpop.f32.mrb[0].mxu1 }
  0xde   :  { %v1457_v40 = vpack.c.bf16 %v1559_v39, %v1559_v39  ;;  %v392_v41 = vpop.f32.mrb[1].mxu0  ;;  %v1116_v45 = vmul.f32 %v1559_v39, %v1559_v39  ;;  %v980_v54 = vsel %vm976_vm5, %v1559_v39, 0.0  ;;  %v1866_v15 = vpop.f32.mrb[1].mxu1  ;;  %v1489_v19 = vpack.c.bf16 %v1859_v10, %v1859_v10 }
  0xdf   :  { %v1455_v42 = vpack.c.bf16 %v392_v41, %v392_v41  ;;  %v1114_v43 = vmul.f32 %v392_v41, %v392_v41  ;;  %v1560_v44 = vpop.f32.mrb[2].mxu0  ;;  %v977_v48 = vsel %vm976_vm5, %v392_v41, 0.0  ;;  %v1875_v20 = vpop.f32.mrb[2].mxu1  ;;  %v1487_v26 = vpack.c.bf16 %v1866_v15, %v1866_v15 }
  0xe0   :  { %906 = vst.msk [vmem:[%s2456_s2 + $0x8] sm:$0xf] %vm903_vm4, %v1457_v40  ;;  %v1458_v46 = vpack.c.bf16 %v1560_v44, %v1560_v44  ;;  %v395_v47 = vpop.f32.mrb[3].mxu0  ;;  %v1117_v52 = vmul.f32 %v1560_v44, %v1560_v44  ;;  %v1181_v59 = vsel %vm976_vm5, %v1116_v45, 0.0  ;;  %v982_v61 = vsel %vm976_vm5, %v1560_v44, 0.0  ;;  %v1881_v22 = vpop.f32.mrb[3].mxu1 }
  0xe1   :  { %904 = vst.msk [vmem:[%s2456_s2] sm:$0xf] %vm903_vm4, %v1455_v42  ;;  %v1456_v49 = vpack.c.bf16 %v395_v47, %v395_v47  ;;  %v978_v50 = vsel %vm976_vm5, %v395_v47, 0.0  ;;  %v1115_v51 = vmul.f32 %v395_v47, %v395_v47  ;;  %v1178_v55 = vsel %vm976_vm5, %v1114_v43, 0.0  ;;  %938 = vst.msk [vmem:[%s2456_s2 + $0x88] sm:$0xf] %vm903_vm4, %v1489_v19 }
  0xe2   :  { %907 = vst.msk [vmem:[%s2456_s2 + $0xc] sm:$0xf] %vm903_vm4, %v1458_v46  ;;  %v979_v53 = vadd.f32 %v978_v50, %v977_v48  ;;  %v1183_v62 = vsel %vm976_vm5, %v1117_v52, 0.0  ;;  %v1490_v30 = vpack.c.bf16 %v1875_v20, %v1875_v20  ;;  %936 = vst.msk [vmem:[%s2456_s2 + $0x80] sm:$0xf] %vm903_vm4, %v1487_v26 }
  0xe3   :  { %905 = vst.msk [vmem:[%s2456_s2 + $0x4] sm:$0xf] %vm903_vm4, %v1456_v49  ;;  %v1179_v56 = vsel %vm976_vm5, %v1115_v51, 0.0 }
  0xe4   :  { %v981_v57 = vadd.f32 %v980_v54, %v979_v53  ;;  %v1180_v58 = vadd.f32 %v1179_v56, %v1178_v55  ;;  %939 = vst.msk [vmem:[%s2456_s2 + $0x8c] sm:$0xf] %vm903_vm4, %v1490_v30 }
  0xe5   :  { %v1563_v60 = vpop.f32.mrb[4].mxu0  ;;  %v1909_v44 = vpop.f32.mrb[4].mxu1 }
  0xe6   :  { %v1182_v63 = vadd.f32 %v1181_v59, %v1180_v58  ;;  %v1461_v0 = vpack.c.bf16 %v1563_v60, %v1563_v60  ;;  %v408_v1 = vpop.f32.mrb[5].mxu0  ;;  %v983_v3 = vadd.f32 %v982_v61, %v981_v57  ;;  %v1120_v11 = vmul.f32 %v1563_v60, %v1563_v60  ;;  %v1915_v48 = vpop.f32.mrb[5].mxu1 }
  0xe7   :  { %v1459_v2 = vpack.c.bf16 %v408_v1, %v408_v1  ;;  %v984_v4 = vsel %vm976_vm5, %v408_v1, 0.0  ;;  %v1118_v5 = vmul.f32 %v408_v1, %v408_v1  ;;  %v1564_v6 = vpop.f32.mrb[6].mxu0  ;;  %v988_v23 = vsel %vm976_vm5, %v1563_v60, 0.0  ;;  %v1923_v53 = vpop.f32.mrb[6].mxu1 }
  0xe8   :  { %910 = vst.msk [vmem:[%s2456_s2 + $0x18] sm:$0xf] %vm903_vm4, %v1461_v0  ;;  %v1184_v7 = vadd.f32 %v1183_v62, %v1182_v63  ;;  %v1462_v8 = vpack.c.bf16 %v1564_v6, %v1564_v6  ;;  %v411_v9 = vpop.f32.mrb[7].mxu0  ;;  %v985_v12 = vadd.f32 %v984_v4, %v983_v3  ;;  %v1121_v24 = vmul.f32 %v1564_v6, %v1564_v6  ;;  %v1929_v56 = vpop.f32.mrb[7].mxu1 }
  0xe9   :  { %908 = vst.msk [vmem:[%s2456_s2 + $0x10] sm:$0xf] %vm903_vm4, %v1459_v2  ;;  %v1185_v13 = vsel %vm976_vm5, %v1118_v5, 0.0  ;;  %v1460_v14 = vpack.c.bf16 %v411_v9, %v411_v9  ;;  %v986_v17 = vsel %vm976_vm5, %v411_v9, 0.0  ;;  %v1119_v18 = vmul.f32 %v411_v9, %v411_v9 }
  0xea   :  { %v1186_v16 = vadd.f32 %v1185_v13, %v1184_v7  ;;  %911 = vst.msk [vmem:[%s2456_s2 + $0x1c] sm:$0xf] %vm903_vm4, %v1462_v8  ;;  %v987_v21 = vadd.f32 %v986_v17, %v985_v12  ;;  %v1189_v31 = vsel %vm976_vm5, %v1120_v11, 0.0  ;;  %v990_v32 = vsel %vm976_vm5, %v1564_v6, 0.0 }
  0xeb   :  { %909 = vst.msk [vmem:[%s2456_s2 + $0x14] sm:$0xf] %vm903_vm4, %v1460_v14  ;;  %v1187_v25 = vsel %vm976_vm5, %v1119_v18, 0.0  ;;  %v1191_v40 = vsel %vm976_vm5, %v1121_v24, 0.0  ;;  %v1488_v60 = vpack.c.bf16 %v1881_v22, %v1881_v22  ;;  %v1493_v0 = vpack.c.bf16 %v1909_v44, %v1909_v44 }
  0xec   :  { %v989_v27 = vadd.f32 %v988_v23, %v987_v21  ;;  %v1188_v28 = vadd.f32 %v1187_v25, %v1186_v16 }
  0xed   :  { %v1567_v29 = vpop.f32.mrb[8].mxu0  ;;  %937 = vst.msk [vmem:[%s2456_s2 + $0x84] sm:$0xf] %vm903_vm4, %v1488_v60  ;;  %942 = vst.msk [vmem:[%s2456_s2 + $0x98] sm:$0xf] %vm903_vm4, %v1493_v0  ;;  %v1953_v16 = vpop.f32.mrb[8].mxu1 }
  0xee   :  { %v1465_v33 = vpack.c.bf16 %v1567_v29, %v1567_v29  ;;  %v424_v34 = vpop.f32.mrb[9].mxu0  ;;  %v1190_v35 = vadd.f32 %v1189_v31, %v1188_v28  ;;  %v991_v37 = vadd.f32 %v990_v32, %v989_v27  ;;  %v1124_v49 = vmul.f32 %v1567_v29, %v1567_v29  ;;  %v1959_v21 = vpop.f32.mrb[9].mxu1 }
  0xef   :  { %v1463_v36 = vpack.c.bf16 %v424_v34, %v424_v34  ;;  %v992_v38 = vsel %vm976_vm5, %v424_v34, 0.0  ;;  %v1568_v39 = vpop.f32.mrb[10].mxu0  ;;  %v1122_v41 = vmul.f32 %v424_v34, %v424_v34  ;;  %v996_v57 = vsel %vm976_vm5, %v1567_v29, 0.0  ;;  %v1967_v27 = vpop.f32.mrb[10].mxu1 }
  0xf0   :  { %914 = vst.msk [vmem:[%s2456_s2 + $0x28] sm:$0xf] %vm903_vm4, %v1465_v33  ;;  %v1466_v42 = vpack.c.bf16 %v1568_v39, %v1568_v39  ;;  %v427_v43 = vpop.f32.mrb[11].mxu0  ;;  %v993_v45 = vadd.f32 %v992_v38, %v991_v37  ;;  %v1192_v46 = vadd.f32 %v1191_v40, %v1190_v35  ;;  %v1125_v58 = vmul.f32 %v1568_v39, %v1568_v39  ;;  %v1973_v30 = vpop.f32.mrb[11].mxu1 }
  0xf1   :  { %912 = vst.msk [vmem:[%s2456_s2 + $0x20] sm:$0xf] %vm903_vm4, %v1463_v36  ;;  %v1464_v47 = vpack.c.bf16 %v427_v43, %v427_v43  ;;  %v1193_v50 = vsel %vm976_vm5, %v1122_v41, 0.0  ;;  %v994_v51 = vsel %vm976_vm5, %v427_v43, 0.0  ;;  %v1123_v52 = vmul.f32 %v427_v43, %v427_v43 }
  0xf2   :  { %915 = vst.msk [vmem:[%s2456_s2 + $0x2c] sm:$0xf] %vm903_vm4, %v1466_v42  ;;  %v1194_v54 = vadd.f32 %v1193_v50, %v1192_v46  ;;  %v995_v55 = vadd.f32 %v994_v51, %v993_v45  ;;  %v1197_v1 = vsel %vm976_vm5, %v1124_v49, 0.0  ;;  %v998_v2 = vsel %vm976_vm5, %v1568_v39, 0.0 }
  0xf3   :  { %913 = vst.msk [vmem:[%s2456_s2 + $0x24] sm:$0xf] %vm903_vm4, %v1464_v47  ;;  %v1195_v59 = vsel %vm976_vm5, %v1123_v52, 0.0  ;;  %v1199_v11 = vsel %vm976_vm5, %v1125_v58, 0.0  ;;  %v1491_v34 = vpack.c.bf16 %v1915_v48, %v1915_v48  ;;  %v1494_v38 = vpack.c.bf16 %v1923_v53, %v1923_v53 }
  0xf4   :  { %v997_v61 = vadd.f32 %v996_v57, %v995_v55  ;;  %v1196_v62 = vadd.f32 %v1195_v59, %v1194_v54 }
  0xf5   :  { %v1571_v63 = vpop.f32.mrb[12].mxu0  ;;  %940 = vst.msk [vmem:[%s2456_s2 + $0x90] sm:$0xf] %vm903_vm4, %v1491_v34  ;;  %943 = vst.msk [vmem:[%s2456_s2 + $0x9c] sm:$0xf] %vm903_vm4, %v1494_v38  ;;  %v1997_v55 = vpop.f32.mrb[12].mxu1 }
  0xf6   :  { %v1469_v3 = vpack.c.bf16 %v1571_v63, %v1571_v63  ;;  %v440_v4 = vpop.f32.mrb[13].mxu0  ;;  %v1198_v5 = vadd.f32 %v1197_v1, %v1196_v62  ;;  %v999_v7 = vadd.f32 %v998_v2, %v997_v61  ;;  %v1128_v23 = vmul.f32 %v1571_v63, %v1571_v63  ;;  %v2003_v60 = vpop.f32.mrb[13].mxu1 }
  0xf7   :  { %v1467_v6 = vpack.c.bf16 %v440_v4, %v440_v4  ;;  %v1000_v8 = vsel %vm976_vm5, %v440_v4, 0.0  ;;  %v1572_v9 = vpop.f32.mrb[14].mxu0  ;;  %v1126_v12 = vmul.f32 %v440_v4, %v440_v4  ;;  %v1004_v31 = vsel %vm976_vm5, %v1571_v63, 0.0  ;;  %v2011_v1 = vpop.f32.mrb[14].mxu1 }
  0xf8   :  { %918 = vst.msk [vmem:[%s2456_s2 + $0x38] sm:$0xf] %vm903_vm4, %v1469_v3  ;;  %v1470_v13 = vpack.c.bf16 %v1572_v9, %v1572_v9  ;;  %v443_v14 = vpop.f32.mrb[15].mxu0  ;;  %v1001_v17 = vadd.f32 %v1000_v8, %v999_v7  ;;  %v1200_v18 = vadd.f32 %v1199_v11, %v1198_v5  ;;  %v1129_v32 = vmul.f32 %v1572_v9, %v1572_v9  ;;  %v2017_v4 = vpop.f32.mrb[15].mxu1 }
  0xf9   :  { %916 = vst.msk [vmem:[%s2456_s2 + $0x30] sm:$0xf] %vm903_vm4, %v1467_v6  ;;  %v1468_v19 = vpack.c.bf16 %v443_v14, %v443_v14  ;;  %v1201_v24 = vsel %vm976_vm5, %v1126_v12, 0.0  ;;  %v1002_v25 = vsel %vm976_vm5, %v443_v14, 0.0  ;;  %v1127_v26 = vmul.f32 %v443_v14, %v443_v14 }
  0xfa   :  { %919 = vst.msk [vmem:[%s2456_s2 + $0x3c] sm:$0xf] %vm903_vm4, %v1470_v13  ;;  %v1202_v28 = vadd.f32 %v1201_v24, %v1200_v18  ;;  %v1003_v29 = vadd.f32 %v1002_v25, %v1001_v17  ;;  %v1205_v39 = vsel %vm976_vm5, %v1128_v23, 0.0  ;;  %v1006_v40 = vsel %vm976_vm5, %v1572_v9, 0.0 }
  0xfb   :  { %917 = vst.msk [vmem:[%s2456_s2 + $0x34] sm:$0xf] %vm903_vm4, %v1468_v19  ;;  %v1203_v33 = vsel %vm976_vm5, %v1127_v26, 0.0  ;;  %v1207_v50 = vsel %vm976_vm5, %v1129_v32, 0.0  ;;  %v1492_v8 = vpack.c.bf16 %v1929_v56, %v1929_v56  ;;  %v1497_v13 = vpack.c.bf16 %v1953_v16, %v1953_v16 }
  0xfc   :  { %v1005_v35 = vadd.f32 %v1004_v31, %v1003_v29  ;;  %v1204_v36 = vadd.f32 %v1203_v33, %v1202_v28 }
  0xfd   :  { %v1575_v37 = vpop.f32.mrb[16].mxu0  ;;  %941 = vst.msk [vmem:[%s2456_s2 + $0x94] sm:$0xf] %vm903_vm4, %v1492_v8  ;;  %946 = vst.msk [vmem:[%s2456_s2 + $0xa8] sm:$0xf] %vm903_vm4, %v1497_v13  ;;  %v2041_v34 = vpop.f32.mrb[16].mxu1 }
  0xfe   :  { %v1473_v41 = vpack.c.bf16 %v1575_v37, %v1575_v37  ;;  %v456_v42 = vpop.f32.mrb[17].mxu0  ;;  %v1206_v43 = vadd.f32 %v1205_v39, %v1204_v36  ;;  %v1007_v46 = vadd.f32 %v1006_v40, %v1005_v35  ;;  %v1132_v61 = vmul.f32 %v1575_v37, %v1575_v37  ;;  %v2047_v38 = vpop.f32.mrb[17].mxu1 }
  0xff   :  { %v1471_v45 = vpack.c.bf16 %v456_v42, %v456_v42  ;;  %v1008_v47 = vsel %vm976_vm5, %v456_v42, 0.0  ;;  %v1576_v49 = vpop.f32.mrb[18].mxu0  ;;  %v1130_v51 = vmul.f32 %v456_v42, %v456_v42  ;;  %v1012_v5 = vsel %vm976_vm5, %v1575_v37, 0.0 }
 0x100   :  { %922 = vst.msk [vmem:[%s2456_s2 + $0x48] sm:$0xf] %vm903_vm4, %v1473_v41  ;;  %v1474_v52 = vpack.c.bf16 %v1576_v49, %v1576_v49  ;;  %v459_v54 = vpop.f32.mrb[19].mxu0  ;;  %v1009_v57 = vadd.f32 %v1008_v47, %v1007_v46  ;;  %v1208_v58 = vadd.f32 %v1207_v50, %v1206_v43  ;;  %v1133_v6 = vmul.f32 %v1576_v49, %v1576_v49  ;;  %v2055_v43 = vpop.f32.mrb[18].mxu1 }
 0x101   :  { %920 = vst.msk [vmem:[%s2456_s2 + $0x40] sm:$0xf] %vm903_vm4, %v1471_v45  ;;  %v1472_v59 = vpack.c.bf16 %v459_v54, %v459_v54  ;;  %v1209_v62 = vsel %vm976_vm5, %v1130_v51, 0.0  ;;  %v1010_v63 = vsel %vm976_vm5, %v459_v54, 0.0  ;;  %v1131_v0 = vmul.f32 %v459_v54, %v459_v54  ;;  %v2061_v47 = vpop.f32.mrb[19].mxu1 }
 0x102   :  { %923 = vst.msk [vmem:[%s2456_s2 + $0x4c] sm:$0xf] %vm903_vm4, %v1474_v52  ;;  %v1210_v2 = vadd.f32 %v1209_v62, %v1208_v58  ;;  %v1011_v3 = vadd.f32 %v1010_v63, %v1009_v57  ;;  %v1213_v14 = vsel %vm976_vm5, %v1132_v61, 0.0  ;;  %v1014_v17 = vsel %vm976_vm5, %v1576_v49, 0.0 }
 0x103   :  { %921 = vst.msk [vmem:[%s2456_s2 + $0x44] sm:$0xf] %vm903_vm4, %v1472_v59  ;;  %v1211_v7 = vsel %vm976_vm5, %v1131_v0, 0.0  ;;  %v1215_v29 = vsel %vm976_vm5, %v1133_v6, 0.0  ;;  %v1495_v52 = vpack.c.bf16 %v1959_v21, %v1959_v21  ;;  %v1498_v59 = vpack.c.bf16 %v1967_v27, %v1967_v27 }
 0x104   :  { %v1013_v9 = vadd.f32 %v1012_v5, %v1011_v3  ;;  %v1212_v11 = vadd.f32 %v1211_v7, %v1210_v2 }
 0x105   :  { %v1579_v12 = vpop.f32.mrb[20].mxu0  ;;  %944 = vst.msk [vmem:[%s2456_s2 + $0xa0] sm:$0xf] %vm903_vm4, %v1495_v52  ;;  %947 = vst.msk [vmem:[%s2456_s2 + $0xac] sm:$0xf] %vm903_vm4, %v1498_v59  ;;  %v2085_v13 = vpop.f32.mrb[20].mxu1 }
 0x106   :  { %v1477_v18 = vpack.c.bf16 %v1579_v12, %v1579_v12  ;;  %v472_v19 = vpop.f32.mrb[21].mxu0  ;;  %v1214_v23 = vadd.f32 %v1213_v14, %v1212_v11  ;;  %v1015_v25 = vadd.f32 %v1014_v17, %v1013_v9  ;;  %v1136_v39 = vmul.f32 %v1579_v12, %v1579_v12 }
 0x107   :  { %v1475_v24 = vpack.c.bf16 %v472_v19, %v472_v19  ;;  %v1016_v26 = vsel %vm976_vm5, %v472_v19, 0.0  ;;  %v1580_v28 = vpop.f32.mrb[22].mxu0  ;;  %v1134_v31 = vmul.f32 %v472_v19, %v472_v19  ;;  %v1020_v49 = vsel %vm976_vm5, %v1579_v12, 0.0  ;;  %v2091_v19 = vpop.f32.mrb[21].mxu1 }
 0x108   :  { %926 = vst.msk [vmem:[%s2456_s2 + $0x58] sm:$0xf] %vm903_vm4, %v1477_v18  ;;  %v1478_v32 = vpack.c.bf16 %v1580_v28, %v1580_v28  ;;  %v475_v33 = vpop.f32.mrb[23].mxu0  ;;  %v1017_v35 = vadd.f32 %v1016_v26, %v1015_v25  ;;  %v1216_v36 = vadd.f32 %v1215_v29, %v1214_v23  ;;  %v1137_v50 = vmul.f32 %v1580_v28, %v1580_v28 }
 0x109   :  { %924 = vst.msk [vmem:[%s2456_s2 + $0x50] sm:$0xf] %vm903_vm4, %v1475_v24  ;;  %v1476_v37 = vpack.c.bf16 %v475_v33, %v475_v33  ;;  %v1217_v40 = vsel %vm976_vm5, %v1134_v31, 0.0  ;;  %v1018_v41 = vsel %vm976_vm5, %v475_v33, 0.0  ;;  %v1135_v42 = vmul.f32 %v475_v33, %v475_v33 }
 0x10a   :  { %927 = vst.msk [vmem:[%s2456_s2 + $0x5c] sm:$0xf] %vm903_vm4, %v1478_v32  ;;  %v1218_v45 = vadd.f32 %v1217_v40, %v1216_v36  ;;  %v1019_v46 = vadd.f32 %v1018_v41, %v1017_v35  ;;  %v1221_v61 = vsel %vm976_vm5, %v1136_v39, 0.0  ;;  %v1022_v62 = vsel %vm976_vm5, %v1580_v28, 0.0  ;;  %v2099_v28 = vpop.f32.mrb[22].mxu1 }
 0x10b   :  { %925 = vst.msk [vmem:[%s2456_s2 + $0x54] sm:$0xf] %vm903_vm4, %v1476_v37  ;;  %v1219_v51 = vsel %vm976_vm5, %v1135_v42, 0.0  ;;  %v1223_v8 = vsel %vm976_vm5, %v1137_v50, 0.0  ;;  %v2105_v32 = vpop.f32.mrb[23].mxu1  ;;  %v1496_v37 = vpack.c.bf16 %v1973_v30, %v1973_v30  ;;  %v1501_v42 = vpack.c.bf16 %v1997_v55, %v1997_v55 }
 0x10c   :  { %v1021_v54 = vadd.f32 %v1020_v49, %v1019_v46  ;;  %v1220_v57 = vadd.f32 %v1219_v51, %v1218_v45 }
 0x10d   :  { %v1583_v58 = vpop.f32.mrb[24].mxu0  ;;  %945 = vst.msk [vmem:[%s2456_s2 + $0xa4] sm:$0xf] %vm903_vm4, %v1496_v37  ;;  %950 = vst.msk [vmem:[%s2456_s2 + $0xb8] sm:$0xf] %vm903_vm4, %v1501_v42 }
 0x10e   :  { %v1481_v63 = vpack.c.bf16 %v1583_v58, %v1583_v58  ;;  %v488_v0 = vpop.f32.mrb[25].mxu0  ;;  %v1222_v2 = vadd.f32 %v1221_v61, %v1220_v57  ;;  %v1023_v5 = vadd.f32 %v1022_v62, %v1021_v54  ;;  %v1140_v23 = vmul.f32 %v1583_v58, %v1583_v58 }
 0x10f   :  { %v1479_v3 = vpack.c.bf16 %v488_v0, %v488_v0  ;;  %v1024_v6 = vsel %vm976_vm5, %v488_v0, 0.0  ;;  %v1584_v7 = vpop.f32.mrb[26].mxu0  ;;  %v1138_v9 = vmul.f32 %v488_v0, %v488_v0  ;;  %v1028_v33 = vsel %vm976_vm5, %v1583_v58, 0.0  ;;  %v2129_v0 = vpop.f32.mrb[24].mxu1 }
 0x110   :  { %930 = vst.msk [vmem:[%s2456_s2 + $0x68] sm:$0xf] %vm903_vm4, %v1481_v63  ;;  %v1482_v11 = vpack.c.bf16 %v1584_v7, %v1584_v7  ;;  %v491_v12 = vpop.f32.mrb[27].mxu0  ;;  %v1025_v14 = vadd.f32 %v1024_v6, %v1023_v5  ;;  %v1224_v17 = vadd.f32 %v1223_v8, %v1222_v2  ;;  %v1141_v35 = vmul.f32 %v1584_v7, %v1584_v7  ;;  %v2135_v6 = vpop.f32.mrb[25].mxu1 }
 0x111   :  { %928 = vst.msk [vmem:[%s2456_s2 + $0x60] sm:$0xf] %vm903_vm4, %v1479_v3  ;;  %v1480_v18 = vpack.c.bf16 %v491_v12, %v491_v12  ;;  %v1225_v24 = vsel %vm976_vm5, %v1138_v9, 0.0  ;;  %v1026_v25 = vsel %vm976_vm5, %v491_v12, 0.0  ;;  %v1139_v26 = vmul.f32 %v491_v12, %v491_v12  ;;  %v2143_v12 = vpop.f32.mrb[26].mxu1 }
 0x112   :  { %931 = vst.msk [vmem:[%s2456_s2 + $0x6c] sm:$0xf] %vm903_vm4, %v1482_v11  ;;  %v1226_v29 = vadd.f32 %v1225_v24, %v1224_v17  ;;  %v1027_v31 = vadd.f32 %v1026_v25, %v1025_v14  ;;  %v1229_v45 = vsel %vm976_vm5, %v1140_v23, 0.0  ;;  %v1030_v46 = vsel %vm976_vm5, %v1584_v7, 0.0  ;;  %v2151_v23 = vpop.f32.mrb[27].mxu1 }
 0x113   :  { %929 = vst.msk [vmem:[%s2456_s2 + $0x64] sm:$0xf] %vm903_vm4, %v1480_v18  ;;  %v1227_v36 = vsel %vm976_vm5, %v1139_v26, 0.0  ;;  %v1231_v59 = vsel %vm976_vm5, %v1141_v35, 0.0  ;;  %v1146_v18 = vmul.f32 %v1866_v15, %v1866_v15  ;;  %v1502_v35 = vpack.c.bf16 %v2011_v1, %v2011_v1 }
 0x114   :  { %v1029_v39 = vadd.f32 %v1028_v33, %v1027_v31  ;;  %v1228_v40 = vadd.f32 %v1227_v36, %v1226_v29  ;;  %v1499_v29 = vpack.c.bf16 %v2003_v60, %v2003_v60 }
 0x115   :  { %v1587_v41 = vpop.f32.mrb[28].mxu0  ;;  %951 = vst.msk [vmem:[%s2456_s2 + $0xbc] sm:$0xf] %vm903_vm4, %v1502_v35 }
 0x116   :  { %v1485_v49 = vpack.c.bf16 %v1587_v41, %v1587_v41  ;;  %v504_v50 = vpop.f32.mrb[29].mxu0  ;;  %v1230_v51 = vadd.f32 %v1229_v45, %v1228_v40  ;;  %v1031_v54 = vadd.f32 %v1030_v46, %v1029_v39  ;;  %v1144_v7 = vmul.f32 %v1587_v41, %v1587_v41  ;;  %948 = vst.msk [vmem:[%s2456_s2 + $0xb0] sm:$0xf] %vm903_vm4, %v1499_v29 }
 0x117   :  { %v1483_v52 = vpack.c.bf16 %v504_v50, %v504_v50  ;;  %v1032_v57 = vsel %vm976_vm5, %v504_v50, 0.0  ;;  %v1588_v58 = vpop.f32.mrb[30].mxu0  ;;  %v1142_v61 = vmul.f32 %v504_v50, %v504_v50  ;;  %v1036_v24 = vsel %vm976_vm5, %v1587_v41, 0.0  ;;  %v2183_v50 = vpop.f32.mrb[28].mxu1 }
 0x118   :  { %934 = vst.msk [vmem:[%s2456_s2 + $0x78] sm:$0xf] %vm903_vm4, %v1485_v49  ;;  %v1486_v62 = vpack.c.bf16 %v1588_v58, %v1588_v58  ;;  %v507_v63 = vpop.f32.mrb[31].mxu0  ;;  %v1033_v2 = vadd.f32 %v1032_v57, %v1031_v54  ;;  %v1232_v3 = vadd.f32 %v1231_v59, %v1230_v51  ;;  %v1145_v25 = vmul.f32 %v1588_v58, %v1588_v58  ;;  %v2187_v57 = vpop.f32.mrb[29].mxu1 }
 0x119   :  { %932 = vst.msk [vmem:[%s2456_s2 + $0x70] sm:$0xf] %vm903_vm4, %v1483_v52  ;;  %v1484_v5 = vpack.c.bf16 %v507_v63, %v507_v63  ;;  %v1233_v8 = vsel %vm976_vm5, %v1142_v61, 0.0  ;;  %v1034_v9 = vsel %vm976_vm5, %v507_v63, 0.0  ;;  %v1143_v11 = vmul.f32 %v507_v63, %v507_v63 }
 0x11a   :  { %935 = vst.msk [vmem:[%s2456_s2 + $0x7c] sm:$0xf] %vm903_vm4, %v1486_v62  ;;  %v1234_v14 = vadd.f32 %v1233_v8, %v1232_v3  ;;  %v1035_v17 = vadd.f32 %v1034_v9, %v1033_v2  ;;  %v1237_v36 = vsel %vm976_vm5, %v1144_v7, 0.0  ;;  %v1038_v37 = vsel %vm976_vm5, %v1588_v58, 0.0  ;;  %v2199_v62 = vpop.f32.mrb[30].mxu1 }
 0x11b   :  { %933 = vst.msk [vmem:[%s2456_s2 + $0x74] sm:$0xf] %vm903_vm4, %v1484_v5  ;;  %v1235_v26 = vsel %vm976_vm5, %v1143_v11, 0.0  ;;  %v1040_v39 = vsel %vm976_vm5, %v1866_v15, 0.0  ;;  %v1500_v40 = vpack.c.bf16 %v2017_v4, %v2017_v4  ;;  %v1239_v45 = vsel %vm976_vm5, %v1145_v25, 0.0 }
 0x11c   :  { %v1037_v31 = vadd.f32 %v1036_v24, %v1035_v17  ;;  %v1236_v33 = vadd.f32 %v1235_v26, %v1234_v14  ;;  %v1241_v46 = vsel %vm976_vm5, %v1146_v18, 0.0  ;;  %v1147_v15 = vmul.f32 %v1881_v22, %v1881_v22 }
 0x11d   :  { %949 = vst.msk [vmem:[%s2456_s2 + $0xb4] sm:$0xf] %vm903_vm4, %v1500_v40  ;;  %v1505_v49 = vpack.c.bf16 %v2041_v34, %v2041_v34  ;;  %v1503_v54 = vpack.c.bf16 %v2047_v38, %v2047_v38  ;;  %v1148_v58 = vmul.f32 %v1859_v10, %v1859_v10  ;;  %v1042_v59 = vsel %vm976_vm5, %v1881_v22, 0.0  ;;  %v2207_v22 = vpop.f32.mrb[31].mxu1 }
 0x11e   :  { %v1238_v41 = vadd.f32 %v1237_v36, %v1236_v33  ;;  %v1039_v42 = vadd.f32 %v1038_v37, %v1037_v31  ;;  %v1506_v61 = vpack.c.bf16 %v2055_v43, %v2055_v43  ;;  %v1044_v63 = vsel %vm976_vm5, %v1859_v10, 0.0 }
 0x11f   :  { %954 = vst.msk [vmem:[%s2456_s2 + $0xc8] sm:$0xf] %vm903_vm4, %v1505_v49  ;;  %952 = vst.msk [vmem:[%s2456_s2 + $0xc0] sm:$0xf] %vm903_vm4, %v1503_v54  ;;  %v1149_v5 = vmul.f32 %v1875_v20, %v1875_v20  ;;  %v1243_v7 = vsel %vm976_vm5, %v1147_v15, 0.0  ;;  %v1150_v8 = vmul.f32 %v1915_v48, %v1915_v48  ;;  %v1504_v10 = vpack.c.bf16 %v2061_v47, %v2061_v47 }
 0x120   :  { %v1041_v51 = vadd.f32 %v1040_v39, %v1039_v42  ;;  %v1240_v52 = vadd.f32 %v1239_v45, %v1238_v41  ;;  %955 = vst.msk [vmem:[%s2456_s2 + $0xcc] sm:$0xf] %vm903_vm4, %v1506_v61  ;;  %v1509_v14 = vpack.c.bf16 %v2085_v13, %v2085_v13  ;;  %v1245_v17 = vsel %vm976_vm5, %v1148_v58, 0.0 }
 0x121   :  { %v1046_v18 = vsel %vm976_vm5, %v1875_v20, 0.0  ;;  %v1048_v24 = vsel %vm976_vm5, %v1915_v48, 0.0  ;;  %953 = vst.msk [vmem:[%s2456_s2 + $0xc4] sm:$0xf] %vm903_vm4, %v1504_v10  ;;  %v1507_v25 = vpack.c.bf16 %v2091_v19, %v2091_v19  ;;  %v1247_v20 = vsel %vm976_vm5, %v1149_v5, 0.0 }
 0x122   :  { %v1242_v2 = vadd.f32 %v1241_v46, %v1240_v52  ;;  %v1043_v3 = vadd.f32 %v1042_v59, %v1041_v51  ;;  %958 = vst.msk [vmem:[%s2456_s2 + $0xd8] sm:$0xf] %vm903_vm4, %v1509_v14  ;;  %v1249_v31 = vsel %vm976_vm5, %v1150_v8, 0.0  ;;  %v1151_v48 = vmul.f32 %v1929_v56, %v1929_v56 }
 0x123   :  { %956 = vst.msk [vmem:[%s2456_s2 + $0xd0] sm:$0xf] %vm903_vm4, %v1507_v25  ;;  %v1510_v33 = vpack.c.bf16 %v2099_v28, %v2099_v28  ;;  %v1508_v37 = vpack.c.bf16 %v2105_v32, %v2105_v32  ;;  %v1152_v39 = vmul.f32 %v1909_v44, %v1909_v44  ;;  %v1050_v40 = vsel %vm976_vm5, %v1929_v56, 0.0 }
 0x124   :  { %v1045_v9 = vadd.f32 %v1044_v63, %v1043_v3  ;;  %v1244_v11 = vadd.f32 %v1243_v7, %v1242_v2  ;;  %v1513_v41 = vpack.c.bf16 %v2129_v0, %v2129_v0  ;;  %v1052_v42 = vsel %vm976_vm5, %v1909_v44, 0.0 }
 0x125   :  { %959 = vst.msk [vmem:[%s2456_s2 + $0xdc] sm:$0xf] %vm903_vm4, %v1510_v33  ;;  %957 = vst.msk [vmem:[%s2456_s2 + $0xd4] sm:$0xf] %vm903_vm4, %v1508_v37  ;;  %v1153_v56 = vmul.f32 %v1923_v53, %v1923_v53  ;;  %v1251_v15 = vsel %vm976_vm5, %v1151_v48, 0.0  ;;  %v1154_v49 = vmul.f32 %v1959_v21, %v1959_v21  ;;  %v1511_v44 = vpack.c.bf16 %v2135_v6, %v2135_v6 }
 0x126   :  { %v1246_v26 = vadd.f32 %v1245_v17, %v1244_v11  ;;  %v1047_v29 = vadd.f32 %v1046_v18, %v1045_v9  ;;  %962 = vst.msk [vmem:[%s2456_s2 + $0xe8] sm:$0xf] %vm903_vm4, %v1513_v41  ;;  %v1514_v54 = vpack.c.bf16 %v2143_v12, %v2143_v12  ;;  %v1253_v58 = vsel %vm976_vm5, %v1152_v39, 0.0 }
 0x127   :  { %v1054_v59 = vsel %vm976_vm5, %v1923_v53, 0.0  ;;  %v1056_v61 = vsel %vm976_vm5, %v1959_v21, 0.0  ;;  %960 = vst.msk [vmem:[%s2456_s2 + $0xe0] sm:$0xf] %vm903_vm4, %v1511_v44  ;;  %v1512_v63 = vpack.c.bf16 %v2151_v23, %v2151_v23  ;;  %v1255_v53 = vsel %vm976_vm5, %v1153_v56, 0.0 }
 0x128   :  { %v1049_v35 = vadd.f32 %v1048_v24, %v1047_v29  ;;  %v1248_v36 = vadd.f32 %v1247_v20, %v1246_v26  ;;  %963 = vst.msk [vmem:[%s2456_s2 + $0xec] sm:$0xf] %vm903_vm4, %v1514_v54  ;;  %v1257_v5 = vsel %vm976_vm5, %v1154_v49, 0.0  ;;  %v1155_v21 = vmul.f32 %v1973_v30, %v1973_v30 }
 0x129   :  { %961 = vst.msk [vmem:[%s2456_s2 + $0xe4] sm:$0xf] %vm903_vm4, %v1512_v63  ;;  %v1517_v7 = vpack.c.bf16 %v2183_v50, %v2183_v50  ;;  %v1515_v9 = vpack.c.bf16 %v2187_v57, %v2187_v57  ;;  %v1156_v11 = vmul.f32 %v1953_v16, %v1953_v16  ;;  %v1058_v14 = vsel %vm976_vm5, %v1973_v30, 0.0 }
 0x12a   :  { %v1250_v45 = vadd.f32 %v1249_v31, %v1248_v36  ;;  %v1051_v46 = vadd.f32 %v1050_v40, %v1049_v35  ;;  %v1518_v17 = vpack.c.bf16 %v2199_v62, %v2199_v62  ;;  %v1060_v18 = vsel %vm976_vm5, %v1953_v16, 0.0 }
 0x12b   :  { %966 = vst.msk [vmem:[%s2456_s2 + $0xf8] sm:$0xf] %vm903_vm4, %v1517_v7  ;;  %964 = vst.msk [vmem:[%s2456_s2 + $0xf0] sm:$0xf] %vm903_vm4, %v1515_v9  ;;  %v1157_v30 = vmul.f32 %v1967_v27, %v1967_v27  ;;  %v1259_v26 = vsel %vm976_vm5, %v1155_v21, 0.0  ;;  %v1158_v29 = vmul.f32 %v2003_v60, %v2003_v60  ;;  %v1516_v16 = vpack.c.bf16 %v2207_v22, %v2207_v22 }
 0x12c   :  { %v1053_v51 = vadd.f32 %v1052_v42, %v1051_v46  ;;  %v1252_v52 = vadd.f32 %v1251_v15, %v1250_v45  ;;  %967 = vst.msk [vmem:[%s2456_s2 + $0xfc] sm:$0xf] %vm903_vm4, %v1518_v17  ;;  %v1261_v48 = vsel %vm976_vm5, %v1156_v11, 0.0  ;;  %v1062_v33 = vsel %vm976_vm5, %v1967_v27, 0.0 }
 0x12d   :  { %v1064_v35 = vsel %vm976_vm5, %v2003_v60, 0.0  ;;  %965 = vst.msk [vmem:[%s2456_s2 + $0xf4] sm:$0xf] %vm903_vm4, %v1516_v16  ;;  %v1263_v39 = vsel %vm976_vm5, %v1157_v30, 0.0  ;;  %v1265_v40 = vsel %vm976_vm5, %v1158_v29, 0.0  ;;  %v1159_v41 = vmul.f32 %v2017_v4, %v2017_v4 }
 0x12e   :  { %v1254_v2 = vadd.f32 %v1253_v58, %v1252_v52  ;;  %v1055_v3 = vadd.f32 %v1054_v59, %v1053_v51  ;;  %v1160_v27 = vmul.f32 %v1997_v55, %v1997_v55  ;;  %v1066_v60 = vsel %vm976_vm5, %v2017_v4, 0.0 }
 0x12f   :  { %v1068_v15 = vsel %vm976_vm5, %v1997_v55, 0.0  ;;  %v1161_v49 = vmul.f32 %v2011_v1, %v2011_v1  ;;  %v1267_v44 = vsel %vm976_vm5, %v1159_v41, 0.0  ;;  %v1162_v51 = vmul.f32 %v2047_v38, %v2047_v38 }
 0x130   :  { %v1057_v8 = vadd.f32 %v1056_v61, %v1055_v3  ;;  %v1256_v10 = vadd.f32 %v1255_v53, %v1254_v2  ;;  %v1269_v58 = vsel %vm976_vm5, %v1160_v27, 0.0  ;;  %v1070_v4 = vsel %vm976_vm5, %v2011_v1, 0.0 }
 0x131   :  { %v1072_v59 = vsel %vm976_vm5, %v2047_v38, 0.0  ;;  %v1271_v63 = vsel %vm976_vm5, %v1161_v49, 0.0  ;;  %v1273_v2 = vsel %vm976_vm5, %v1162_v51, 0.0  ;;  %v1163_v3 = vmul.f32 %v2061_v47, %v2061_v47 }
 0x132   :  { %v1258_v24 = vadd.f32 %v1257_v5, %v1256_v10  ;;  %v1059_v25 = vadd.f32 %v1058_v14, %v1057_v8  ;;  %v1164_v21 = vmul.f32 %v2041_v34, %v2041_v34  ;;  %v1074_v1 = vsel %vm976_vm5, %v2061_v47, 0.0 }
 0x133   :  { %v1076_v38 = vsel %vm976_vm5, %v2041_v34, 0.0  ;;  %v1165_v10 = vmul.f32 %v2055_v43, %v2055_v43  ;;  %v1275_v9 = vsel %vm976_vm5, %v1163_v3, 0.0  ;;  %v1166_v11 = vmul.f32 %v2091_v19, %v2091_v19 }
 0x134   :  { %v1061_v20 = vadd.f32 %v1060_v18, %v1059_v25  ;;  %v1260_v31 = vadd.f32 %v1259_v26, %v1258_v24  ;;  %v1277_v18 = vsel %vm976_vm5, %v1164_v21, 0.0  ;;  %v1078_v47 = vsel %vm976_vm5, %v2055_v43, 0.0 }
 0x135   :  { %v1080_v24 = vsel %vm976_vm5, %v2091_v19, 0.0  ;;  %v1279_v30 = vsel %vm976_vm5, %v1165_v10, 0.0  ;;  %v1281_v26 = vsel %vm976_vm5, %v1166_v11, 0.0  ;;  %v1167_v29 = vmul.f32 %v2105_v32, %v2105_v32 }
 0x136   :  { %v1262_v36 = vadd.f32 %v1261_v48, %v1260_v31  ;;  %v1063_v37 = vadd.f32 %v1062_v33, %v1061_v20  ;;  %v1168_v31 = vmul.f32 %v2085_v13, %v2085_v13  ;;  %v1082_v43 = vsel %vm976_vm5, %v2105_v32, 0.0 }
 0x137   :  { %v1084_v19 = vsel %vm976_vm5, %v2085_v13, 0.0  ;;  %v1086_v32 = vsel %vm976_vm5, %v2099_v28, 0.0  ;;  %v1172_v49 = vmul.f32 %v2129_v0, %v2129_v0 }
 0x138   :  { %v1065_v42 = vadd.f32 %v1064_v35, %v1063_v37  ;;  %v1264_v45 = vadd.f32 %v1263_v39, %v1262_v36  ;;  %v1169_v35 = vmul.f32 %v2099_v28, %v2099_v28  ;;  %v1283_v36 = vsel %vm976_vm5, %v1167_v29, 0.0 }
 0x139   :  { %v1170_v37 = vmul.f32 %v2135_v6, %v2135_v6  ;;  %v1285_v41 = vsel %vm976_vm5, %v1168_v31, 0.0  ;;  %v1090_v28 = vsel %vm976_vm5, %v2151_v23, 0.0 }
 0x13a   :  { %v1266_v46 = vadd.f32 %v1265_v40, %v1264_v45  ;;  %v1067_v56 = vadd.f32 %v1066_v60, %v1065_v42  ;;  %v1088_v42 = vsel %vm976_vm5, %v2135_v6, 0.0  ;;  %v1287_v27 = vsel %vm976_vm5, %v1169_v35, 0.0 }
 0x13b   :  { %v1289_v60 = vsel %vm976_vm5, %v1170_v37, 0.0  ;;  %v1092_v6 = vsel %vm976_vm5, %v2129_v0, 0.0 }
 0x13c   :  { %v1069_v52 = vadd.f32 %v1068_v15, %v1067_v56  ;;  %v1268_v54 = vadd.f32 %v1267_v44, %v1266_v46  ;;  %v1171_v46 = vmul.f32 %v2151_v23, %v2151_v23  ;;  %v1094_v23 = vsel %vm976_vm5, %v2143_v12, 0.0 }
 0x13e   :  { %v1270_v61 = vadd.f32 %v1269_v58, %v1268_v54  ;;  %v1071_v55 = vadd.f32 %v1070_v4, %v1069_v52  ;;  %v1173_v52 = vmul.f32 %v2143_v12, %v2143_v12  ;;  %v1291_v54 = vsel %vm976_vm5, %v1171_v46, 0.0 }
 0x13f   :  { %v1174_v58 = vmul.f32 %v2187_v57, %v2187_v57  ;;  %v1098_v12 = vsel %vm976_vm5, %v2207_v22, 0.0 }
 0x140   :  { %v1073_v53 = vadd.f32 %v1072_v59, %v1071_v55  ;;  %v1272_v5 = vadd.f32 %v1271_v63, %v1270_v61  ;;  %v1293_v61 = vsel %vm976_vm5, %v1172_v49, 0.0  ;;  %v1096_v55 = vsel %vm976_vm5, %v2187_v57, 0.0 }
 0x141   :  { %v1297_v3 = vsel %vm976_vm5, %v1174_v58, 0.0  ;;  %v1100_v57 = vsel %vm976_vm5, %v2183_v50, 0.0 }
 0x142   :  { %v1274_v7 = vadd.f32 %v1273_v2, %v1272_v5  ;;  %v1075_v8 = vadd.f32 %v1074_v1, %v1073_v53  ;;  %v1295_v2 = vsel %vm976_vm5, %v1173_v52, 0.0  ;;  %v1175_v53 = vmul.f32 %v2207_v22, %v2207_v22 }
 0x143   :  { %v1176_v1 = vmul.f32 %v2183_v50, %v2183_v50 }
 0x144   :  { %v1077_v14 = vadd.f32 %v1076_v38, %v1075_v8  ;;  %v1276_v17 = vadd.f32 %v1275_v9, %v1274_v7  ;;  %v1177_v38 = vmul.f32 %v2199_v62, %v2199_v62  ;;  %v1299_v10 = vsel %vm976_vm5, %v1175_v53, 0.0 }
 0x146   :  { %v1278_v25 = vadd.f32 %v1277_v18, %v1276_v17  ;;  %v1079_v34 = vadd.f32 %v1078_v47, %v1077_v14  ;;  %v1301_v14 = vsel %vm976_vm5, %v1176_v1, 0.0  ;;  %v1102_v17 = vsel %vm976_vm5, %v2199_v62, 0.0 }
 0x147   :  { %v1303_v22 = vsel %vm976_vm5, %v1177_v38, 0.0 }
 0x148   :  { %v1081_v16 = vadd.f32 %v1080_v24, %v1079_v34  ;;  %v1280_v20 = vadd.f32 %v1279_v30, %v1278_v25 }
 0x14a   :  { %v1282_v48 = vadd.f32 %v1281_v26, %v1280_v20  ;;  %v1083_v33 = vadd.f32 %v1082_v43, %v1081_v16  ;;  %v975_v43 = vld [vmem:[%s2454_s3] sm:$0x1] }
 0x14c   :  { %v1085_v39 = vadd.f32 %v1084_v19, %v1083_v33  ;;  %v1284_v40 = vadd.f32 %v1283_v36, %v1282_v48  ;;  %v1113_v33 = vld [vmem:[%s2455_s4] sm:$0x1] }
 0x14e   :  { %v1286_v45 = vadd.f32 %v1285_v41, %v1284_v40  ;;  %v1087_v13 = vadd.f32 %v1086_v32, %v1085_v39 }
 0x150   :  { %v1089_v56 = vadd.f32 %v1088_v42, %v1087_v13  ;;  %v1288_v15 = vadd.f32 %v1287_v27, %v1286_v45 }
 0x152   :  { %v1290_v44 = vadd.f32 %v1289_v60, %v1288_v15  ;;  %v1091_v51 = vadd.f32 %v1090_v28, %v1089_v56 }
 0x154   :  { %v1093_v4 = vadd.f32 %v1092_v6, %v1091_v51  ;;  %v1292_v59 = vadd.f32 %v1291_v54, %v1290_v44 }
 0x156   :  { %v1294_v63 = vadd.f32 %v1293_v61, %v1292_v59  ;;  %v1095_v0 = vadd.f32 %v1094_v23, %v1093_v4 }
 0x158   :  { %v1097_v5 = vadd.f32 %v1096_v55, %v1095_v0  ;;  %v1296_v21 = vadd.f32 %v1295_v2, %v1294_v63 }
 0x15a   :  { %v1298_v7 = vadd.f32 %v1297_v3, %v1296_v21  ;;  %v1099_v8 = vadd.f32 %v1098_v12, %v1097_v5 }
 0x15c   :  { %v1101_v9 = vadd.f32 %v1100_v57, %v1099_v8  ;;  %v1300_v11 = vadd.f32 %v1299_v10, %v1298_v7 }
 0x15e   :  { %v1103_v18 = vadd.f32 %v1102_v17, %v1101_v9  ;;  %v1302_v47 = vadd.f32 %v1301_v14, %v1300_v11 }
 0x160   :  { %v1104_v24 = vrot.slane %v1103_v18, 4  ;;  %v1304_v25 = vadd.f32 %v1303_v22, %v1302_v47 }
 0x162   :  { %v1105_v34 = vadd.f32 %v1104_v24, %v1103_v18  ;;  %v1305_v50 = vrot.slane %v1304_v25, 4 }
 0x164   :  { %v1106_v30 = vrot.slane %v1105_v34, 2  ;;  %v1306_v26 = vadd.f32 %v1305_v50, %v1304_v25 }
 0x166   :  { %v1107_v29 = vadd.f32 %v1106_v30, %v1105_v34  ;;  %v1307_v16 = vrot.slane %v1306_v26, 2 }
 0x168   :  { %v1108_v20 = vrot.slane %v1107_v29, 1  ;;  %v1308_v31 = vadd.f32 %v1307_v16, %v1306_v26 }
 0x16a   :  { %v1109_v48 = vadd.f32 %v1108_v20, %v1107_v29  ;;  %v1309_v62 = vrot.slane %v1308_v31, 1 }
 0x16c   :  { %v1110_v19 = vadd.f32 %v1109_v48, %v975_v43  ;;  %v1310_v35 = vadd.f32 %v1309_v62, %v1308_v31 }
 0x16e   :  { %1112 = vst.msk [vmem:[%s2454_s3] sm:$0x1] %vm972_vm3, %v1110_v19  ;;  %v1311_v36 = vadd.f32 %v1310_v35, %v1113_v33 }
 0x170   :  { %1312 = vst.msk [vmem:[%s2455_s4] sm:$0x1] %vm972_vm3, %v1311_v36 }

// kernel: tile.74
= control target key start
LH: loop header
LB: loop body
LE: loop exit
PB: predicated region body
PF: predicated region fallthrough
CT: control target
= control target key end

     0   :  { %s20_s0 = inlined_call_operand.<no memory space> [shape: f32[], index: 0, kind: input, shape index: {}]   ;;  %s21_s1 = inlined_call_operand.vmem [shape: f32[1,128], index: 1, kind: output, shape index: {}]  }
   0x1   :  { %v2_v0 = vstv %s20_s0 }
   0x2   :  { %3 = vst [vmem:[%s21_s1] sm:$0x1] %v2_v0 }

// kernel: forward.22
= control target key start
LH: loop header
LB: loop body
LE: loop exit
PB: predicated region body
PF: predicated region fallthrough
CT: control target
= control target key end

     0   :  { %s379_s0 = inlined_call_operand.vmem [shape: bf16[64,128], index: 0, kind: input, shape index: {}]   ;;  %s380_s1 = inlined_call_operand.vmem [shape: f32[1,128], index: 1, kind: input, shape index: {}]   ;;  %s381_s2 = inlined_call_operand.vmem [shape: f32[1,128], index: 2, kind: input, shape index: {}]   ;;  %s382_s3 = inlined_call_operand.vmem [shape: bf16[64,128], index: 3, kind: input, shape index: {}]   ;;  %s383_s4 = inlined_call_operand.vmem [shape: f32[1,128], index: 4, kind: input, shape index: {}]   ;;  %s384_s5 = inlined_call_operand.vmem [shape: f32[1,128], index: 5, kind: input, shape index: {}]   ;;  %s385_s6 = inlined_call_operand.vmem [shape: bf16[64,128], index: 6, kind: output, shape index: {}]  }
   0x1   :  { %v196_v0 = vld [vmem:[%s379_s0] sm:$0xff]   ;;  %v247_v9 = vld [vmem:[%s379_s0 + $0x8] sm:$0xff]   ;;  %v248_v20 = vld [vmem:[%s379_s0 + $0x10] sm:$0xff]  }
   0x2   :  { %v297_v1 = vld [vmem:[%s380_s1] ss:$0 sm:$0xff]  ;;  %v197_v2 = vunpack.c.l.bf16 %v196_v0  ;;  %v198_v3 = vunpack.c.h.bf16 %v196_v0  ;;  %v250_v10 = vld [vmem:[%s382_s3 + $0x8] sm:$0xff]   ;;  %v201_v14 = vunpack.c.l.bf16 %v247_v9  ;;  %v202_v15 = vunpack.c.h.bf16 %v247_v9  ;;  %v251_v29 = vld [vmem:[%s382_s3 + $0x10] sm:$0xff]  }
   0x3   :  { %v212_v4 = vld [vmem:[%s382_s3] sm:$0xff]   ;;  %v217_v18 = vunpack.c.l.bf16 %v250_v10  ;;  %v218_v19 = vunpack.c.h.bf16 %v250_v10  ;;  %v205_v32 = vunpack.c.l.bf16 %v248_v20  ;;  %v206_v33 = vunpack.c.h.bf16 %v248_v20  ;;  %v249_v42 = vld [vmem:[%s379_s0 + $0x18] sm:$0xff]  }
   0x4   :  { %v305_v5 = vld [vmem:[%s383_s4] ss:$0 sm:$0xff]  ;;  %v213_v7 = vunpack.c.l.bf16 %v212_v4  ;;  %v214_v8 = vunpack.c.h.bf16 %v212_v4  ;;  %v46_v11 = vmul.f32 %v197_v2, %v297_v1  ;;  %v47_v12 = vmul.f32 %v198_v3, %v297_v1  ;;  %v252_v47 = vld [vmem:[%s382_s3 + $0x18] sm:$0xff]  }
   0x5   :  { %v310_v6 = vld [vmem:[%s381_s2] ss:$0 sm:$0xff]  ;;  %v48_v23 = vmul.f32 %v201_v14, %v297_v1  ;;  %v49_v24 = vmul.f32 %v202_v15, %v297_v1  ;;  %v94_v27 = vmul.f32 %v217_v18, %v305_v5  ;;  %v95_v28 = vmul.f32 %v218_v19, %v305_v5 }
   0x6   :  { %v323_v13 = vld [vmem:[%s384_s5] ss:$0 sm:$0xff]  ;;  %v92_v16 = vmul.f32 %v213_v7, %v305_v5  ;;  %v93_v17 = vmul.f32 %v214_v8, %v305_v5  ;;  %v61_v21 = vadd.f32 %v310_v6, %v46_v11  ;;  %v62_v22 = vadd.f32 %v310_v6, %v47_v12 }
   0x7   :  { %v63_v30 = vadd.f32 %v310_v6, %v48_v23  ;;  %v64_v31 = vadd.f32 %v310_v6, %v49_v24  ;;  %v109_v36 = vadd.f32 %v323_v13, %v94_v27  ;;  %v110_v37 = vadd.f32 %v323_v13, %v95_v28 }
   0x8   :  { %v107_v25 = vadd.f32 %v323_v13, %v92_v16  ;;  %v108_v26 = vadd.f32 %v323_v13, %v93_v17  ;;  %v50_v38 = vmul.f32 %v205_v32, %v297_v1  ;;  %v51_v39 = vmul.f32 %v206_v33, %v297_v1 }
   0x9   :  { %v221_v40 = vunpack.c.l.bf16 %v251_v29  ;;  %v222_v41 = vunpack.c.h.bf16 %v251_v29  ;;  %v117_v45 = vadd.f32 %v109_v36, %v63_v30  ;;  %v118_v46 = vadd.f32 %v110_v37, %v64_v31 }
   0xa   :  { %v115_v34 = vadd.f32 %v107_v25, %v61_v21  ;;  %v116_v35 = vadd.f32 %v108_v26, %v62_v22  ;;  %v65_v48 = vadd.f32 %v310_v6, %v50_v38  ;;  %v66_v49 = vadd.f32 %v310_v6, %v51_v39 }
   0xb   :  { %v96_v50 = vmul.f32 %v221_v40, %v305_v5  ;;  %v97_v51 = vmul.f32 %v222_v41, %v305_v5  ;;  %v125_v53 = vmax.f32 %v117_v45, 0.0  ;;  %v126_v54 = vmax.f32 %v118_v46, 0.0 }
   0xc   :  { %v123_v43 = vmax.f32 %v115_v34, 0.0  ;;  %v124_v44 = vmax.f32 %v116_v35, 0.0  ;;  %v209_v55 = vunpack.c.l.bf16 %v249_v42  ;;  %v210_v58 = vunpack.c.h.bf16 %v249_v42 }
   0xd   :  { %v111_v56 = vadd.f32 %v323_v13, %v96_v50  ;;  %v112_v57 = vadd.f32 %v323_v13, %v97_v51  ;;  %v225_v59 = vunpack.c.l.bf16 %v252_v47  ;;  %v235_v60 = vpack.c.bf16 %v126_v54, %v125_v53 }
   0xe   :  { %v230_v52 = vpack.c.bf16 %v124_v44, %v123_v43  ;;  %v52_v61 = vmul.f32 %v209_v55, %v297_v1  ;;  %v226_v62 = vunpack.c.h.bf16 %v252_v47  ;;  %v53_v2 = vmul.f32 %v210_v58, %v297_v1 }
   0xf   :  { %v119_v63 = vadd.f32 %v111_v56, %v65_v48  ;;  %v120_v0 = vadd.f32 %v112_v57, %v66_v49  ;;  %v98_v3 = vmul.f32 %v225_v59, %v305_v5  ;;  %253 = vst [vmem:[%s385_s6 + $0x8] sm:$0xff] %v235_v60  }
  0x10   :  { %231 = vst [vmem:[%s385_s6] sm:$0xff] %v230_v52   ;;  %v67_v4 = vadd.f32 %v310_v6, %v52_v61  ;;  %v99_v7 = vmul.f32 %v226_v62, %v305_v5  ;;  %v68_v10 = vadd.f32 %v310_v6, %v53_v2 }
  0x11   :  { %v127_v8 = vmax.f32 %v119_v63, 0.0  ;;  %v128_v9 = vmax.f32 %v120_v0, 0.0  ;;  %v113_v11 = vadd.f32 %v323_v13, %v98_v3 }
  0x12   :  { %v114_v12 = vadd.f32 %v323_v13, %v99_v7 }
  0x13   :  { %v240_v14 = vpack.c.bf16 %v128_v9, %v127_v8  ;;  %v121_v1 = vadd.f32 %v113_v11, %v67_v4 }
  0x14   :  { %v122_v15 = vadd.f32 %v114_v12, %v68_v10 }
  0x15   :  { %254 = vst [vmem:[%s385_s6 + $0x10] sm:$0xff] %v240_v14   ;;  %v129_v16 = vmax.f32 %v121_v1, 0.0 }
  0x16   :  { %v130_v17 = vmax.f32 %v122_v15, 0.0 }
  0x18   :  { %v245_v18 = vpack.c.bf16 %v130_v17, %v129_v16 }
  0x1a   :  { %255 = vst [vmem:[%s385_s6 + $0x18] sm:$0xff] %v245_v18  }

// kernel: forward.19
= control target key start
LH: loop header
LB: loop body
LE: loop exit
PB: predicated region body
PF: predicated region fallthrough
CT: control target
= control target key end

     0   :  { %v1860_v0 = vmov 0   ;;  %vm439_vm0 = vcmask 130048   ;;  %vm1081_vm1 = vcmask 125952   ;;  %vm1150_vm2 = vcmask 122880   ;;  %s2768_s1 = inlined_call_operand.vmem [shape: bf16[144,16], index: 1, kind: input, shape index: {}]   ;;  %s2769_s0 = inlined_call_operand.vmem [shape: bf16[512,144], index: 0, kind: input, shape index: {}]   ;;  %s2770_s2 = inlined_call_operand.vmem [shape: bf16[512,16], index: 2, kind: output, shape index: {0}]   ;;  %s2771_s3 = inlined_call_operand.vmem [shape: f32[1,16], index: 3, kind: output, shape index: {1}]   ;;  %s2772_s4 = inlined_call_operand.vmem [shape: f32[1,16], index: 4, kind: output, shape index: {2}]  }
   0x1   :  { %536 = vmatprep.subr.bf16.mxu0 %v1860_v0  ;;  %v1755_v1 = vld [vmem:[%s2768_s1] sm:$0xff]   ;;  %1735 = vmatprep.subr.bf16.mxu1 %v1860_v0  ;;  %v1756_v2 = vld [vmem:[%s2768_s1 + $0x8] sm:$0xff]   ;;  %v1757_v3 = vld [vmem:[%s2768_s1 + $0x10] sm:$0xff]  }
   0x2   :  { %537 = vmatpush1.bf16.msra.mxu0 %v1755_v1  ;;  %1744 = vmatpush1.bf16.msra.mxu1 %v1755_v1  ;;  %v1758_v4 = vld [vmem:[%s2768_s1 + $0x18] sm:$0xff]   ;;  %v1766_v5 = vld [vmem:[%s2769_s0 + $0x4] ss:$8 sps:$4 sm:$0xff]   ;;  %v1761_v9 = vld [vmem:[%s2768_s1 + $0x30] sm:$0xff]  }
   0x3   :  { %538 = vmatprep.subr.bf16.mxu0 %v1860_v0  ;;  %1736 = vmatprep.subr.bf16.mxu1 %v1860_v0  ;;  %v1759_v6 = vld [vmem:[%s2768_s1 + $0x20] sm:$0xff]   ;;  %v1760_v7 = vld [vmem:[%s2768_s1 + $0x28] sm:$0xff]   ;;  %v1762_v10 = vld [vmem:[%s2768_s1 + $0x38] sm:$0xff]  }
   0x4   :  { %1575 = vmatprep.mubr.msk.bf16.mxu0 %vm439_vm0, %v1766_v5  ;;  %v1790_v8 = vld [vmem:[%s2769_s0 + $0x104] ss:$8 sps:$4 sm:$0xff]   ;;  %v1764_v12 = vld [vmem:[%s2769_s0] ss:$8 sps:$4 sm:$0xff]   ;;  %v1767_v13 = vld [vmem:[%s2769_s0 + $0x14] ss:$8 sps:$4 sm:$0xff]  }
   0x5   :  { %1591 = vmatprep.mubr.msk.bf16.mxu1 %vm439_vm0, %v1790_v8  ;;  %v1763_v11 = vld [vmem:[%s2768_s1 + $0x40] sm:$0xff]   ;;  %v1794_v15 = vld [vmem:[%s2769_s0 + $0x114] ss:$8 sps:$4 sm:$0xff]   ;;  %v1769_v16 = vld [vmem:[%s2769_s0 + $0x10] ss:$8 sps:$4 sm:$0xff]  }
   0x6   :  { %539 = vmatpush1.bf16.msra.mxu0 %v1756_v2  ;;  %1745 = vmatpush1.bf16.msra.mxu1 %v1756_v2  ;;  %v1788_v14 = vld [vmem:[%s2769_s0 + $0x100] ss:$8 sps:$4 sm:$0xff]   ;;  %v1770_v17 = vld [vmem:[%s2769_s0 + $0x24] ss:$8 sps:$4 sm:$0xff]   ;;  %v1796_v18 = vld [vmem:[%s2769_s0 + $0x110] ss:$8 sps:$4 sm:$0xff]  }
   0x7   :  { %540 = vmatprep.subr.bf16.mxu0 %v1860_v0  ;;  %1737 = vmatprep.subr.bf16.mxu1 %v1860_v0  ;;  %v1800_v19 = vld [vmem:[%s2769_s0 + $0x124] ss:$8 sps:$4 sm:$0xff]   ;;  %v1772_v20 = vld [vmem:[%s2769_s0 + $0x20] ss:$8 sps:$4 sm:$0xff]   ;;  %v1773_v21 = vld [vmem:[%s2769_s0 + $0x34] ss:$8 sps:$4 sm:$0xff]  }
   0x8   :  { %v1802_v22 = vld [vmem:[%s2769_s0 + $0x120] ss:$8 sps:$4 sm:$0xff]   ;;  %v1806_v23 = vld [vmem:[%s2769_s0 + $0x134] ss:$8 sps:$4 sm:$0xff]   ;;  %v1775_v24 = vld [vmem:[%s2769_s0 + $0x30] ss:$8 sps:$4 sm:$0xff]  }
   0x9   :  { %v1808_v25 = vld [vmem:[%s2769_s0 + $0x130] ss:$8 sps:$4 sm:$0xff]   ;;  %v1776_v26 = vld [vmem:[%s2769_s0 + $0x44] ss:$8 sps:$4 sm:$0xff]   ;;  %v1778_v28 = vld [vmem:[%s2769_s0 + $0x40] ss:$8 sps:$4 sm:$0xff]  }
   0xa   :  { %541 = vmatpush1.bf16.msra.mxu0 %v1757_v3  ;;  %1746 = vmatpush1.bf16.msra.mxu1 %v1757_v3  ;;  %v1812_v27 = vld [vmem:[%s2769_s0 + $0x144] ss:$8 sps:$4 sm:$0xff]   ;;  %v1814_v29 = vld [vmem:[%s2769_s0 + $0x140] ss:$8 sps:$4 sm:$0xff]   ;;  %v1779_v30 = vld [vmem:[%s2769_s0 + $0x54] ss:$8 sps:$4 sm:$0xff]  }
   0xb   :  { %542 = vmatprep.subr.bf16.mxu0 %v1860_v0  ;;  %1738 = vmatprep.subr.bf16.mxu1 %v1860_v0  ;;  %v1818_v31 = vld [vmem:[%s2769_s0 + $0x154] ss:$8 sps:$4 sm:$0xff]   ;;  %v1781_v32 = vld [vmem:[%s2769_s0 + $0x50] ss:$8 sps:$4 sm:$0xff]   ;;  %v1782_v34 = vld [vmem:[%s2769_s0 + $0x64] ss:$8 sps:$4 sm:$0xff]  }
   0xc   :  { %v1820_v33 = vld [vmem:[%s2769_s0 + $0x150] ss:$8 sps:$4 sm:$0xff]   ;;  %v1824_v35 = vld [vmem:[%s2769_s0 + $0x164] ss:$8 sps:$4 sm:$0xff]   ;;  %v1784_v36 = vld [vmem:[%s2769_s0 + $0x60] ss:$8 sps:$4 sm:$0xff]  }
   0xd   :  { %v1826_v37 = vld [vmem:[%s2769_s0 + $0x160] ss:$8 sps:$4 sm:$0xff]   ;;  %v1785_v38 = vld [vmem:[%s2769_s0 + $0x74] ss:$8 sps:$4 sm:$0xff]   ;;  %v1787_v40 = vld [vmem:[%s2769_s0 + $0x70] ss:$8 sps:$4 sm:$0xff]  }
   0xe   :  { %543 = vmatpush1.bf16.msra.mxu0 %v1758_v4  ;;  %1747 = vmatpush1.bf16.msra.mxu1 %v1758_v4  ;;  %v1830_v39 = vld [vmem:[%s2769_s0 + $0x174] ss:$8 sps:$4 sm:$0xff]   ;;  %v1832_v41 = vld [vmem:[%s2769_s0 + $0x170] ss:$8 sps:$4 sm:$0xff]   ;;  %v1791_v42 = vld [vmem:[%s2769_s0 + $0x84] ss:$8 sps:$4 sm:$0xff]  }
   0xf   :  { %544 = vmatprep.subr.bf16.mxu0 %v1860_v0  ;;  %1739 = vmatprep.subr.bf16.mxu1 %v1860_v0  ;;  %v1836_v43 = vld [vmem:[%s2769_s0 + $0x184] ss:$8 sps:$4 sm:$0xff]   ;;  %v1793_v44 = vld [vmem:[%s2769_s0 + $0x80] ss:$8 sps:$4 sm:$0xff]   ;;  %v1797_v46 = vld [vmem:[%s2769_s0 + $0x94] ss:$8 sps:$4 sm:$0xff]  }
  0x10   :  { %v1838_v45 = vld [vmem:[%s2769_s0 + $0x180] ss:$8 sps:$4 sm:$0xff]   ;;  %v1839_v47 = vld [vmem:[%s2769_s0 + $0x194] ss:$8 sps:$4 sm:$0xff]   ;;  %v1799_v48 = vld [vmem:[%s2769_s0 + $0x90] ss:$8 sps:$4 sm:$0xff]  }
  0x11   :  { %v1841_v49 = vld [vmem:[%s2769_s0 + $0x190] ss:$8 sps:$4 sm:$0xff]   ;;  %v1803_v50 = vld [vmem:[%s2769_s0 + $0xa4] ss:$8 sps:$4 sm:$0xff]   ;;  %v1805_v52 = vld [vmem:[%s2769_s0 + $0xa0] ss:$8 sps:$4 sm:$0xff]  }
  0x12   :  { %545 = vmatpush1.bf16.msra.mxu0 %v1759_v6  ;;  %1748 = vmatpush1.bf16.msra.mxu1 %v1759_v6  ;;  %v1842_v51 = vld [vmem:[%s2769_s0 + $0x1a4] ss:$8 sps:$4 sm:$0xff]   ;;  %v1844_v53 = vld [vmem:[%s2769_s0 + $0x1a0] ss:$8 sps:$4 sm:$0xff]   ;;  %v1809_v54 = vld [vmem:[%s2769_s0 + $0xb4] ss:$8 sps:$4 sm:$0xff]  }
  0x13   :  { %546 = vmatprep.subr.bf16.mxu0 %v1860_v0  ;;  %1740 = vmatprep.subr.bf16.mxu1 %v1860_v0  ;;  %v1845_v55 = vld [vmem:[%s2769_s0 + $0x1b4] ss:$8 sps:$4 sm:$0xff]   ;;  %v1811_v56 = vld [vmem:[%s2769_s0 + $0xb0] ss:$8 sps:$4 sm:$0xff]   ;;  %v1815_v58 = vld [vmem:[%s2769_s0 + $0xc4] ss:$8 sps:$4 sm:$0xff]  }
  0x14   :  { %v1847_v57 = vld [vmem:[%s2769_s0 + $0x1b0] ss:$8 sps:$4 sm:$0xff]   ;;  %v1848_v59 = vld [vmem:[%s2769_s0 + $0x1c4] ss:$8 sps:$4 sm:$0xff]   ;;  %v1817_v60 = vld [vmem:[%s2769_s0 + $0xc0] ss:$8 sps:$4 sm:$0xff]  }
  0x15   :  { %v1850_v61 = vld [vmem:[%s2769_s0 + $0x1c0] ss:$8 sps:$4 sm:$0xff]   ;;  %v1821_v62 = vld [vmem:[%s2769_s0 + $0xd4] ss:$8 sps:$4 sm:$0xff]   ;;  %v1853_v1 = vld [vmem:[%s2769_s0 + $0x1d0] ss:$8 sps:$4 sm:$0xff]  }
  0x16   :  { %547 = vmatpush1.bf16.msra.mxu0 %v1760_v7  ;;  %1749 = vmatpush1.bf16.msra.mxu1 %v1760_v7  ;;  %v1851_v63 = vld [vmem:[%s2769_s0 + $0x1d4] ss:$8 sps:$4 sm:$0xff]   ;;  %v1827_v2 = vld [vmem:[%s2769_s0 + $0xe4] ss:$8 sps:$4 sm:$0xff]   ;;  %v1829_v4 = vld [vmem:[%s2769_s0 + $0xe0] ss:$8 sps:$4 sm:$0xff]  }
  0x17   :  { %548 = vmatprep.subr.bf16.mxu0 %v1860_v0  ;;  %1741 = vmatprep.subr.bf16.mxu1 %v1860_v0  ;;  %v1854_v3 = vld [vmem:[%s2769_s0 + $0x1e4] ss:$8 sps:$4 sm:$0xff]   ;;  %v1856_v5 = vld [vmem:[%s2769_s0 + $0x1e0] ss:$8 sps:$4 sm:$0xff]   ;;  %v1833_v6 = vld [vmem:[%s2769_s0 + $0xf4] ss:$8 sps:$4 sm:$0xff]  }
  0x18   :  { %v1857_v7 = vld [vmem:[%s2769_s0 + $0x1f4] ss:$8 sps:$4 sm:$0xff]   ;;  %v1835_v8 = vld [vmem:[%s2769_s0 + $0xf0] ss:$8 sps:$4 sm:$0xff]  }
  0x1a   :  { %549 = vmatpush1.bf16.msra.mxu0 %v1761_v9  ;;  %1750 = vmatpush1.bf16.msra.mxu1 %v1761_v9  ;;  %v1859_v9 = vld [vmem:[%s2769_s0 + $0x1f0] ss:$8 sps:$4 sm:$0xff]  }
  0x1b   :  { %550 = vmatprep.subr.bf16.mxu0 %v1860_v0  ;;  %1742 = vmatprep.subr.bf16.mxu1 %v1860_v0 }
  0x1e   :  { %551 = vmatpush1.bf16.msra.mxu0 %v1762_v10  ;;  %1751 = vmatpush1.bf16.msra.mxu1 %v1762_v10 }
  0x1f   :  { %552 = vmatprep.subr.bf16.mxu0 %v1860_v0  ;;  %1743 = vmatprep.subr.bf16.mxu1 %v1860_v0  ;;  %v1823_v0 = vld [vmem:[%s2769_s0 + $0xd0] ss:$8 sps:$4 sm:$0xff]  }
  0x22   :  { %553 = vmatpush1.bf16.msra.mxu0 %v1763_v11  ;;  %1752 = vmatpush1.bf16.msra.mxu1 %v1763_v11 }
  0x25   :  { %569 = vmatmul.mubr.bf16.vlgmr.msra.gmra.mrb[0].mxu0 %v1764_v12  ;;  %697 = vmatmul.mubr.bf16.vlgmr.msra.gmra.mrb[0].mxu1 %v1788_v14 }
  0x26   :  { %1576 = vmatprep.mubr.msk.bf16.mxu0 %vm439_vm0, %v1767_v13  ;;  %1592 = vmatprep.mubr.msk.bf16.mxu1 %vm439_vm0, %v1794_v15 }
  0x2d   :  { %577 = vmatmul.mubr.bf16.gmra.mrb[4].mxu0 %v1769_v16  ;;  %705 = vmatmul.mubr.bf16.gmra.mrb[4].mxu1 %v1796_v18 }
  0x2e   :  { %1577 = vmatprep.mubr.msk.bf16.mxu0 %vm439_vm0, %v1770_v17  ;;  %1593 = vmatprep.mubr.msk.bf16.mxu1 %vm439_vm0, %v1800_v19 }
  0x35   :  { %585 = vmatmul.mubr.bf16.gmra.mrb[8].mxu0 %v1772_v20  ;;  %713 = vmatmul.mubr.bf16.gmra.mrb[8].mxu1 %v1802_v22 }
  0x36   :  { %1578 = vmatprep.mubr.msk.bf16.mxu0 %vm439_vm0, %v1773_v21  ;;  %1594 = vmatprep.mubr.msk.bf16.mxu1 %vm439_vm0, %v1806_v23 }
  0x3d   :  { %593 = vmatmul.mubr.bf16.gmra.mrb[12].mxu0 %v1775_v24  ;;  %721 = vmatmul.mubr.bf16.gmra.mrb[12].mxu1 %v1808_v25 }
  0x3e   :  { %1579 = vmatprep.mubr.msk.bf16.mxu0 %vm439_vm0, %v1776_v26  ;;  %1595 = vmatprep.mubr.msk.bf16.mxu1 %vm439_vm0, %v1812_v27 }
  0x45   :  { %601 = vmatmul.mubr.bf16.gmra.mrb[16].mxu0 %v1778_v28  ;;  %729 = vmatmul.mubr.bf16.gmra.mrb[16].mxu1 %v1814_v29 }
  0x46   :  { %1580 = vmatprep.mubr.msk.bf16.mxu0 %vm439_vm0, %v1779_v30  ;;  %1596 = vmatprep.mubr.msk.bf16.mxu1 %vm439_vm0, %v1818_v31 }
  0x4d   :  { %609 = vmatmul.mubr.bf16.gmra.mrb[20].mxu0 %v1781_v32  ;;  %737 = vmatmul.mubr.bf16.gmra.mrb[20].mxu1 %v1820_v33 }
  0x4e   :  { %1581 = vmatprep.mubr.msk.bf16.mxu0 %vm439_vm0, %v1782_v34  ;;  %1597 = vmatprep.mubr.msk.bf16.mxu1 %vm439_vm0, %v1824_v35 }
  0x55   :  { %617 = vmatmul.mubr.bf16.gmra.mrb[24].mxu0 %v1784_v36  ;;  %745 = vmatmul.mubr.bf16.gmra.mrb[24].mxu1 %v1826_v37 }
  0x56   :  { %1582 = vmatprep.mubr.msk.bf16.mxu0 %vm439_vm0, %v1785_v38  ;;  %1598 = vmatprep.mubr.msk.bf16.mxu1 %vm439_vm0, %v1830_v39 }
  0x5d   :  { %625 = vmatmul.mubr.bf16.gmra.mrb[28].mxu0 %v1787_v40  ;;  %753 = vmatmul.mubr.bf16.gmra.mrb[28].mxu1 %v1832_v41 }
  0x5e   :  { %1583 = vmatprep.mubr.msk.bf16.mxu0 %vm439_vm0, %v1791_v42  ;;  %1599 = vmatprep.mubr.msk.bf16.mxu1 %vm439_vm0, %v1836_v43 }
  0x65   :  { %633 = vmatmul.mubr.bf16.gmra.mrb[32].mxu0 %v1793_v44  ;;  %761 = vmatmul.mubr.bf16.gmra.mrb[32].mxu1 %v1838_v45 }
  0x66   :  { %1584 = vmatprep.mubr.msk.bf16.mxu0 %vm439_vm0, %v1797_v46  ;;  %1600 = vmatprep.mubr.msk.bf16.mxu1 %vm439_vm0, %v1839_v47 }
  0x6d   :  { %641 = vmatmul.mubr.bf16.gmra.mrb[36].mxu0 %v1799_v48  ;;  %769 = vmatmul.mubr.bf16.gmra.mrb[36].mxu1 %v1841_v49 }
  0x6e   :  { %1585 = vmatprep.mubr.msk.bf16.mxu0 %vm439_vm0, %v1803_v50  ;;  %1601 = vmatprep.mubr.msk.bf16.mxu1 %vm439_vm0, %v1842_v51 }
  0x75   :  { %649 = vmatmul.mubr.bf16.gmra.mrb[40].mxu0 %v1805_v52  ;;  %777 = vmatmul.mubr.bf16.gmra.mrb[40].mxu1 %v1844_v53 }
  0x76   :  { %1586 = vmatprep.mubr.msk.bf16.mxu0 %vm439_vm0, %v1809_v54  ;;  %1602 = vmatprep.mubr.msk.bf16.mxu1 %vm439_vm0, %v1845_v55 }
  0x7d   :  { %657 = vmatmul.mubr.bf16.gmra.mrb[44].mxu0 %v1811_v56  ;;  %785 = vmatmul.mubr.bf16.gmra.mrb[44].mxu1 %v1847_v57 }
  0x7e   :  { %1587 = vmatprep.mubr.msk.bf16.mxu0 %vm439_vm0, %v1815_v58  ;;  %1603 = vmatprep.mubr.msk.bf16.mxu1 %vm439_vm0, %v1848_v59 }
  0x85   :  { %665 = vmatmul.mubr.bf16.gmra.mrb[48].mxu0 %v1817_v60  ;;  %793 = vmatmul.mubr.bf16.gmra.mrb[48].mxu1 %v1850_v61 }
  0x86   :  { %1588 = vmatprep.mubr.msk.bf16.mxu0 %vm439_vm0, %v1821_v62  ;;  %1604 = vmatprep.mubr.msk.bf16.mxu1 %vm439_vm0, %v1851_v63 }
  0x8d   :  { %673 = vmatmul.mubr.bf16.gmra.mrb[52].mxu0 %v1823_v0  ;;  %801 = vmatmul.mubr.bf16.gmra.mrb[52].mxu1 %v1853_v1 }
  0x8e   :  { %1589 = vmatprep.mubr.msk.bf16.mxu0 %vm439_vm0, %v1827_v2  ;;  %1605 = vmatprep.mubr.msk.bf16.mxu1 %vm439_vm0, %v1854_v3 }
  0x95   :  { %681 = vmatmul.mubr.bf16.gmra.mrb[56].mxu0 %v1829_v4  ;;  %809 = vmatmul.mubr.bf16.gmra.mrb[56].mxu1 %v1856_v5 }
  0x96   :  { %1590 = vmatprep.mubr.msk.bf16.mxu0 %vm439_vm0, %v1833_v6  ;;  %1606 = vmatprep.mubr.msk.bf16.mxu1 %vm439_vm0, %v1857_v7 }
  0x9d   :  { %689 = vmatmul.mubr.bf16.gmra.mrb[60].mxu0 %v1835_v8  ;;  %817 = vmatmul.mubr.bf16.gmra.mrb[60].mxu1 %v1859_v9 }
  0xf8   :  { %v570_v10 = vpop.f32.mrb[0].mxu0  ;;  %v2138_v11 = vpop.f32.mrb[0].mxu1 }
  0xf9   :  { %v1671_v12 = vpack.c.bf16 %v570_v10, %v570_v10  ;;  %v1291_v13 = vmul.f32 %v570_v10, %v570_v10  ;;  %v572_v14 = vpop.f32.mrb[1].mxu0  ;;  %v1703_v15 = vpack.c.bf16 %v2138_v11, %v2138_v11  ;;  %v700_v16 = vpop.f32.mrb[1].mxu1  ;;  %v1154_v19 = vsel %vm439_vm0, %v570_v10, 0.0 }
  0xfa   :  { %v573_v17 = vpop.f32.mrb[2].mxu0  ;;  %v2142_v18 = vpop.f32.mrb[2].mxu1 }
  0xfb   :  { %1082 = vst.msk [vmem:[%s2770_s2] sm:$0xf] %vm1081_vm1, %v1671_v12  ;;  %v1672_v20 = vpack.c.bf16 %v573_v17, %v573_v17  ;;  %v1155_v21 = vsel %vm439_vm0, %v573_v17, 0.0  ;;  %v1292_v22 = vmul.f32 %v573_v17, %v573_v17  ;;  %v575_v23 = vpop.f32.mrb[3].mxu0  ;;  %1114 = vst.msk [vmem:[%s2770_s2 + $0x80] sm:$0xf] %vm1081_vm1, %v1703_v15  ;;  %v1704_v26 = vpack.c.bf16 %v2142_v18, %v2142_v18 }
  0xfc   :  { %v703_v24 = vpop.f32.mrb[3].mxu1  ;;  %v1156_v25 = vadd.f32 %v1155_v21, %v1154_v19  ;;  %v1355_v27 = vsel %vm439_vm0, %v1291_v13, 0.0 }
  0xfd   :  { %1083 = vst.msk [vmem:[%s2770_s2 + $0x4] sm:$0xf] %vm1081_vm1, %v1672_v20  ;;  %v1356_v28 = vsel %vm439_vm0, %v1292_v22, 0.0  ;;  %1115 = vst.msk [vmem:[%s2770_s2 + $0x84] sm:$0xf] %vm1081_vm1, %v1704_v26 }
  0xfe   :  { %v1357_v29 = vadd.f32 %v1356_v28, %v1355_v27 }
 0x100   :  { %v578_v30 = vpop.f32.mrb[4].mxu0  ;;  %v2166_v31 = vpop.f32.mrb[4].mxu1 }
 0x101   :  { %v1673_v32 = vpack.c.bf16 %v578_v30, %v578_v30  ;;  %v1157_v33 = vsel %vm439_vm0, %v578_v30, 0.0  ;;  %v1293_v34 = vmul.f32 %v578_v30, %v578_v30  ;;  %v580_v35 = vpop.f32.mrb[5].mxu0  ;;  %v1705_v36 = vpack.c.bf16 %v2166_v31, %v2166_v31  ;;  %v708_v37 = vpop.f32.mrb[5].mxu1 }
 0x102   :  { %v1158_v38 = vadd.f32 %v1157_v33, %v1156_v25  ;;  %v581_v39 = vpop.f32.mrb[6].mxu0  ;;  %v2171_v40 = vpop.f32.mrb[6].mxu1 }
 0x103   :  { %1084 = vst.msk [vmem:[%s2770_s2 + $0x8] sm:$0xf] %vm1081_vm1, %v1673_v32  ;;  %v1358_v41 = vsel %vm439_vm0, %v1293_v34, 0.0  ;;  %v1674_v42 = vpack.c.bf16 %v581_v39, %v581_v39  ;;  %v1159_v43 = vsel %vm439_vm0, %v581_v39, 0.0  ;;  %v1294_v44 = vmul.f32 %v581_v39, %v581_v39  ;;  %v583_v45 = vpop.f32.mrb[7].mxu0  ;;  %v711_v46 = vpop.f32.mrb[7].mxu1 }
 0x104   :  { %1116 = vst.msk [vmem:[%s2770_s2 + $0x88] sm:$0xf] %vm1081_vm1, %v1705_v36  ;;  %v1359_v47 = vadd.f32 %v1358_v41, %v1357_v29  ;;  %v1160_v48 = vadd.f32 %v1159_v43, %v1158_v38  ;;  %v1706_v49 = vpack.c.bf16 %v2171_v40, %v2171_v40 }
 0x105   :  { %1085 = vst.msk [vmem:[%s2770_s2 + $0xc] sm:$0xf] %vm1081_vm1, %v1674_v42  ;;  %v1360_v50 = vsel %vm439_vm0, %v1294_v44, 0.0 }
 0x106   :  { %v1361_v51 = vadd.f32 %v1360_v50, %v1359_v47  ;;  %1117 = vst.msk [vmem:[%s2770_s2 + $0x8c] sm:$0xf] %vm1081_vm1, %v1706_v49 }
 0x108   :  { %v586_v52 = vpop.f32.mrb[8].mxu0  ;;  %v2194_v53 = vpop.f32.mrb[8].mxu1 }
 0x109   :  { %v1675_v54 = vpack.c.bf16 %v586_v52, %v586_v52  ;;  %v1161_v55 = vsel %vm439_vm0, %v586_v52, 0.0  ;;  %v1295_v56 = vmul.f32 %v586_v52, %v586_v52  ;;  %v588_v57 = vpop.f32.mrb[9].mxu0  ;;  %v1707_v58 = vpack.c.bf16 %v2194_v53, %v2194_v53  ;;  %v716_v59 = vpop.f32.mrb[9].mxu1 }
 0x10a   :  { %v1162_v60 = vadd.f32 %v1161_v55, %v1160_v48  ;;  %v589_v61 = vpop.f32.mrb[10].mxu0  ;;  %v2199_v62 = vpop.f32.mrb[10].mxu1 }
 0x10b   :  { %1086 = vst.msk [vmem:[%s2770_s2 + $0x10] sm:$0xf] %vm1081_vm1, %v1675_v54  ;;  %v1362_v63 = vsel %vm439_vm0, %v1295_v56, 0.0  ;;  %v1676_v0 = vpack.c.bf16 %v589_v61, %v589_v61  ;;  %v1163_v1 = vsel %vm439_vm0, %v589_v61, 0.0  ;;  %v1296_v2 = vmul.f32 %v589_v61, %v589_v61  ;;  %v591_v3 = vpop.f32.mrb[11].mxu0  ;;  %v719_v4 = vpop.f32.mrb[11].mxu1 }
 0x10c   :  { %1118 = vst.msk [vmem:[%s2770_s2 + $0x90] sm:$0xf] %vm1081_vm1, %v1707_v58  ;;  %v1363_v5 = vadd.f32 %v1362_v63, %v1361_v51  ;;  %v1164_v6 = vadd.f32 %v1163_v1, %v1162_v60  ;;  %v1708_v7 = vpack.c.bf16 %v2199_v62, %v2199_v62 }
 0x10d   :  { %1087 = vst.msk [vmem:[%s2770_s2 + $0x14] sm:$0xf] %vm1081_vm1, %v1676_v0  ;;  %v1364_v8 = vsel %vm439_vm0, %v1296_v2, 0.0 }
 0x10e   :  { %v1365_v9 = vadd.f32 %v1364_v8, %v1363_v5  ;;  %1119 = vst.msk [vmem:[%s2770_s2 + $0x94] sm:$0xf] %vm1081_vm1, %v1708_v7 }
 0x110   :  { %v594_v10 = vpop.f32.mrb[12].mxu0  ;;  %v2222_v12 = vpop.f32.mrb[12].mxu1 }
 0x111   :  { %v1677_v13 = vpack.c.bf16 %v594_v10, %v594_v10  ;;  %v1165_v14 = vsel %vm439_vm0, %v594_v10, 0.0  ;;  %v1297_v15 = vmul.f32 %v594_v10, %v594_v10  ;;  %v596_v16 = vpop.f32.mrb[13].mxu0  ;;  %v1709_v17 = vpack.c.bf16 %v2222_v12, %v2222_v12  ;;  %v724_v19 = vpop.f32.mrb[13].mxu1 }
 0x112   :  { %v1166_v20 = vadd.f32 %v1165_v14, %v1164_v6  ;;  %v597_v21 = vpop.f32.mrb[14].mxu0  ;;  %v2227_v22 = vpop.f32.mrb[14].mxu1 }
 0x113   :  { %1088 = vst.msk [vmem:[%s2770_s2 + $0x18] sm:$0xf] %vm1081_vm1, %v1677_v13  ;;  %v1366_v23 = vsel %vm439_vm0, %v1297_v15, 0.0  ;;  %v1678_v24 = vpack.c.bf16 %v597_v21, %v597_v21  ;;  %v1167_v25 = vsel %vm439_vm0, %v597_v21, 0.0  ;;  %v1298_v26 = vmul.f32 %v597_v21, %v597_v21  ;;  %v599_v27 = vpop.f32.mrb[15].mxu0  ;;  %v727_v28 = vpop.f32.mrb[15].mxu1 }
 0x114   :  { %1120 = vst.msk [vmem:[%s2770_s2 + $0x98] sm:$0xf] %vm1081_vm1, %v1709_v17  ;;  %v1367_v29 = vadd.f32 %v1366_v23, %v1365_v9  ;;  %v1168_v30 = vadd.f32 %v1167_v25, %v1166_v20  ;;  %v1710_v32 = vpack.c.bf16 %v2227_v22, %v2227_v22 }
 0x115   :  { %1089 = vst.msk [vmem:[%s2770_s2 + $0x1c] sm:$0xf] %vm1081_vm1, %v1678_v24  ;;  %v1368_v33 = vsel %vm439_vm0, %v1298_v26, 0.0 }
 0x116   :  { %v1369_v34 = vadd.f32 %v1368_v33, %v1367_v29  ;;  %1121 = vst.msk [vmem:[%s2770_s2 + $0x9c] sm:$0xf] %vm1081_vm1, %v1710_v32 }
 0x118   :  { %v602_v35 = vpop.f32.mrb[16].mxu0  ;;  %v2250_v36 = vpop.f32.mrb[16].mxu1 }
 0x119   :  { %v1679_v37 = vpack.c.bf16 %v602_v35, %v602_v35  ;;  %v1169_v38 = vsel %vm439_vm0, %v602_v35, 0.0  ;;  %v1299_v39 = vmul.f32 %v602_v35, %v602_v35  ;;  %v604_v41 = vpop.f32.mrb[17].mxu0  ;;  %v1711_v42 = vpack.c.bf16 %v2250_v36, %v2250_v36  ;;  %v732_v43 = vpop.f32.mrb[17].mxu1 }
 0x11a   :  { %v1170_v44 = vadd.f32 %v1169_v38, %v1168_v30  ;;  %v605_v45 = vpop.f32.mrb[18].mxu0  ;;  %v2255_v46 = vpop.f32.mrb[18].mxu1 }
 0x11b   :  { %1090 = vst.msk [vmem:[%s2770_s2 + $0x20] sm:$0xf] %vm1081_vm1, %v1679_v37  ;;  %v1370_v47 = vsel %vm439_vm0, %v1299_v39, 0.0  ;;  %v1680_v48 = vpack.c.bf16 %v605_v45, %v605_v45  ;;  %v1171_v49 = vsel %vm439_vm0, %v605_v45, 0.0  ;;  %v1300_v50 = vmul.f32 %v605_v45, %v605_v45  ;;  %v607_v51 = vpop.f32.mrb[19].mxu0  ;;  %v735_v52 = vpop.f32.mrb[19].mxu1 }
 0x11c   :  { %1122 = vst.msk [vmem:[%s2770_s2 + $0xa0] sm:$0xf] %vm1081_vm1, %v1711_v42  ;;  %v1371_v54 = vadd.f32 %v1370_v47, %v1369_v34  ;;  %v1172_v55 = vadd.f32 %v1171_v49, %v1170_v44  ;;  %v1712_v56 = vpack.c.bf16 %v2255_v46, %v2255_v46 }
 0x11d   :  { %1091 = vst.msk [vmem:[%s2770_s2 + $0x24] sm:$0xf] %vm1081_vm1, %v1680_v48  ;;  %v1372_v57 = vsel %vm439_vm0, %v1300_v50, 0.0 }
 0x11e   :  { %v1373_v58 = vadd.f32 %v1372_v57, %v1371_v54  ;;  %1123 = vst.msk [vmem:[%s2770_s2 + $0xa4] sm:$0xf] %vm1081_vm1, %v1712_v56 }
 0x120   :  { %v610_v59 = vpop.f32.mrb[20].mxu0  ;;  %v2278_v60 = vpop.f32.mrb[20].mxu1 }
 0x121   :  { %v1681_v61 = vpack.c.bf16 %v610_v59, %v610_v59  ;;  %v1173_v63 = vsel %vm439_vm0, %v610_v59, 0.0  ;;  %v1301_v0 = vmul.f32 %v610_v59, %v610_v59  ;;  %v612_v1 = vpop.f32.mrb[21].mxu0  ;;  %v1713_v2 = vpack.c.bf16 %v2278_v60, %v2278_v60  ;;  %v740_v3 = vpop.f32.mrb[21].mxu1 }
 0x122   :  { %v1174_v4 = vadd.f32 %v1173_v63, %v1172_v55  ;;  %v613_v5 = vpop.f32.mrb[22].mxu0  ;;  %v2283_v6 = vpop.f32.mrb[22].mxu1 }
 0x123   :  { %1092 = vst.msk [vmem:[%s2770_s2 + $0x28] sm:$0xf] %vm1081_vm1, %v1681_v61  ;;  %v1374_v7 = vsel %vm439_vm0, %v1301_v0, 0.0  ;;  %v1682_v8 = vpack.c.bf16 %v613_v5, %v613_v5  ;;  %v1175_v9 = vsel %vm439_vm0, %v613_v5, 0.0  ;;  %v1302_v10 = vmul.f32 %v613_v5, %v613_v5  ;;  %v615_v13 = vpop.f32.mrb[23].mxu0  ;;  %v743_v14 = vpop.f32.mrb[23].mxu1 }
 0x124   :  { %1124 = vst.msk [vmem:[%s2770_s2 + $0xa8] sm:$0xf] %vm1081_vm1, %v1713_v2  ;;  %v1375_v15 = vadd.f32 %v1374_v7, %v1373_v58  ;;  %v1176_v16 = vadd.f32 %v1175_v9, %v1174_v4  ;;  %v1714_v17 = vpack.c.bf16 %v2283_v6, %v2283_v6 }
 0x125   :  { %1093 = vst.msk [vmem:[%s2770_s2 + $0x2c] sm:$0xf] %vm1081_vm1, %v1682_v8  ;;  %v1376_v19 = vsel %vm439_vm0, %v1302_v10, 0.0  ;;  %v1861_v10 = vmov 0.0  }
 0x126   :  { %v1377_v20 = vadd.f32 %v1376_v19, %v1375_v15  ;;  %1125 = vst.msk [vmem:[%s2770_s2 + $0xac] sm:$0xf] %vm1081_vm1, %v1714_v17 }
 0x127   :  { %1151 = vst.msk [vmem:[%s2771_s3] sm:$0x1] %vm1150_vm2, %v1861_v10  ;;  %1152 = vst.msk [vmem:[%s2772_s4] sm:$0x1] %vm1150_vm2, %v1861_v10 }
 0x128   :  { %v618_v21 = vpop.f32.mrb[24].mxu0  ;;  %v2306_v23 = vpop.f32.mrb[24].mxu1 }
 0x129   :  { %v1683_v24 = vpack.c.bf16 %v618_v21, %v618_v21  ;;  %v1177_v25 = vsel %vm439_vm0, %v618_v21, 0.0  ;;  %v1303_v26 = vmul.f32 %v618_v21, %v618_v21  ;;  %v620_v27 = vpop.f32.mrb[25].mxu0  ;;  %v1715_v28 = vpack.c.bf16 %v2306_v23, %v2306_v23  ;;  %v748_v29 = vpop.f32.mrb[25].mxu1 }
 0x12a   :  { %v1178_v30 = vadd.f32 %v1177_v25, %v1176_v16  ;;  %v621_v32 = vpop.f32.mrb[26].mxu0  ;;  %v2311_v33 = vpop.f32.mrb[26].mxu1 }
 0x12b   :  { %1094 = vst.msk [vmem:[%s2770_s2 + $0x30] sm:$0xf] %vm1081_vm1, %v1683_v24  ;;  %v1378_v34 = vsel %vm439_vm0, %v1303_v26, 0.0  ;;  %v1684_v35 = vpack.c.bf16 %v621_v32, %v621_v32  ;;  %v1179_v37 = vsel %vm439_vm0, %v621_v32, 0.0  ;;  %v1304_v38 = vmul.f32 %v621_v32, %v621_v32  ;;  %v623_v39 = vpop.f32.mrb[27].mxu0  ;;  %v751_v41 = vpop.f32.mrb[27].mxu1 }
 0x12c   :  { %1126 = vst.msk [vmem:[%s2770_s2 + $0xb0] sm:$0xf] %vm1081_vm1, %v1715_v28  ;;  %v1379_v42 = vadd.f32 %v1378_v34, %v1377_v20  ;;  %v1180_v43 = vadd.f32 %v1179_v37, %v1178_v30  ;;  %v1716_v44 = vpack.c.bf16 %v2311_v33, %v2311_v33 }
 0x12d   :  { %1095 = vst.msk [vmem:[%s2770_s2 + $0x34] sm:$0xf] %vm1081_vm1, %v1684_v35  ;;  %v1380_v45 = vsel %vm439_vm0, %v1304_v38, 0.0 }
 0x12e   :  { %v1381_v47 = vadd.f32 %v1380_v45, %v1379_v42  ;;  %1127 = vst.msk [vmem:[%s2770_s2 + $0xb4] sm:$0xf] %vm1081_vm1, %v1716_v44 }
 0x130   :  { %v626_v48 = vpop.f32.mrb[28].mxu0  ;;  %v2334_v49 = vpop.f32.mrb[28].mxu1 }
 0x131   :  { %v1685_v50 = vpack.c.bf16 %v626_v48, %v626_v48  ;;  %v1181_v51 = vsel %vm439_vm0, %v626_v48, 0.0  ;;  %v1305_v52 = vmul.f32 %v626_v48, %v626_v48  ;;  %v628_v54 = vpop.f32.mrb[29].mxu0  ;;  %v1717_v55 = vpack.c.bf16 %v2334_v49, %v2334_v49  ;;  %v756_v56 = vpop.f32.mrb[29].mxu1 }
 0x132   :  { %v1182_v57 = vadd.f32 %v1181_v51, %v1180_v43  ;;  %v629_v58 = vpop.f32.mrb[30].mxu0  ;;  %v2339_v59 = vpop.f32.mrb[30].mxu1 }
 0x133   :  { %1096 = vst.msk [vmem:[%s2770_s2 + $0x38] sm:$0xf] %vm1081_vm1, %v1685_v50  ;;  %v1382_v61 = vsel %vm439_vm0, %v1305_v52, 0.0  ;;  %v1686_v63 = vpack.c.bf16 %v629_v58, %v629_v58  ;;  %v1183_v0 = vsel %vm439_vm0, %v629_v58, 0.0  ;;  %v1306_v1 = vmul.f32 %v629_v58, %v629_v58  ;;  %v631_v2 = vpop.f32.mrb[31].mxu0  ;;  %v759_v3 = vpop.f32.mrb[31].mxu1 }
 0x134   :  { %1128 = vst.msk [vmem:[%s2770_s2 + $0xb8] sm:$0xf] %vm1081_vm1, %v1717_v55  ;;  %v1383_v4 = vadd.f32 %v1382_v61, %v1381_v47  ;;  %v1184_v5 = vadd.f32 %v1183_v0, %v1182_v57  ;;  %v1718_v7 = vpack.c.bf16 %v2339_v59, %v2339_v59 }
 0x135   :  { %1097 = vst.msk [vmem:[%s2770_s2 + $0x3c] sm:$0xf] %vm1081_vm1, %v1686_v63  ;;  %v1384_v8 = vsel %vm439_vm0, %v1306_v1, 0.0 }
 0x136   :  { %v1385_v9 = vadd.f32 %v1384_v8, %v1383_v4  ;;  %1129 = vst.msk [vmem:[%s2770_s2 + $0xbc] sm:$0xf] %vm1081_vm1, %v1718_v7 }
 0x138   :  { %v634_v13 = vpop.f32.mrb[32].mxu0  ;;  %v2370_v14 = vpop.f32.mrb[32].mxu1 }
 0x139   :  { %v1687_v15 = vpack.c.bf16 %v634_v13, %v634_v13  ;;  %v1185_v16 = vsel %vm439_vm0, %v634_v13, 0.0  ;;  %v1307_v17 = vmul.f32 %v634_v13, %v634_v13  ;;  %v636_v19 = vpop.f32.mrb[33].mxu0  ;;  %v1719_v20 = vpack.c.bf16 %v2370_v14, %v2370_v14  ;;  %v764_v21 = vpop.f32.mrb[33].mxu1 }
 0x13a   :  { %v1186_v24 = vadd.f32 %v1185_v16, %v1184_v5  ;;  %v637_v25 = vpop.f32.mrb[34].mxu0  ;;  %v2375_v26 = vpop.f32.mrb[34].mxu1 }
 0x13b   :  { %1098 = vst.msk [vmem:[%s2770_s2 + $0x40] sm:$0xf] %vm1081_vm1, %v1687_v15  ;;  %v1386_v27 = vsel %vm439_vm0, %v1307_v17, 0.0  ;;  %v1688_v28 = vpack.c.bf16 %v637_v25, %v637_v25  ;;  %v1187_v29 = vsel %vm439_vm0, %v637_v25, 0.0  ;;  %v1308_v30 = vmul.f32 %v637_v25, %v637_v25  ;;  %v639_v32 = vpop.f32.mrb[35].mxu0  ;;  %v767_v34 = vpop.f32.mrb[35].mxu1 }
 0x13c   :  { %1130 = vst.msk [vmem:[%s2770_s2 + $0xc0] sm:$0xf] %vm1081_vm1, %v1719_v20  ;;  %v1387_v35 = vadd.f32 %v1386_v27, %v1385_v9  ;;  %v1188_v37 = vadd.f32 %v1187_v29, %v1186_v24  ;;  %v1720_v38 = vpack.c.bf16 %v2375_v26, %v2375_v26 }
 0x13d   :  { %1099 = vst.msk [vmem:[%s2770_s2 + $0x44] sm:$0xf] %vm1081_vm1, %v1688_v28  ;;  %v1388_v39 = vsel %vm439_vm0, %v1308_v30, 0.0 }
 0x13e   :  { %v1389_v41 = vadd.f32 %v1388_v39, %v1387_v35  ;;  %1131 = vst.msk [vmem:[%s2770_s2 + $0xc4] sm:$0xf] %vm1081_vm1, %v1720_v38 }
 0x140   :  { %v642_v42 = vpop.f32.mrb[36].mxu0  ;;  %v2398_v43 = vpop.f32.mrb[36].mxu1 }
 0x141   :  { %v1689_v44 = vpack.c.bf16 %v642_v42, %v642_v42  ;;  %v1189_v45 = vsel %vm439_vm0, %v642_v42, 0.0  ;;  %v1309_v47 = vmul.f32 %v642_v42, %v642_v42  ;;  %v644_v48 = vpop.f32.mrb[37].mxu0  ;;  %v1721_v50 = vpack.c.bf16 %v2398_v43, %v2398_v43  ;;  %v772_v51 = vpop.f32.mrb[37].mxu1 }
 0x142   :  { %v1190_v52 = vadd.f32 %v1189_v45, %v1188_v37  ;;  %v645_v54 = vpop.f32.mrb[38].mxu0  ;;  %v2403_v55 = vpop.f32.mrb[38].mxu1 }
 0x143   :  { %1100 = vst.msk [vmem:[%s2770_s2 + $0x48] sm:$0xf] %vm1081_vm1, %v1689_v44  ;;  %v1390_v56 = vsel %vm439_vm0, %v1309_v47, 0.0  ;;  %v1690_v57 = vpack.c.bf16 %v645_v54, %v645_v54  ;;  %v1191_v58 = vsel %vm439_vm0, %v645_v54, 0.0  ;;  %v1310_v61 = vmul.f32 %v645_v54, %v645_v54  ;;  %v647_v63 = vpop.f32.mrb[39].mxu0  ;;  %v775_v0 = vpop.f32.mrb[39].mxu1 }
 0x144   :  { %1132 = vst.msk [vmem:[%s2770_s2 + $0xc8] sm:$0xf] %vm1081_vm1, %v1721_v50  ;;  %v1391_v1 = vadd.f32 %v1390_v56, %v1389_v41  ;;  %v1192_v2 = vadd.f32 %v1191_v58, %v1190_v52  ;;  %v1722_v3 = vpack.c.bf16 %v2403_v55, %v2403_v55 }
 0x145   :  { %1101 = vst.msk [vmem:[%s2770_s2 + $0x4c] sm:$0xf] %vm1081_vm1, %v1690_v57  ;;  %v1392_v4 = vsel %vm439_vm0, %v1310_v61, 0.0 }
 0x146   :  { %v1393_v5 = vadd.f32 %v1392_v4, %v1391_v1  ;;  %1133 = vst.msk [vmem:[%s2770_s2 + $0xcc] sm:$0xf] %vm1081_vm1, %v1722_v3 }
 0x148   :  { %v650_v7 = vpop.f32.mrb[40].mxu0  ;;  %v2426_v8 = vpop.f32.mrb[40].mxu1 }
 0x149   :  { %v1691_v9 = vpack.c.bf16 %v650_v7, %v650_v7  ;;  %v1193_v10 = vsel %vm439_vm0, %v650_v7, 0.0  ;;  %v1311_v13 = vmul.f32 %v650_v7, %v650_v7  ;;  %v652_v15 = vpop.f32.mrb[41].mxu0  ;;  %v1723_v16 = vpack.c.bf16 %v2426_v8, %v2426_v8  ;;  %v780_v17 = vpop.f32.mrb[41].mxu1 }
 0x14a   :  { %v1194_v19 = vadd.f32 %v1193_v10, %v1192_v2  ;;  %v653_v20 = vpop.f32.mrb[42].mxu0  ;;  %v2431_v21 = vpop.f32.mrb[42].mxu1 }
 0x14b   :  { %1102 = vst.msk [vmem:[%s2770_s2 + $0x50] sm:$0xf] %vm1081_vm1, %v1691_v9  ;;  %v1394_v24 = vsel %vm439_vm0, %v1311_v13, 0.0  ;;  %v1692_v25 = vpack.c.bf16 %v653_v20, %v653_v20  ;;  %v1195_v27 = vsel %vm439_vm0, %v653_v20, 0.0  ;;  %v1312_v28 = vmul.f32 %v653_v20, %v653_v20  ;;  %v655_v29 = vpop.f32.mrb[43].mxu0  ;;  %v783_v30 = vpop.f32.mrb[43].mxu1 }
 0x14c   :  { %1134 = vst.msk [vmem:[%s2770_s2 + $0xd0] sm:$0xf] %vm1081_vm1, %v1723_v16  ;;  %v1395_v32 = vadd.f32 %v1394_v24, %v1393_v5  ;;  %v1196_v34 = vadd.f32 %v1195_v27, %v1194_v19  ;;  %v1724_v35 = vpack.c.bf16 %v2431_v21, %v2431_v21 }
 0x14d   :  { %1103 = vst.msk [vmem:[%s2770_s2 + $0x54] sm:$0xf] %vm1081_vm1, %v1692_v25  ;;  %v1396_v37 = vsel %vm439_vm0, %v1312_v28, 0.0 }
 0x14e   :  { %v1397_v38 = vadd.f32 %v1396_v37, %v1395_v32  ;;  %1135 = vst.msk [vmem:[%s2770_s2 + $0xd4] sm:$0xf] %vm1081_vm1, %v1724_v35 }
 0x150   :  { %v658_v39 = vpop.f32.mrb[44].mxu0  ;;  %v2454_v41 = vpop.f32.mrb[44].mxu1 }
 0x151   :  { %v1693_v42 = vpack.c.bf16 %v658_v39, %v658_v39  ;;  %v1197_v44 = vsel %vm439_vm0, %v658_v39, 0.0  ;;  %v1313_v45 = vmul.f32 %v658_v39, %v658_v39  ;;  %v660_v47 = vpop.f32.mrb[45].mxu0  ;;  %v1725_v48 = vpack.c.bf16 %v2454_v41, %v2454_v41  ;;  %v788_v50 = vpop.f32.mrb[45].mxu1 }
 0x152   :  { %v1198_v51 = vadd.f32 %v1197_v44, %v1196_v34  ;;  %v661_v52 = vpop.f32.mrb[46].mxu0  ;;  %v2459_v54 = vpop.f32.mrb[46].mxu1 }
 0x153   :  { %1104 = vst.msk [vmem:[%s2770_s2 + $0x58] sm:$0xf] %vm1081_vm1, %v1693_v42  ;;  %v1398_v56 = vsel %vm439_vm0, %v1313_v45, 0.0  ;;  %v1694_v57 = vpack.c.bf16 %v661_v52, %v661_v52  ;;  %v1199_v58 = vsel %vm439_vm0, %v661_v52, 0.0  ;;  %v1314_v61 = vmul.f32 %v661_v52, %v661_v52  ;;  %v663_v63 = vpop.f32.mrb[47].mxu0  ;;  %v791_v0 = vpop.f32.mrb[47].mxu1 }
 0x154   :  { %1136 = vst.msk [vmem:[%s2770_s2 + $0xd8] sm:$0xf] %vm1081_vm1, %v1725_v48  ;;  %v1399_v1 = vadd.f32 %v1398_v56, %v1397_v38  ;;  %v1200_v2 = vadd.f32 %v1199_v58, %v1198_v51  ;;  %v1726_v3 = vpack.c.bf16 %v2459_v54, %v2459_v54 }
 0x155   :  { %1105 = vst.msk [vmem:[%s2770_s2 + $0x5c] sm:$0xf] %vm1081_vm1, %v1694_v57  ;;  %v1400_v4 = vsel %vm439_vm0, %v1314_v61, 0.0 }
 0x156   :  { %v1401_v5 = vadd.f32 %v1400_v4, %v1399_v1  ;;  %1137 = vst.msk [vmem:[%s2770_s2 + $0xdc] sm:$0xf] %vm1081_vm1, %v1726_v3 }
 0x158   :  { %v666_v7 = vpop.f32.mrb[48].mxu0  ;;  %v2482_v9 = vpop.f32.mrb[48].mxu1 }
 0x159   :  { %v1695_v10 = vpack.c.bf16 %v666_v7, %v666_v7  ;;  %v1201_v13 = vsel %vm439_vm0, %v666_v7, 0.0  ;;  %v1315_v15 = vmul.f32 %v666_v7, %v666_v7  ;;  %v668_v16 = vpop.f32.mrb[49].mxu0  ;;  %v1727_v17 = vpack.c.bf16 %v2482_v9, %v2482_v9  ;;  %v796_v19 = vpop.f32.mrb[49].mxu1 }
 0x15a   :  { %v1202_v20 = vadd.f32 %v1201_v13, %v1200_v2  ;;  %v669_v24 = vpop.f32.mrb[50].mxu0  ;;  %v2487_v25 = vpop.f32.mrb[50].mxu1 }
 0x15b   :  { %1106 = vst.msk [vmem:[%s2770_s2 + $0x60] sm:$0xf] %vm1081_vm1, %v1695_v10  ;;  %v1402_v27 = vsel %vm439_vm0, %v1315_v15, 0.0  ;;  %v1696_v28 = vpack.c.bf16 %v669_v24, %v669_v24  ;;  %v1203_v29 = vsel %vm439_vm0, %v669_v24, 0.0  ;;  %v1316_v30 = vmul.f32 %v669_v24, %v669_v24  ;;  %v671_v32 = vpop.f32.mrb[51].mxu0  ;;  %v799_v34 = vpop.f32.mrb[51].mxu1 }
 0x15c   :  { %1138 = vst.msk [vmem:[%s2770_s2 + $0xe0] sm:$0xf] %vm1081_vm1, %v1727_v17  ;;  %v1403_v35 = vadd.f32 %v1402_v27, %v1401_v5  ;;  %v1204_v37 = vadd.f32 %v1203_v29, %v1202_v20  ;;  %v1728_v38 = vpack.c.bf16 %v2487_v25, %v2487_v25 }
 0x15d   :  { %1107 = vst.msk [vmem:[%s2770_s2 + $0x64] sm:$0xf] %vm1081_vm1, %v1696_v28  ;;  %v1404_v39 = vsel %vm439_vm0, %v1316_v30, 0.0 }
 0x15e   :  { %v1405_v42 = vadd.f32 %v1404_v39, %v1403_v35  ;;  %1139 = vst.msk [vmem:[%s2770_s2 + $0xe4] sm:$0xf] %vm1081_vm1, %v1728_v38 }
 0x160   :  { %v674_v44 = vpop.f32.mrb[52].mxu0  ;;  %v2510_v45 = vpop.f32.mrb[52].mxu1 }
 0x161   :  { %v1697_v47 = vpack.c.bf16 %v674_v44, %v674_v44  ;;  %v1205_v48 = vsel %vm439_vm0, %v674_v44, 0.0  ;;  %v1317_v50 = vmul.f32 %v674_v44, %v674_v44  ;;  %v676_v51 = vpop.f32.mrb[53].mxu0  ;;  %v1729_v52 = vpack.c.bf16 %v2510_v45, %v2510_v45  ;;  %v804_v56 = vpop.f32.mrb[53].mxu1 }
 0x162   :  { %v1206_v57 = vadd.f32 %v1205_v48, %v1204_v37  ;;  %v677_v58 = vpop.f32.mrb[54].mxu0  ;;  %v2515_v61 = vpop.f32.mrb[54].mxu1 }
 0x163   :  { %1108 = vst.msk [vmem:[%s2770_s2 + $0x68] sm:$0xf] %vm1081_vm1, %v1697_v47  ;;  %v1406_v63 = vsel %vm439_vm0, %v1317_v50, 0.0  ;;  %v1698_v0 = vpack.c.bf16 %v677_v58, %v677_v58  ;;  %v1207_v1 = vsel %vm439_vm0, %v677_v58, 0.0  ;;  %v1318_v2 = vmul.f32 %v677_v58, %v677_v58  ;;  %v679_v3 = vpop.f32.mrb[55].mxu0  ;;  %v807_v4 = vpop.f32.mrb[55].mxu1 }
 0x164   :  { %1140 = vst.msk [vmem:[%s2770_s2 + $0xe8] sm:$0xf] %vm1081_vm1, %v1729_v52  ;;  %v1407_v5 = vadd.f32 %v1406_v63, %v1405_v42  ;;  %v1208_v7 = vadd.f32 %v1207_v1, %v1206_v57  ;;  %v1730_v10 = vpack.c.bf16 %v2515_v61, %v2515_v61  ;;  %v1323_v4 = vmul.f32 %v2138_v11, %v2138_v11 }
 0x165   :  { %1109 = vst.msk [vmem:[%s2770_s2 + $0x6c] sm:$0xf] %vm1081_vm1, %v1698_v0  ;;  %v1408_v13 = vsel %vm439_vm0, %v1318_v2, 0.0 }
 0x166   :  { %v1409_v15 = vadd.f32 %v1408_v13, %v1407_v5  ;;  %1141 = vst.msk [vmem:[%s2770_s2 + $0xec] sm:$0xf] %vm1081_vm1, %v1730_v10 }
 0x168   :  { %v682_v16 = vpop.f32.mrb[56].mxu0  ;;  %v2538_v17 = vpop.f32.mrb[56].mxu1 }
 0x169   :  { %v1699_v19 = vpack.c.bf16 %v682_v16, %v682_v16  ;;  %v1209_v20 = vsel %vm439_vm0, %v682_v16, 0.0  ;;  %v1319_v24 = vmul.f32 %v682_v16, %v682_v16  ;;  %v684_v27 = vpop.f32.mrb[57].mxu0  ;;  %v1731_v28 = vpack.c.bf16 %v2538_v17, %v2538_v17  ;;  %v812_v29 = vpop.f32.mrb[57].mxu1 }
 0x16a   :  { %v1210_v30 = vadd.f32 %v1209_v20, %v1208_v7  ;;  %v685_v32 = vpop.f32.mrb[58].mxu0  ;;  %v2543_v34 = vpop.f32.mrb[58].mxu1 }
 0x16b   :  { %1110 = vst.msk [vmem:[%s2770_s2 + $0x70] sm:$0xf] %vm1081_vm1, %v1699_v19  ;;  %v1410_v35 = vsel %vm439_vm0, %v1319_v24, 0.0  ;;  %v1700_v37 = vpack.c.bf16 %v685_v32, %v685_v32  ;;  %v1211_v38 = vsel %vm439_vm0, %v685_v32, 0.0  ;;  %v1320_v39 = vmul.f32 %v685_v32, %v685_v32  ;;  %v687_v42 = vpop.f32.mrb[59].mxu0  ;;  %v815_v44 = vpop.f32.mrb[59].mxu1 }
 0x16c   :  { %1142 = vst.msk [vmem:[%s2770_s2 + $0xf0] sm:$0xf] %vm1081_vm1, %v1731_v28  ;;  %v1411_v47 = vadd.f32 %v1410_v35, %v1409_v15  ;;  %v1212_v48 = vadd.f32 %v1211_v38, %v1210_v30  ;;  %v1732_v50 = vpack.c.bf16 %v2543_v34, %v2543_v34  ;;  %v1217_v30 = vsel %vm439_vm0, %v2138_v11, 0.0 }
 0x16d   :  { %1111 = vst.msk [vmem:[%s2770_s2 + $0x74] sm:$0xf] %vm1081_vm1, %v1700_v37  ;;  %v1412_v51 = vsel %vm439_vm0, %v1320_v39, 0.0  ;;  %v1324_v32 = vmul.f32 %v2142_v18, %v2142_v18  ;;  %v1418_v39 = vsel %vm439_vm0, %v1323_v4, 0.0  ;;  %v1219_v11 = vsel %vm439_vm0, %v2142_v18, 0.0 }
 0x16e   :  { %v1413_v52 = vadd.f32 %v1412_v51, %v1411_v47  ;;  %1143 = vst.msk [vmem:[%s2770_s2 + $0xf4] sm:$0xf] %vm1081_vm1, %v1732_v50  ;;  %v1325_v42 = vmul.f32 %v2166_v31, %v2166_v31  ;;  %v1221_v50 = vsel %vm439_vm0, %v2166_v31, 0.0  ;;  %v1326_v51 = vmul.f32 %v2171_v40, %v2171_v40 }
 0x16f   :  { %v1223_v18 = vsel %vm439_vm0, %v2171_v40, 0.0  ;;  %v1225_v31 = vsel %vm439_vm0, %v2194_v53, 0.0  ;;  %v1227_v40 = vsel %vm439_vm0, %v2199_v62, 0.0 }
 0x170   :  { %v690_v56 = vpop.f32.mrb[60].mxu0  ;;  %v2566_v57 = vpop.f32.mrb[60].mxu1 }
 0x171   :  { %v1701_v58 = vpack.c.bf16 %v690_v56, %v690_v56  ;;  %v1213_v63 = vsel %vm439_vm0, %v690_v56, 0.0  ;;  %v1321_v0 = vmul.f32 %v690_v56, %v690_v56  ;;  %v692_v1 = vpop.f32.mrb[61].mxu0  ;;  %v1733_v2 = vpack.c.bf16 %v2566_v57, %v2566_v57  ;;  %v820_v3 = vpop.f32.mrb[61].mxu1 }
 0x172   :  { %v1214_v5 = vadd.f32 %v1213_v63, %v1212_v48  ;;  %v693_v7 = vpop.f32.mrb[62].mxu0  ;;  %v2573_v10 = vpop.f32.mrb[62].mxu1  ;;  %v1420_v48 = vsel %vm439_vm0, %v1324_v32, 0.0  ;;  %v1327_v63 = vmul.f32 %v2194_v53, %v2194_v53  ;;  %v1328_v3 = vmul.f32 %v2199_v62, %v2199_v62 }
 0x173   :  { %1112 = vst.msk [vmem:[%s2770_s2 + $0x78] sm:$0xf] %vm1081_vm1, %v1701_v58  ;;  %v1414_v13 = vsel %vm439_vm0, %v1321_v0, 0.0  ;;  %v1702_v15 = vpack.c.bf16 %v693_v7, %v693_v7  ;;  %v1215_v16 = vsel %vm439_vm0, %v693_v7, 0.0  ;;  %v1322_v19 = vmul.f32 %v693_v7, %v693_v7  ;;  %v695_v20 = vpop.f32.mrb[63].mxu0  ;;  %v823_v24 = vpop.f32.mrb[63].mxu1 }
 0x174   :  { %1144 = vst.msk [vmem:[%s2770_s2 + $0xf8] sm:$0xf] %vm1081_vm1, %v1733_v2  ;;  %v1415_v27 = vadd.f32 %v1414_v13, %v1413_v52  ;;  %v1216_v28 = vadd.f32 %v1215_v16, %v1214_v5  ;;  %v1734_v29 = vpack.c.bf16 %v2573_v10, %v2573_v10  ;;  %v1422_v58 = vsel %vm439_vm0, %v1325_v42, 0.0 }
 0x175   :  { %1113 = vst.msk [vmem:[%s2770_s2 + $0x7c] sm:$0xf] %vm1081_vm1, %v1702_v15  ;;  %v1416_v35 = vsel %vm439_vm0, %v1322_v19, 0.0  ;;  %v1424_v2 = vsel %vm439_vm0, %v1326_v51, 0.0  ;;  %v1426_v7 = vsel %vm439_vm0, %v1327_v63, 0.0  ;;  %v1329_v13 = vmul.f32 %v2222_v12, %v2222_v12 }
 0x176   :  { %v1218_v37 = vadd.f32 %v1217_v30, %v1216_v28  ;;  %v1417_v38 = vadd.f32 %v1416_v35, %v1415_v27  ;;  %1145 = vst.msk [vmem:[%s2770_s2 + $0xfc] sm:$0xf] %vm1081_vm1, %v1734_v29  ;;  %v1428_v19 = vsel %vm439_vm0, %v1328_v3, 0.0  ;;  %v1229_v53 = vsel %vm439_vm0, %v2222_v12, 0.0 }
 0x177   :  { %v1330_v20 = vmul.f32 %v2227_v22, %v2227_v22  ;;  %v1430_v28 = vsel %vm439_vm0, %v1329_v13, 0.0  ;;  %v1231_v62 = vsel %vm439_vm0, %v2227_v22, 0.0  ;;  %v1331_v29 = vmul.f32 %v2250_v36, %v2250_v36 }
 0x178   :  { %v1220_v44 = vadd.f32 %v1219_v11, %v1218_v37  ;;  %v1419_v47 = vadd.f32 %v1418_v39, %v1417_v38  ;;  %v1233_v12 = vsel %vm439_vm0, %v2250_v36, 0.0  ;;  %v1332_v37 = vmul.f32 %v2255_v46, %v2255_v46 }
 0x179   :  { %v1432_v35 = vsel %vm439_vm0, %v1330_v20, 0.0  ;;  %v1434_v11 = vsel %vm439_vm0, %v1331_v29, 0.0  ;;  %v1235_v22 = vsel %vm439_vm0, %v2255_v46, 0.0  ;;  %v1333_v42 = vmul.f32 %v2278_v60, %v2278_v60 }
 0x17a   :  { %v1222_v52 = vadd.f32 %v1221_v50, %v1220_v44  ;;  %v1421_v56 = vadd.f32 %v1420_v48, %v1419_v47  ;;  %v1436_v48 = vsel %vm439_vm0, %v1332_v37, 0.0  ;;  %v1237_v36 = vsel %vm439_vm0, %v2278_v60, 0.0 }
 0x17b   :  { %v1334_v50 = vmul.f32 %v2283_v6, %v2283_v6  ;;  %v1239_v46 = vsel %vm439_vm0, %v2283_v6, 0.0  ;;  %v1241_v60 = vsel %vm439_vm0, %v2306_v23, 0.0  ;;  %v1243_v6 = vsel %vm439_vm0, %v2311_v33, 0.0 }
 0x17c   :  { %v1224_v0 = vadd.f32 %v1223_v18, %v1222_v52  ;;  %v1423_v1 = vadd.f32 %v1422_v58, %v1421_v56  ;;  %v1438_v56 = vsel %vm439_vm0, %v1333_v42, 0.0  ;;  %v1335_v58 = vmul.f32 %v2306_v23, %v2306_v23 }
 0x17d   :  { %v1245_v23 = vsel %vm439_vm0, %v2334_v49, 0.0  ;;  %v1338_v13 = vmul.f32 %v2339_v59, %v2339_v59  ;;  %v1343_v42 = vmul.f32 %v2426_v8, %v2426_v8 }
 0x17e   :  { %v1226_v4 = vadd.f32 %v1225_v31, %v1224_v0  ;;  %v1425_v5 = vadd.f32 %v1424_v2, %v1423_v1  ;;  %v1440_v0 = vsel %vm439_vm0, %v1334_v50, 0.0  ;;  %v1336_v1 = vmul.f32 %v2311_v33, %v2311_v33 }
 0x17f   :  { %v1442_v3 = vsel %vm439_vm0, %v1335_v58, 0.0  ;;  %v1247_v33 = vsel %vm439_vm0, %v2339_v59, 0.0  ;;  %v1251_v59 = vsel %vm439_vm0, %v2375_v26, 0.0 }
 0x180   :  { %v1228_v15 = vadd.f32 %v1227_v40, %v1226_v4  ;;  %v1427_v16 = vadd.f32 %v1426_v7, %v1425_v5  ;;  %v1337_v4 = vmul.f32 %v2334_v49, %v2334_v49  ;;  %v1444_v40 = vsel %vm439_vm0, %v1336_v1, 0.0 }
 0x181   :  { %v1249_v49 = vsel %vm439_vm0, %v2370_v14, 0.0 }
 0x182   :  { %v1230_v24 = vadd.f32 %v1229_v53, %v1228_v15  ;;  %v1429_v27 = vadd.f32 %v1428_v19, %v1427_v16  ;;  %v1446_v19 = vsel %vm439_vm0, %v1337_v4, 0.0  ;;  %v1339_v53 = vmul.f32 %v2370_v14, %v2370_v14 }
 0x183   :  { %v1253_v14 = vsel %vm439_vm0, %v2398_v43, 0.0  ;;  %v1348_v4 = vmul.f32 %v2487_v25, %v2487_v25 }
 0x184   :  { %v1232_v30 = vadd.f32 %v1231_v62, %v1230_v24  ;;  %v1431_v32 = vadd.f32 %v1430_v28, %v1429_v27  ;;  %v1448_v27 = vsel %vm439_vm0, %v1338_v13, 0.0  ;;  %v1340_v28 = vmul.f32 %v2375_v26, %v2375_v26 }
 0x185   :  { %v1255_v26 = vsel %vm439_vm0, %v2403_v55, 0.0 }
 0x186   :  { %v1433_v38 = vadd.f32 %v1432_v35, %v1431_v32  ;;  %v1234_v39 = vadd.f32 %v1233_v12, %v1232_v30  ;;  %v1450_v30 = vsel %vm439_vm0, %v1339_v53, 0.0  ;;  %v1341_v32 = vmul.f32 %v2398_v43, %v2398_v43 }
 0x187   :  { %v1452_v37 = vsel %vm439_vm0, %v1340_v28, 0.0  ;;  %v1257_v43 = vsel %vm439_vm0, %v2426_v8, 0.0  ;;  %v1261_v8 = vsel %vm439_vm0, %v2454_v41, 0.0 }
 0x188   :  { %v1236_v44 = vadd.f32 %v1235_v22, %v1234_v39  ;;  %v1435_v47 = vadd.f32 %v1434_v11, %v1433_v38  ;;  %v1342_v38 = vmul.f32 %v2403_v55, %v2403_v55  ;;  %v1454_v22 = vsel %vm439_vm0, %v1341_v32, 0.0 }
 0x189   :  { %v1259_v55 = vsel %vm439_vm0, %v2431_v21, 0.0  ;;  %v1275_v32 = vsel %vm439_vm0, %v2543_v34, 0.0 }
 0x18a   :  { %v1238_v51 = vadd.f32 %v1237_v36, %v1236_v44  ;;  %v1437_v52 = vadd.f32 %v1436_v48, %v1435_v47  ;;  %v1456_v48 = vsel %vm439_vm0, %v1342_v38, 0.0  ;;  %v1344_v36 = vmul.f32 %v2431_v21, %v2431_v21 }
 0x18b   :  { %v1263_v21 = vsel %vm439_vm0, %v2459_v54, 0.0  ;;  %v1354_v38 = vmul.f32 %v2573_v10, %v2573_v10 }
 0x18c   :  { %v1240_v18 = vadd.f32 %v1239_v46, %v1238_v51  ;;  %v1439_v63 = vadd.f32 %v1438_v56, %v1437_v52  ;;  %v1458_v52 = vsel %vm439_vm0, %v1343_v42, 0.0  ;;  %v1345_v56 = vmul.f32 %v2454_v41, %v2454_v41 }
 0x18d   :  { %v1265_v41 = vsel %vm439_vm0, %v2482_v9, 0.0 }
 0x18e   :  { %v1242_v2 = vadd.f32 %v1241_v60, %v1240_v18  ;;  %v1441_v31 = vadd.f32 %v1440_v0, %v1439_v63  ;;  %v1460_v18 = vsel %vm439_vm0, %v1344_v36, 0.0  ;;  %v1346_v63 = vmul.f32 %v2459_v54, %v2459_v54 }
 0x18f   :  { %v1462_v1 = vsel %vm439_vm0, %v1345_v56, 0.0  ;;  %v1267_v54 = vsel %vm439_vm0, %v2487_v25, 0.0  ;;  %v1271_v25 = vsel %vm439_vm0, %v2515_v61, 0.0  ;;  %v1153_v56 = vld [vmem:[%s2771_s3] sm:$0x1] }
 0x190   :  { %v1244_v5 = vadd.f32 %v1243_v6, %v1242_v2  ;;  %v1443_v7 = vadd.f32 %v1442_v3, %v1441_v31  ;;  %v1347_v2 = vmul.f32 %v2482_v9, %v2482_v9  ;;  %v1464_v6 = vsel %vm439_vm0, %v1346_v63, 0.0 }
 0x191   :  { %v1269_v9 = vsel %vm439_vm0, %v2510_v45, 0.0 }
 0x192   :  { %v1246_v15 = vadd.f32 %v1245_v23, %v1244_v5  ;;  %v1445_v16 = vadd.f32 %v1444_v40, %v1443_v7  ;;  %v1466_v40 = vsel %vm439_vm0, %v1347_v2, 0.0  ;;  %v1349_v23 = vmul.f32 %v2510_v45, %v2510_v45 }
 0x193   :  { %v1273_v45 = vsel %vm439_vm0, %v2538_v17, 0.0 }
 0x194   :  { %v1248_v20 = vadd.f32 %v1247_v33, %v1246_v15  ;;  %v1447_v24 = vadd.f32 %v1446_v19, %v1445_v16  ;;  %v1468_v16 = vsel %vm439_vm0, %v1348_v4, 0.0  ;;  %v1350_v19 = vmul.f32 %v2515_v61, %v2515_v61 }
 0x196   :  { %v1250_v62 = vadd.f32 %v1249_v49, %v1248_v20  ;;  %v1449_v29 = vadd.f32 %v1448_v27, %v1447_v24  ;;  %v1470_v20 = vsel %vm439_vm0, %v1349_v23, 0.0  ;;  %v1351_v24 = vmul.f32 %v2538_v17, %v2538_v17 }
 0x197   :  { %v1472_v28 = vsel %vm439_vm0, %v1350_v19, 0.0 }
 0x198   :  { %v1451_v35 = vadd.f32 %v1450_v30, %v1449_v29  ;;  %v1252_v12 = vadd.f32 %v1251_v59, %v1250_v62  ;;  %v1352_v62 = vmul.f32 %v2543_v34, %v2543_v34  ;;  %v1353_v29 = vmul.f32 %v2566_v57, %v2566_v57 }
 0x199   :  { %v1474_v61 = vsel %vm439_vm0, %v1351_v24, 0.0  ;;  %v1480_v34 = vsel %vm439_vm0, %v1354_v38, 0.0 }
 0x19a   :  { %v1453_v39 = vadd.f32 %v1452_v37, %v1451_v35  ;;  %v1254_v11 = vadd.f32 %v1253_v14, %v1252_v12  ;;  %v1277_v35 = vsel %vm439_vm0, %v2566_v57, 0.0  ;;  %v1476_v17 = vsel %vm439_vm0, %v1352_v62, 0.0 }
 0x19b   :  { %v1478_v14 = vsel %vm439_vm0, %v1353_v29, 0.0 }
 0x19c   :  { %v1455_v44 = vadd.f32 %v1454_v22, %v1453_v39  ;;  %v1256_v47 = vadd.f32 %v1255_v26, %v1254_v11  ;;  %v1279_v22 = vsel %vm439_vm0, %v2573_v10, 0.0 }
 0x19e   :  { %v1457_v50 = vadd.f32 %v1456_v48, %v1455_v44  ;;  %v1258_v51 = vadd.f32 %v1257_v43, %v1256_v47 }
 0x1a0   :  { %v1459_v46 = vadd.f32 %v1458_v52, %v1457_v50  ;;  %v1260_v58 = vadd.f32 %v1259_v55, %v1258_v51 }
 0x1a2   :  { %v1461_v0 = vadd.f32 %v1460_v18, %v1459_v46  ;;  %v1262_v60 = vadd.f32 %v1261_v8, %v1260_v58  ;;  %v1290_v58 = vld [vmem:[%s2772_s4] sm:$0x1] }
 0x1a4   :  { %v1463_v31 = vadd.f32 %v1462_v1, %v1461_v0  ;;  %v1264_v3 = vadd.f32 %v1263_v21, %v1262_v60 }
 0x1a6   :  { %v1465_v5 = vadd.f32 %v1464_v6, %v1463_v31  ;;  %v1266_v7 = vadd.f32 %v1265_v41, %v1264_v3 }
 0x1a8   :  { %v1467_v13 = vadd.f32 %v1466_v40, %v1465_v5  ;;  %v1268_v15 = vadd.f32 %v1267_v54, %v1266_v7 }
 0x1aa   :  { %v1469_v33 = vadd.f32 %v1468_v16, %v1467_v13  ;;  %v1270_v53 = vadd.f32 %v1269_v9, %v1268_v15 }
 0x1ac   :  { %v1471_v27 = vadd.f32 %v1470_v20, %v1469_v33  ;;  %v1272_v49 = vadd.f32 %v1271_v25, %v1270_v53 }
 0x1ae   :  { %v1473_v30 = vadd.f32 %v1472_v28, %v1471_v27  ;;  %v1274_v59 = vadd.f32 %v1273_v45, %v1272_v49 }
 0x1b0   :  { %v1475_v12 = vadd.f32 %v1474_v61, %v1473_v30  ;;  %v1276_v37 = vadd.f32 %v1275_v32, %v1274_v59 }
 0x1b2   :  { %v1477_v39 = vadd.f32 %v1476_v17, %v1475_v12  ;;  %v1278_v11 = vadd.f32 %v1277_v35, %v1276_v37 }
 0x1b4   :  { %v1479_v26 = vadd.f32 %v1478_v14, %v1477_v39  ;;  %v1280_v42 = vadd.f32 %v1279_v22, %v1278_v11 }
 0x1b6   :  { %v1281_v44 = vrot.slane %v1280_v42, 4  ;;  %v1481_v57 = vadd.f32 %v1480_v34, %v1479_v26 }
 0x1b8   :  { %v1282_v47 = vadd.f32 %v1281_v44, %v1280_v42  ;;  %v1482_v48 = vrot.slane %v1481_v57, 4 }
 0x1ba   :  { %v1283_v43 = vrot.slane %v1282_v47, 2  ;;  %v1483_v36 = vadd.f32 %v1482_v48, %v1481_v57 }
 0x1bc   :  { %v1284_v50 = vadd.f32 %v1283_v43, %v1282_v47  ;;  %v1484_v51 = vrot.slane %v1483_v36, 2 }
 0x1be   :  { %v1285_v52 = vrot.slane %v1284_v50, 1  ;;  %v1485_v55 = vadd.f32 %v1484_v51, %v1483_v36 }
 0x1c0   :  { %v1286_v46 = vadd.f32 %v1285_v52, %v1284_v50  ;;  %v1486_v10 = vrot.slane %v1485_v55, 1 }
 0x1c2   :  { %v1287_v18 = vadd.f32 %v1286_v46, %v1153_v56  ;;  %v1487_v8 = vadd.f32 %v1486_v10, %v1485_v55 }
 0x1c4   :  { %1289 = vst.msk [vmem:[%s2771_s3] sm:$0x1] %vm1150_vm2, %v1287_v18  ;;  %v1488_v63 = vadd.f32 %v1487_v8, %v1290_v58 }
 0x1c6   :  { %1489 = vst.msk [vmem:[%s2772_s4] sm:$0x1] %vm1150_vm2, %v1488_v63 }

// kernel: forward.26
= control target key start
LH: loop header
LB: loop body
LE: loop exit
PB: predicated region body
PF: predicated region fallthrough
CT: control target
= control target key end

     0   :  { %vm79_vm0 = vcmask 130048   ;;  %vm286_vm1 = vcmask 253952   ;;  %v487_v9 = vmov 0.0   ;;  %vm265_vm2 = vcmask 257024   ;;  %s708_s1 = inlined_call_operand.vmem [shape: bf16[16,32], index: 1, kind: input, shape index: {}]   ;;  %s709_s0 = inlined_call_operand.vmem [shape: bf16[128,16], index: 0, kind: input, shape index: {}]   ;;  %s710_s3 = inlined_call_operand.vmem [shape: f32[1,32], index: 3, kind: output, shape index: {1}]   ;;  %s711_s4 = inlined_call_operand.vmem [shape: f32[1,32], index: 4, kind: output, shape index: {2}]   ;;  %s712_s2 = inlined_call_operand.vmem [shape: bf16[128,32], index: 2, kind: output, shape index: {0}]  }
   0x1   :  { %v478_v0 = vld [vmem:[%s708_s1] sm:$0xff]   ;;  %v480_v2 = vld [vmem:[%s709_s0 + $0x8] sm:$0xff]   ;;  %v481_v3 = vld [vmem:[%s709_s0 + $0x10] sm:$0xff]   ;;  %287 = vst.msk [vmem:[%s710_s3] sm:$0x1] %vm286_vm1, %v487_v9  ;;  %vm290_vm3 = vcmask 261120  }
   0x2   :  { %v479_v1 = vld [vmem:[%s709_s0] sm:$0xff]   ;;  %457 = vmatprep.subr.bf16.mxu0 %v478_v0  ;;  %475 = vmatprep.subr.bf16.mxu1 %v478_v0  ;;  %v484_v5 = vld [vmem:[%s709_s0 + $0x28] sm:$0xff]   ;;  %v485_v6 = vld [vmem:[%s709_s0 + $0x30] sm:$0xff]   ;;  %288 = vst.msk [vmem:[%s711_s4] sm:$0x1] %vm286_vm1, %v487_v9 }
   0x3   :  { %458 = vmatpush3.bf16.msra.mxu0 %v478_v0  ;;  %459 = vmatprep.mubr.msk.bf16.mxu0 %vm79_vm0, %v479_v1  ;;  %v483_v4 = vld [vmem:[%s709_s0 + $0x20] sm:$0xff]   ;;  %v482_v7 = vld [vmem:[%s709_s0 + $0x18] sm:$0xff]  }
   0x4   :  { %476 = vmatpush3.bf16.msra.mxu1 %v478_v0  ;;  %467 = vmatprep.mubr.msk.bf16.mxu1 %vm79_vm0, %v483_v4  ;;  %v486_v8 = vld [vmem:[%s709_s0 + $0x38] sm:$0xff]  }
   0x6   :  { %460 = vmatmul.mubr.msk.bf16.vlgmr.msra.gmra.mrb[0].mxu0 %vm79_vm0, %v480_v2 }
   0x7   :  { %463 = vmatprep.mubr.msk.bf16.mxu0 %vm79_vm0, %v481_v3  ;;  %468 = vmatmul.mubr.msk.bf16.vlgmr.msra.gmra.mrb[0].mxu1 %vm79_vm0, %v484_v5 }
   0x8   :  { %471 = vmatprep.mubr.msk.bf16.mxu1 %vm79_vm0, %v485_v6 }
   0xe   :  { %464 = vmatmul.mubr.msk.bf16.gmra.mrb[4].mxu0 %vm79_vm0, %v482_v7 }
   0xf   :  { %472 = vmatmul.mubr.msk.bf16.gmra.mrb[4].mxu1 %vm79_vm0, %v486_v8 }
  0xd9   :  { %v461_v10 = vpop.f32.mrb[0].mxu0 }
  0xda   :  { %v434_v11 = vpack.c.bf16 %v461_v10, %v461_v10  ;;  %v138_v12 = vpop.f32.mrb[1].mxu0  ;;  %v556_v16 = vpop.f32.mrb[0].mxu1  ;;  %v334_v17 = vmul.f32 %v461_v10, %v461_v10  ;;  %v294_v30 = vsel %vm290_vm3, %v461_v10, 0.0 }
  0xdb   :  { %v432_v13 = vpack.c.bf16 %v138_v12, %v138_v12  ;;  %v332_v14 = vmul.f32 %v138_v12, %v138_v12  ;;  %v462_v15 = vpop.f32.mrb[2].mxu0  ;;  %v562_v20 = vpop.f32.mrb[1].mxu1  ;;  %v291_v21 = vsel %vm290_vm3, %v138_v12, 0.0  ;;  %v442_v28 = vpack.c.bf16 %v556_v16, %v556_v16 }
  0xdc   :  { %268 = vst.msk [vmem:[%s712_s2 + $0x8] sm:$0xf] %vm265_vm2, %v434_v11  ;;  %v435_v18 = vpack.c.bf16 %v462_v15, %v462_v15  ;;  %v141_v19 = vpop.f32.mrb[3].mxu0  ;;  %v570_v25 = vpop.f32.mrb[2].mxu1  ;;  %v335_v26 = vmul.f32 %v462_v15, %v462_v15  ;;  %v440_v33 = vpack.c.bf16 %v562_v20, %v562_v20  ;;  %v351_v37 = vsel %vm290_vm3, %v334_v17, 0.0 }
  0xdd   :  { %266 = vst.msk [vmem:[%s712_s2] sm:$0xf] %vm265_vm2, %v432_v13  ;;  %v433_v22 = vpack.c.bf16 %v141_v19, %v141_v19  ;;  %v292_v23 = vsel %vm290_vm3, %v141_v19, 0.0  ;;  %v333_v24 = vmul.f32 %v141_v19, %v141_v19  ;;  %v578_v29 = vpop.f32.mrb[3].mxu1  ;;  %v348_v31 = vsel %vm290_vm3, %v332_v14, 0.0 }
  0xde   :  { %269 = vst.msk [vmem:[%s712_s2 + $0xc] sm:$0xf] %vm265_vm2, %v435_v18  ;;  %v293_v27 = vadd.f32 %v292_v23, %v291_v21  ;;  %276 = vst.msk [vmem:[%s712_s2 + $0x28] sm:$0xf] %vm265_vm2, %v442_v28  ;;  %v443_v36 = vpack.c.bf16 %v570_v25, %v570_v25  ;;  %v441_v39 = vpack.c.bf16 %v578_v29, %v578_v29  ;;  %v296_v40 = vsel %vm290_vm3, %v462_v15, 0.0 }
  0xdf   :  { %267 = vst.msk [vmem:[%s712_s2 + $0x4] sm:$0xf] %vm265_vm2, %v433_v22  ;;  %v349_v32 = vsel %vm290_vm3, %v333_v24, 0.0  ;;  %274 = vst.msk [vmem:[%s712_s2 + $0x20] sm:$0xf] %vm265_vm2, %v440_v33  ;;  %v353_v41 = vsel %vm290_vm3, %v335_v26, 0.0  ;;  %v340_v1 = vmul.f32 %v562_v20, %v562_v20  ;;  %v341_v18 = vmul.f32 %v578_v29, %v578_v29 }
  0xe0   :  { %v295_v34 = vadd.f32 %v294_v30, %v293_v27  ;;  %v350_v35 = vadd.f32 %v349_v32, %v348_v31  ;;  %277 = vst.msk [vmem:[%s712_s2 + $0x2c] sm:$0xf] %vm265_vm2, %v443_v36  ;;  %275 = vst.msk [vmem:[%s712_s2 + $0x24] sm:$0xf] %vm265_vm2, %v441_v39  ;;  %v306_v11 = vsel %vm290_vm3, %v562_v20, 0.0  ;;  %v342_v22 = vmul.f32 %v556_v16, %v556_v16 }
  0xe1   :  { %v465_v38 = vpop.f32.mrb[4].mxu0  ;;  %v363_v17 = vsel %vm290_vm3, %v340_v1, 0.0  ;;  %v308_v23 = vsel %vm290_vm3, %v578_v29, 0.0  ;;  %v310_v27 = vsel %vm290_vm3, %v556_v16, 0.0  ;;  %v343_v28 = vmul.f32 %v570_v25, %v570_v25 }
  0xe2   :  { %v352_v42 = vadd.f32 %v351_v37, %v350_v35  ;;  %v438_v43 = vpack.c.bf16 %v465_v38, %v465_v38  ;;  %v154_v44 = vpop.f32.mrb[5].mxu0  ;;  %v297_v46 = vadd.f32 %v296_v40, %v295_v34  ;;  %v613_v50 = vpop.f32.mrb[4].mxu1  ;;  %v338_v59 = vmul.f32 %v465_v38, %v465_v38 }
  0xe3   :  { %v436_v45 = vpack.c.bf16 %v154_v44, %v154_v44  ;;  %v298_v47 = vsel %vm290_vm3, %v154_v44, 0.0  ;;  %v336_v48 = vmul.f32 %v154_v44, %v154_v44  ;;  %v466_v49 = vpop.f32.mrb[6].mxu0  ;;  %v186_v54 = vpop.f32.mrb[5].mxu1  ;;  %v302_v2 = vsel %vm290_vm3, %v465_v38, 0.0 }
  0xe4   :  { %272 = vst.msk [vmem:[%s712_s2 + $0x18] sm:$0xf] %vm265_vm2, %v438_v43  ;;  %v354_v51 = vadd.f32 %v353_v41, %v352_v42  ;;  %v439_v52 = vpack.c.bf16 %v466_v49, %v466_v49  ;;  %v157_v53 = vpop.f32.mrb[7].mxu0  ;;  %v299_v55 = vadd.f32 %v298_v47, %v297_v46  ;;  %v624_v58 = vpop.f32.mrb[6].mxu1  ;;  %v339_v3 = vmul.f32 %v466_v49, %v466_v49 }
  0xe5   :  { %270 = vst.msk [vmem:[%s712_s2 + $0x10] sm:$0xf] %vm265_vm2, %v436_v45  ;;  %v355_v56 = vsel %vm290_vm3, %v336_v48, 0.0  ;;  %v437_v57 = vpack.c.bf16 %v157_v53, %v157_v53  ;;  %v300_v61 = vsel %vm290_vm3, %v157_v53, 0.0  ;;  %v337_v62 = vmul.f32 %v157_v53, %v157_v53  ;;  %v189_v63 = vpop.f32.mrb[7].mxu1 }
  0xe6   :  { %v356_v60 = vadd.f32 %v355_v56, %v354_v51  ;;  %273 = vst.msk [vmem:[%s712_s2 + $0x1c] sm:$0xf] %vm265_vm2, %v439_v52  ;;  %v301_v0 = vadd.f32 %v300_v61, %v299_v55  ;;  %v446_v5 = vpack.c.bf16 %v613_v50, %v613_v50  ;;  %v444_v8 = vpack.c.bf16 %v186_v54, %v186_v54 }
  0xe7   :  { %271 = vst.msk [vmem:[%s712_s2 + $0x14] sm:$0xf] %vm265_vm2, %v437_v57  ;;  %v357_v4 = vsel %vm290_vm3, %v337_v62, 0.0  ;;  %v359_v9 = vsel %vm290_vm3, %v338_v59, 0.0  ;;  %v304_v10 = vsel %vm290_vm3, %v466_v49, 0.0  ;;  %v447_v12 = vpack.c.bf16 %v624_v58, %v624_v58 }
  0xe8   :  { %v303_v6 = vadd.f32 %v302_v2, %v301_v0  ;;  %v358_v7 = vadd.f32 %v357_v4, %v356_v60  ;;  %280 = vst.msk [vmem:[%s712_s2 + $0x38] sm:$0xf] %vm265_vm2, %v446_v5  ;;  %278 = vst.msk [vmem:[%s712_s2 + $0x30] sm:$0xf] %vm265_vm2, %v444_v8  ;;  %v361_v15 = vsel %vm290_vm3, %v339_v3, 0.0  ;;  %v445_v19 = vpack.c.bf16 %v189_v63, %v189_v63 }
  0xe9   :  { %281 = vst.msk [vmem:[%s712_s2 + $0x3c] sm:$0xf] %vm265_vm2, %v447_v12  ;;  %v365_v30 = vsel %vm290_vm3, %v341_v18, 0.0  ;;  %v344_v31 = vmul.f32 %v186_v54, %v186_v54  ;;  %v367_v29 = vsel %vm290_vm3, %v342_v22, 0.0  ;;  %v312_v34 = vsel %vm290_vm3, %v570_v25, 0.0 }
  0xea   :  { %v360_v13 = vadd.f32 %v359_v9, %v358_v7  ;;  %v305_v14 = vadd.f32 %v304_v10, %v303_v6  ;;  %279 = vst.msk [vmem:[%s712_s2 + $0x34] sm:$0xf] %vm265_vm2, %v445_v19  ;;  %v314_v35 = vsel %vm290_vm3, %v186_v54, 0.0  ;;  %v369_v38 = vsel %vm290_vm3, %v343_v28, 0.0  ;;  %v289_v2 = vld [vmem:[%s710_s3] sm:$0x1] }
  0xeb   :  { %v371_v16 = vsel %vm290_vm3, %v344_v31, 0.0  ;;  %v345_v39 = vmul.f32 %v189_v63, %v189_v63  ;;  %v346_v42 = vmul.f32 %v613_v50, %v613_v50  ;;  %v316_v43 = vsel %vm290_vm3, %v189_v63, 0.0  ;;  %v331_v4 = vld [vmem:[%s711_s4] sm:$0x1] }
  0xec   :  { %v307_v20 = vadd.f32 %v306_v11, %v305_v14  ;;  %v362_v21 = vadd.f32 %v361_v15, %v360_v13  ;;  %v318_v25 = vsel %vm290_vm3, %v613_v50, 0.0  ;;  %v347_v46 = vmul.f32 %v624_v58, %v624_v58 }
  0xed   :  { %v373_v47 = vsel %vm290_vm3, %v345_v39, 0.0  ;;  %v375_v51 = vsel %vm290_vm3, %v346_v42, 0.0  ;;  %v320_v52 = vsel %vm290_vm3, %v624_v58, 0.0 }
  0xee   :  { %v364_v24 = vadd.f32 %v363_v17, %v362_v21  ;;  %v309_v26 = vadd.f32 %v308_v23, %v307_v20  ;;  %v377_v55 = vsel %vm290_vm3, %v347_v46, 0.0 }
  0xf0   :  { %v311_v32 = vadd.f32 %v310_v27, %v309_v26  ;;  %v366_v33 = vadd.f32 %v365_v30, %v364_v24 }
  0xf2   :  { %v368_v36 = vadd.f32 %v367_v29, %v366_v33  ;;  %v313_v37 = vadd.f32 %v312_v34, %v311_v32 }
  0xf4   :  { %v315_v40 = vadd.f32 %v314_v35, %v313_v37  ;;  %v370_v41 = vadd.f32 %v369_v38, %v368_v36 }
  0xf6   :  { %v372_v44 = vadd.f32 %v371_v16, %v370_v41  ;;  %v317_v45 = vadd.f32 %v316_v43, %v315_v40 }
  0xf8   :  { %v319_v48 = vadd.f32 %v318_v25, %v317_v45  ;;  %v374_v49 = vadd.f32 %v373_v47, %v372_v44 }
  0xfa   :  { %v321_v53 = vadd.f32 %v320_v52, %v319_v48  ;;  %v376_v54 = vadd.f32 %v375_v51, %v374_v49 }
  0xfc   :  { %v322_v56 = vrot.slane %v321_v53, 4  ;;  %v378_v57 = vadd.f32 %v377_v55, %v376_v54 }
  0xfe   :  { %v323_v59 = vadd.f32 %v322_v56, %v321_v53  ;;  %v379_v50 = vrot.slane %v378_v57, 4 }
 0x100   :  { %v324_v60 = vrot.slane %v323_v59, 2  ;;  %v380_v61 = vadd.f32 %v379_v50, %v378_v57 }
 0x102   :  { %v325_v62 = vadd.f32 %v324_v60, %v323_v59  ;;  %v381_v63 = vrot.slane %v380_v61, 2 }
 0x104   :  { %v326_v0 = vrot.slane %v325_v62, 1  ;;  %v382_v1 = vadd.f32 %v381_v63, %v380_v61 }
 0x106   :  { %v327_v3 = vadd.f32 %v326_v0, %v325_v62  ;;  %v383_v58 = vrot.slane %v382_v1, 1 }
 0x108   :  { %v328_v5 = vadd.f32 %v327_v3, %v289_v2  ;;  %v384_v6 = vadd.f32 %v383_v58, %v382_v1 }
 0x10a   :  { %330 = vst.msk [vmem:[%s710_s3] sm:$0x1] %vm286_vm1, %v328_v5  ;;  %v385_v7 = vadd.f32 %v384_v6, %v331_v4 }
 0x10c   :  { %386 = vst.msk [vmem:[%s711_s4] sm:$0x1] %vm286_vm1, %v385_v7 }

// kernel: forward.24
= control target key start
LH: loop header
LB: loop body
LE: loop exit
PB: predicated region body
PF: predicated region fallthrough
CT: control target
= control target key end

     0   :  { %v22_v0 = vlaneseq  ;;  %s116_s0 = inlined_call_operand.vmem [shape: bf16[16,256], index: 0, kind: input, shape index: {}]   ;;  %s117_s1 = inlined_call_operand.vmem [shape: f32[1,256], index: 1, kind: input, shape index: {}]   ;;  %s118_s2 = inlined_call_operand.vmem [shape: f32[1,256], index: 2, kind: input, shape index: {}]   ;;  %s119_s3 = inlined_call_operand.vmem [shape: bf16[16,256], index: 3, kind: output, shape index: {}]  }
   0x1   :  { %v14_v1 = vld [vmem:[%s116_s0] sm:$0xff]  ;;  %v15_v3 = vld [vmem:[%s116_s0 + $0x8] sm:$0xff] }
   0x2   :  { %v23_v2 = vshrl.u32 %v22_v0, 7  ;;  %v16_v4 = vunpack.c.l.bf16 %v14_v1  ;;  %v17_v5 = vunpack.c.h.bf16 %v14_v1  ;;  %v20_v6 = vld [vmem:[%s117_s1] sm:$0x3]  ;;  %v18_v10 = vunpack.c.l.bf16 %v15_v3 }
   0x3   :  { %v36_v7 = vld [vmem:[%s118_s2] sm:$0x3]  ;;  %v19_v11 = vunpack.c.h.bf16 %v15_v3 }
   0x4   :  { %v24_v8 = vsub.s32 0, %v23_v2  ;;  %v28_v9 = vsub.s32 1, %v23_v2 }
   0x6   :  { %v25_v12 = vrot.slane %v20_v6, %v24_v8  ;;  %v29_v13 = vrot.slane %v20_v6, %v28_v9  ;;  %v41_v14 = vrot.slane %v36_v7, %v24_v8  ;;  %v45_v15 = vrot.slane %v36_v7, %v28_v9 }
   0x8   :  { %v32_v16 = vmul.f32 %v25_v12, %v16_v4  ;;  %v33_v17 = vmul.f32 %v29_v13, %v17_v5  ;;  %v34_v18 = vmul.f32 %v25_v12, %v18_v10  ;;  %v35_v19 = vmul.f32 %v29_v13, %v19_v11 }
   0xa   :  { %v48_v20 = vadd.f32 %v41_v14, %v32_v16  ;;  %v49_v21 = vadd.f32 %v45_v15, %v33_v17  ;;  %v50_v22 = vadd.f32 %v41_v14, %v34_v18  ;;  %v51_v23 = vadd.f32 %v45_v15, %v35_v19 }
   0xc   :  { %v52_v24 = vmax.f32 %v48_v20, 0.0  ;;  %v53_v25 = vmax.f32 %v49_v21, 0.0  ;;  %v54_v26 = vmax.f32 %v50_v22, 0.0  ;;  %v55_v27 = vmax.f32 %v51_v23, 0.0 }
   0xe   :  { %v76_v28 = vpack.c.bf16 %v53_v25, %v52_v24  ;;  %v77_v29 = vpack.c.bf16 %v55_v27, %v54_v26 }
  0x10   :  { %68 = vst [vmem:[%s119_s3] sm:$0xff] %v76_v28  ;;  %69 = vst [vmem:[%s119_s3 + $0x8] sm:$0xff] %v77_v29 }

// kernel: forward.23
= control target key start
LH: loop header
LB: loop body
LE: loop exit
PB: predicated region body
PF: predicated region fallthrough
CT: control target
= control target key end

     0   :  { %v613_v0 = vmov 0   ;;  %vm175_vm0 = vcmask 130048   ;;  %vm382_vm1 = vcmask 253952   ;;  %v614_v26 = vmov 0.0   ;;  %s883_s1 = inlined_call_operand.vmem [shape: bf16[144,32], index: 1, kind: input, shape index: {}]   ;;  %s884_s0 = inlined_call_operand.vmem [shape: bf16[128,144], index: 0, kind: input, shape index: {}]   ;;  %s885_s3 = inlined_call_operand.vmem [shape: f32[1,32], index: 3, kind: output, shape index: {1}]   ;;  %s886_s4 = inlined_call_operand.vmem [shape: f32[1,32], index: 4, kind: output, shape index: {2}]   ;;  %s887_s2 = inlined_call_operand.vmem [shape: bf16[128,32], index: 2, kind: output, shape index: {0}]  }
   0x1   :  { %200 = vmatprep.subr.bf16.mxu0 %v613_v0  ;;  %v580_v1 = vld [vmem:[%s883_s1] sm:$0xff]   ;;  %560 = vmatprep.subr.bf16.mxu1 %v613_v0  ;;  %v581_v2 = vld [vmem:[%s883_s1 + $0x8] sm:$0xff]   ;;  %v582_v3 = vld [vmem:[%s883_s1 + $0x10] sm:$0xff]   ;;  %383 = vst.msk [vmem:[%s885_s3] sm:$0x1] %vm382_vm1, %v614_v26  ;;  %vm361_vm2 = vcmask 257024  }
   0x2   :  { %201 = vmatpush1.bf16.msra.mxu0 %v580_v1  ;;  %569 = vmatpush1.bf16.msra.mxu1 %v580_v1  ;;  %v583_v4 = vld [vmem:[%s883_s1 + $0x18] sm:$0xff]   ;;  %v591_v5 = vld [vmem:[%s884_s0 + $0x4] ss:$8 sps:$4 sm:$0xff]   ;;  %v586_v9 = vld [vmem:[%s883_s1 + $0x30] sm:$0xff]   ;;  %384 = vst.msk [vmem:[%s886_s4] sm:$0x1] %vm382_vm1, %v614_v26 }
   0x3   :  { %202 = vmatprep.subr.bf16.mxu0 %v613_v0  ;;  %561 = vmatprep.subr.bf16.mxu1 %v613_v0  ;;  %v597_v6 = vld [vmem:[%s884_s0 + $0x44] ss:$8 sps:$4 sm:$0xff]   ;;  %v587_v10 = vld [vmem:[%s883_s1 + $0x38] sm:$0xff]   ;;  %v589_v12 = vld [vmem:[%s884_s0] ss:$8 sps:$4 sm:$0xff]   ;;  %vm386_vm3 = vcmask 261120  }
   0x4   :  { %520 = vmatprep.mubr.msk.bf16.mxu0 %vm175_vm0, %v591_v5  ;;  %v584_v7 = vld [vmem:[%s883_s1 + $0x20] sm:$0xff]   ;;  %524 = vmatprep.mubr.msk.bf16.mxu1 %vm175_vm0, %v597_v6  ;;  %v585_v8 = vld [vmem:[%s883_s1 + $0x28] sm:$0xff]   ;;  %v592_v14 = vld [vmem:[%s884_s0 + $0x14] ss:$8 sps:$4 sm:$0xff]  }
   0x5   :  { %v588_v11 = vld [vmem:[%s883_s1 + $0x40] sm:$0xff]   ;;  %v601_v15 = vld [vmem:[%s884_s0 + $0x54] ss:$8 sps:$4 sm:$0xff]   ;;  %v594_v16 = vld [vmem:[%s884_s0 + $0x10] ss:$8 sps:$4 sm:$0xff]  }
   0x6   :  { %203 = vmatpush1.bf16.msra.mxu0 %v581_v2  ;;  %570 = vmatpush1.bf16.msra.mxu1 %v581_v2  ;;  %v595_v13 = vld [vmem:[%s884_s0 + $0x40] ss:$8 sps:$4 sm:$0xff]   ;;  %v603_v17 = vld [vmem:[%s884_s0 + $0x50] ss:$8 sps:$4 sm:$0xff]   ;;  %v598_v18 = vld [vmem:[%s884_s0 + $0x24] ss:$8 sps:$4 sm:$0xff]  }
   0x7   :  { %204 = vmatprep.subr.bf16.mxu0 %v613_v0  ;;  %562 = vmatprep.subr.bf16.mxu1 %v613_v0  ;;  %v607_v19 = vld [vmem:[%s884_s0 + $0x64] ss:$8 sps:$4 sm:$0xff]   ;;  %v600_v20 = vld [vmem:[%s884_s0 + $0x20] ss:$8 sps:$4 sm:$0xff]   ;;  %v604_v22 = vld [vmem:[%s884_s0 + $0x34] ss:$8 sps:$4 sm:$0xff]  }
   0x8   :  { %v609_v21 = vld [vmem:[%s884_s0 + $0x60] ss:$8 sps:$4 sm:$0xff]   ;;  %v610_v23 = vld [vmem:[%s884_s0 + $0x74] ss:$8 sps:$4 sm:$0xff]   ;;  %v606_v24 = vld [vmem:[%s884_s0 + $0x30] ss:$8 sps:$4 sm:$0xff]  }
   0x9   :  { %v612_v25 = vld [vmem:[%s884_s0 + $0x70] ss:$8 sps:$4 sm:$0xff]  }
   0xa   :  { %205 = vmatpush1.bf16.msra.mxu0 %v582_v3  ;;  %571 = vmatpush1.bf16.msra.mxu1 %v582_v3 }
   0xb   :  { %206 = vmatprep.subr.bf16.mxu0 %v613_v0  ;;  %563 = vmatprep.subr.bf16.mxu1 %v613_v0 }
   0xe   :  { %207 = vmatpush1.bf16.msra.mxu0 %v583_v4  ;;  %572 = vmatpush1.bf16.msra.mxu1 %v583_v4 }
   0xf   :  { %208 = vmatprep.subr.bf16.mxu0 %v613_v0  ;;  %564 = vmatprep.subr.bf16.mxu1 %v613_v0 }
  0x12   :  { %209 = vmatpush1.bf16.msra.mxu0 %v584_v7  ;;  %573 = vmatpush1.bf16.msra.mxu1 %v584_v7 }
  0x13   :  { %210 = vmatprep.subr.bf16.mxu0 %v613_v0  ;;  %565 = vmatprep.subr.bf16.mxu1 %v613_v0 }
  0x16   :  { %211 = vmatpush1.bf16.msra.mxu0 %v585_v8  ;;  %574 = vmatpush1.bf16.msra.mxu1 %v585_v8 }
  0x17   :  { %212 = vmatprep.subr.bf16.mxu0 %v613_v0  ;;  %566 = vmatprep.subr.bf16.mxu1 %v613_v0 }
  0x1a   :  { %213 = vmatpush1.bf16.msra.mxu0 %v586_v9  ;;  %575 = vmatpush1.bf16.msra.mxu1 %v586_v9 }
  0x1b   :  { %214 = vmatprep.subr.bf16.mxu0 %v613_v0  ;;  %567 = vmatprep.subr.bf16.mxu1 %v613_v0 }
  0x1e   :  { %215 = vmatpush1.bf16.msra.mxu0 %v587_v10  ;;  %576 = vmatpush1.bf16.msra.mxu1 %v587_v10 }
  0x1f   :  { %216 = vmatprep.subr.bf16.mxu0 %v613_v0  ;;  %568 = vmatprep.subr.bf16.mxu1 %v613_v0 }
  0x22   :  { %217 = vmatpush1.bf16.msra.mxu0 %v588_v11  ;;  %577 = vmatpush1.bf16.msra.mxu1 %v588_v11 }
  0x25   :  { %233 = vmatmul.mubr.bf16.vlgmr.msra.gmra.mrb[0].mxu0 %v589_v12  ;;  %265 = vmatmul.mubr.bf16.vlgmr.msra.gmra.mrb[0].mxu1 %v595_v13 }
  0x26   :  { %521 = vmatprep.mubr.msk.bf16.mxu0 %vm175_vm0, %v592_v14  ;;  %525 = vmatprep.mubr.msk.bf16.mxu1 %vm175_vm0, %v601_v15 }
  0x2d   :  { %241 = vmatmul.mubr.bf16.gmra.mrb[4].mxu0 %v594_v16  ;;  %273 = vmatmul.mubr.bf16.gmra.mrb[4].mxu1 %v603_v17 }
  0x2e   :  { %522 = vmatprep.mubr.msk.bf16.mxu0 %vm175_vm0, %v598_v18  ;;  %526 = vmatprep.mubr.msk.bf16.mxu1 %vm175_vm0, %v607_v19 }
  0x35   :  { %249 = vmatmul.mubr.bf16.gmra.mrb[8].mxu0 %v600_v20  ;;  %281 = vmatmul.mubr.bf16.gmra.mrb[8].mxu1 %v609_v21 }
  0x36   :  { %523 = vmatprep.mubr.msk.bf16.mxu0 %vm175_vm0, %v604_v22  ;;  %527 = vmatprep.mubr.msk.bf16.mxu1 %vm175_vm0, %v610_v23 }
  0x3d   :  { %257 = vmatmul.mubr.bf16.gmra.mrb[12].mxu0 %v606_v24  ;;  %289 = vmatmul.mubr.bf16.gmra.mrb[12].mxu1 %v612_v25 }
  0xf8   :  { %v234_v27 = vpop.f32.mrb[0].mxu0  ;;  %v731_v28 = vpop.f32.mrb[0].mxu1 }
  0xf9   :  { %v544_v29 = vpack.c.bf16 %v234_v27, %v234_v27  ;;  %v428_v30 = vmul.f32 %v234_v27, %v234_v27  ;;  %v236_v31 = vpop.f32.mrb[1].mxu0  ;;  %v552_v32 = vpack.c.bf16 %v731_v28, %v731_v28  ;;  %v268_v33 = vpop.f32.mrb[1].mxu1  ;;  %v387_v36 = vsel %vm386_vm3, %v234_v27, 0.0 }
  0xfa   :  { %v237_v34 = vpop.f32.mrb[2].mxu0  ;;  %v735_v35 = vpop.f32.mrb[2].mxu1 }
  0xfb   :  { %362 = vst.msk [vmem:[%s887_s2] sm:$0xf] %vm361_vm2, %v544_v29  ;;  %v545_v37 = vpack.c.bf16 %v237_v34, %v237_v34  ;;  %v388_v38 = vsel %vm386_vm3, %v237_v34, 0.0  ;;  %v429_v39 = vmul.f32 %v237_v34, %v237_v34  ;;  %v239_v40 = vpop.f32.mrb[3].mxu0  ;;  %370 = vst.msk [vmem:[%s887_s2 + $0x20] sm:$0xf] %vm361_vm2, %v552_v32  ;;  %v553_v43 = vpack.c.bf16 %v735_v35, %v735_v35 }
  0xfc   :  { %v271_v41 = vpop.f32.mrb[3].mxu1  ;;  %v389_v42 = vadd.f32 %v388_v38, %v387_v36  ;;  %v444_v44 = vsel %vm386_vm3, %v428_v30, 0.0 }
  0xfd   :  { %363 = vst.msk [vmem:[%s887_s2 + $0x4] sm:$0xf] %vm361_vm2, %v545_v37  ;;  %v445_v45 = vsel %vm386_vm3, %v429_v39, 0.0  ;;  %371 = vst.msk [vmem:[%s887_s2 + $0x24] sm:$0xf] %vm361_vm2, %v553_v43  ;;  %v436_v37 = vmul.f32 %v731_v28, %v731_v28 }
  0xfe   :  { %v446_v46 = vadd.f32 %v445_v45, %v444_v44 }
 0x100   :  { %v242_v47 = vpop.f32.mrb[4].mxu0  ;;  %v759_v48 = vpop.f32.mrb[4].mxu1 }
 0x101   :  { %v546_v49 = vpack.c.bf16 %v242_v47, %v242_v47  ;;  %v390_v50 = vsel %vm386_vm3, %v242_v47, 0.0  ;;  %v430_v51 = vmul.f32 %v242_v47, %v242_v47  ;;  %v244_v52 = vpop.f32.mrb[5].mxu0  ;;  %v554_v53 = vpack.c.bf16 %v759_v48, %v759_v48  ;;  %v276_v54 = vpop.f32.mrb[5].mxu1 }
 0x102   :  { %v391_v55 = vadd.f32 %v390_v50, %v389_v42  ;;  %v245_v56 = vpop.f32.mrb[6].mxu0  ;;  %v764_v57 = vpop.f32.mrb[6].mxu1  ;;  %v437_v52 = vmul.f32 %v735_v35, %v735_v35 }
 0x103   :  { %364 = vst.msk [vmem:[%s887_s2 + $0x8] sm:$0xf] %vm361_vm2, %v546_v49  ;;  %v447_v58 = vsel %vm386_vm3, %v430_v51, 0.0  ;;  %v547_v59 = vpack.c.bf16 %v245_v56, %v245_v56  ;;  %v392_v60 = vsel %vm386_vm3, %v245_v56, 0.0  ;;  %v431_v61 = vmul.f32 %v245_v56, %v245_v56  ;;  %v247_v62 = vpop.f32.mrb[7].mxu0  ;;  %v279_v63 = vpop.f32.mrb[7].mxu1 }
 0x104   :  { %372 = vst.msk [vmem:[%s887_s2 + $0x28] sm:$0xf] %vm361_vm2, %v554_v53  ;;  %v448_v0 = vadd.f32 %v447_v58, %v446_v46  ;;  %v393_v1 = vadd.f32 %v392_v60, %v391_v55  ;;  %v555_v2 = vpack.c.bf16 %v764_v57, %v764_v57  ;;  %v402_v51 = vsel %vm386_vm3, %v731_v28, 0.0 }
 0x105   :  { %365 = vst.msk [vmem:[%s887_s2 + $0xc] sm:$0xf] %vm361_vm2, %v547_v59  ;;  %v449_v3 = vsel %vm386_vm3, %v431_v61, 0.0  ;;  %v459_v56 = vsel %vm386_vm3, %v436_v37, 0.0  ;;  %v404_v28 = vsel %vm386_vm3, %v735_v35, 0.0  ;;  %v438_v58 = vmul.f32 %v759_v48, %v759_v48 }
 0x106   :  { %v450_v4 = vadd.f32 %v449_v3, %v448_v0  ;;  %373 = vst.msk [vmem:[%s887_s2 + $0x2c] sm:$0xf] %vm361_vm2, %v555_v2  ;;  %v461_v61 = vsel %vm386_vm3, %v437_v52, 0.0  ;;  %v406_v62 = vsel %vm386_vm3, %v759_v48, 0.0  ;;  %v439_v63 = vmul.f32 %v764_v57, %v764_v57 }
 0x107   :  { %v463_v2 = vsel %vm386_vm3, %v438_v58, 0.0  ;;  %v408_v35 = vsel %vm386_vm3, %v764_v57, 0.0 }
 0x108   :  { %v250_v5 = vpop.f32.mrb[8].mxu0  ;;  %v787_v6 = vpop.f32.mrb[8].mxu1 }
 0x109   :  { %v548_v7 = vpack.c.bf16 %v250_v5, %v250_v5  ;;  %v394_v8 = vsel %vm386_vm3, %v250_v5, 0.0  ;;  %v432_v9 = vmul.f32 %v250_v5, %v250_v5  ;;  %v252_v10 = vpop.f32.mrb[9].mxu0  ;;  %v556_v11 = vpack.c.bf16 %v787_v6, %v787_v6  ;;  %v284_v12 = vpop.f32.mrb[9].mxu1 }
 0x10a   :  { %v395_v13 = vadd.f32 %v394_v8, %v393_v1  ;;  %v253_v14 = vpop.f32.mrb[10].mxu0  ;;  %v792_v15 = vpop.f32.mrb[10].mxu1  ;;  %v440_v3 = vmul.f32 %v787_v6, %v787_v6  ;;  %v410_v48 = vsel %vm386_vm3, %v787_v6, 0.0 }
 0x10b   :  { %366 = vst.msk [vmem:[%s887_s2 + $0x10] sm:$0xf] %vm361_vm2, %v548_v7  ;;  %v451_v16 = vsel %vm386_vm3, %v432_v9, 0.0  ;;  %v549_v17 = vpack.c.bf16 %v253_v14, %v253_v14  ;;  %v396_v18 = vsel %vm386_vm3, %v253_v14, 0.0  ;;  %v433_v19 = vmul.f32 %v253_v14, %v253_v14  ;;  %v255_v20 = vpop.f32.mrb[11].mxu0  ;;  %v287_v21 = vpop.f32.mrb[11].mxu1 }
 0x10c   :  { %374 = vst.msk [vmem:[%s887_s2 + $0x30] sm:$0xf] %vm361_vm2, %v556_v11  ;;  %v452_v22 = vadd.f32 %v451_v16, %v450_v4  ;;  %v397_v23 = vadd.f32 %v396_v18, %v395_v13  ;;  %v557_v24 = vpack.c.bf16 %v792_v15, %v792_v15  ;;  %v465_v7 = vsel %vm386_vm3, %v439_v63, 0.0 }
 0x10d   :  { %367 = vst.msk [vmem:[%s887_s2 + $0x14] sm:$0xf] %vm361_vm2, %v549_v17  ;;  %v453_v25 = vsel %vm386_vm3, %v433_v19, 0.0  ;;  %v441_v8 = vmul.f32 %v792_v15, %v792_v15  ;;  %v467_v12 = vsel %vm386_vm3, %v440_v3, 0.0  ;;  %v412_v57 = vsel %vm386_vm3, %v792_v15, 0.0 }
 0x10e   :  { %v454_v26 = vadd.f32 %v453_v25, %v452_v22  ;;  %375 = vst.msk [vmem:[%s887_s2 + $0x34] sm:$0xf] %vm361_vm2, %v557_v24 }
 0x10f   :  { %v469_v17 = vsel %vm386_vm3, %v441_v8, 0.0 }
 0x110   :  { %v258_v27 = vpop.f32.mrb[12].mxu0  ;;  %v290_v29 = vpop.f32.mrb[12].mxu1 }
 0x111   :  { %v550_v30 = vpack.c.bf16 %v258_v27, %v258_v27  ;;  %v398_v31 = vsel %vm386_vm3, %v258_v27, 0.0  ;;  %v434_v32 = vmul.f32 %v258_v27, %v258_v27  ;;  %v260_v33 = vpop.f32.mrb[13].mxu0  ;;  %v558_v34 = vpack.c.bf16 %v290_v29, %v290_v29  ;;  %v292_v36 = vpop.f32.mrb[13].mxu1 }
 0x112   :  { %v399_v38 = vadd.f32 %v398_v31, %v397_v23  ;;  %v261_v39 = vpop.f32.mrb[14].mxu0  ;;  %v293_v40 = vpop.f32.mrb[14].mxu1  ;;  %v442_v9 = vmul.f32 %v290_v29, %v290_v29  ;;  %v414_v13 = vsel %vm386_vm3, %v290_v29, 0.0  ;;  %v385_v36 = vld [vmem:[%s885_s3] sm:$0x1] }
 0x113   :  { %368 = vst.msk [vmem:[%s887_s2 + $0x18] sm:$0xf] %vm361_vm2, %v550_v30  ;;  %v455_v41 = vsel %vm386_vm3, %v434_v32, 0.0  ;;  %v551_v42 = vpack.c.bf16 %v261_v39, %v261_v39  ;;  %v400_v43 = vsel %vm386_vm3, %v261_v39, 0.0  ;;  %v435_v44 = vmul.f32 %v261_v39, %v261_v39  ;;  %v263_v45 = vpop.f32.mrb[15].mxu0  ;;  %v295_v46 = vpop.f32.mrb[15].mxu1 }
 0x114   :  { %376 = vst.msk [vmem:[%s887_s2 + $0x38] sm:$0xf] %vm361_vm2, %v558_v34  ;;  %v456_v47 = vadd.f32 %v455_v41, %v454_v26  ;;  %v401_v49 = vadd.f32 %v400_v43, %v399_v38  ;;  %v559_v50 = vpack.c.bf16 %v293_v40, %v293_v40  ;;  %v471_v18 = vsel %vm386_vm3, %v442_v9, 0.0  ;;  %v427_v39 = vld [vmem:[%s886_s4] sm:$0x1] }
 0x115   :  { %369 = vst.msk [vmem:[%s887_s2 + $0x1c] sm:$0xf] %vm361_vm2, %v551_v42  ;;  %v457_v53 = vsel %vm386_vm3, %v435_v44, 0.0  ;;  %v443_v6 = vmul.f32 %v293_v40, %v293_v40  ;;  %v416_v21 = vsel %vm386_vm3, %v293_v40, 0.0 }
 0x116   :  { %v403_v54 = vadd.f32 %v402_v51, %v401_v49  ;;  %v458_v55 = vadd.f32 %v457_v53, %v456_v47  ;;  %377 = vst.msk [vmem:[%s887_s2 + $0x3c] sm:$0xf] %vm361_vm2, %v559_v50 }
 0x117   :  { %v473_v24 = vsel %vm386_vm3, %v443_v6, 0.0 }
 0x118   :  { %v405_v59 = vadd.f32 %v404_v28, %v403_v54  ;;  %v460_v60 = vadd.f32 %v459_v56, %v458_v55 }
 0x11a   :  { %v462_v0 = vadd.f32 %v461_v61, %v460_v60  ;;  %v407_v1 = vadd.f32 %v406_v62, %v405_v59 }
 0x11c   :  { %v409_v4 = vadd.f32 %v408_v35, %v407_v1  ;;  %v464_v5 = vadd.f32 %v463_v2, %v462_v0 }
 0x11e   :  { %v411_v10 = vadd.f32 %v410_v48, %v409_v4  ;;  %v466_v11 = vadd.f32 %v465_v7, %v464_v5 }
 0x120   :  { %v468_v14 = vadd.f32 %v467_v12, %v466_v11  ;;  %v413_v16 = vadd.f32 %v412_v57, %v411_v10 }
 0x122   :  { %v470_v19 = vadd.f32 %v469_v17, %v468_v14  ;;  %v415_v20 = vadd.f32 %v414_v13, %v413_v16 }
 0x124   :  { %v472_v22 = vadd.f32 %v471_v18, %v470_v19  ;;  %v417_v23 = vadd.f32 %v416_v21, %v415_v20 }
 0x126   :  { %v418_v25 = vrot.slane %v417_v23, 4  ;;  %v474_v26 = vadd.f32 %v473_v24, %v472_v22 }
 0x128   :  { %v419_v15 = vadd.f32 %v418_v25, %v417_v23  ;;  %v475_v27 = vrot.slane %v474_v26, 4 }
 0x12a   :  { %v420_v29 = vrot.slane %v419_v15, 2  ;;  %v476_v30 = vadd.f32 %v475_v27, %v474_v26 }
 0x12c   :  { %v421_v31 = vadd.f32 %v420_v29, %v419_v15  ;;  %v477_v32 = vrot.slane %v476_v30, 2 }
 0x12e   :  { %v422_v33 = vrot.slane %v421_v31, 1  ;;  %v478_v34 = vadd.f32 %v477_v32, %v476_v30 }
 0x130   :  { %v423_v37 = vadd.f32 %v422_v33, %v421_v31  ;;  %v479_v38 = vrot.slane %v478_v34, 1 }
 0x132   :  { %v424_v40 = vadd.f32 %v423_v37, %v385_v36  ;;  %v480_v41 = vadd.f32 %v479_v38, %v478_v34 }
 0x134   :  { %426 = vst.msk [vmem:[%s885_s3] sm:$0x1] %vm382_vm1, %v424_v40  ;;  %v481_v42 = vadd.f32 %v480_v41, %v427_v39 }
 0x136   :  { %482 = vst.msk [vmem:[%s886_s4] sm:$0x1] %vm382_vm1, %v481_v42 }

// kernel: forward.27
= control target key start
LH: loop header
LB: loop body
LE: loop exit
PB: predicated region body
PF: predicated region fallthrough
CT: control target
= control target key end

     0   :  { %v31_v0 = vlaneseq  ;;  %s194_s0 = inlined_call_operand.vmem [shape: bf16[16,256], index: 0, kind: input, shape index: {}]   ;;  %s195_s1 = inlined_call_operand.vmem [shape: f32[1,256], index: 1, kind: input, shape index: {}]   ;;  %s196_s2 = inlined_call_operand.vmem [shape: f32[1,256], index: 2, kind: input, shape index: {}]   ;;  %s197_s3 = inlined_call_operand.vmem [shape: bf16[16,256], index: 3, kind: input, shape index: {}]   ;;  %s198_s4 = inlined_call_operand.vmem [shape: f32[1,256], index: 4, kind: input, shape index: {}]   ;;  %s199_s5 = inlined_call_operand.vmem [shape: f32[1,256], index: 5, kind: input, shape index: {}]   ;;  %s200_s6 = inlined_call_operand.vmem [shape: bf16[16,256], index: 6, kind: output, shape index: {}]  }
   0x1   :  { %v23_v1 = vld [vmem:[%s194_s0] sm:$0xff]  ;;  %v24_v8 = vld [vmem:[%s194_s0 + $0x8] sm:$0xff] }
   0x2   :  { %v29_v2 = vld [vmem:[%s195_s1] sm:$0x3]  ;;  %v32_v3 = vshrl.u32 %v31_v0, 7  ;;  %v25_v5 = vunpack.c.l.bf16 %v23_v1  ;;  %v26_v6 = vunpack.c.h.bf16 %v23_v1  ;;  %v62_v9 = vld [vmem:[%s197_s3 + $0x8] sm:$0xff]  ;;  %v27_v14 = vunpack.c.l.bf16 %v24_v8 }
   0x3   :  { %v61_v4 = vld [vmem:[%s197_s3] sm:$0xff]  ;;  %v28_v15 = vunpack.c.h.bf16 %v24_v8  ;;  %v65_v18 = vunpack.c.l.bf16 %v62_v9  ;;  %v66_v19 = vunpack.c.h.bf16 %v62_v9 }
   0x4   :  { %v45_v7 = vld [vmem:[%s196_s2] sm:$0x3]  ;;  %v33_v10 = vsub.s32 0, %v32_v3  ;;  %v37_v11 = vsub.s32 1, %v32_v3  ;;  %v63_v16 = vunpack.c.l.bf16 %v61_v4  ;;  %v64_v17 = vunpack.c.h.bf16 %v61_v4 }
   0x5   :  { %v67_v12 = vld [vmem:[%s198_s4] sm:$0x3] }
   0x6   :  { %v83_v13 = vld [vmem:[%s199_s5] sm:$0x3]  ;;  %v34_v20 = vrot.slane %v29_v2, %v33_v10  ;;  %v38_v21 = vrot.slane %v29_v2, %v37_v11  ;;  %v50_v22 = vrot.slane %v45_v7, %v33_v10  ;;  %v54_v23 = vrot.slane %v45_v7, %v37_v11 }
   0x7   :  { %v72_v24 = vrot.slane %v67_v12, %v33_v10  ;;  %v76_v25 = vrot.slane %v67_v12, %v37_v11  ;;  %v88_v26 = vrot.slane %v83_v13, %v33_v10  ;;  %v92_v27 = vrot.slane %v83_v13, %v37_v11 }
   0x8   :  { %v41_v28 = vmul.f32 %v34_v20, %v25_v5  ;;  %v42_v29 = vmul.f32 %v38_v21, %v26_v6  ;;  %v43_v30 = vmul.f32 %v34_v20, %v27_v14  ;;  %v44_v31 = vmul.f32 %v38_v21, %v28_v15 }
   0x9   :  { %v79_v32 = vmul.f32 %v72_v24, %v63_v16  ;;  %v80_v33 = vmul.f32 %v76_v25, %v64_v17  ;;  %v81_v34 = vmul.f32 %v72_v24, %v65_v18  ;;  %v82_v35 = vmul.f32 %v76_v25, %v66_v19 }
   0xa   :  { %v57_v36 = vadd.f32 %v50_v22, %v41_v28  ;;  %v58_v37 = vadd.f32 %v54_v23, %v42_v29  ;;  %v59_v38 = vadd.f32 %v50_v22, %v43_v30  ;;  %v60_v39 = vadd.f32 %v54_v23, %v44_v31 }
   0xb   :  { %v95_v40 = vadd.f32 %v88_v26, %v79_v32  ;;  %v96_v41 = vadd.f32 %v92_v27, %v80_v33  ;;  %v97_v42 = vadd.f32 %v88_v26, %v81_v34  ;;  %v98_v43 = vadd.f32 %v92_v27, %v82_v35 }
   0xd   :  { %v99_v44 = vadd.f32 %v95_v40, %v57_v36  ;;  %v100_v45 = vadd.f32 %v96_v41, %v58_v37  ;;  %v101_v46 = vadd.f32 %v97_v42, %v59_v38  ;;  %v102_v47 = vadd.f32 %v98_v43, %v60_v39 }
   0xf   :  { %v103_v48 = vmax.f32 %v99_v44, 0.0  ;;  %v104_v49 = vmax.f32 %v100_v45, 0.0  ;;  %v105_v50 = vmax.f32 %v101_v46, 0.0  ;;  %v106_v51 = vmax.f32 %v102_v47, 0.0 }
  0x11   :  { %v127_v52 = vpack.c.bf16 %v104_v49, %v103_v48  ;;  %v128_v53 = vpack.c.bf16 %v106_v51, %v105_v50 }
  0x13   :  { %119 = vst [vmem:[%s200_s6] sm:$0xff] %v127_v52  ;;  %120 = vst [vmem:[%s200_s6 + $0x8] sm:$0xff] %v128_v53 }

// kernel: forward.25
= control target key start
LH: loop header
LB: loop body
LE: loop exit
PB: predicated region body
PF: predicated region fallthrough
CT: control target
= control target key end

     0   :  { %vm311_vm0 = vcmask 261120   ;;  %vm615_vm1 = vcmask 253952   ;;  %v970_v42 = vmov 0.0   ;;  %vm594_vm2 = vcmask 257024   ;;  %s1260_s1 = inlined_call_operand.vmem [shape: bf16[288,32], index: 1, kind: input, shape index: {}]   ;;  %s1261_s0 = inlined_call_operand.vmem [shape: bf16[128,288], index: 0, kind: input, shape index: {}]   ;;  %s1262_s3 = inlined_call_operand.vmem [shape: f32[1,32], index: 3, kind: output, shape index: {1}]   ;;  %s1263_s4 = inlined_call_operand.vmem [shape: f32[1,32], index: 4, kind: output, shape index: {2}]   ;;  %s1264_s2 = inlined_call_operand.vmem [shape: bf16[128,32], index: 2, kind: output, shape index: {0}]  }
   0x1   :  { %v920_v0 = vld [vmem:[%s1260_s1 + $0x40] sm:$0xff]   ;;  %v922_v2 = vld [vmem:[%s1260_s1 + $0x48] sm:$0xff]   ;;  %v924_v4 = vld [vmem:[%s1260_s1 + $0x50] sm:$0xff]   ;;  %616 = vst.msk [vmem:[%s1262_s3] sm:$0x1] %vm615_vm1, %v970_v42 }
   0x2   :  { %v921_v1 = vld [vmem:[%s1260_s1] sm:$0xff]   ;;  %809 = vmatprep.subr.bf16.mxu0 %v920_v0  ;;  %903 = vmatprep.subr.bf16.mxu1 %v920_v0  ;;  %v923_v3 = vld [vmem:[%s1260_s1 + $0x8] sm:$0xff]   ;;  %v925_v5 = vld [vmem:[%s1260_s1 + $0x10] sm:$0xff]   ;;  %617 = vst.msk [vmem:[%s1263_s4] sm:$0x1] %vm615_vm1, %v970_v42 }
   0x3   :  { %810 = vmatpush3.bf16.msra.mxu0 %v921_v1  ;;  %911 = vmatpush3.bf16.msra.mxu1 %v921_v1  ;;  %v926_v6 = vld [vmem:[%s1260_s1 + $0x58] sm:$0xff]   ;;  %v928_v8 = vld [vmem:[%s1260_s1 + $0x60] sm:$0xff]   ;;  %v930_v10 = vld [vmem:[%s1260_s1 + $0x68] sm:$0xff]  }
   0x4   :  { %811 = vmatprep.subr.bf16.mxu0 %v922_v2  ;;  %904 = vmatprep.subr.bf16.mxu1 %v922_v2  ;;  %v927_v7 = vld [vmem:[%s1260_s1 + $0x18] sm:$0xff]   ;;  %v929_v9 = vld [vmem:[%s1260_s1 + $0x20] sm:$0xff]   ;;  %v931_v13 = vld [vmem:[%s1260_s1 + $0x28] sm:$0xff]  }
   0x5   :  { %v938_v11 = vld [vmem:[%s1261_s0 + $0x4] ss:$12 sps:$4 sm:$0xff]   ;;  %v941_v12 = vld [vmem:[%s1261_s0 + $0x94] ss:$12 sps:$4 sm:$0xff]   ;;  %v934_v16 = vld [vmem:[%s1260_s1 + $0x78] sm:$0xff]  }
   0x6   :  { %v932_v14 = vld [vmem:[%s1260_s1 + $0x70] sm:$0xff]   ;;  %368 = vmatprep.mubr.bf16.mxu0 %v938_v11  ;;  %416 = vmatprep.mubr.bf16.mxu1 %v941_v12  ;;  %v935_v17 = vld [vmem:[%s1260_s1 + $0x38] sm:$0xff]   ;;  %v936_v18 = vld [vmem:[%s1261_s0] ss:$12 sps:$4 sm:$0xff]  }
   0x7   :  { %812 = vmatpush3.bf16.msra.mxu0 %v923_v3  ;;  %912 = vmatpush3.bf16.msra.mxu1 %v923_v3  ;;  %v933_v15 = vld [vmem:[%s1260_s1 + $0x30] sm:$0xff]   ;;  %v942_v19 = vld [vmem:[%s1260_s1 + $0x80] sm:$0xff]   ;;  %v943_v21 = vld [vmem:[%s1261_s0 + $0x1c] ss:$12 sps:$4 sm:$0xff]  }
   0x8   :  { %813 = vmatprep.subr.bf16.mxu0 %v924_v4  ;;  %905 = vmatprep.subr.bf16.mxu1 %v924_v4  ;;  %v939_v20 = vld [vmem:[%s1261_s0 + $0x90] ss:$12 sps:$4 sm:$0xff]   ;;  %v945_v22 = vld [vmem:[%s1261_s0 + $0xac] ss:$12 sps:$4 sm:$0xff]   ;;  %v948_v25 = vld [vmem:[%s1261_s0 + $0xa8] ss:$12 sps:$4 sm:$0xff]  }
   0x9   :  { %v949_v23 = vld [vmem:[%s1260_s1 + $0x88] sm:$0xff]   ;;  %v947_v24 = vld [vmem:[%s1261_s0 + $0x18] ss:$12 sps:$4 sm:$0xff]   ;;  %v950_v26 = vld [vmem:[%s1261_s0 + $0x34] ss:$12 sps:$4 sm:$0xff]  }
   0xa   :  { %v952_v27 = vld [vmem:[%s1261_s0 + $0x8] ss:$12 sps:$4 sm:$0xff]   ;;  %v953_v28 = vld [vmem:[%s1261_s0 + $0x30] ss:$12 sps:$4 sm:$0xff]   ;;  %v954_v29 = vld [vmem:[%s1261_s0 + $0x20] ss:$12 sps:$4 sm:$0xff]  }
   0xb   :  { %814 = vmatpush3.bf16.msra.mxu0 %v925_v5  ;;  %913 = vmatpush3.bf16.msra.mxu1 %v925_v5  ;;  %v955_v30 = vld [vmem:[%s1261_s0 + $0x4c] ss:$12 sps:$4 sm:$0xff]   ;;  %v958_v32 = vld [vmem:[%s1261_s0 + $0x48] ss:$12 sps:$4 sm:$0xff]   ;;  %v959_v33 = vld [vmem:[%s1261_s0 + $0x50] ss:$12 sps:$4 sm:$0xff]  }
   0xc   :  { %815 = vmatprep.subr.bf16.mxu0 %v926_v6  ;;  %906 = vmatprep.subr.bf16.mxu1 %v926_v6  ;;  %v957_v31 = vld [vmem:[%s1261_s0 + $0x38] ss:$12 sps:$4 sm:$0xff]   ;;  %v962_v35 = vld [vmem:[%s1261_s0 + $0x68] ss:$12 sps:$4 sm:$0xff]   ;;  %v963_v36 = vld [vmem:[%s1261_s0 + $0x60] ss:$12 sps:$4 sm:$0xff]  }
   0xd   :  { %v960_v34 = vld [vmem:[%s1261_s0 + $0x64] ss:$12 sps:$4 sm:$0xff]   ;;  %v964_v37 = vld [vmem:[%s1261_s0 + $0x80] ss:$12 sps:$4 sm:$0xff]   ;;  %v965_v38 = vld [vmem:[%s1261_s0 + $0x7c] ss:$12 sps:$4 sm:$0xff]  }
   0xe   :  { %v967_v39 = vld [vmem:[%s1261_s0 + $0x98] ss:$12 sps:$4 sm:$0xff]   ;;  %v969_v41 = vld [vmem:[%s1261_s0 + $0xb0] ss:$12 sps:$4 sm:$0xff]  }
   0xf   :  { %816 = vmatpush3.bf16.msra.mxu0 %v927_v7  ;;  %914 = vmatpush3.bf16.msra.mxu1 %v927_v7  ;;  %v968_v40 = vld [vmem:[%s1261_s0 + $0x78] ss:$12 sps:$4 sm:$0xff]  }
  0x10   :  { %817 = vmatprep.subr.bf16.mxu0 %v928_v8  ;;  %907 = vmatprep.subr.bf16.mxu1 %v928_v8 }
  0x13   :  { %818 = vmatpush3.bf16.msra.mxu0 %v929_v9  ;;  %915 = vmatpush3.bf16.msra.mxu1 %v929_v9 }
  0x14   :  { %819 = vmatprep.subr.bf16.mxu0 %v930_v10  ;;  %908 = vmatprep.subr.bf16.mxu1 %v930_v10 }
  0x17   :  { %820 = vmatpush3.bf16.msra.mxu0 %v931_v13  ;;  %916 = vmatpush3.bf16.msra.mxu1 %v931_v13 }
  0x18   :  { %821 = vmatprep.subr.bf16.mxu0 %v932_v14  ;;  %909 = vmatprep.subr.bf16.mxu1 %v932_v14 }
  0x1b   :  { %822 = vmatpush3.bf16.msra.mxu0 %v933_v15  ;;  %917 = vmatpush3.bf16.msra.mxu1 %v933_v15 }
  0x1c   :  { %823 = vmatprep.subr.bf16.mxu0 %v934_v16  ;;  %910 = vmatprep.subr.bf16.mxu1 %v934_v16 }
  0x1f   :  { %824 = vmatpush3.bf16.msra.mxu0 %v935_v17  ;;  %918 = vmatpush3.bf16.msra.mxu1 %v935_v17 }
  0x20   :  { %883 = vmatprep.subr.bf16.mxu1 %v942_v19 }
  0x22   :  { %369 = vmatmul.mubr.bf16.vlgmr.msra.gmra.mrb[0].mxu0 %v936_v18  ;;  %417 = vmatmul.mubr.bf16.vlgmr.msra.gmra.mrb[0].mxu1 %v939_v20 }
  0x23   :  { %884 = vmatpush3.bf16.msra.mxu1 %v942_v19  ;;  %376 = vmatprep.mubr.bf16.mxu0 %v943_v21 }
  0x24   :  { %424 = vmatprep.mubr.bf16.mxu1 %v945_v22  ;;  %885 = vmatprep.subr.bf16.mxu1 %v949_v23 }
  0x27   :  { %886 = vmatpush3.bf16.msra.mxu1 %v949_v23 }
  0x2a   :  { %377 = vmatmul.mubr.bf16.gmra.mrb[4].mxu0 %v947_v24  ;;  %425 = vmatmul.mubr.bf16.gmra.mrb[4].mxu1 %v948_v25 }
  0x2b   :  { %384 = vmatprep.mubr.bf16.mxu0 %v950_v26  ;;  %887 = vmatprep.mubr.msk.bf16.mxu1 %vm311_vm0, %v952_v27 }
  0x32   :  { %385 = vmatmul.mubr.bf16.gmra.mrb[8].mxu0 %v953_v28  ;;  %888 = vmatmul.mubr.msk.bf16.vlgmr.msra.gmra.mrb[8].mxu1 %vm311_vm0, %v954_v29 }
  0x33   :  { %392 = vmatprep.mubr.bf16.mxu0 %v955_v30  ;;  %891 = vmatprep.mubr.msk.bf16.mxu1 %vm311_vm0, %v957_v31 }
  0x3a   :  { %393 = vmatmul.mubr.bf16.gmra.mrb[12].mxu0 %v958_v32  ;;  %892 = vmatmul.mubr.msk.bf16.gmra.mrb[12].mxu1 %vm311_vm0, %v959_v33 }
  0x3b   :  { %400 = vmatprep.mubr.bf16.mxu0 %v960_v34  ;;  %895 = vmatprep.mubr.msk.bf16.mxu1 %vm311_vm0, %v962_v35 }
  0x42   :  { %401 = vmatmul.mubr.bf16.gmra.mrb[16].mxu0 %v963_v36  ;;  %896 = vmatmul.mubr.msk.bf16.gmra.mrb[16].mxu1 %vm311_vm0, %v964_v37 }
  0x43   :  { %408 = vmatprep.mubr.bf16.mxu0 %v965_v38  ;;  %899 = vmatprep.mubr.msk.bf16.mxu1 %vm311_vm0, %v967_v39 }
  0x4a   :  { %409 = vmatmul.mubr.bf16.gmra.mrb[20].mxu0 %v968_v40  ;;  %900 = vmatmul.mubr.msk.bf16.gmra.mrb[20].mxu1 %vm311_vm0, %v969_v41 }
  0xf5   :  { %v825_v43 = vpop.f32.mrb[0].mxu0  ;;  %v861_v44 = vpop.f32.mrb[0].mxu1 }
  0xf6   :  { %v826_v45 = vpop.f32.mrb[1].mxu0  ;;  %v862_v46 = vpop.f32.mrb[1].mxu1 }
  0xf7   :  { %v827_v47 = vadd.f32 %v826_v45, %v825_v43  ;;  %v828_v48 = vpop.f32.mrb[2].mxu0  ;;  %v1138_v49 = vadd.f32 %v862_v46, %v861_v44  ;;  %v864_v50 = vpop.f32.mrb[2].mxu1 }
  0xf8   :  { %v829_v51 = vpop.f32.mrb[3].mxu0  ;;  %v865_v52 = vpop.f32.mrb[3].mxu1 }
  0xf9   :  { %v830_v53 = vadd.f32 %v829_v51, %v828_v48  ;;  %v1140_v54 = vadd.f32 %v865_v52, %v864_v50 }
  0xfd   :  { %v831_v55 = vpop.f32.mrb[4].mxu0  ;;  %v867_v56 = vpop.f32.mrb[4].mxu1 }
  0xfe   :  { %v832_v57 = vpop.f32.mrb[5].mxu0  ;;  %v868_v58 = vpop.f32.mrb[5].mxu1 }
  0xff   :  { %v833_v59 = vadd.f32 %v832_v57, %v831_v55  ;;  %v834_v60 = vpop.f32.mrb[6].mxu0  ;;  %v1142_v61 = vadd.f32 %v868_v58, %v867_v56  ;;  %v870_v62 = vpop.f32.mrb[6].mxu1 }
 0x100   :  { %v835_v63 = vpop.f32.mrb[7].mxu0  ;;  %v871_v0 = vpop.f32.mrb[7].mxu1 }
 0x101   :  { %v836_v1 = vadd.f32 %v835_v63, %v834_v60  ;;  %v1144_v2 = vadd.f32 %v871_v0, %v870_v62 }
 0x105   :  { %v837_v3 = vpop.f32.mrb[8].mxu0  ;;  %v889_v4 = vpop.f32.mrb[8].mxu1 }
 0x106   :  { %v476_v5 = vadd.f32 %v889_v4, %v833_v59  ;;  %v838_v6 = vpop.f32.mrb[9].mxu0  ;;  %v467_v7 = vpop.f32.mrb[9].mxu1 }
 0x107   :  { %v839_v8 = vadd.f32 %v838_v6, %v837_v3  ;;  %v468_v9 = vadd.f32 %v827_v47, %v467_v7  ;;  %v840_v10 = vpop.f32.mrb[10].mxu0  ;;  %v890_v11 = vpop.f32.mrb[10].mxu1 }
 0x108   :  { %v795_v12 = vpack.c.bf16 %v476_v5, %v476_v5  ;;  %v479_v13 = vadd.f32 %v890_v11, %v836_v1  ;;  %v841_v14 = vpop.f32.mrb[11].mxu0  ;;  %v470_v15 = vpop.f32.mrb[11].mxu1  ;;  %v662_v21 = vmul.f32 %v476_v5, %v476_v5  ;;  %v622_v28 = vsel %vm311_vm0, %v476_v5, 0.0 }
 0x109   :  { %v793_v16 = vpack.c.bf16 %v468_v9, %v468_v9  ;;  %v842_v17 = vadd.f32 %v841_v14, %v840_v10  ;;  %v660_v19 = vmul.f32 %v468_v9, %v468_v9  ;;  %v471_v20 = vadd.f32 %v830_v53, %v470_v15 }
 0x10a   :  { %597 = vst.msk [vmem:[%s1264_s2 + $0x8] sm:$0xf] %vm594_vm2, %v795_v12  ;;  %v796_v18 = vpack.c.bf16 %v479_v13, %v479_v13  ;;  %v619_v22 = vsel %vm311_vm0, %v468_v9, 0.0  ;;  %v663_v29 = vmul.f32 %v479_v13, %v479_v13  ;;  %v679_v39 = vsel %vm311_vm0, %v662_v21, 0.0 }
 0x10b   :  { %595 = vst.msk [vmem:[%s1264_s2] sm:$0xf] %vm594_vm2, %v793_v16  ;;  %v794_v23 = vpack.c.bf16 %v471_v20, %v471_v20  ;;  %v620_v24 = vsel %vm311_vm0, %v471_v20, 0.0  ;;  %v661_v25 = vmul.f32 %v471_v20, %v471_v20  ;;  %v676_v33 = vsel %vm311_vm0, %v660_v19, 0.0 }
 0x10c   :  { %598 = vst.msk [vmem:[%s1264_s2 + $0xc] sm:$0xf] %vm594_vm2, %v796_v18  ;;  %v621_v30 = vadd.f32 %v620_v24, %v619_v22  ;;  %v624_v40 = vsel %vm311_vm0, %v479_v13, 0.0  ;;  %v681_v55 = vsel %vm311_vm0, %v663_v29, 0.0 }
 0x10d   :  { %v843_v26 = vpop.f32.mrb[12].mxu0  ;;  %v893_v27 = vpop.f32.mrb[12].mxu1  ;;  %596 = vst.msk [vmem:[%s1264_s2 + $0x4] sm:$0xf] %vm594_vm2, %v794_v23  ;;  %v677_v34 = vsel %vm311_vm0, %v661_v25, 0.0 }
 0x10e   :  { %v844_v31 = vpop.f32.mrb[13].mxu0  ;;  %v483_v32 = vpop.f32.mrb[13].mxu1  ;;  %v623_v41 = vadd.f32 %v622_v28, %v621_v30  ;;  %v678_v42 = vadd.f32 %v677_v34, %v676_v33 }
 0x10f   :  { %v845_v35 = vadd.f32 %v844_v31, %v843_v26  ;;  %v484_v36 = vadd.f32 %v839_v8, %v483_v32  ;;  %v846_v37 = vpop.f32.mrb[14].mxu0  ;;  %v894_v38 = vpop.f32.mrb[14].mxu1 }
 0x110   :  { %v847_v43 = vpop.f32.mrb[15].mxu0  ;;  %v486_v44 = vpop.f32.mrb[15].mxu1  ;;  %v680_v50 = vadd.f32 %v679_v39, %v678_v42  ;;  %v625_v51 = vadd.f32 %v624_v40, %v623_v41 }
 0x111   :  { %v492_v45 = vadd.f32 %v893_v27, %v845_v35  ;;  %v797_v46 = vpack.c.bf16 %v484_v36, %v484_v36  ;;  %v626_v47 = vsel %vm311_vm0, %v484_v36, 0.0  ;;  %v664_v48 = vmul.f32 %v484_v36, %v484_v36 }
 0x112   :  { %v848_v52 = vadd.f32 %v847_v43, %v846_v37  ;;  %v487_v53 = vadd.f32 %v842_v17, %v486_v44  ;;  %v627_v58 = vadd.f32 %v626_v47, %v625_v51  ;;  %v682_v59 = vadd.f32 %v681_v55, %v680_v50 }
 0x113   :  { %v799_v56 = vpack.c.bf16 %v492_v45, %v492_v45  ;;  %599 = vst.msk [vmem:[%s1264_s2 + $0x10] sm:$0xf] %vm594_vm2, %v797_v46  ;;  %v683_v57 = vsel %vm311_vm0, %v664_v48, 0.0  ;;  %v666_v63 = vmul.f32 %v492_v45, %v492_v45  ;;  %v630_v15 = vsel %vm311_vm0, %v492_v45, 0.0 }
 0x114   :  { %v495_v60 = vadd.f32 %v894_v38, %v848_v52  ;;  %v798_v62 = vpack.c.bf16 %v487_v53, %v487_v53  ;;  %v628_v0 = vsel %vm311_vm0, %v487_v53, 0.0  ;;  %v665_v1 = vmul.f32 %v487_v53, %v487_v53 }
 0x115   :  { %601 = vst.msk [vmem:[%s1264_s2 + $0x18] sm:$0xf] %vm594_vm2, %v799_v56  ;;  %v849_v3 = vpop.f32.mrb[16].mxu0  ;;  %v897_v4 = vpop.f32.mrb[16].mxu1  ;;  %v684_v5 = vadd.f32 %v683_v57, %v682_v59  ;;  %v629_v10 = vadd.f32 %v628_v0, %v627_v58  ;;  %v687_v19 = vsel %vm311_vm0, %v666_v63, 0.0 }
 0x116   :  { %v800_v6 = vpack.c.bf16 %v495_v60, %v495_v60  ;;  %v667_v7 = vmul.f32 %v495_v60, %v495_v60  ;;  %600 = vst.msk [vmem:[%s1264_s2 + $0x14] sm:$0xf] %vm594_vm2, %v798_v62  ;;  %v850_v8 = vpop.f32.mrb[17].mxu0  ;;  %v499_v9 = vpop.f32.mrb[17].mxu1  ;;  %v685_v11 = vsel %vm311_vm0, %v665_v1, 0.0  ;;  %v632_v23 = vsel %vm311_vm0, %v495_v60, 0.0 }
 0x117   :  { %v851_v12 = vadd.f32 %v850_v8, %v849_v3  ;;  %v852_v13 = vpop.f32.mrb[18].mxu0  ;;  %v898_v14 = vpop.f32.mrb[18].mxu1  ;;  %v686_v16 = vadd.f32 %v685_v11, %v684_v5  ;;  %v631_v20 = vadd.f32 %v630_v15, %v629_v10 }
 0x118   :  { %602 = vst.msk [vmem:[%s1264_s2 + $0x1c] sm:$0xf] %vm594_vm2, %v800_v6  ;;  %v853_v17 = vpop.f32.mrb[19].mxu0  ;;  %v502_v18 = vpop.f32.mrb[19].mxu1  ;;  %v689_v24 = vsel %vm311_vm0, %v667_v7, 0.0 }
 0x119   :  { %v854_v21 = vadd.f32 %v853_v17, %v852_v13  ;;  %v500_v22 = vadd.f32 %v851_v12, %v499_v9  ;;  %v688_v25 = vadd.f32 %v687_v19, %v686_v16  ;;  %v633_v27 = vadd.f32 %v632_v23, %v631_v20 }
 0x11b   :  { %v801_v26 = vpack.c.bf16 %v500_v22, %v500_v22  ;;  %v634_v28 = vsel %vm311_vm0, %v500_v22, 0.0  ;;  %v668_v29 = vmul.f32 %v500_v22, %v500_v22  ;;  %v690_v30 = vadd.f32 %v689_v24, %v688_v25 }
 0x11c   :  { %v503_v31 = vadd.f32 %v854_v21, %v502_v18  ;;  %v635_v32 = vadd.f32 %v634_v28, %v633_v27 }
 0x11d   :  { %603 = vst.msk [vmem:[%s1264_s2 + $0x20] sm:$0xf] %vm594_vm2, %v801_v26  ;;  %v691_v33 = vsel %vm311_vm0, %v668_v29, 0.0  ;;  %v855_v34 = vpop.f32.mrb[20].mxu0  ;;  %v901_v35 = vpop.f32.mrb[20].mxu1 }
 0x11e   :  { %v692_v36 = vadd.f32 %v691_v33, %v690_v30  ;;  %v802_v37 = vpack.c.bf16 %v503_v31, %v503_v31  ;;  %v636_v38 = vsel %vm311_vm0, %v503_v31, 0.0  ;;  %v669_v39 = vmul.f32 %v503_v31, %v503_v31  ;;  %v856_v40 = vpop.f32.mrb[21].mxu0  ;;  %v515_v41 = vpop.f32.mrb[21].mxu1 }
 0x11f   :  { %v637_v42 = vadd.f32 %v636_v38, %v635_v32  ;;  %v524_v43 = vadd.f32 %v901_v35, %v1142_v61  ;;  %v857_v44 = vadd.f32 %v856_v40, %v855_v34  ;;  %v516_v45 = vadd.f32 %v1138_v49, %v515_v41  ;;  %v858_v46 = vpop.f32.mrb[22].mxu0  ;;  %v902_v47 = vpop.f32.mrb[22].mxu1  ;;  %v618_v38 = vld [vmem:[%s1262_s3] sm:$0x1] }
 0x120   :  { %604 = vst.msk [vmem:[%s1264_s2 + $0x24] sm:$0xf] %vm594_vm2, %v802_v37  ;;  %v693_v48 = vsel %vm311_vm0, %v669_v39, 0.0  ;;  %v527_v50 = vadd.f32 %v902_v47, %v1144_v2  ;;  %v859_v51 = vpop.f32.mrb[23].mxu0  ;;  %v518_v52 = vpop.f32.mrb[23].mxu1 }
 0x121   :  { %v694_v53 = vadd.f32 %v693_v48, %v692_v36  ;;  %v807_v55 = vpack.c.bf16 %v524_v43, %v524_v43  ;;  %v508_v56 = vadd.f32 %v897_v4, %v857_v44  ;;  %v805_v61 = vpack.c.bf16 %v516_v45, %v516_v45  ;;  %v659_v41 = vld [vmem:[%s1263_s4] sm:$0x1] }
 0x122   :  { %v808_v49 = vpack.c.bf16 %v527_v50, %v527_v50  ;;  %v860_v60 = vadd.f32 %v859_v51, %v858_v46  ;;  %v519_v62 = vadd.f32 %v1140_v54, %v518_v52  ;;  %v672_v4 = vmul.f32 %v516_v45, %v516_v45 }
 0x123   :  { %609 = vst.msk [vmem:[%s1264_s2 + $0x38] sm:$0xf] %vm594_vm2, %v807_v55  ;;  %v803_v57 = vpack.c.bf16 %v508_v56, %v508_v56  ;;  %v638_v58 = vsel %vm311_vm0, %v508_v56, 0.0  ;;  %v670_v59 = vmul.f32 %v508_v56, %v508_v56  ;;  %607 = vst.msk [vmem:[%s1264_s2 + $0x30] sm:$0xf] %vm594_vm2, %v805_v61  ;;  %v642_v8 = vsel %vm311_vm0, %v516_v45, 0.0 }
 0x124   :  { %v639_v2 = vadd.f32 %v638_v58, %v637_v42  ;;  %610 = vst.msk [vmem:[%s1264_s2 + $0x3c] sm:$0xf] %vm594_vm2, %v808_v49  ;;  %v511_v1 = vadd.f32 %v898_v14, %v860_v60  ;;  %v806_v3 = vpack.c.bf16 %v519_v62, %v519_v62  ;;  %v673_v10 = vmul.f32 %v519_v62, %v519_v62 }
 0x125   :  { %605 = vst.msk [vmem:[%s1264_s2 + $0x28] sm:$0xf] %vm594_vm2, %v803_v57  ;;  %v695_v63 = vsel %vm311_vm0, %v670_v59, 0.0  ;;  %v674_v13 = vmul.f32 %v524_v43, %v524_v43  ;;  %v699_v14 = vsel %vm311_vm0, %v672_v4, 0.0  ;;  %v644_v15 = vsel %vm311_vm0, %v519_v62, 0.0 }
 0x126   :  { %v696_v0 = vadd.f32 %v695_v63, %v694_v53  ;;  %v804_v5 = vpack.c.bf16 %v511_v1, %v511_v1  ;;  %v640_v6 = vsel %vm311_vm0, %v511_v1, 0.0  ;;  %v671_v7 = vmul.f32 %v511_v1, %v511_v1  ;;  %608 = vst.msk [vmem:[%s1264_s2 + $0x34] sm:$0xf] %vm594_vm2, %v806_v3 }
 0x127   :  { %v641_v54 = vadd.f32 %v640_v6, %v639_v2  ;;  %v646_v18 = vsel %vm311_vm0, %v524_v43, 0.0  ;;  %v675_v19 = vmul.f32 %v527_v50, %v527_v50  ;;  %v701_v20 = vsel %vm311_vm0, %v673_v10, 0.0 }
 0x128   :  { %606 = vst.msk [vmem:[%s1264_s2 + $0x2c] sm:$0xf] %vm594_vm2, %v804_v5  ;;  %v697_v9 = vsel %vm311_vm0, %v671_v7, 0.0  ;;  %v703_v23 = vsel %vm311_vm0, %v674_v13, 0.0  ;;  %v648_v24 = vsel %vm311_vm0, %v527_v50, 0.0 }
 0x129   :  { %v698_v11 = vadd.f32 %v697_v9, %v696_v0  ;;  %v643_v12 = vadd.f32 %v642_v8, %v641_v54  ;;  %v705_v27 = vsel %vm311_vm0, %v675_v19, 0.0 }
 0x12b   :  { %v645_v16 = vadd.f32 %v644_v15, %v643_v12  ;;  %v700_v17 = vadd.f32 %v699_v14, %v698_v11 }
 0x12d   :  { %v647_v21 = vadd.f32 %v646_v18, %v645_v16  ;;  %v702_v22 = vadd.f32 %v701_v20, %v700_v17 }
 0x12f   :  { %v649_v25 = vadd.f32 %v648_v24, %v647_v21  ;;  %v704_v26 = vadd.f32 %v703_v23, %v702_v22 }
 0x131   :  { %v650_v28 = vrot.slane %v649_v25, 4  ;;  %v706_v29 = vadd.f32 %v705_v27, %v704_v26 }
 0x133   :  { %v651_v30 = vadd.f32 %v650_v28, %v649_v25  ;;  %v707_v31 = vrot.slane %v706_v29, 4 }
 0x135   :  { %v652_v32 = vrot.slane %v651_v30, 2  ;;  %v708_v33 = vadd.f32 %v707_v31, %v706_v29 }
 0x137   :  { %v653_v34 = vadd.f32 %v652_v32, %v651_v30  ;;  %v709_v35 = vrot.slane %v708_v33, 2 }
 0x139   :  { %v654_v36 = vrot.slane %v653_v34, 1  ;;  %v710_v37 = vadd.f32 %v709_v35, %v708_v33 }
 0x13b   :  { %v655_v39 = vadd.f32 %v654_v36, %v653_v34  ;;  %v711_v40 = vrot.slane %v710_v37, 1 }
 0x13d   :  { %v656_v42 = vadd.f32 %v655_v39, %v618_v38  ;;  %v712_v43 = vadd.f32 %v711_v40, %v710_v37 }
 0x13f   :  { %658 = vst.msk [vmem:[%s1262_s3] sm:$0x1] %vm615_vm1, %v656_v42  ;;  %v713_v44 = vadd.f32 %v712_v43, %v659_v41 }
 0x141   :  { %714 = vst.msk [vmem:[%s1263_s4] sm:$0x1] %vm615_vm1, %v713_v44 }

// kernel: forward.31
= control target key start
LH: loop header
LB: loop body
LE: loop exit
PB: predicated region body
PF: predicated region fallthrough
CT: control target
= control target key end

     0   :  { %vm45_vm0 = vcmask 261120   ;;  %vm126_vm1 = vcmask 516096   ;;  %v210_v4 = vmov 0.0   ;;  %vm117_vm2 = vcmask 519168   ;;  %s294_s1 = inlined_call_operand.vmem [shape: bf16[32,64], index: 1, kind: input, shape index: {}]   ;;  %s295_s0 = inlined_call_operand.vmem [shape: bf16[32,32], index: 0, kind: input, shape index: {}]   ;;  %s296_s3 = inlined_call_operand.vmem [shape: f32[1,64], index: 3, kind: output, shape index: {1}]   ;;  %s297_s4 = inlined_call_operand.vmem [shape: f32[1,64], index: 4, kind: output, shape index: {2}]   ;;  %s298_s2 = inlined_call_operand.vmem [shape: bf16[32,64], index: 2, kind: output, shape index: {0}]  }
   0x1   :  { %v206_v0 = vld [vmem:[%s294_s1] sm:$0xff]   ;;  %v207_v1 = vld [vmem:[%s294_s1 + $0x8] sm:$0xff]   ;;  %127 = vst.msk [vmem:[%s296_s3] sm:$0x1] %vm126_vm1, %v210_v4  ;;  %128 = vst.msk [vmem:[%s297_s4] sm:$0x1] %vm126_vm1, %v210_v4 }
   0x2   :  { %197 = vmatprep.subr.bf16.mxu0 %v206_v0  ;;  %v208_v2 = vld [vmem:[%s295_s0] sm:$0xff]   ;;  %v209_v3 = vld [vmem:[%s295_s0 + $0x8] sm:$0xff]   ;;  %vm130_vm3 = vcmask 523264  }
   0x3   :  { %198 = vmatpush3.bf16.msra.mxu0 %v206_v0  ;;  %201 = vmatprep.mubr.msk.bf16.mxu0 %vm45_vm0, %v208_v2 }
   0x4   :  { %199 = vmatprep.subr.bf16.mxu0 %v207_v1 }
   0x7   :  { %200 = vmatpush3.bf16.msra.mxu0 %v207_v1 }
   0x8   :  { %v129_v40 = vld [vmem:[%s296_s3] sm:$0x1] }
   0x9   :  { %v147_v43 = vld [vmem:[%s297_s4] sm:$0x1] }
   0xa   :  { %202 = vmatmul.mubr.msk.bf16.vlgmr.msra.gmra.mrb[0].mxu0 %vm45_vm0, %v209_v3 }
  0xdd   :  { %v203_v5 = vpop.f32.mrb[0].mxu0 }
  0xde   :  { %v191_v6 = vpack.c.bf16 %v203_v5, %v203_v5  ;;  %v86_v7 = vpop.f32.mrb[1].mxu0  ;;  %v150_v11 = vmul.f32 %v203_v5, %v203_v5  ;;  %v134_v19 = vsel %vm130_vm3, %v203_v5, 0.0 }
  0xdf   :  { %v189_v8 = vpack.c.bf16 %v86_v7, %v86_v7  ;;  %v148_v9 = vmul.f32 %v86_v7, %v86_v7  ;;  %v204_v10 = vpop.f32.mrb[2].mxu0  ;;  %v131_v14 = vsel %vm130_vm3, %v86_v7, 0.0 }
  0xe0   :  { %120 = vst.msk [vmem:[%s298_s2 + $0x8] sm:$0xf] %vm117_vm2, %v191_v6  ;;  %v192_v12 = vpack.c.bf16 %v204_v10, %v204_v10  ;;  %v89_v13 = vpop.f32.mrb[3].mxu0  ;;  %v151_v21 = vmul.f32 %v204_v10, %v204_v10  ;;  %v155_v25 = vsel %vm130_vm3, %v150_v11, 0.0  ;;  %v136_v26 = vsel %vm130_vm3, %v204_v10, 0.0 }
  0xe1   :  { %118 = vst.msk [vmem:[%s298_s2] sm:$0xf] %vm117_vm2, %v189_v8  ;;  %v190_v15 = vpack.c.bf16 %v89_v13, %v89_v13  ;;  %v132_v16 = vsel %vm130_vm3, %v89_v13, 0.0  ;;  %v149_v17 = vmul.f32 %v89_v13, %v89_v13  ;;  %v152_v20 = vsel %vm130_vm3, %v148_v9, 0.0 }
  0xe2   :  { %121 = vst.msk [vmem:[%s298_s2 + $0xc] sm:$0xf] %vm117_vm2, %v192_v12  ;;  %v133_v18 = vadd.f32 %v132_v16, %v131_v14  ;;  %v157_v29 = vsel %vm130_vm3, %v151_v21, 0.0 }
  0xe3   :  { %119 = vst.msk [vmem:[%s298_s2 + $0x4] sm:$0xf] %vm117_vm2, %v190_v15  ;;  %v153_v22 = vsel %vm130_vm3, %v149_v17, 0.0 }
  0xe4   :  { %v135_v23 = vadd.f32 %v134_v19, %v133_v18  ;;  %v154_v24 = vadd.f32 %v153_v22, %v152_v20 }
  0xe6   :  { %v137_v27 = vadd.f32 %v136_v26, %v135_v23  ;;  %v156_v28 = vadd.f32 %v155_v25, %v154_v24 }
  0xe8   :  { %v138_v30 = vrot.slane %v137_v27, 4  ;;  %v158_v31 = vadd.f32 %v157_v29, %v156_v28 }
  0xea   :  { %v139_v32 = vadd.f32 %v138_v30, %v137_v27  ;;  %v159_v33 = vrot.slane %v158_v31, 4 }
  0xec   :  { %v140_v34 = vrot.slane %v139_v32, 2  ;;  %v160_v35 = vadd.f32 %v159_v33, %v158_v31 }
  0xee   :  { %v141_v36 = vadd.f32 %v140_v34, %v139_v32  ;;  %v161_v37 = vrot.slane %v160_v35, 2 }
  0xf0   :  { %v142_v38 = vrot.slane %v141_v36, 1  ;;  %v162_v39 = vadd.f32 %v161_v37, %v160_v35 }
  0xf2   :  { %v143_v41 = vadd.f32 %v142_v38, %v141_v36  ;;  %v163_v42 = vrot.slane %v162_v39, 1 }
  0xf4   :  { %v144_v44 = vadd.f32 %v143_v41, %v129_v40  ;;  %v164_v45 = vadd.f32 %v163_v42, %v162_v39 }
  0xf6   :  { %146 = vst.msk [vmem:[%s296_s3] sm:$0x1] %vm126_vm1, %v144_v44  ;;  %v165_v46 = vadd.f32 %v164_v45, %v147_v43 }
  0xf8   :  { %166 = vst.msk [vmem:[%s297_s4] sm:$0x1] %vm126_vm1, %v165_v46 }

// kernel: forward.29
= control target key start
LH: loop header
LB: loop body
LE: loop exit
PB: predicated region body
PF: predicated region fallthrough
CT: control target
= control target key end

     0   :  { %v19_v0 = vlaneseq  ;;  %v107_v21 = vmov 1983009808   ;;  %s140_s0 = inlined_call_operand.vmem [shape: bf16[4,512], index: 0, kind: input, shape index: {}]   ;;  %s141_s1 = inlined_call_operand.vmem [shape: f32[1,512], index: 1, kind: input, shape index: {}]   ;;  %s142_s2 = inlined_call_operand.vmem [shape: f32[1,512], index: 2, kind: input, shape index: {}]   ;;  %s143_s3 = inlined_call_operand.vmem [shape: bf16[4,512], index: 3, kind: output, shape index: {}]  }
   0x1   :  { %v14_v1 = vld [vmem:[%s140_s0] sm:$0xff]  ;;  %v84_v22 = vunpack.c.l.s4 %v107_v21 }
   0x2   :  { %v20_v2 = vshrl.u32 %v19_v0, 7  ;;  %v17_v3 = vld [vmem:[%s141_s1] sm:$0xf]  ;;  %v15_v9 = vunpack.c.l.bf16 %v14_v1  ;;  %v16_v10 = vunpack.c.h.bf16 %v14_v1 }
   0x3   :  { %v41_v8 = vld [vmem:[%s142_s2] sm:$0xf]  ;;  %v85_v29 = vunpack.c.0.s8 %v84_v22 }
   0x4   :  { %v21_v4 = vsub.s32 0, %v20_v2  ;;  %v25_v5 = vsub.s32 1, %v20_v2  ;;  %v29_v6 = vsub.s32 2, %v20_v2  ;;  %v33_v7 = vsub.s32 3, %v20_v2 }
   0x5   :  { %v88_v34 = vsub.s32 %v85_v29, %v20_v2 }
   0x6   :  { %v22_v11 = vrot.slane %v17_v3, %v21_v4  ;;  %v26_v12 = vrot.slane %v17_v3, %v25_v5  ;;  %v30_v13 = vrot.slane %v17_v3, %v29_v6  ;;  %v34_v14 = vrot.slane %v17_v3, %v33_v7 }
   0x7   :  { %v46_v15 = vrot.slane %v41_v8, %v21_v4  ;;  %v50_v16 = vrot.slane %v41_v8, %v25_v5  ;;  %v54_v17 = vrot.slane %v41_v8, %v29_v6  ;;  %v58_v18 = vrot.slane %v41_v8, %v33_v7 }
   0x8   :  { %v35_v19 = vcombine.low %v22_v11, %v26_v12  ;;  %v36_v20 = vcombine.low %v30_v13, %v34_v14 }
   0x9   :  { %v59_v23 = vcombine.low %v46_v15, %v50_v16  ;;  %v60_v24 = vcombine.low %v54_v17, %v58_v18 }
   0xa   :  { %v39_v25 = vmul.f32 %v35_v19, %v15_v9  ;;  %v40_v26 = vmul.f32 %v36_v20, %v16_v10 }
   0xc   :  { %v63_v27 = vadd.f32 %v59_v23, %v39_v25  ;;  %v64_v28 = vadd.f32 %v60_v24, %v40_v26 }
   0xe   :  { %v65_v30 = vmax.f32 %v63_v27, 0.0  ;;  %v66_v31 = vmax.f32 %v64_v28, 0.0 }
  0x10   :  { %v69_v32 = vcombine.high %v65_v30, %v65_v30  ;;  %v70_v33 = vcombine.high %v66_v31, %v66_v31 }
  0x12   :  { %v104_v35 = vpack.c.bf16 %v69_v32, %v65_v30  ;;  %v105_v36 = vpack.c.bf16 %v70_v33, %v66_v31 }
  0x14   :  { %v89_v37 = vrot.slane %v104_v35, %v88_v34  ;;  %v96_v38 = vrot.slane %v105_v36, %v88_v34 }
  0x16   :  { %v97_v39 = vcombine.low %v89_v37, %v96_v38 }
  0x18   :  { %99 = vst [vmem:[%s143_s3] sm:$0xff] %v97_v39 }

// kernel: forward.28
= control target key start
LH: loop header
LB: loop body
LE: loop exit
PB: predicated region body
PF: predicated region fallthrough
CT: control target
= control target key end

     0   :  { %vm197_vm0 = vcmask 261120   ;;  %vm327_vm1 = vcmask 516096   ;;  %v481_v24 = vmov 0.0   ;;  %vm318_vm2 = vcmask 519168   ;;  %s625_s1 = inlined_call_operand.vmem [shape: bf16[288,64], index: 1, kind: input, shape index: {}]   ;;  %s626_s0 = inlined_call_operand.vmem [shape: bf16[32,288], index: 0, kind: input, shape index: {}]   ;;  %s627_s3 = inlined_call_operand.vmem [shape: f32[1,64], index: 3, kind: output, shape index: {1}]   ;;  %s628_s4 = inlined_call_operand.vmem [shape: f32[1,64], index: 4, kind: output, shape index: {2}]   ;;  %s629_s2 = inlined_call_operand.vmem [shape: bf16[32,64], index: 2, kind: output, shape index: {0}]  }
   0x1   :  { %v455_v0 = vld [vmem:[%s625_s1 + $0x40] sm:$0xff]   ;;  %v457_v2 = vld [vmem:[%s625_s1 + $0x48] sm:$0xff]   ;;  %v459_v4 = vld [vmem:[%s625_s1 + $0x50] sm:$0xff]   ;;  %328 = vst.msk [vmem:[%s627_s3] sm:$0x1] %vm327_vm1, %v481_v24  ;;  %vm331_vm3 = vcmask 523264  }
   0x2   :  { %v456_v1 = vld [vmem:[%s625_s1] sm:$0xff]   ;;  %414 = vmatprep.subr.bf16.mxu0 %v455_v0  ;;  %v458_v3 = vld [vmem:[%s625_s1 + $0x8] sm:$0xff]   ;;  %v460_v5 = vld [vmem:[%s625_s1 + $0x10] sm:$0xff]   ;;  %329 = vst.msk [vmem:[%s628_s4] sm:$0x1] %vm327_vm1, %v481_v24 }
   0x3   :  { %415 = vmatpush3.bf16.msra.mxu0 %v456_v1  ;;  %v461_v6 = vld [vmem:[%s625_s1 + $0x58] sm:$0xff]   ;;  %v463_v8 = vld [vmem:[%s625_s1 + $0x60] sm:$0xff]   ;;  %v465_v11 = vld [vmem:[%s625_s1 + $0x68] sm:$0xff]  }
   0x4   :  { %416 = vmatprep.subr.bf16.mxu0 %v457_v2  ;;  %v462_v7 = vld [vmem:[%s625_s1 + $0x18] sm:$0xff]   ;;  %v469_v9 = vld [vmem:[%s625_s1 + $0x80] sm:$0xff]   ;;  %v466_v12 = vld [vmem:[%s625_s1 + $0x28] sm:$0xff]  }
   0x5   :  { %v464_v10 = vld [vmem:[%s625_s1 + $0x20] sm:$0xff]   ;;  %446 = vmatprep.subr.bf16.mxu1 %v469_v9  ;;  %v472_v13 = vld [vmem:[%s625_s1 + $0x88] sm:$0xff]   ;;  %v467_v14 = vld [vmem:[%s625_s1 + $0x70] sm:$0xff]  }
   0x6   :  { %447 = vmatpush3.bf16.msra.mxu1 %v469_v9  ;;  %v475_v15 = vld [vmem:[%s626_s0 + $0x4] ss:$12 sps:$4 sm:$0xff]   ;;  %v476_v16 = vld [vmem:[%s626_s0 + $0x8] ss:$12 sps:$4 sm:$0xff]   ;;  %v477_v17 = vld [vmem:[%s626_s0 + $0x20] ss:$12 sps:$4 sm:$0xff]  }
   0x7   :  { %417 = vmatpush3.bf16.msra.mxu0 %v458_v3  ;;  %448 = vmatprep.subr.bf16.mxu1 %v472_v13  ;;  %v468_v18 = vld [vmem:[%s625_s1 + $0x30] sm:$0xff]   ;;  %v470_v19 = vld [vmem:[%s625_s1 + $0x78] sm:$0xff]   ;;  %v473_v21 = vld [vmem:[%s626_s0] ss:$12 sps:$4 sm:$0xff]  }
   0x8   :  { %418 = vmatprep.subr.bf16.mxu0 %v459_v4  ;;  %236 = vmatprep.mubr.bf16.mxu0 %v475_v15  ;;  %v471_v20 = vld [vmem:[%s625_s1 + $0x38] sm:$0xff]  }
   0x9   :  { %450 = vmatprep.mubr.msk.bf16.mxu1 %vm197_vm0, %v476_v16  ;;  %v478_v22 = vld [vmem:[%s626_s0 + $0x1c] ss:$12 sps:$4 sm:$0xff]   ;;  %v480_v23 = vld [vmem:[%s626_s0 + $0x18] ss:$12 sps:$4 sm:$0xff]   ;;  %v348_v15 = vld [vmem:[%s628_s4] sm:$0x1] }
   0xa   :  { %449 = vmatpush3.bf16.msra.mxu1 %v472_v13 }
   0xb   :  { %419 = vmatpush3.bf16.msra.mxu0 %v460_v5 }
   0xc   :  { %420 = vmatprep.subr.bf16.mxu0 %v461_v6 }
   0xd   :  { %451 = vmatmul.mubr.msk.bf16.vlgmr.msra.gmra.mrb[0].mxu1 %vm197_vm0, %v477_v17 }
   0xf   :  { %421 = vmatpush3.bf16.msra.mxu0 %v462_v7 }
  0x10   :  { %422 = vmatprep.subr.bf16.mxu0 %v463_v8 }
  0x13   :  { %423 = vmatpush3.bf16.msra.mxu0 %v464_v10 }
  0x14   :  { %424 = vmatprep.subr.bf16.mxu0 %v465_v11 }
  0x17   :  { %425 = vmatpush3.bf16.msra.mxu0 %v466_v12  ;;  %v330_v12 = vld [vmem:[%s627_s3] sm:$0x1] }
  0x18   :  { %426 = vmatprep.subr.bf16.mxu0 %v467_v14 }
  0x1b   :  { %427 = vmatpush3.bf16.msra.mxu0 %v468_v18 }
  0x1c   :  { %428 = vmatprep.subr.bf16.mxu0 %v470_v19 }
  0x1f   :  { %429 = vmatpush3.bf16.msra.mxu0 %v471_v20 }
  0x22   :  { %237 = vmatmul.mubr.bf16.vlgmr.msra.gmra.mrb[0].mxu0 %v473_v21 }
  0x23   :  { %244 = vmatprep.mubr.bf16.mxu0 %v478_v22 }
  0x2a   :  { %245 = vmatmul.mubr.bf16.gmra.mrb[4].mxu0 %v480_v23 }
  0xe0   :  { %v452_v25 = vpop.f32.mrb[0].mxu1 }
  0xe1   :  { %v287_v26 = vpop.f32.mrb[1].mxu1 }
  0xe2   :  { %v453_v27 = vpop.f32.mrb[2].mxu1 }
  0xe3   :  { %v290_v28 = vpop.f32.mrb[3].mxu1 }
  0xf5   :  { %v430_v29 = vpop.f32.mrb[0].mxu0 }
  0xf6   :  { %v431_v30 = vpop.f32.mrb[1].mxu0 }
  0xf7   :  { %v432_v31 = vadd.f32 %v431_v30, %v430_v29  ;;  %v433_v32 = vpop.f32.mrb[2].mxu0 }
  0xf8   :  { %v434_v33 = vpop.f32.mrb[3].mxu0 }
  0xf9   :  { %v435_v34 = vadd.f32 %v434_v33, %v433_v32  ;;  %v288_v35 = vadd.f32 %v432_v31, %v287_v26 }
  0xfb   :  { %v410_v36 = vpack.c.bf16 %v288_v35, %v288_v35  ;;  %v349_v37 = vmul.f32 %v288_v35, %v288_v35  ;;  %v291_v38 = vadd.f32 %v435_v34, %v290_v28  ;;  %v332_v39 = vsel %vm331_vm3, %v288_v35, 0.0 }
  0xfd   :  { %319 = vst.msk [vmem:[%s629_s2] sm:$0xf] %vm318_vm2, %v410_v36  ;;  %v411_v40 = vpack.c.bf16 %v291_v38, %v291_v38  ;;  %v333_v41 = vsel %vm331_vm3, %v291_v38, 0.0  ;;  %v350_v42 = vmul.f32 %v291_v38, %v291_v38  ;;  %v436_v43 = vpop.f32.mrb[4].mxu0  ;;  %v353_v46 = vsel %vm331_vm3, %v349_v37, 0.0 }
  0xfe   :  { %v334_v44 = vadd.f32 %v333_v41, %v332_v39  ;;  %v437_v45 = vpop.f32.mrb[5].mxu0 }
  0xff   :  { %320 = vst.msk [vmem:[%s629_s2 + $0x4] sm:$0xf] %vm318_vm2, %v411_v40  ;;  %v354_v47 = vsel %vm331_vm3, %v350_v42, 0.0  ;;  %v438_v48 = vadd.f32 %v437_v45, %v436_v43  ;;  %v439_v49 = vpop.f32.mrb[6].mxu0 }
 0x100   :  { %v355_v50 = vadd.f32 %v354_v47, %v353_v46  ;;  %v440_v51 = vpop.f32.mrb[7].mxu0 }
 0x101   :  { %v296_v52 = vadd.f32 %v452_v25, %v438_v48  ;;  %v441_v53 = vadd.f32 %v440_v51, %v439_v49 }
 0x103   :  { %v412_v54 = vpack.c.bf16 %v296_v52, %v296_v52  ;;  %v335_v55 = vsel %vm331_vm3, %v296_v52, 0.0  ;;  %v351_v56 = vmul.f32 %v296_v52, %v296_v52  ;;  %v299_v57 = vadd.f32 %v453_v27, %v441_v53 }
 0x104   :  { %v336_v58 = vadd.f32 %v335_v55, %v334_v44 }
 0x105   :  { %321 = vst.msk [vmem:[%s629_s2 + $0x8] sm:$0xf] %vm318_vm2, %v412_v54  ;;  %v356_v59 = vsel %vm331_vm3, %v351_v56, 0.0  ;;  %v413_v60 = vpack.c.bf16 %v299_v57, %v299_v57  ;;  %v337_v61 = vsel %vm331_vm3, %v299_v57, 0.0  ;;  %v352_v62 = vmul.f32 %v299_v57, %v299_v57 }
 0x106   :  { %v357_v63 = vadd.f32 %v356_v59, %v355_v50  ;;  %v338_v0 = vadd.f32 %v337_v61, %v336_v58 }
 0x107   :  { %322 = vst.msk [vmem:[%s629_s2 + $0xc] sm:$0xf] %vm318_vm2, %v413_v60  ;;  %v358_v1 = vsel %vm331_vm3, %v352_v62, 0.0 }
 0x108   :  { %v339_v2 = vrot.slane %v338_v0, 4  ;;  %v359_v3 = vadd.f32 %v358_v1, %v357_v63 }
 0x10a   :  { %v340_v4 = vadd.f32 %v339_v2, %v338_v0  ;;  %v360_v5 = vrot.slane %v359_v3, 4 }
 0x10c   :  { %v341_v6 = vrot.slane %v340_v4, 2  ;;  %v361_v7 = vadd.f32 %v360_v5, %v359_v3 }
 0x10e   :  { %v342_v8 = vadd.f32 %v341_v6, %v340_v4  ;;  %v362_v9 = vrot.slane %v361_v7, 2 }
 0x110   :  { %v343_v10 = vrot.slane %v342_v8, 1  ;;  %v363_v11 = vadd.f32 %v362_v9, %v361_v7 }
 0x112   :  { %v344_v13 = vadd.f32 %v343_v10, %v342_v8  ;;  %v364_v14 = vrot.slane %v363_v11, 1 }
 0x114   :  { %v345_v16 = vadd.f32 %v344_v13, %v330_v12  ;;  %v365_v17 = vadd.f32 %v364_v14, %v363_v11 }
 0x116   :  { %347 = vst.msk [vmem:[%s627_s3] sm:$0x1] %vm327_vm1, %v345_v16  ;;  %v366_v18 = vadd.f32 %v365_v17, %v348_v15 }
 0x118   :  { %367 = vst.msk [vmem:[%s628_s4] sm:$0x1] %vm327_vm1, %v366_v18 }

// kernel: forward.32
= control target key start
LH: loop header
LB: loop body
LE: loop exit
PB: predicated region body
PF: predicated region fallthrough
CT: control target
= control target key end

     0   :  { %v28_v0 = vlaneseq  ;;  %v169_v42 = vmov 1983009808   ;;  %s226_s0 = inlined_call_operand.vmem [shape: bf16[4,512], index: 0, kind: input, shape index: {}]   ;;  %s227_s1 = inlined_call_operand.vmem [shape: f32[1,512], index: 1, kind: input, shape index: {}]   ;;  %s228_s3 = inlined_call_operand.vmem [shape: bf16[4,512], index: 3, kind: input, shape index: {}]   ;;  %s229_s2 = inlined_call_operand.vmem [shape: f32[1,512], index: 2, kind: input, shape index: {}]   ;;  %s230_s4 = inlined_call_operand.vmem [shape: f32[1,512], index: 4, kind: input, shape index: {}]   ;;  %s231_s5 = inlined_call_operand.vmem [shape: f32[1,512], index: 5, kind: input, shape index: {}]   ;;  %s232_s6 = inlined_call_operand.vmem [shape: bf16[4,512], index: 6, kind: output, shape index: {}]  }
   0x1   :  { %v23_v1 = vld [vmem:[%s226_s0] sm:$0xff]  ;;  %v146_v43 = vunpack.c.l.s4 %v169_v42 }
   0x2   :  { %v29_v2 = vshrl.u32 %v28_v0, 7  ;;  %v74_v3 = vld [vmem:[%s228_s3] sm:$0xff]  ;;  %v24_v10 = vunpack.c.l.bf16 %v23_v1  ;;  %v25_v11 = vunpack.c.h.bf16 %v23_v1 }
   0x3   :  { %v26_v4 = vld [vmem:[%s227_s1] sm:$0xf]  ;;  %v75_v12 = vunpack.c.l.bf16 %v74_v3  ;;  %v76_v13 = vunpack.c.h.bf16 %v74_v3  ;;  %v147_v52 = vunpack.c.0.s8 %v146_v43 }
   0x4   :  { %v30_v5 = vsub.s32 0, %v29_v2  ;;  %v34_v6 = vsub.s32 1, %v29_v2  ;;  %v38_v7 = vsub.s32 2, %v29_v2  ;;  %v42_v8 = vsub.s32 3, %v29_v2  ;;  %v50_v9 = vld [vmem:[%s229_s2] sm:$0xf] }
   0x5   :  { %v77_v14 = vld [vmem:[%s230_s4] sm:$0xf]  ;;  %v150_v57 = vsub.s32 %v147_v52, %v29_v2 }
   0x6   :  { %v31_v15 = vrot.slane %v26_v4, %v30_v5  ;;  %v35_v16 = vrot.slane %v26_v4, %v34_v6  ;;  %v39_v17 = vrot.slane %v26_v4, %v38_v7  ;;  %v43_v18 = vrot.slane %v26_v4, %v42_v8  ;;  %v101_v23 = vld [vmem:[%s231_s5] sm:$0xf] }
   0x7   :  { %v55_v19 = vrot.slane %v50_v9, %v30_v5  ;;  %v59_v20 = vrot.slane %v50_v9, %v34_v6  ;;  %v63_v21 = vrot.slane %v50_v9, %v38_v7  ;;  %v67_v22 = vrot.slane %v50_v9, %v42_v8 }
   0x8   :  { %v44_v24 = vcombine.low %v31_v15, %v35_v16  ;;  %v45_v25 = vcombine.low %v39_v17, %v43_v18  ;;  %v82_v26 = vrot.slane %v77_v14, %v30_v5  ;;  %v86_v27 = vrot.slane %v77_v14, %v34_v6 }
   0x9   :  { %v68_v28 = vcombine.low %v55_v19, %v59_v20  ;;  %v69_v29 = vcombine.low %v63_v21, %v67_v22  ;;  %v90_v30 = vrot.slane %v77_v14, %v38_v7  ;;  %v94_v31 = vrot.slane %v77_v14, %v42_v8 }
   0xa   :  { %v48_v32 = vmul.f32 %v44_v24, %v24_v10  ;;  %v49_v33 = vmul.f32 %v45_v25, %v25_v11  ;;  %v95_v34 = vcombine.low %v82_v26, %v86_v27  ;;  %v106_v35 = vrot.slane %v101_v23, %v30_v5 }
   0xb   :  { %v96_v36 = vcombine.low %v90_v30, %v94_v31  ;;  %v110_v37 = vrot.slane %v101_v23, %v34_v6  ;;  %v114_v38 = vrot.slane %v101_v23, %v38_v7  ;;  %v118_v39 = vrot.slane %v101_v23, %v42_v8 }
   0xc   :  { %v72_v40 = vadd.f32 %v68_v28, %v48_v32  ;;  %v99_v41 = vmul.f32 %v95_v34, %v75_v12  ;;  %v73_v44 = vadd.f32 %v69_v29, %v49_v33 }
   0xd   :  { %v100_v45 = vmul.f32 %v96_v36, %v76_v13  ;;  %v119_v46 = vcombine.low %v106_v35, %v110_v37  ;;  %v120_v47 = vcombine.low %v114_v38, %v118_v39 }
   0xf   :  { %v123_v48 = vadd.f32 %v119_v46, %v99_v41  ;;  %v124_v49 = vadd.f32 %v120_v47, %v100_v45 }
  0x11   :  { %v125_v50 = vadd.f32 %v123_v48, %v72_v40  ;;  %v126_v51 = vadd.f32 %v124_v49, %v73_v44 }
  0x13   :  { %v127_v53 = vmax.f32 %v125_v50, 0.0  ;;  %v128_v54 = vmax.f32 %v126_v51, 0.0 }
  0x15   :  { %v131_v55 = vcombine.high %v127_v53, %v127_v53  ;;  %v132_v56 = vcombine.high %v128_v54, %v128_v54 }
  0x17   :  { %v166_v58 = vpack.c.bf16 %v131_v55, %v127_v53  ;;  %v167_v59 = vpack.c.bf16 %v132_v56, %v128_v54 }
  0x19   :  { %v151_v60 = vrot.slane %v166_v58, %v150_v57  ;;  %v158_v61 = vrot.slane %v167_v59, %v150_v57 }
  0x1b   :  { %v159_v62 = vcombine.low %v151_v60, %v158_v61 }
  0x1d   :  { %161 = vst [vmem:[%s232_s6] sm:$0xff] %v159_v62 }

// kernel: forward.30
= control target key start
LH: loop header
LB: loop body
LE: loop exit
PB: predicated region body
PF: predicated region fallthrough
CT: control target
= control target key end

     0   :  { %vm365_vm0 = vcmask 523264   ;;  %vm544_vm1 = vcmask 516096   ;;  %v777_v46 = vmov 0.0   ;;  %vm535_vm2 = vcmask 519168   ;;  %s989_s1 = inlined_call_operand.vmem [shape: bf16[576,64], index: 1, kind: input, shape index: {}]   ;;  %s990_s0 = inlined_call_operand.vmem [shape: bf16[32,576], index: 0, kind: input, shape index: {}]   ;;  %s991_s3 = inlined_call_operand.vmem [shape: f32[1,64], index: 3, kind: output, shape index: {1}]   ;;  %s992_s4 = inlined_call_operand.vmem [shape: f32[1,64], index: 4, kind: output, shape index: {2}]   ;;  %s993_s2 = inlined_call_operand.vmem [shape: bf16[32,64], index: 2, kind: output, shape index: {0}]  }
   0x1   :  { %v727_v0 = vld [vmem:[%s989_s1 + $0x40] sm:$0xff]   ;;  %v731_v4 = vld [vmem:[%s989_s1 + $0x48] sm:$0xff]   ;;  %v735_v8 = vld [vmem:[%s989_s1 + $0x50] sm:$0xff]   ;;  %545 = vst.msk [vmem:[%s991_s3] sm:$0x1] %vm544_vm1, %v777_v46 }
   0x2   :  { %v728_v1 = vld [vmem:[%s989_s1 + $0xc0] sm:$0xff]   ;;  %652 = vmatprep.subr.bf16.mxu0 %v727_v0  ;;  %v732_v5 = vld [vmem:[%s989_s1 + $0xc8] sm:$0xff]   ;;  %v736_v9 = vld [vmem:[%s989_s1 + $0xd0] sm:$0xff]   ;;  %546 = vst.msk [vmem:[%s992_s4] sm:$0x1] %vm544_vm1, %v777_v46 }
   0x3   :  { %v729_v2 = vld [vmem:[%s989_s1] sm:$0xff]   ;;  %680 = vmatprep.subr.bf16.mxu1 %v728_v1  ;;  %v733_v6 = vld [vmem:[%s989_s1 + $0x8] sm:$0xff]   ;;  %v737_v10 = vld [vmem:[%s989_s1 + $0x10] sm:$0xff]  }
   0x4   :  { %v730_v3 = vld [vmem:[%s989_s1 + $0x80] sm:$0xff]   ;;  %653 = vmatpush3.bf16.msra.mxu0 %v729_v2  ;;  %v734_v7 = vld [vmem:[%s989_s1 + $0x88] sm:$0xff]   ;;  %v738_v11 = vld [vmem:[%s989_s1 + $0x90] sm:$0xff]  }
   0x5   :  { %681 = vmatpush3.bf16.msra.mxu1 %v730_v3  ;;  %654 = vmatprep.subr.bf16.mxu0 %v731_v4  ;;  %v739_v12 = vld [vmem:[%s989_s1 + $0x58] sm:$0xff]   ;;  %v743_v16 = vld [vmem:[%s989_s1 + $0x60] sm:$0xff]   ;;  %v747_v20 = vld [vmem:[%s989_s1 + $0x68] sm:$0xff]  }
   0x6   :  { %682 = vmatprep.subr.bf16.mxu1 %v732_v5  ;;  %v740_v13 = vld [vmem:[%s989_s1 + $0xd8] sm:$0xff]   ;;  %v744_v17 = vld [vmem:[%s989_s1 + $0xe0] sm:$0xff]   ;;  %v748_v21 = vld [vmem:[%s989_s1 + $0xe8] sm:$0xff]  }
   0x7   :  { %v741_v14 = vld [vmem:[%s989_s1 + $0x18] sm:$0xff]   ;;  %v745_v18 = vld [vmem:[%s989_s1 + $0x20] sm:$0xff]   ;;  %v749_v22 = vld [vmem:[%s989_s1 + $0x28] sm:$0xff]  }
   0x8   :  { %655 = vmatpush3.bf16.msra.mxu0 %v733_v6  ;;  %v742_v15 = vld [vmem:[%s989_s1 + $0x98] sm:$0xff]   ;;  %v746_v19 = vld [vmem:[%s989_s1 + $0xa0] sm:$0xff]   ;;  %v750_v23 = vld [vmem:[%s989_s1 + $0xa8] sm:$0xff]  }
   0x9   :  { %683 = vmatpush3.bf16.msra.mxu1 %v734_v7  ;;  %656 = vmatprep.subr.bf16.mxu0 %v735_v8  ;;  %v751_v24 = vld [vmem:[%s989_s1 + $0x70] sm:$0xff]   ;;  %v755_v28 = vld [vmem:[%s989_s1 + $0x78] sm:$0xff]   ;;  %v764_v35 = vld [vmem:[%s990_s0 + $0xc] ss:$20 sps:$4 sm:$0xff]  }
   0xa   :  { %684 = vmatprep.subr.bf16.mxu1 %v736_v9  ;;  %v752_v25 = vld [vmem:[%s989_s1 + $0xf0] sm:$0xff]   ;;  %v756_v29 = vld [vmem:[%s989_s1 + $0xf8] sm:$0xff]   ;;  %v765_v36 = vld [vmem:[%s989_s1 + $0x100] sm:$0xff]   ;;  %453 = vmatprep.mubr.bf16.mxu1 %v764_v35 }
   0xb   :  { %v753_v26 = vld [vmem:[%s989_s1 + $0x30] sm:$0xff]   ;;  %v757_v30 = vld [vmem:[%s989_s1 + $0x38] sm:$0xff]   ;;  %v766_v37 = vld [vmem:[%s989_s1 + $0x108] sm:$0xff]  }
   0xc   :  { %657 = vmatpush3.bf16.msra.mxu0 %v737_v10  ;;  %v754_v27 = vld [vmem:[%s989_s1 + $0xb0] sm:$0xff]   ;;  %v758_v31 = vld [vmem:[%s989_s1 + $0xb8] sm:$0xff]   ;;  %v767_v38 = vld [vmem:[%s990_s0 + $0x2c] ss:$20 sps:$4 sm:$0xff]  }
   0xd   :  { %685 = vmatpush3.bf16.msra.mxu1 %v738_v11  ;;  %658 = vmatprep.subr.bf16.mxu0 %v739_v12  ;;  %v759_v32 = vld [vmem:[%s990_s0] ss:$20 sps:$4 sm:$0xff]   ;;  %v761_v33 = vld [vmem:[%s990_s0 + $0x4] ss:$20 sps:$4 sm:$0xff]   ;;  %v762_v34 = vld [vmem:[%s990_s0 + $0x8] ss:$20 sps:$4 sm:$0xff]  }
   0xe   :  { %686 = vmatprep.subr.bf16.mxu1 %v740_v13  ;;  %404 = vmatprep.mubr.bf16.mxu0 %v761_v33  ;;  %v769_v39 = vld [vmem:[%s990_s0 + $0x34] ss:$20 sps:$4 sm:$0xff]   ;;  %v772_v42 = vld [vmem:[%s990_s0 + $0x30] ss:$20 sps:$4 sm:$0xff]   ;;  %v774_v44 = vld [vmem:[%s989_s1 + $0x118] sm:$0xff]  }
   0xf   :  { %v771_v40 = vld [vmem:[%s990_s0 + $0x28] ss:$20 sps:$4 sm:$0xff]   ;;  %v773_v41 = vld [vmem:[%s989_s1 + $0x110] sm:$0xff]   ;;  %v776_v45 = vld [vmem:[%s990_s0 + $0x38] ss:$20 sps:$4 sm:$0xff]  }
  0x10   :  { %659 = vmatpush3.bf16.msra.mxu0 %v741_v14  ;;  %v775_v43 = vld [vmem:[%s990_s0 + $0x10] ss:$20 sps:$4 sm:$0xff]  }
  0x11   :  { %687 = vmatpush3.bf16.msra.mxu1 %v742_v15  ;;  %660 = vmatprep.subr.bf16.mxu0 %v743_v16 }
  0x12   :  { %688 = vmatprep.subr.bf16.mxu1 %v744_v17 }
  0x14   :  { %661 = vmatpush3.bf16.msra.mxu0 %v745_v18 }
  0x15   :  { %689 = vmatpush3.bf16.msra.mxu1 %v746_v19  ;;  %662 = vmatprep.subr.bf16.mxu0 %v747_v20 }
  0x16   :  { %690 = vmatprep.subr.bf16.mxu1 %v748_v21 }
  0x18   :  { %663 = vmatpush3.bf16.msra.mxu0 %v749_v22 }
  0x19   :  { %691 = vmatpush3.bf16.msra.mxu1 %v750_v23  ;;  %664 = vmatprep.subr.bf16.mxu0 %v751_v24 }
  0x1a   :  { %692 = vmatprep.subr.bf16.mxu1 %v752_v25 }
  0x1c   :  { %665 = vmatpush3.bf16.msra.mxu0 %v753_v26 }
  0x1d   :  { %693 = vmatpush3.bf16.msra.mxu1 %v754_v27  ;;  %666 = vmatprep.subr.bf16.mxu0 %v755_v28 }
  0x1e   :  { %694 = vmatprep.subr.bf16.mxu1 %v756_v29 }
  0x20   :  { %667 = vmatpush3.bf16.msra.mxu0 %v757_v30 }
  0x21   :  { %695 = vmatpush3.bf16.msra.mxu1 %v758_v31  ;;  %714 = vmatprep.subr.bf16.mxu0 %v765_v36 }
  0x23   :  { %405 = vmatmul.mubr.bf16.vlgmr.msra.gmra.mrb[0].mxu0 %v759_v32 }
  0x24   :  { %454 = vmatmul.mubr.bf16.vlgmr.msra.gmra.mrb[0].mxu1 %v762_v34  ;;  %715 = vmatpush3.bf16.msra.mxu0 %v765_v36 }
  0x25   :  { %716 = vmatprep.subr.bf16.mxu0 %v766_v37  ;;  %412 = vmatprep.mubr.bf16.mxu0 %v767_v38 }
  0x26   :  { %461 = vmatprep.mubr.bf16.mxu1 %v769_v39 }
  0x28   :  { %717 = vmatpush3.bf16.msra.mxu0 %v766_v37 }
  0x29   :  { %718 = vmatprep.subr.bf16.mxu0 %v773_v41 }
  0x2b   :  { %413 = vmatmul.mubr.bf16.gmra.mrb[4].mxu0 %v771_v40 }
  0x2c   :  { %462 = vmatmul.mubr.bf16.gmra.mrb[4].mxu1 %v772_v42  ;;  %722 = vmatprep.mubr.msk.bf16.mxu0 %vm365_vm0, %v775_v43 }
  0x2d   :  { %719 = vmatpush3.bf16.msra.mxu0 %v773_v41 }
  0x2e   :  { %720 = vmatprep.subr.bf16.mxu0 %v774_v44 }
  0x31   :  { %721 = vmatpush3.bf16.msra.mxu0 %v774_v44 }
  0x34   :  { %723 = vmatmul.mubr.msk.bf16.vlgmr.msra.gmra.mrb[8].mxu0 %vm365_vm0, %v776_v45 }
  0xf6   :  { %v668_v47 = vpop.f32.mrb[0].mxu0 }
  0xf7   :  { %v696_v48 = vpop.f32.mrb[0].mxu1  ;;  %v669_v49 = vpop.f32.mrb[1].mxu0 }
  0xf8   :  { %v670_v50 = vadd.f32 %v669_v49, %v668_v47  ;;  %v697_v51 = vpop.f32.mrb[1].mxu1  ;;  %v671_v52 = vpop.f32.mrb[2].mxu0 }
  0xf9   :  { %v698_v53 = vadd.f32 %v697_v51, %v696_v48  ;;  %v699_v54 = vpop.f32.mrb[2].mxu1  ;;  %v672_v55 = vpop.f32.mrb[3].mxu0 }
  0xfa   :  { %v673_v56 = vadd.f32 %v672_v55, %v671_v52  ;;  %v700_v57 = vpop.f32.mrb[3].mxu1 }
  0xfb   :  { %v701_v58 = vadd.f32 %v700_v57, %v699_v54  ;;  %v456_v59 = vadd.f32 %v698_v53, %v670_v50  ;;  %v547_v50 = vld [vmem:[%s991_s3] sm:$0x1] }
  0xfc   :  { %v564_v53 = vld [vmem:[%s992_s4] sm:$0x1] }
  0xfd   :  { %v459_v60 = vadd.f32 %v701_v58, %v673_v56 }
  0xfe   :  { %v674_v61 = vpop.f32.mrb[4].mxu0 }
  0xff   :  { %v702_v62 = vpop.f32.mrb[4].mxu1  ;;  %v675_v63 = vpop.f32.mrb[5].mxu0 }
 0x100   :  { %v676_v0 = vadd.f32 %v675_v63, %v674_v61  ;;  %v703_v1 = vpop.f32.mrb[5].mxu1  ;;  %v677_v2 = vpop.f32.mrb[6].mxu0 }
 0x101   :  { %v704_v3 = vadd.f32 %v703_v1, %v702_v62  ;;  %v705_v4 = vpop.f32.mrb[6].mxu1  ;;  %v678_v5 = vpop.f32.mrb[7].mxu0 }
 0x102   :  { %v679_v6 = vadd.f32 %v678_v5, %v677_v2  ;;  %v706_v7 = vpop.f32.mrb[7].mxu1 }
 0x103   :  { %v707_v8 = vadd.f32 %v706_v7, %v705_v4  ;;  %v464_v9 = vadd.f32 %v704_v3, %v676_v0 }
 0x105   :  { %v467_v10 = vadd.f32 %v707_v8, %v679_v6 }
 0x107   :  { %v724_v11 = vpop.f32.mrb[8].mxu0 }
 0x108   :  { %v513_v12 = vadd.f32 %v724_v11, %v464_v9  ;;  %v504_v13 = vpop.f32.mrb[9].mxu0 }
 0x109   :  { %v505_v14 = vadd.f32 %v504_v13, %v456_v59  ;;  %v725_v15 = vpop.f32.mrb[10].mxu0 }
 0x10a   :  { %v650_v16 = vpack.c.bf16 %v513_v12, %v513_v12  ;;  %v516_v17 = vadd.f32 %v725_v15, %v467_v10  ;;  %v507_v18 = vpop.f32.mrb[11].mxu0  ;;  %v567_v22 = vmul.f32 %v513_v12, %v513_v12  ;;  %v551_v29 = vsel %vm365_vm0, %v513_v12, 0.0 }
 0x10b   :  { %v648_v19 = vpack.c.bf16 %v505_v14, %v505_v14  ;;  %v565_v20 = vmul.f32 %v505_v14, %v505_v14  ;;  %v508_v21 = vadd.f32 %v507_v18, %v459_v60  ;;  %v548_v24 = vsel %vm365_vm0, %v505_v14, 0.0 }
 0x10c   :  { %538 = vst.msk [vmem:[%s993_s2 + $0x8] sm:$0xf] %vm535_vm2, %v650_v16  ;;  %v651_v23 = vpack.c.bf16 %v516_v17, %v516_v17  ;;  %v568_v31 = vmul.f32 %v516_v17, %v516_v17  ;;  %v572_v35 = vsel %vm365_vm0, %v567_v22, 0.0  ;;  %v553_v36 = vsel %vm365_vm0, %v516_v17, 0.0 }
 0x10d   :  { %536 = vst.msk [vmem:[%s993_s2] sm:$0xf] %vm535_vm2, %v648_v19  ;;  %v649_v25 = vpack.c.bf16 %v508_v21, %v508_v21  ;;  %v549_v26 = vsel %vm365_vm0, %v508_v21, 0.0  ;;  %v566_v27 = vmul.f32 %v508_v21, %v508_v21  ;;  %v569_v30 = vsel %vm365_vm0, %v565_v20, 0.0 }
 0x10e   :  { %539 = vst.msk [vmem:[%s993_s2 + $0xc] sm:$0xf] %vm535_vm2, %v651_v23  ;;  %v550_v28 = vadd.f32 %v549_v26, %v548_v24  ;;  %v574_v39 = vsel %vm365_vm0, %v568_v31, 0.0 }
 0x10f   :  { %537 = vst.msk [vmem:[%s993_s2 + $0x4] sm:$0xf] %vm535_vm2, %v649_v25  ;;  %v570_v32 = vsel %vm365_vm0, %v566_v27, 0.0 }
 0x110   :  { %v552_v33 = vadd.f32 %v551_v29, %v550_v28  ;;  %v571_v34 = vadd.f32 %v570_v32, %v569_v30 }
 0x112   :  { %v554_v37 = vadd.f32 %v553_v36, %v552_v33  ;;  %v573_v38 = vadd.f32 %v572_v35, %v571_v34 }
 0x114   :  { %v555_v40 = vrot.slane %v554_v37, 4  ;;  %v575_v41 = vadd.f32 %v574_v39, %v573_v38 }
 0x116   :  { %v556_v42 = vadd.f32 %v555_v40, %v554_v37  ;;  %v576_v43 = vrot.slane %v575_v41, 4 }
 0x118   :  { %v557_v44 = vrot.slane %v556_v42, 2  ;;  %v577_v45 = vadd.f32 %v576_v43, %v575_v41 }
 0x11a   :  { %v558_v46 = vadd.f32 %v557_v44, %v556_v42  ;;  %v578_v47 = vrot.slane %v577_v45, 2 }
 0x11c   :  { %v559_v48 = vrot.slane %v558_v46, 1  ;;  %v579_v49 = vadd.f32 %v578_v47, %v577_v45 }
 0x11e   :  { %v560_v51 = vadd.f32 %v559_v48, %v558_v46  ;;  %v580_v52 = vrot.slane %v579_v49, 1 }
 0x120   :  { %v561_v54 = vadd.f32 %v560_v51, %v547_v50  ;;  %v581_v55 = vadd.f32 %v580_v52, %v579_v49 }
 0x122   :  { %563 = vst.msk [vmem:[%s991_s3] sm:$0x1] %vm544_vm1, %v561_v54  ;;  %v582_v56 = vadd.f32 %v581_v55, %v564_v53 }
 0x124   :  { %583 = vst.msk [vmem:[%s992_s4] sm:$0x1] %vm544_vm1, %v582_v56 }

// kernel: forward.33
= control target key start
LH: loop header
LB: loop body
LE: loop exit
PB: predicated region body
PF: predicated region fallthrough
CT: control target
= control target key end

     0   :  { %v327_v0 = vmov 0.0|0.0   ;;  %vm328_vm0 = vmmov 0   ;;  %v329_v4 = vmov 0.0   ;;  %vm46_vm1 = vcmask 523264   ;;  %s434_s1 = inlined_call_operand.vmem [shape: f32[64,10], index: 1, kind: input, shape index: {}]   ;;  %s435_s0 = inlined_call_operand.vmem [shape: bf16[8,16,64], index: 0, kind: input, shape index: {}]   ;;  %s436_s2 = inlined_call_operand.vmem [shape: f32[1,10], index: 2, kind: input, shape index: {}]   ;;  %s437_s3 = inlined_call_operand.vmem [shape: f32[8,10], index: 3, kind: output, shape index: {}]  }
   0x1   :  { %312 = vmatprep.subr.bf16.mxu0 %v327_v0  ;;  %v128_v1 = vld [vmem:[%s434_s1] sm:$0xff]  ;;  %v129_v2 = vld [vmem:[%s434_s1 + $0x8] sm:$0xff]  ;;  %v130_v3 = vld [vmem:[%s434_s1 + $0x10] sm:$0xff]  ;;  %309 = vmatprep.mubr.msk.f32.mxu0 %vm328_vm0, %v329_v4  ;;  %vm151_vm2 = vcmask 1041409   ;;  %vm153_vm3 = vcmask 1042434   ;;  %vm155_vm4 = vcmask 1043459  }
   0x2   :  { %v313_v5 = vpack.c.bf16 %v129_v2, %v128_v1  ;;  %v131_v6 = vld [vmem:[%s434_s1 + $0x18] sm:$0xff]  ;;  %v132_v7 = vld [vmem:[%s434_s1 + $0x20] sm:$0xff]  ;;  %v133_v8 = vld [vmem:[%s434_s1 + $0x28] sm:$0xff]  ;;  %vm157_vm5 = vcmask 1044484   ;;  %vm159_vm6 = vcmask 1045509   ;;  %vm161_vm7 = vcmask 1046534  }
   0x3   :  { %v316_v9 = vpack.c.bf16 %v131_v6, %v130_v3  ;;  %v372_v10 = vld [vmem:[%s434_s1 + $0x30] sm:$0xff]  ;;  %v377_v11 = vld [vmem:[%s434_s1 + $0x38] sm:$0xff]  ;;  %v246_v12 = vld [vmem:[%s435_s0] sm:$0xff]   ;;  %v319_v13 = vpack.c.bf16 %v133_v8, %v132_v7  ;;  %vm163_vm8 = vcmask 1047559   ;;  %vm237_vm9 = vcmask 80896  }
   0x4   :  { %314 = vmatpush3.bf16.msra.mxu0 %v313_v5  ;;  %v322_v14 = vpack.c.bf16 %v377_v11, %v372_v10  ;;  %v247_v15 = vunpack.c.l.bf16 %v246_v12  ;;  %v248_v16 = vunpack.c.h.bf16 %v246_v12  ;;  %v277_v17 = vld [vmem:[%s435_s0 + $0x8] sm:$0xff]   ;;  %v278_v18 = vld [vmem:[%s435_s0 + $0x10] sm:$0xff]   ;;  %v279_v19 = vld [vmem:[%s435_s0 + $0x18] sm:$0xff]  }
   0x5   :  { %315 = vmatprep.subr.bf16.mxu0 %v327_v0  ;;  %v251_v20 = vunpack.c.l.bf16 %v277_v17  ;;  %v252_v21 = vunpack.c.h.bf16 %v277_v17  ;;  %v255_v22 = vunpack.c.l.bf16 %v278_v18  ;;  %v256_v23 = vunpack.c.h.bf16 %v278_v18  ;;  %v280_v24 = vld [vmem:[%s435_s0 + $0x20] sm:$0xff]   ;;  %v281_v25 = vld [vmem:[%s435_s0 + $0x28] sm:$0xff]   ;;  %v282_v26 = vld [vmem:[%s435_s0 + $0x30] sm:$0xff]  }
   0x6   :  { %v259_v27 = vunpack.c.l.bf16 %v279_v19  ;;  %v260_v28 = vunpack.c.h.bf16 %v279_v19  ;;  %v263_v29 = vunpack.c.l.bf16 %v280_v24  ;;  %v264_v30 = vunpack.c.h.bf16 %v280_v24  ;;  %v283_v31 = vld [vmem:[%s435_s0 + $0x38] sm:$0xff]  }
   0x7   :  { %v267_v32 = vunpack.c.l.bf16 %v281_v25  ;;  %v268_v33 = vunpack.c.h.bf16 %v281_v25  ;;  %v271_v34 = vunpack.c.l.bf16 %v282_v26  ;;  %v272_v35 = vunpack.c.h.bf16 %v282_v26 }
   0x8   :  { %317 = vmatpush3.bf16.msra.mxu0 %v316_v9  ;;  %v275_v36 = vunpack.c.l.bf16 %v283_v31  ;;  %v276_v37 = vunpack.c.h.bf16 %v283_v31  ;;  %v47_v38 = vsel %vm46_vm1, %v247_v15, 0.0  ;;  %v48_v39 = vsel %vm46_vm1, %v248_v16, 0.0 }
   0x9   :  { %318 = vmatprep.subr.bf16.mxu0 %v327_v0  ;;  %v49_v40 = vadd.f32 %v48_v39, %v47_v38  ;;  %v56_v41 = vsel %vm46_vm1, %v251_v20, 0.0  ;;  %v57_v42 = vsel %vm46_vm1, %v252_v21, 0.0  ;;  %v65_v43 = vsel %vm46_vm1, %v255_v22, 0.0 }
   0xa   :  { %v58_v44 = vadd.f32 %v57_v42, %v56_v41  ;;  %v66_v45 = vsel %vm46_vm1, %v256_v23, 0.0  ;;  %v74_v46 = vsel %vm46_vm1, %v259_v27, 0.0  ;;  %v75_v47 = vsel %vm46_vm1, %v260_v28, 0.0 }
   0xb   :  { %v50_v48 = vrot.slane %v49_v40, 4  ;;  %v67_v49 = vadd.f32 %v66_v45, %v65_v43  ;;  %v76_v50 = vadd.f32 %v75_v47, %v74_v46  ;;  %v83_v51 = vsel %vm46_vm1, %v263_v29, 0.0 }
   0xc   :  { %320 = vmatpush3.bf16.msra.mxu0 %v319_v13  ;;  %v59_v52 = vrot.slane %v58_v44, 4  ;;  %v84_v53 = vsel %vm46_vm1, %v264_v30, 0.0  ;;  %v92_v54 = vsel %vm46_vm1, %v267_v32, 0.0  ;;  %v93_v55 = vsel %vm46_vm1, %v268_v33, 0.0 }
   0xd   :  { %321 = vmatprep.subr.bf16.mxu0 %v327_v0  ;;  %v51_v56 = vadd.f32 %v50_v48, %v49_v40  ;;  %v68_v57 = vrot.slane %v67_v49, 4  ;;  %v77_v58 = vrot.slane %v76_v50, 4  ;;  %v85_v59 = vadd.f32 %v84_v53, %v83_v51 }
   0xe   :  { %v60_v60 = vadd.f32 %v59_v52, %v58_v44  ;;  %v94_v61 = vadd.f32 %v93_v55, %v92_v54  ;;  %v101_v62 = vsel %vm46_vm1, %v271_v34, 0.0  ;;  %v102_v63 = vsel %vm46_vm1, %v272_v35, 0.0 }
   0xf   :  { %v52_v1 = vrot.slane %v51_v56, 2  ;;  %v69_v2 = vadd.f32 %v68_v57, %v67_v49  ;;  %v78_v3 = vadd.f32 %v77_v58, %v76_v50  ;;  %v86_v4 = vrot.slane %v85_v59, 4 }
  0x10   :  { %323 = vmatpush3.bf16.msra.mxu0 %v322_v14  ;;  %v61_v5 = vrot.slane %v60_v60, 2  ;;  %v95_v6 = vrot.slane %v94_v61, 4  ;;  %v103_v7 = vadd.f32 %v102_v63, %v101_v62  ;;  %v110_v0 = vsel %vm46_vm1, %v275_v36, 0.0 }
  0x11   :  { %v53_v8 = vadd.f32 %v52_v1, %v51_v56  ;;  %v70_v9 = vrot.slane %v69_v2, 2  ;;  %v79_v10 = vrot.slane %v78_v3, 2  ;;  %v87_v11 = vadd.f32 %v86_v4, %v85_v59 }
  0x12   :  { %v62_v12 = vadd.f32 %v61_v5, %v60_v60  ;;  %v96_v13 = vadd.f32 %v95_v6, %v94_v61  ;;  %v104_v15 = vrot.slane %v103_v7, 4  ;;  %v111_v16 = vsel %vm46_vm1, %v276_v37, 0.0  ;;  %v243_v61 = vld [vmem:[%s436_s2] ss:$0 sm:$0xff] }
  0x13   :  { %v54_v17 = vrot.slane %v53_v8, 1  ;;  %v71_v18 = vadd.f32 %v70_v9, %v69_v2  ;;  %v80_v19 = vadd.f32 %v79_v10, %v78_v3  ;;  %v88_v14 = vrot.slane %v87_v11, 2 }
  0x14   :  { %v63_v20 = vrot.slane %v62_v12, 1  ;;  %v97_v21 = vrot.slane %v96_v13, 2  ;;  %v105_v22 = vadd.f32 %v104_v15, %v103_v7  ;;  %v112_v23 = vadd.f32 %v111_v16, %v110_v0 }
  0x15   :  { %v55_v24 = vadd.f32 %v54_v17, %v53_v8  ;;  %v72_v25 = vrot.slane %v71_v18, 1  ;;  %v81_v26 = vrot.slane %v80_v19, 1  ;;  %v89_v27 = vadd.f32 %v88_v14, %v87_v11 }
  0x16   :  { %v64_v28 = vadd.f32 %v63_v20, %v62_v12  ;;  %v98_v29 = vadd.f32 %v97_v21, %v96_v13  ;;  %v106_v30 = vrot.slane %v105_v22, 2  ;;  %v113_v31 = vrot.slane %v112_v23, 4 }
  0x17   :  { %v73_v32 = vadd.f32 %v72_v25, %v71_v18  ;;  %v82_v33 = vadd.f32 %v81_v26, %v80_v19  ;;  %v90_v34 = vrot.slane %v89_v27, 1  ;;  %v120_v35 = vmul.f32 0.0625, %v55_v24 }
  0x18   :  { %v99_v36 = vrot.slane %v98_v29, 1  ;;  %v107_v37 = vadd.f32 %v106_v30, %v105_v22  ;;  %v114_v38 = vadd.f32 %v113_v31, %v112_v23  ;;  %v121_v39 = vmul.f32 0.0625, %v64_v28 }
  0x19   :  { %v91_v40 = vadd.f32 %v90_v34, %v89_v27  ;;  %v122_v41 = vmul.f32 0.0625, %v73_v32  ;;  %v123_v42 = vmul.f32 0.0625, %v82_v33 }
  0x1a   :  { %v100_v43 = vadd.f32 %v99_v36, %v98_v29  ;;  %v108_v44 = vrot.slane %v107_v37, 1  ;;  %v115_v45 = vrot.slane %v114_v38, 2  ;;  %v152_v46 = vsel %vm151_vm2, %v121_v39, %v120_v35 }
  0x1b   :  { %v124_v47 = vmul.f32 0.0625, %v91_v40  ;;  %v154_v48 = vsel %vm153_vm3, %v122_v41, %v152_v46 }
  0x1c   :  { %v109_v49 = vadd.f32 %v108_v44, %v107_v37  ;;  %v116_v50 = vadd.f32 %v115_v45, %v114_v38  ;;  %v125_v51 = vmul.f32 0.0625, %v100_v43  ;;  %v156_v52 = vsel %vm155_vm4, %v123_v42, %v154_v48 }
  0x1d   :  { %v158_v53 = vsel %vm157_vm5, %v124_v47, %v156_v52 }
  0x1e   :  { %v117_v54 = vrot.slane %v116_v50, 1  ;;  %v126_v55 = vmul.f32 0.0625, %v109_v49  ;;  %v160_v56 = vsel %vm159_vm6, %v125_v51, %v158_v53 }
  0x20   :  { %v118_v57 = vadd.f32 %v117_v54, %v116_v50  ;;  %v162_v58 = vsel %vm161_vm7, %v126_v55, %v160_v56 }
  0x22   :  { %v127_v59 = vmul.f32 0.0625, %v118_v57 }
  0x24   :  { %v164_v60 = vsel %vm163_vm8, %v127_v59, %v162_v58 }
  0x25   :  { %310 = vmatmul.mubr.msk.f32.vlgmr.msra.gmra.mrb[0].mxu0 %vm46_vm1, %v164_v60 }
  0xf8   :  { %v233_v62 = vpop.f32.mrb[0].mxu0 }
  0xf9   :  { %v234_v63 = vadd.f32 %v243_v61, %v233_v62  ;;  %v311_v1 = vpop.f32.mrb[1].mxu0 }
  0xfb   :  { %238 = vst.msk [vmem:[%s437_s3] sm:$0xff] %vm237_vm9, %v234_v63 }

</bundles_post_ra>
